<compile_context>
chip_gen: v7x
topology: tpu7x:2x2x1
jax: 0.10.0
libtpu: 0.0.40
codegen_flags: <defaults>
</compile_context>

<pallas_src>
import functools

import jax
import jax.numpy as jnp
from jax.experimental import pallas as pl
from jax.experimental.pallas import tpu as pltpu


_CP = 128          # padded channel width: exactly one lane tile
_KT = 9            # 3x3 conv taps


def _round_up(x, m):
    return (x + m - 1) // m * m


def _fused_context_encoder_kernel(
    x_ref,                       # (P, CP)  bf16  flattened zero-padded input
    w1_ref, b1_ref,              # (9*CP, CP) bf16, (1, CP) f32
    w2_ref, b2_ref,
    w3_ref, b3_ref,
    o_ref,                       # (M, CP)  f32   lane-dense output slab
    pad_ref,                     # VMEM (P, CP) bf16  flattened padded acts
    acc_ref,                     # VMEM (M, CP) f32   tap-matmul accumulator
    *, H, W, P):
    Wp = W + 2
    M = H * Wp                   # slab rows = valid pixels + 2 junk cols / row

    # Rows of pad_ref the per-layer write-back never touches (top halo row +
    # first interior left-halo cell; tail of the bottom halo row + alloc slack).
    # They must be zero; all other halo cells are re-written as masked zeros
    # every layer.  ~40 rows of bf16 stores -> negligible.
    pad_ref[0:Wp + 1, :] = jnp.zeros((Wp + 1, _CP), jnp.bfloat16)
    pad_ref[Wp + 1 + M:P, :] = jnp.zeros((P - Wp - 1 - M, _CP), jnp.bfloat16)

    # Valid-row mask: slab row m maps to output pixel (m // Wp, m % Wp);
    # columns W, W+1 are junk from the flattened-halo trick.
    row_ids = jax.lax.broadcasted_iota(jnp.int32, (M, 1), 0)
    valid = (row_ids % Wp) < W

    def conv_layer(src_ref, w_ref, b_ref, relu):
        # 9 accumulating tap matmuls; every tap is a contiguous static slice of
        # the flattened padded activations (no im2col materialization).
        for t in range(_KT):
            ky, kx = divmod(t, 3)
            off = ky * Wp + kx                          # static offset
            tap = src_ref[off:off + M, :]               # (M, CP) bf16
            wt = w_ref[t * _CP:(t + 1) * _CP, :]        # (CP, CP) bf16
            part = jnp.dot(tap, wt, preferred_element_type=jnp.float32)
            if t == 0:
                acc_ref[...] = part
            else:
                acc_ref[...] = acc_ref[...] + part
        res = acc_ref[...] + b_ref[...]                 # (M, CP) f32
        if relu:
            res = jnp.maximum(res, 0.0)
        return res

    # conv1 + ReLU (taps read directly from the wrapper-padded input block).
    h = conv_layer(x_ref, w1_ref, b1_ref, relu=True)
    pad_ref[Wp + 1:Wp + 1 + M, :] = jnp.where(valid, h, 0.0).astype(jnp.bfloat16)

    # conv2 + ReLU
    h = conv_layer(pad_ref, w2_ref, b2_ref, relu=True)
    pad_ref[Wp + 1:Wp + 1 + M, :] = jnp.where(valid, h, 0.0).astype(jnp.bfloat16)

    # conv3 (no ReLU): lane-dense unmasked f32 store; junk columns are sliced
    # off in the wrapper.
    h = conv_layer(pad_ref, w3_ref, b3_ref, relu=False)
    o_ref[...] = h


def _prep_weight(w_hwio, b):
    """Zero-pad (3,3,Cin,Cout) -> tap-major (9*128, 128) bf16; bias -> (1,128) f32."""
    kh, kw, cin, cout = w_hwio.shape
    wp = jnp.zeros((kh, kw, _CP, _CP), jnp.float32)
    wp = wp.at[:, :, :cin, :cout].set(w_hwio)
    wp = wp.reshape(kh * kw * _CP, _CP).astype(jnp.bfloat16)
    bp = jnp.zeros((1, _CP), jnp.float32).at[0, :cout].set(b)
    return wp, bp


def context_encoder_forward(params, x_nchw, mask_nchw):
    """Matches ContextEncoder.forward: cat([x, mask], dim=1) -> 3 convs."""
    N, _, H, W = x_nchw.shape
    Wp = W + 2
    M = H * Wp
    # +2 rows so the bottom-right tap's contiguous slab stays in bounds;
    # round to 16 for clean bf16 sublane packing.
    P = _round_up((H + 2) * Wp + 2, 16)

    inp = jnp.concatenate([x_nchw, mask_nchw], axis=1)     # (N, C0, H, W)
    x_nhwc = jnp.transpose(inp, (0, 2, 3, 1))               # (N, H, W, C0)
    C0 = x_nhwc.shape[-1]

    (w1, b1), (w2, b2), (w3, b3) = params
    ctx_dim = w3.shape[-1]

    # One-time layout plumbing in XLA: spatial halo + channel pad to one lane
    # tile + flatten rows, so every in-kernel tap is a contiguous slice.
    xp = jnp.pad(x_nhwc, ((0, 0), (1, 1), (1, 1), (0, _CP - C0)))
    xp = xp.reshape(N, (H + 2) * Wp, _CP)
    xp = jnp.pad(xp, ((0, 0), (0, P - (H + 2) * Wp), (0, 0)))
    xp = xp.astype(jnp.bfloat16)                             # (N, P, 128)

    w1p, b1p = _prep_weight(w1, b1)
    w2p, b2p = _prep_weight(w2, b2)
    w3p, b3p = _prep_weight(w3, b3)

    kernel = functools.partial(_fused_context_encoder_kernel, H=H, W=W, P=P)
    wspec = pl.BlockSpec((_KT * _CP, _CP), lambda n: (0, 0))
    bspec = pl.BlockSpec((1, _CP), lambda n: (0, 0))

    out = pl.pallas_call(
        kernel,
        out_shape=jax.ShapeDtypeStruct((N, M, _CP), jnp.float32),
        grid_spec=pltpu.PrefetchScalarGridSpec(
            num_scalar_prefetch=0,
            grid=(N,),
            in_specs=[
                pl.BlockSpec((None, P, _CP), lambda n: (n, 0, 0)),  # input
                wspec, bspec,     # conv1
                wspec, bspec,     # conv2
                wspec, bspec,     # conv3
            ],
            out_specs=pl.BlockSpec((None, M, _CP), lambda n: (n, 0, 0)),
            scratch_shapes=[
                pltpu.VMEM((P, _CP), jnp.bfloat16),   # flattened padded acts
                pltpu.VMEM((M, _CP), jnp.float32),    # f32 accumulator
            ],
        ),
        compiler_params=pltpu.CompilerParams(
            dimension_semantics=("parallel",),
            vmem_limit_bytes=32 * 1024 * 1024),
    )(xp, w1p, b1p, w2p, b2p, w3p, b3p)

    # (N, H*(W+2), 128) -> drop junk columns + zero-padded channels -> NCHW.
    out = out.reshape(N, H, Wp, _CP)[:, :, :W, :ctx_dim]
    return jnp.transpose(out, (0, 3, 1, 2))


def init_context_encoder_params(key, input_dim, context_dim):
    """Deterministic synthetic parameters; shapes match the PyTorch module."""
    c_in = input_dim + 1
    dims = [(c_in, 64), (64, 128), (128, context_dim)]
    params = []
    for i, (ci, co) in enumerate(dims):
        kw, kb = jax.random.split(jax.random.fold_in(key, i))
        fan_in = ci * 3 * 3
        scale = 1.0 / jnp.sqrt(fan_in)
        w = jax.random.uniform(kw, (3, 3, ci, co), jnp.float32, -scale, scale)
        b = jax.random.uniform(kb, (co,), jnp.float32, -scale, scale)
        params.append((w, b))
    return params


def _reference_forward(params, x_nchw, mask_nchw, *, bf16_operands):
    """Pure-JAX reference (lax.conv).  With bf16_operands=True it mimics the
    kernel's bf16-operand / f32-accumulate matmuls."""
    inp = jnp.concatenate([x_nchw, mask_nchw], axis=1)
    h = jnp.transpose(inp, (0, 2, 3, 1))
    for i, (w, b) in enumerate(params):
        lhs, rhs = h, w
        if bf16_operands:
            lhs = lhs.astype(jnp.bfloat16)
            rhs = rhs.astype(jnp.bfloat16)
        h = jax.lax.conv_general_dilated(
            lhs, rhs, window_strides=(1, 1), padding="SAME",
            dimension_numbers=("NHWC", "HWIO", "NHWC"),
            preferred_element_type=jnp.float32)
        h = h + b
        if i < 2:
            h = jnp.maximum(h, 0.0)
    return jnp.transpose(h, (0, 3, 1, 2))


if __name__ == "__main__":
    key = jax.random.PRNGKey(0)
    batch, input_dim, H, W = 2, 4, 16, 16
    context_dim = 32

    kx, km, kp = jax.random.split(key, 3)
    x = jax.random.normal(kx, (batch, input_dim, H, W), jnp.float32)
    mask = (jax.random.uniform(km, (batch, 1, H, W)) > 0.5).astype(jnp.float32)

    params = init_context_encoder_params(kp, input_dim, context_dim)

    out = jax.jit(context_encoder_forward)(params, x, mask)
    out = jax.block_until_ready(out)
    assert out.shape == (batch, context_dim, H, W), out.shape

    # Tight check against a reference that matches the kernel's bf16 operands.
    ref_bf16 = jax.block_until_ready(
        _reference_forward(params, x, mask, bf16_operands=True))
    err_bf16 = float(jnp.max(jnp.abs(out - ref_bf16)))
    assert err_bf16 < 5e-3, f"max abs error vs bf16-operand reference {err_bf16}"

    # Loose sanity check against the exact f32 reference (bf16 rounding only).
    ref_f32 = jax.block_until_ready(
        _reference_forward(params, x, mask, bf16_operands=False))
    err_f32 = float(jnp.max(jnp.abs(out - ref_f32)))
    assert err_f32 < 5e-2, f"max abs error vs f32 reference {err_f32}"

    print("KERNEL_OK")
</pallas_src>

<mosaic_0001>
module attributes {stable_mosaic.version = 11 : i64} {
  func.func @_fused_context_encoder_kernel(%arg0: i32, %arg1: memref<1x336x128xbf16, #tpu.memory_space<vmem>>, %arg2: memref<1152x128xbf16, #tpu.memory_space<vmem>>, %arg3: memref<1x128xf32, #tpu.memory_space<vmem>>, %arg4: memref<1152x128xbf16, #tpu.memory_space<vmem>>, %arg5: memref<1x128xf32, #tpu.memory_space<vmem>>, %arg6: memref<1152x128xbf16, #tpu.memory_space<vmem>>, %arg7: memref<1x128xf32, #tpu.memory_space<vmem>>, %arg8: memref<1x288x128xf32, #tpu.memory_space<vmem>>, %arg9: memref<336x128xbf16, #tpu.memory_space<vmem>>, %arg10: memref<288x128xf32, #tpu.memory_space<vmem>>) attributes {dimension_semantics = [#tpu.dimension_semantics<parallel>], iteration_bounds = array<i64: 2>, scalar_prefetch = 0 : i64, scratch_operands = 2 : i64, tpu.core_type = #tpu.core_type<tc>, window_params = [{transform_indices = @transform_0, window_bounds = array<i64: 1, 336, 128>}, {pipeline_mode = #tpu.pipeline_mode<synchronous>, transform_indices = @transform_1, window_bounds = array<i64: 1152, 128>}, {pipeline_mode = #tpu.pipeline_mode<synchronous>, transform_indices = @transform_2, window_bounds = array<i64: 1, 128>}, {pipeline_mode = #tpu.pipeline_mode<synchronous>, transform_indices = @transform_3, window_bounds = array<i64: 1152, 128>}, {pipeline_mode = #tpu.pipeline_mode<synchronous>, transform_indices = @transform_4, window_bounds = array<i64: 1, 128>}, {pipeline_mode = #tpu.pipeline_mode<synchronous>, transform_indices = @transform_5, window_bounds = array<i64: 1152, 128>}, {pipeline_mode = #tpu.pipeline_mode<synchronous>, transform_indices = @transform_6, window_bounds = array<i64: 1, 128>}, {transform_indices = @transform_7, window_bounds = array<i64: 1, 288, 128>}]} {
    %cst = arith.constant 0.000000e+00 : bf16
    %0 = vector.broadcast %cst : bf16 to vector<19x128xbf16>
    %c0 = arith.constant 0 : index
    %c0_0 = arith.constant 0 : index
    %1 = vector.load %arg9[%c0, %c0_0] : memref<336x128xbf16, #tpu.memory_space<vmem>>, vector<19x128xbf16>
    tpu.vector_store %arg9[%c0, %c0_0], %0 {strides = array<i32>} : memref<336x128xbf16, #tpu.memory_space<vmem>>, vector<19x128xbf16>,
    %cst_1 = arith.constant 0.000000e+00 : bf16
    %2 = vector.broadcast %cst_1 : bf16 to vector<29x128xbf16>
    %c307 = arith.constant 307 : index
    %c0_2 = arith.constant 0 : index
    %3 = vector.load %arg9[%c307, %c0_2] : memref<336x128xbf16, #tpu.memory_space<vmem>>, vector<29x128xbf16>
    tpu.vector_store %arg9[%c307, %c0_2], %2 {strides = array<i32>} : memref<336x128xbf16, #tpu.memory_space<vmem>>, vector<29x128xbf16>,
    %4 = tpu.iota {dimensions = array<i32: 0>} : vector<288x1xi32>
    %c18_i32 = arith.constant 18 : i32
    %c0_i32 = arith.constant 0 : i32
    %5 = arith.cmpi eq, %c18_i32, %c0_i32 : i32
    %c1_i32 = arith.constant 1 : i32
    %6 = arith.select %5, %c1_i32, %c18_i32 : i32
    %7 = vector.broadcast %6 : i32 to vector<288x1xi32>
    %8 = arith.remsi %4, %7 : vector<288x1xi32>
    %c0_i32_3 = arith.constant 0 : i32
    %9 = vector.broadcast %c0_i32_3 : i32 to vector<288x1xi32>
    %10 = arith.cmpi ne, %8, %9 : vector<288x1xi32>
    %c0_i32_4 = arith.constant 0 : i32
    %11 = vector.broadcast %c0_i32_4 : i32 to vector<288x1xi32>
    %12 = arith.cmpi slt, %8, %11 : vector<288x1xi32>
    %c0_i32_5 = arith.constant 0 : i32
    %13 = arith.cmpi slt, %6, %c0_i32_5 : i32
    %14 = vector.broadcast %13 : i1 to vector<288x1xi1>
    %15 = vector.broadcast %14 : vector<288x1xi1> to vector<288x1xi1>
    %16 = arith.xori %12, %15 : vector<288x1xi1>
    %17 = arith.andi %16, %10 : vector<288x1xi1>
    %18 = vector.broadcast %6 : i32 to vector<288x1xi32>
    %19 = arith.addi %8, %18 : vector<288x1xi32>
    %20 = arith.select %17, %19, %8 : vector<288x1xi1>, vector<288x1xi32>
    %c16_i32 = arith.constant 16 : i32
    %21 = vector.broadcast %c16_i32 : i32 to vector<288x1xi32>
    %22 = arith.cmpi slt, %20, %21 : vector<288x1xi32>
    %c0_6 = arith.constant 0 : index
    %c0_7 = arith.constant 0 : index
    %c0_8 = arith.constant 0 : index
    %23 = vector.load %arg1[%c0_6, %c0_7, %c0_8] : memref<1x336x128xbf16, #tpu.memory_space<vmem>>, vector<1x288x128xbf16>
    %24 = vector.shape_cast %23 : vector<1x288x128xbf16> to vector<288x128xbf16>
    %c0_9 = arith.constant 0 : index
    %c0_10 = arith.constant 0 : index
    %25 = vector.load %arg2[%c0_9, %c0_10] : memref<1152x128xbf16, #tpu.memory_space<vmem>>, vector<128x128xbf16>
    %cst_11 = arith.constant dense<0.000000e+00> : vector<288x128xf32>
    %26 = tpu.matmul %24, %25, %cst_11 {dimension_numbers = #tpu.dot_dimension_numbers<[1], [0], [0], [1], [0, 0, 1, 1], [], []>} : vector<288x128xbf16>, vector<128x128xbf16>, vector<288x128xf32> -> vector<288x128xf32>
    %c0_12 = arith.constant 0 : index
    %c0_13 = arith.constant 0 : index
    %27 = vector.load %arg10[%c0_12, %c0_13] : memref<288x128xf32, #tpu.memory_space<vmem>>, vector<288x128xf32>
    tpu.vector_store %arg10[%c0_12, %c0_13], %26 {strides = array<i32>} : memref<288x128xf32, #tpu.memory_space<vmem>>, vector<288x128xf32>,
    %c0_14 = arith.constant 0 : index
    %c1 = arith.constant 1 : index
    %c0_15 = arith.constant 0 : index
    %28 = vector.load %arg1[%c0_14, %c1, %c0_15] : memref<1x336x128xbf16, #tpu.memory_space<vmem>>, vector<1x288x128xbf16>
    %29 = vector.shape_cast %28 : vector<1x288x128xbf16> to vector<288x128xbf16>
    %c128 = arith.constant 128 : index
    %c0_16 = arith.constant 0 : index
    %30 = vector.load %arg2[%c128, %c0_16] : memref<1152x128xbf16, #tpu.memory_space<vmem>>, vector<128x128xbf16>
    %cst_17 = arith.constant dense<0.000000e+00> : vector<288x128xf32>
    %31 = tpu.matmul %29, %30, %cst_17 {dimension_numbers = #tpu.dot_dimension_numbers<[1], [0], [0], [1], [0, 0, 1, 1], [], []>} : vector<288x128xbf16>, vector<128x128xbf16>, vector<288x128xf32> -> vector<288x128xf32>
    %c0_18 = arith.constant 0 : index
    %c0_19 = arith.constant 0 : index
    %32 = vector.load %arg10[%c0_18, %c0_19] : memref<288x128xf32, #tpu.memory_space<vmem>>, vector<288x128xf32>
    %33 = arith.addf %32, %31 : vector<288x128xf32>
    %c0_20 = arith.constant 0 : index
    %c0_21 = arith.constant 0 : index
    %34 = vector.load %arg10[%c0_20, %c0_21] : memref<288x128xf32, #tpu.memory_space<vmem>>, vector<288x128xf32>
    tpu.vector_store %arg10[%c0_20, %c0_21], %33 {strides = array<i32>} : memref<288x128xf32, #tpu.memory_space<vmem>>, vector<288x128xf32>,
    %c0_22 = arith.constant 0 : index
    %c2 = arith.constant 2 : index
    %c0_23 = arith.constant 0 : index
    %35 = vector.load %arg1[%c0_22, %c2, %c0_23] : memref<1x336x128xbf16, #tpu.memory_space<vmem>>, vector<1x288x128xbf16>
    %36 = vector.shape_cast %35 : vector<1x288x128xbf16> to vector<288x128xbf16>
    %c256 = arith.constant 256 : index
    %c0_24 = arith.constant 0 : index
    %37 = vector.load %arg2[%c256, %c0_24] : memref<1152x128xbf16, #tpu.memory_space<vmem>>, vector<128x128xbf16>
    %cst_25 = arith.constant dense<0.000000e+00> : vector<288x128xf32>
    %38 = tpu.matmul %36, %37, %cst_25 {dimension_numbers = #tpu.dot_dimension_numbers<[1], [0], [0], [1], [0, 0, 1, 1], [], []>} : vector<288x128xbf16>, vector<128x128xbf16>, vector<288x128xf32> -> vector<288x128xf32>
    %c0_26 = arith.constant 0 : index
    %c0_27 = arith.constant 0 : index
    %39 = vector.load %arg10[%c0_26, %c0_27] : memref<288x128xf32, #tpu.memory_space<vmem>>, vector<288x128xf32>
    %40 = arith.addf %39, %38 : vector<288x128xf32>
    %c0_28 = arith.constant 0 : index
    %c0_29 = arith.constant 0 : index
    %41 = vector.load %arg10[%c0_28, %c0_29] : memref<288x128xf32, #tpu.memory_space<vmem>>, vector<288x128xf32>
    tpu.vector_store %arg10[%c0_28, %c0_29], %40 {strides = array<i32>} : memref<288x128xf32, #tpu.memory_space<vmem>>, vector<288x128xf32>,
    %c0_30 = arith.constant 0 : index
    %c18 = arith.constant 18 : index
    %c0_31 = arith.constant 0 : index
    %42 = vector.load %arg1[%c0_30, %c18, %c0_31] : memref<1x336x128xbf16, #tpu.memory_space<vmem>>, vector<1x288x128xbf16>
    %43 = vector.shape_cast %42 : vector<1x288x128xbf16> to vector<288x128xbf16>
    %c384 = arith.constant 384 : index
    %c0_32 = arith.constant 0 : index
    %44 = vector.load %arg2[%c384, %c0_32] : memref<1152x128xbf16, #tpu.memory_space<vmem>>, vector<128x128xbf16>
    %cst_33 = arith.constant dense<0.000000e+00> : vector<288x128xf32>
    %45 = tpu.matmul %43, %44, %cst_33 {dimension_numbers = #tpu.dot_dimension_numbers<[1], [0], [0], [1], [0, 0, 1, 1], [], []>} : vector<288x128xbf16>, vector<128x128xbf16>, vector<288x128xf32> -> vector<288x128xf32>
    %c0_34 = arith.constant 0 : index
    %c0_35 = arith.constant 0 : index
    %46 = vector.load %arg10[%c0_34, %c0_35] : memref<288x128xf32, #tpu.memory_space<vmem>>, vector<288x128xf32>
    %47 = arith.addf %46, %45 : vector<288x128xf32>
    %c0_36 = arith.constant 0 : index
    %c0_37 = arith.constant 0 : index
    %48 = vector.load %arg10[%c0_36, %c0_37] : memref<288x128xf32, #tpu.memory_space<vmem>>, vector<288x128xf32>
    tpu.vector_store %arg10[%c0_36, %c0_37], %47 {strides = array<i32>} : memref<288x128xf32, #tpu.memory_space<vmem>>, vector<288x128xf32>,
    %c0_38 = arith.constant 0 : index
    %c19 = arith.constant 19 : index
    %c0_39 = arith.constant 0 : index
    %49 = vector.load %arg1[%c0_38, %c19, %c0_39] : memref<1x336x128xbf16, #tpu.memory_space<vmem>>, vector<1x288x128xbf16>
    %50 = vector.shape_cast %49 : vector<1x288x128xbf16> to vector<288x128xbf16>
    %c512 = arith.constant 512 : index
    %c0_40 = arith.constant 0 : index
    %51 = vector.load %arg2[%c512, %c0_40] : memref<1152x128xbf16, #tpu.memory_space<vmem>>, vector<128x128xbf16>
    %cst_41 = arith.constant dense<0.000000e+00> : vector<288x128xf32>
    %52 = tpu.matmul %50, %51, %cst_41 {dimension_numbers = #tpu.dot_dimension_numbers<[1], [0], [0], [1], [0, 0, 1, 1], [], []>} : vector<288x128xbf16>, vector<128x128xbf16>, vector<288x128xf32> -> vector<288x128xf32>
    %c0_42 = arith.constant 0 : index
    %c0_43 = arith.constant 0 : index
    %53 = vector.load %arg10[%c0_42, %c0_43] : memref<288x128xf32, #tpu.memory_space<vmem>>, vector<288x128xf32>
    %54 = arith.addf %53, %52 : vector<288x128xf32>
    %c0_44 = arith.constant 0 : index
    %c0_45 = arith.constant 0 : index
    %55 = vector.load %arg10[%c0_44, %c0_45] : memref<288x128xf32, #tpu.memory_space<vmem>>, vector<288x128xf32>
    tpu.vector_store %arg10[%c0_44, %c0_45], %54 {strides = array<i32>} : memref<288x128xf32, #tpu.memory_space<vmem>>, vector<288x128xf32>,
    %c0_46 = arith.constant 0 : index
    %c20 = arith.constant 20 : index
    %c0_47 = arith.constant 0 : index
    %56 = vector.load %arg1[%c0_46, %c20, %c0_47] : memref<1x336x128xbf16, #tpu.memory_space<vmem>>, vector<1x288x128xbf16>
    %57 = vector.shape_cast %56 : vector<1x288x128xbf16> to vector<288x128xbf16>
    %c640 = arith.constant 640 : index
    %c0_48 = arith.constant 0 : index
    %58 = vector.load %arg2[%c640, %c0_48] : memref<1152x128xbf16, #tpu.memory_space<vmem>>, vector<128x128xbf16>
    %cst_49 = arith.constant dense<0.000000e+00> : vector<288x128xf32>
    %59 = tpu.matmul %57, %58, %cst_49 {dimension_numbers = #tpu.dot_dimension_numbers<[1], [0], [0], [1], [0, 0, 1, 1], [], []>} : vector<288x128xbf16>, vector<128x128xbf16>, vector<288x128xf32> -> vector<288x128xf32>
    %c0_50 = arith.constant 0 : index
    %c0_51 = arith.constant 0 : index
    %60 = vector.load %arg10[%c0_50, %c0_51] : memref<288x128xf32, #tpu.memory_space<vmem>>, vector<288x128xf32>
    %61 = arith.addf %60, %59 : vector<288x128xf32>
    %c0_52 = arith.constant 0 : index
    %c0_53 = arith.constant 0 : index
    %62 = vector.load %arg10[%c0_52, %c0_53] : memref<288x128xf32, #tpu.memory_space<vmem>>, vector<288x128xf32>
    tpu.vector_store %arg10[%c0_52, %c0_53], %61 {strides = array<i32>} : memref<288x128xf32, #tpu.memory_space<vmem>>, vector<288x128xf32>,
    %c0_54 = arith.constant 0 : index
    %c36 = arith.constant 36 : index
    %c0_55 = arith.constant 0 : index
    %63 = vector.load %arg1[%c0_54, %c36, %c0_55] : memref<1x336x128xbf16, #tpu.memory_space<vmem>>, vector<1x288x128xbf16>
    %64 = vector.shape_cast %63 : vector<1x288x128xbf16> to vector<288x128xbf16>
    %c768 = arith.constant 768 : index
    %c0_56 = arith.constant 0 : index
    %65 = vector.load %arg2[%c768, %c0_56] : memref<1152x128xbf16, #tpu.memory_space<vmem>>, vector<128x128xbf16>
    %cst_57 = arith.constant dense<0.000000e+00> : vector<288x128xf32>
    %66 = tpu.matmul %64, %65, %cst_57 {dimension_numbers = #tpu.dot_dimension_numbers<[1], [0], [0], [1], [0, 0, 1, 1], [], []>} : vector<288x128xbf16>, vector<128x128xbf16>, vector<288x128xf32> -> vector<288x128xf32>
    %c0_58 = arith.constant 0 : index
    %c0_59 = arith.constant 0 : index
    %67 = vector.load %arg10[%c0_58, %c0_59] : memref<288x128xf32, #tpu.memory_space<vmem>>, vector<288x128xf32>
    %68 = arith.addf %67, %66 : vector<288x128xf32>
    %c0_60 = arith.constant 0 : index
    %c0_61 = arith.constant 0 : index
    %69 = vector.load %arg10[%c0_60, %c0_61] : memref<288x128xf32, #tpu.memory_space<vmem>>, vector<288x128xf32>
    tpu.vector_store %arg10[%c0_60, %c0_61], %68 {strides = array<i32>} : memref<288x128xf32, #tpu.memory_space<vmem>>, vector<288x128xf32>,
    %c0_62 = arith.constant 0 : index
    %c37 = arith.constant 37 : index
    %c0_63 = arith.constant 0 : index
    %70 = vector.load %arg1[%c0_62, %c37, %c0_63] : memref<1x336x128xbf16, #tpu.memory_space<vmem>>, vector<1x288x128xbf16>
    %71 = vector.shape_cast %70 : vector<1x288x128xbf16> to vector<288x128xbf16>
    %c896 = arith.constant 896 : index
    %c0_64 = arith.constant 0 : index
    %72 = vector.load %arg2[%c896, %c0_64] : memref<1152x128xbf16, #tpu.memory_space<vmem>>, vector<128x128xbf16>
    %cst_65 = arith.constant dense<0.000000e+00> : vector<288x128xf32>
    %73 = tpu.matmul %71, %72, %cst_65 {dimension_numbers = #tpu.dot_dimension_numbers<[1], [0], [0], [1], [0, 0, 1, 1], [], []>} : vector<288x128xbf16>, vector<128x128xbf16>, vector<288x128xf32> -> vector<288x128xf32>
    %c0_66 = arith.constant 0 : index
    %c0_67 = arith.constant 0 : index
    %74 = vector.load %arg10[%c0_66, %c0_67] : memref<288x128xf32, #tpu.memory_space<vmem>>, vector<288x128xf32>
    %75 = arith.addf %74, %73 : vector<288x128xf32>
    %c0_68 = arith.constant 0 : index
    %c0_69 = arith.constant 0 : index
    %76 = vector.load %arg10[%c0_68, %c0_69] : memref<288x128xf32, #tpu.memory_space<vmem>>, vector<288x128xf32>
    tpu.vector_store %arg10[%c0_68, %c0_69], %75 {strides = array<i32>} : memref<288x128xf32, #tpu.memory_space<vmem>>, vector<288x128xf32>,
    %c0_70 = arith.constant 0 : index
    %c38 = arith.constant 38 : index
    %c0_71 = arith.constant 0 : index
    %77 = vector.load %arg1[%c0_70, %c38, %c0_71] : memref<1x336x128xbf16, #tpu.memory_space<vmem>>, vector<1x288x128xbf16>
    %78 = vector.shape_cast %77 : vector<1x288x128xbf16> to vector<288x128xbf16>
    %c1024 = arith.constant 1024 : index
    %c0_72 = arith.constant 0 : index
    %79 = vector.load %arg2[%c1024, %c0_72] : memref<1152x128xbf16, #tpu.memory_space<vmem>>, vector<128x128xbf16>
    %cst_73 = arith.constant dense<0.000000e+00> : vector<288x128xf32>
    %80 = tpu.matmul %78, %79, %cst_73 {dimension_numbers = #tpu.dot_dimension_numbers<[1], [0], [0], [1], [0, 0, 1, 1], [], []>} : vector<288x128xbf16>, vector<128x128xbf16>, vector<288x128xf32> -> vector<288x128xf32>
    %c0_74 = arith.constant 0 : index
    %c0_75 = arith.constant 0 : index
    %81 = vector.load %arg10[%c0_74, %c0_75] : memref<288x128xf32, #tpu.memory_space<vmem>>, vector<288x128xf32>
    %82 = arith.addf %81, %80 : vector<288x128xf32>
    %c0_76 = arith.constant 0 : index
    %c0_77 = arith.constant 0 : index
    %83 = vector.load %arg10[%c0_76, %c0_77] : memref<288x128xf32, #tpu.memory_space<vmem>>, vector<288x128xf32>
    tpu.vector_store %arg10[%c0_76, %c0_77], %82 {strides = array<i32>} : memref<288x128xf32, #tpu.memory_space<vmem>>, vector<288x128xf32>,
    %c0_78 = arith.constant 0 : index
    %c0_79 = arith.constant 0 : index
    %84 = vector.load %arg10[%c0_78, %c0_79] : memref<288x128xf32, #tpu.memory_space<vmem>>, vector<288x128xf32>
    %c0_80 = arith.constant 0 : index
    %c0_81 = arith.constant 0 : index
    %85 = vector.load %arg3[%c0_80, %c0_81] : memref<1x128xf32, #tpu.memory_space<vmem>>, vector<1x128xf32>
    %86 = vector.broadcast %85 : vector<1x128xf32> to vector<288x128xf32>
    %87 = arith.addf %84, %86 : vector<288x128xf32>
    %cst_82 = arith.constant 0.000000e+00 : f32
    %88 = vector.broadcast %cst_82 : f32 to vector<288x128xf32>
    %89 = arith.maximumf %87, %88 : vector<288x128xf32>
    %cst_83 = arith.constant 0.000000e+00 : f32
    %90 = vector.shape_cast %22 : vector<288x1xi1> to vector<288x1xi1>
    %91 = vector.broadcast %90 : vector<288x1xi1> to vector<288x128xi1>
    %92 = vector.broadcast %cst_83 : f32 to vector<288x128xf32>
    %93 = arith.select %91, %89, %92 : vector<288x128xi1>, vector<288x128xf32>
    %94 = arith.truncf %93 : vector<288x128xf32> to vector<288x128xbf16>
    %c19_84 = arith.constant 19 : index
    %c0_85 = arith.constant 0 : index
    %95 = vector.load %arg9[%c19_84, %c0_85] : memref<336x128xbf16, #tpu.memory_space<vmem>>, vector<288x128xbf16>
    tpu.vector_store %arg9[%c19_84, %c0_85], %94 {strides = array<i32>} : memref<336x128xbf16, #tpu.memory_space<vmem>>, vector<288x128xbf16>,
    %c0_86 = arith.constant 0 : index
    %c0_87 = arith.constant 0 : index
    %96 = vector.load %arg9[%c0_86, %c0_87] : memref<336x128xbf16, #tpu.memory_space<vmem>>, vector<288x128xbf16>
    %c0_88 = arith.constant 0 : index
    %c0_89 = arith.constant 0 : index
    %97 = vector.load %arg4[%c0_88, %c0_89] : memref<1152x128xbf16, #tpu.memory_space<vmem>>, vector<128x128xbf16>
    %cst_90 = arith.constant dense<0.000000e+00> : vector<288x128xf32>
    %98 = tpu.matmul %96, %97, %cst_90 {dimension_numbers = #tpu.dot_dimension_numbers<[1], [0], [0], [1], [0, 0, 1, 1], [], []>} : vector<288x128xbf16>, vector<128x128xbf16>, vector<288x128xf32> -> vector<288x128xf32>
    %c0_91 = arith.constant 0 : index
    %c0_92 = arith.constant 0 : index
    %99 = vector.load %arg10[%c0_91, %c0_92] : memref<288x128xf32, #tpu.memory_space<vmem>>, vector<288x128xf32>
    tpu.vector_store %arg10[%c0_91, %c0_92], %98 {strides = array<i32>} : memref<288x128xf32, #tpu.memory_space<vmem>>, vector<288x128xf32>,
    %c1_93 = arith.constant 1 : index
    %c0_94 = arith.constant 0 : index
    %100 = vector.load %arg9[%c1_93, %c0_94] : memref<336x128xbf16, #tpu.memory_space<vmem>>, vector<288x128xbf16>
    %c128_95 = arith.constant 128 : index
    %c0_96 = arith.constant 0 : index
    %101 = vector.load %arg4[%c128_95, %c0_96] : memref<1152x128xbf16, #tpu.memory_space<vmem>>, vector<128x128xbf16>
    %cst_97 = arith.constant dense<0.000000e+00> : vector<288x128xf32>
    %102 = tpu.matmul %100, %101, %cst_97 {dimension_numbers = #tpu.dot_dimension_numbers<[1], [0], [0], [1], [0, 0, 1, 1], [], []>} : vector<288x128xbf16>, vector<128x128xbf16>, vector<288x128xf32> -> vector<288x128xf32>
    %c0_98 = arith.constant 0 : index
    %c0_99 = arith.constant 0 : index
    %103 = vector.load %arg10[%c0_98, %c0_99] : memref<288x128xf32, #tpu.memory_space<vmem>>, vector<288x128xf32>
    %104 = arith.addf %103, %102 : vector<288x128xf32>
    %c0_100 = arith.constant 0 : index
    %c0_101 = arith.constant 0 : index
    %105 = vector.load %arg10[%c0_100, %c0_101] : memref<288x128xf32, #tpu.memory_space<vmem>>, vector<288x128xf32>
    tpu.vector_store %arg10[%c0_100, %c0_101], %104 {strides = array<i32>} : memref<288x128xf32, #tpu.memory_space<vmem>>, vector<288x128xf32>,
    %c2_102 = arith.constant 2 : index
    %c0_103 = arith.constant 0 : index
    %106 = vector.load %arg9[%c2_102, %c0_103] : memref<336x128xbf16, #tpu.memory_space<vmem>>, vector<288x128xbf16>
    %c256_104 = arith.constant 256 : index
    %c0_105 = arith.constant 0 : index
    %107 = vector.load %arg4[%c256_104, %c0_105] : memref<1152x128xbf16, #tpu.memory_space<vmem>>, vector<128x128xbf16>
    %cst_106 = arith.constant dense<0.000000e+00> : vector<288x128xf32>
    %108 = tpu.matmul %106, %107, %cst_106 {dimension_numbers = #tpu.dot_dimension_numbers<[1], [0], [0], [1], [0, 0, 1, 1], [], []>} : vector<288x128xbf16>, vector<128x128xbf16>, vector<288x128xf32> -> vector<288x128xf32>
    %c0_107 = arith.constant 0 : index
    %c0_108 = arith.constant 0 : index
    %109 = vector.load %arg10[%c0_107, %c0_108] : memref<288x128xf32, #tpu.memory_space<vmem>>, vector<288x128xf32>
    %110 = arith.addf %109, %108 : vector<288x128xf32>
    %c0_109 = arith.constant 0 : index
    %c0_110 = arith.constant 0 : index
    %111 = vector.load %arg10[%c0_109, %c0_110] : memref<288x128xf32, #tpu.memory_space<vmem>>, vector<288x128xf32>
    tpu.vector_store %arg10[%c0_109, %c0_110], %110 {strides = array<i32>} : memref<288x128xf32, #tpu.memory_space<vmem>>, vector<288x128xf32>,
    %c18_111 = arith.constant 18 : index
    %c0_112 = arith.constant 0 : index
    %112 = vector.load %arg9[%c18_111, %c0_112] : memref<336x128xbf16, #tpu.memory_space<vmem>>, vector<288x128xbf16>
    %c384_113 = arith.constant 384 : index
    %c0_114 = arith.constant 0 : index
    %113 = vector.load %arg4[%c384_113, %c0_114] : memref<1152x128xbf16, #tpu.memory_space<vmem>>, vector<128x128xbf16>
    %cst_115 = arith.constant dense<0.000000e+00> : vector<288x128xf32>
    %114 = tpu.matmul %112, %113, %cst_115 {dimension_numbers = #tpu.dot_dimension_numbers<[1], [0], [0], [1], [0, 0, 1, 1], [], []>} : vector<288x128xbf16>, vector<128x128xbf16>, vector<288x128xf32> -> vector<288x128xf32>
    %c0_116 = arith.constant 0 : index
    %c0_117 = arith.constant 0 : index
    %115 = vector.load %arg10[%c0_116, %c0_117] : memref<288x128xf32, #tpu.memory_space<vmem>>, vector<288x128xf32>
    %116 = arith.addf %115, %114 : vector<288x128xf32>
    %c0_118 = arith.constant 0 : index
    %c0_119 = arith.constant 0 : index
    %117 = vector.load %arg10[%c0_118, %c0_119] : memref<288x128xf32, #tpu.memory_space<vmem>>, vector<288x128xf32>
    tpu.vector_store %arg10[%c0_118, %c0_119], %116 {strides = array<i32>} : memref<288x128xf32, #tpu.memory_space<vmem>>, vector<288x128xf32>,
    %c19_120 = arith.constant 19 : index
    %c0_121 = arith.constant 0 : index
    %118 = vector.load %arg9[%c19_120, %c0_121] : memref<336x128xbf16, #tpu.memory_space<vmem>>, vector<288x128xbf16>
    %c512_122 = arith.constant 512 : index
    %c0_123 = arith.constant 0 : index
    %119 = vector.load %arg4[%c512_122, %c0_123] : memref<1152x128xbf16, #tpu.memory_space<vmem>>, vector<128x128xbf16>
    %cst_124 = arith.constant dense<0.000000e+00> : vector<288x128xf32>
    %120 = tpu.matmul %118, %119, %cst_124 {dimension_numbers = #tpu.dot_dimension_numbers<[1], [0], [0], [1], [0, 0, 1, 1], [], []>} : vector<288x128xbf16>, vector<128x128xbf16>, vector<288x128xf32> -> vector<288x128xf32>
    %c0_125 = arith.constant 0 : index
    %c0_126 = arith.constant 0 : index
    %121 = vector.load %arg10[%c0_125, %c0_126] : memref<288x128xf32, #tpu.memory_space<vmem>>, vector<288x128xf32>
    %122 = arith.addf %121, %120 : vector<288x128xf32>
    %c0_127 = arith.constant 0 : index
    %c0_128 = arith.constant 0 : index
    %123 = vector.load %arg10[%c0_127, %c0_128] : memref<288x128xf32, #tpu.memory_space<vmem>>, vector<288x128xf32>
    tpu.vector_store %arg10[%c0_127, %c0_128], %122 {strides = array<i32>} : memref<288x128xf32, #tpu.memory_space<vmem>>, vector<288x128xf32>,
    %c20_129 = arith.constant 20 : index
    %c0_130 = arith.constant 0 : index
    %124 = vector.load %arg9[%c20_129, %c0_130] : memref<336x128xbf16, #tpu.memory_space<vmem>>, vector<288x128xbf16>
    %c640_131 = arith.constant 640 : index
    %c0_132 = arith.constant 0 : index
    %125 = vector.load %arg4[%c640_131, %c0_132] : memref<1152x128xbf16, #tpu.memory_space<vmem>>, vector<128x128xbf16>
    %cst_133 = arith.constant dense<0.000000e+00> : vector<288x128xf32>
    %126 = tpu.matmul %124, %125, %cst_133 {dimension_numbers = #tpu.dot_dimension_numbers<[1], [0], [0], [1], [0, 0, 1, 1], [], []>} : vector<288x128xbf16>, vector<128x128xbf16>, vector<288x128xf32> -> vector<288x128xf32>
    %c0_134 = arith.constant 0 : index
    %c0_135 = arith.constant 0 : index
    %127 = vector.load %arg10[%c0_134, %c0_135] : memref<288x128xf32, #tpu.memory_space<vmem>>, vector<288x128xf32>
    %128 = arith.addf %127, %126 : vector<288x128xf32>
    %c0_136 = arith.constant 0 : index
    %c0_137 = arith.constant 0 : index
    %129 = vector.load %arg10[%c0_136, %c0_137] : memref<288x128xf32, #tpu.memory_space<vmem>>, vector<288x128xf32>
    tpu.vector_store %arg10[%c0_136, %c0_137], %128 {strides = array<i32>} : memref<288x128xf32, #tpu.memory_space<vmem>>, vector<288x128xf32>,
    %c36_138 = arith.constant 36 : index
    %c0_139 = arith.constant 0 : index
    %130 = vector.load %arg9[%c36_138, %c0_139] : memref<336x128xbf16, #tpu.memory_space<vmem>>, vector<288x128xbf16>
    %c768_140 = arith.constant 768 : index
    %c0_141 = arith.constant 0 : index
    %131 = vector.load %arg4[%c768_140, %c0_141] : memref<1152x128xbf16, #tpu.memory_space<vmem>>, vector<128x128xbf16>
    %cst_142 = arith.constant dense<0.000000e+00> : vector<288x128xf32>
    %132 = tpu.matmul %130, %131, %cst_142 {dimension_numbers = #tpu.dot_dimension_numbers<[1], [0], [0], [1], [0, 0, 1, 1], [], []>} : vector<288x128xbf16>, vector<128x128xbf16>, vector<288x128xf32> -> vector<288x128xf32>
    %c0_143 = arith.constant 0 : index
    %c0_144 = arith.constant 0 : index
    %133 = vector.load %arg10[%c0_143, %c0_144] : memref<288x128xf32, #tpu.memory_space<vmem>>, vector<288x128xf32>
    %134 = arith.addf %133, %132 : vector<288x128xf32>
    %c0_145 = arith.constant 0 : index
    %c0_146 = arith.constant 0 : index
    %135 = vector.load %arg10[%c0_145, %c0_146] : memref<288x128xf32, #tpu.memory_space<vmem>>, vector<288x128xf32>
    tpu.vector_store %arg10[%c0_145, %c0_146], %134 {strides = array<i32>} : memref<288x128xf32, #tpu.memory_space<vmem>>, vector<288x128xf32>,
    %c37_147 = arith.constant 37 : index
    %c0_148 = arith.constant 0 : index
    %136 = vector.load %arg9[%c37_147, %c0_148] : memref<336x128xbf16, #tpu.memory_space<vmem>>, vector<288x128xbf16>
    %c896_149 = arith.constant 896 : index
    %c0_150 = arith.constant 0 : index
    %137 = vector.load %arg4[%c896_149, %c0_150] : memref<1152x128xbf16, #tpu.memory_space<vmem>>, vector<128x128xbf16>
    %cst_151 = arith.constant dense<0.000000e+00> : vector<288x128xf32>
    %138 = tpu.matmul %136, %137, %cst_151 {dimension_numbers = #tpu.dot_dimension_numbers<[1], [0], [0], [1], [0, 0, 1, 1], [], []>} : vector<288x128xbf16>, vector<128x128xbf16>, vector<288x128xf32> -> vector<288x128xf32>
    %c0_152 = arith.constant 0 : index
    %c0_153 = arith.constant 0 : index
    %139 = vector.load %arg10[%c0_152, %c0_153] : memref<288x128xf32, #tpu.memory_space<vmem>>, vector<288x128xf32>
    %140 = arith.addf %139, %138 : vector<288x128xf32>
    %c0_154 = arith.constant 0 : index
    %c0_155 = arith.constant 0 : index
    %141 = vector.load %arg10[%c0_154, %c0_155] : memref<288x128xf32, #tpu.memory_space<vmem>>, vector<288x128xf32>
    tpu.vector_store %arg10[%c0_154, %c0_155], %140 {strides = array<i32>} : memref<288x128xf32, #tpu.memory_space<vmem>>, vector<288x128xf32>,
    %c38_156 = arith.constant 38 : index
    %c0_157 = arith.constant 0 : index
    %142 = vector.load %arg9[%c38_156, %c0_157] : memref<336x128xbf16, #tpu.memory_space<vmem>>, vector<288x128xbf16>
    %c1024_158 = arith.constant 1024 : index
    %c0_159 = arith.constant 0 : index
    %143 = vector.load %arg4[%c1024_158, %c0_159] : memref<1152x128xbf16, #tpu.memory_space<vmem>>, vector<128x128xbf16>
    %cst_160 = arith.constant dense<0.000000e+00> : vector<288x128xf32>
    %144 = tpu.matmul %142, %143, %cst_160 {dimension_numbers = #tpu.dot_dimension_numbers<[1], [0], [0], [1], [0, 0, 1, 1], [], []>} : vector<288x128xbf16>, vector<128x128xbf16>, vector<288x128xf32> -> vector<288x128xf32>
    %c0_161 = arith.constant 0 : index
    %c0_162 = arith.constant 0 : index
    %145 = vector.load %arg10[%c0_161, %c0_162] : memref<288x128xf32, #tpu.memory_space<vmem>>, vector<288x128xf32>
    %146 = arith.addf %145, %144 : vector<288x128xf32>
    %c0_163 = arith.constant 0 : index
    %c0_164 = arith.constant 0 : index
    %147 = vector.load %arg10[%c0_163, %c0_164] : memref<288x128xf32, #tpu.memory_space<vmem>>, vector<288x128xf32>
    tpu.vector_store %arg10[%c0_163, %c0_164], %146 {strides = array<i32>} : memref<288x128xf32, #tpu.memory_space<vmem>>, vector<288x128xf32>,
    %c0_165 = arith.constant 0 : index
    %c0_166 = arith.constant 0 : index
    %148 = vector.load %arg10[%c0_165, %c0_166] : memref<288x128xf32, #tpu.memory_space<vmem>>, vector<288x128xf32>
    %c0_167 = arith.constant 0 : index
    %c0_168 = arith.constant 0 : index
    %149 = vector.load %arg5[%c0_167, %c0_168] : memref<1x128xf32, #tpu.memory_space<vmem>>, vector<1x128xf32>
    %150 = vector.broadcast %149 : vector<1x128xf32> to vector<288x128xf32>
    %151 = arith.addf %148, %150 : vector<288x128xf32>
    %cst_169 = arith.constant 0.000000e+00 : f32
    %152 = vector.broadcast %cst_169 : f32 to vector<288x128xf32>
    %153 = arith.maximumf %151, %152 : vector<288x128xf32>
    %cst_170 = arith.constant 0.000000e+00 : f32
    %154 = vector.shape_cast %22 : vector<288x1xi1> to vector<288x1xi1>
    %155 = vector.broadcast %154 : vector<288x1xi1> to vector<288x128xi1>
    %156 = vector.broadcast %cst_170 : f32 to vector<288x128xf32>
    %157 = arith.select %155, %153, %156 : vector<288x128xi1>, vector<288x128xf32>
    %158 = arith.truncf %157 : vector<288x128xf32> to vector<288x128xbf16>
    %c19_171 = arith.constant 19 : index
    %c0_172 = arith.constant 0 : index
    %159 = vector.load %arg9[%c19_171, %c0_172] : memref<336x128xbf16, #tpu.memory_space<vmem>>, vector<288x128xbf16>
    tpu.vector_store %arg9[%c19_171, %c0_172], %158 {strides = array<i32>} : memref<336x128xbf16, #tpu.memory_space<vmem>>, vector<288x128xbf16>,
    %c0_173 = arith.constant 0 : index
    %c0_174 = arith.constant 0 : index
    %160 = vector.load %arg9[%c0_173, %c0_174] : memref<336x128xbf16, #tpu.memory_space<vmem>>, vector<288x128xbf16>
    %c0_175 = arith.constant 0 : index
    %c0_176 = arith.constant 0 : index
    %161 = vector.load %arg6[%c0_175, %c0_176] : memref<1152x128xbf16, #tpu.memory_space<vmem>>, vector<128x128xbf16>
    %cst_177 = arith.constant dense<0.000000e+00> : vector<288x128xf32>
    %162 = tpu.matmul %160, %161, %cst_177 {dimension_numbers = #tpu.dot_dimension_numbers<[1], [0], [0], [1], [0, 0, 1, 1], [], []>} : vector<288x128xbf16>, vector<128x128xbf16>, vector<288x128xf32> -> vector<288x128xf32>
    %c0_178 = arith.constant 0 : index
    %c0_179 = arith.constant 0 : index
    %163 = vector.load %arg10[%c0_178, %c0_179] : memref<288x128xf32, #tpu.memory_space<vmem>>, vector<288x128xf32>
    tpu.vector_store %arg10[%c0_178, %c0_179], %162 {strides = array<i32>} : memref<288x128xf32, #tpu.memory_space<vmem>>, vector<288x128xf32>,
    %c1_180 = arith.constant 1 : index
    %c0_181 = arith.constant 0 : index
    %164 = vector.load %arg9[%c1_180, %c0_181] : memref<336x128xbf16, #tpu.memory_space<vmem>>, vector<288x128xbf16>
    %c128_182 = arith.constant 128 : index
    %c0_183 = arith.constant 0 : index
    %165 = vector.load %arg6[%c128_182, %c0_183] : memref<1152x128xbf16, #tpu.memory_space<vmem>>, vector<128x128xbf16>
    %cst_184 = arith.constant dense<0.000000e+00> : vector<288x128xf32>
    %166 = tpu.matmul %164, %165, %cst_184 {dimension_numbers = #tpu.dot_dimension_numbers<[1], [0], [0], [1], [0, 0, 1, 1], [], []>} : vector<288x128xbf16>, vector<128x128xbf16>, vector<288x128xf32> -> vector<288x128xf32>
    %c0_185 = arith.constant 0 : index
    %c0_186 = arith.constant 0 : index
    %167 = vector.load %arg10[%c0_185, %c0_186] : memref<288x128xf32, #tpu.memory_space<vmem>>, vector<288x128xf32>
    %168 = arith.addf %167, %166 : vector<288x128xf32>
    %c0_187 = arith.constant 0 : index
    %c0_188 = arith.constant 0 : index
    %169 = vector.load %arg10[%c0_187, %c0_188] : memref<288x128xf32, #tpu.memory_space<vmem>>, vector<288x128xf32>
    tpu.vector_store %arg10[%c0_187, %c0_188], %168 {strides = array<i32>} : memref<288x128xf32, #tpu.memory_space<vmem>>, vector<288x128xf32>,
    %c2_189 = arith.constant 2 : index
    %c0_190 = arith.constant 0 : index
    %170 = vector.load %arg9[%c2_189, %c0_190] : memref<336x128xbf16, #tpu.memory_space<vmem>>, vector<288x128xbf16>
    %c256_191 = arith.constant 256 : index
    %c0_192 = arith.constant 0 : index
    %171 = vector.load %arg6[%c256_191, %c0_192] : memref<1152x128xbf16, #tpu.memory_space<vmem>>, vector<128x128xbf16>
    %cst_193 = arith.constant dense<0.000000e+00> : vector<288x128xf32>
    %172 = tpu.matmul %170, %171, %cst_193 {dimension_numbers = #tpu.dot_dimension_numbers<[1], [0], [0], [1], [0, 0, 1, 1], [], []>} : vector<288x128xbf16>, vector<128x128xbf16>, vector<288x128xf32> -> vector<288x128xf32>
    %c0_194 = arith.constant 0 : index
    %c0_195 = arith.constant 0 : index
    %173 = vector.load %arg10[%c0_194, %c0_195] : memref<288x128xf32, #tpu.memory_space<vmem>>, vector<288x128xf32>
    %174 = arith.addf %173, %172 : vector<288x128xf32>
    %c0_196 = arith.constant 0 : index
    %c0_197 = arith.constant 0 : index
    %175 = vector.load %arg10[%c0_196, %c0_197] : memref<288x128xf32, #tpu.memory_space<vmem>>, vector<288x128xf32>
    tpu.vector_store %arg10[%c0_196, %c0_197], %174 {strides = array<i32>} : memref<288x128xf32, #tpu.memory_space<vmem>>, vector<288x128xf32>,
    %c18_198 = arith.constant 18 : index
    %c0_199 = arith.constant 0 : index
    %176 = vector.load %arg9[%c18_198, %c0_199] : memref<336x128xbf16, #tpu.memory_space<vmem>>, vector<288x128xbf16>
    %c384_200 = arith.constant 384 : index
    %c0_201 = arith.constant 0 : index
    %177 = vector.load %arg6[%c384_200, %c0_201] : memref<1152x128xbf16, #tpu.memory_space<vmem>>, vector<128x128xbf16>
    %cst_202 = arith.constant dense<0.000000e+00> : vector<288x128xf32>
    %178 = tpu.matmul %176, %177, %cst_202 {dimension_numbers = #tpu.dot_dimension_numbers<[1], [0], [0], [1], [0, 0, 1, 1], [], []>} : vector<288x128xbf16>, vector<128x128xbf16>, vector<288x128xf32> -> vector<288x128xf32>
    %c0_203 = arith.constant 0 : index
    %c0_204 = arith.constant 0 : index
    %179 = vector.load %arg10[%c0_203, %c0_204] : memref<288x128xf32, #tpu.memory_space<vmem>>, vector<288x128xf32>
    %180 = arith.addf %179, %178 : vector<288x128xf32>
    %c0_205 = arith.constant 0 : index
    %c0_206 = arith.constant 0 : index
    %181 = vector.load %arg10[%c0_205, %c0_206] : memref<288x128xf32, #tpu.memory_space<vmem>>, vector<288x128xf32>
    tpu.vector_store %arg10[%c0_205, %c0_206], %180 {strides = array<i32>} : memref<288x128xf32, #tpu.memory_space<vmem>>, vector<288x128xf32>,
    %c19_207 = arith.constant 19 : index
    %c0_208 = arith.constant 0 : index
    %182 = vector.load %arg9[%c19_207, %c0_208] : memref<336x128xbf16, #tpu.memory_space<vmem>>, vector<288x128xbf16>
    %c512_209 = arith.constant 512 : index
    %c0_210 = arith.constant 0 : index
    %183 = vector.load %arg6[%c512_209, %c0_210] : memref<1152x128xbf16, #tpu.memory_space<vmem>>, vector<128x128xbf16>
    %cst_211 = arith.constant dense<0.000000e+00> : vector<288x128xf32>
    %184 = tpu.matmul %182, %183, %cst_211 {dimension_numbers = #tpu.dot_dimension_numbers<[1], [0], [0], [1], [0, 0, 1, 1], [], []>} : vector<288x128xbf16>, vector<128x128xbf16>, vector<288x128xf32> -> vector<288x128xf32>
    %c0_212 = arith.constant 0 : index
    %c0_213 = arith.constant 0 : index
    %185 = vector.load %arg10[%c0_212, %c0_213] : memref<288x128xf32, #tpu.memory_space<vmem>>, vector<288x128xf32>
    %186 = arith.addf %185, %184 : vector<288x128xf32>
    %c0_214 = arith.constant 0 : index
    %c0_215 = arith.constant 0 : index
    %187 = vector.load %arg10[%c0_214, %c0_215] : memref<288x128xf32, #tpu.memory_space<vmem>>, vector<288x128xf32>
    tpu.vector_store %arg10[%c0_214, %c0_215], %186 {strides = array<i32>} : memref<288x128xf32, #tpu.memory_space<vmem>>, vector<288x128xf32>,
    %c20_216 = arith.constant 20 : index
    %c0_217 = arith.constant 0 : index
    %188 = vector.load %arg9[%c20_216, %c0_217] : memref<336x128xbf16, #tpu.memory_space<vmem>>, vector<288x128xbf16>
    %c640_218 = arith.constant 640 : index
    %c0_219 = arith.constant 0 : index
    %189 = vector.load %arg6[%c640_218, %c0_219] : memref<1152x128xbf16, #tpu.memory_space<vmem>>, vector<128x128xbf16>
    %cst_220 = arith.constant dense<0.000000e+00> : vector<288x128xf32>
    %190 = tpu.matmul %188, %189, %cst_220 {dimension_numbers = #tpu.dot_dimension_numbers<[1], [0], [0], [1], [0, 0, 1, 1], [], []>} : vector<288x128xbf16>, vector<128x128xbf16>, vector<288x128xf32> -> vector<288x128xf32>
    %c0_221 = arith.constant 0 : index
    %c0_222 = arith.constant 0 : index
    %191 = vector.load %arg10[%c0_221, %c0_222] : memref<288x128xf32, #tpu.memory_space<vmem>>, vector<288x128xf32>
    %192 = arith.addf %191, %190 : vector<288x128xf32>
    %c0_223 = arith.constant 0 : index
    %c0_224 = arith.constant 0 : index
    %193 = vector.load %arg10[%c0_223, %c0_224] : memref<288x128xf32, #tpu.memory_space<vmem>>, vector<288x128xf32>
    tpu.vector_store %arg10[%c0_223, %c0_224], %192 {strides = array<i32>} : memref<288x128xf32, #tpu.memory_space<vmem>>, vector<288x128xf32>,
    %c36_225 = arith.constant 36 : index
    %c0_226 = arith.constant 0 : index
    %194 = vector.load %arg9[%c36_225, %c0_226] : memref<336x128xbf16, #tpu.memory_space<vmem>>, vector<288x128xbf16>
    %c768_227 = arith.constant 768 : index
    %c0_228 = arith.constant 0 : index
    %195 = vector.load %arg6[%c768_227, %c0_228] : memref<1152x128xbf16, #tpu.memory_space<vmem>>, vector<128x128xbf16>
    %cst_229 = arith.constant dense<0.000000e+00> : vector<288x128xf32>
    %196 = tpu.matmul %194, %195, %cst_229 {dimension_numbers = #tpu.dot_dimension_numbers<[1], [0], [0], [1], [0, 0, 1, 1], [], []>} : vector<288x128xbf16>, vector<128x128xbf16>, vector<288x128xf32> -> vector<288x128xf32>
    %c0_230 = arith.constant 0 : index
    %c0_231 = arith.constant 0 : index
    %197 = vector.load %arg10[%c0_230, %c0_231] : memref<288x128xf32, #tpu.memory_space<vmem>>, vector<288x128xf32>
    %198 = arith.addf %197, %196 : vector<288x128xf32>
    %c0_232 = arith.constant 0 : index
    %c0_233 = arith.constant 0 : index
    %199 = vector.load %arg10[%c0_232, %c0_233] : memref<288x128xf32, #tpu.memory_space<vmem>>, vector<288x128xf32>
    tpu.vector_store %arg10[%c0_232, %c0_233], %198 {strides = array<i32>} : memref<288x128xf32, #tpu.memory_space<vmem>>, vector<288x128xf32>,
    %c37_234 = arith.constant 37 : index
    %c0_235 = arith.constant 0 : index
    %200 = vector.load %arg9[%c37_234, %c0_235] : memref<336x128xbf16, #tpu.memory_space<vmem>>, vector<288x128xbf16>
    %c896_236 = arith.constant 896 : index
    %c0_237 = arith.constant 0 : index
    %201 = vector.load %arg6[%c896_236, %c0_237] : memref<1152x128xbf16, #tpu.memory_space<vmem>>, vector<128x128xbf16>
    %cst_238 = arith.constant dense<0.000000e+00> : vector<288x128xf32>
    %202 = tpu.matmul %200, %201, %cst_238 {dimension_numbers = #tpu.dot_dimension_numbers<[1], [0], [0], [1], [0, 0, 1, 1], [], []>} : vector<288x128xbf16>, vector<128x128xbf16>, vector<288x128xf32> -> vector<288x128xf32>
    %c0_239 = arith.constant 0 : index
    %c0_240 = arith.constant 0 : index
    %203 = vector.load %arg10[%c0_239, %c0_240] : memref<288x128xf32, #tpu.memory_space<vmem>>, vector<288x128xf32>
    %204 = arith.addf %203, %202 : vector<288x128xf32>
    %c0_241 = arith.constant 0 : index
    %c0_242 = arith.constant 0 : index
    %205 = vector.load %arg10[%c0_241, %c0_242] : memref<288x128xf32, #tpu.memory_space<vmem>>, vector<288x128xf32>
    tpu.vector_store %arg10[%c0_241, %c0_242], %204 {strides = array<i32>} : memref<288x128xf32, #tpu.memory_space<vmem>>, vector<288x128xf32>,
    %c38_243 = arith.constant 38 : index
    %c0_244 = arith.constant 0 : index
    %206 = vector.load %arg9[%c38_243, %c0_244] : memref<336x128xbf16, #tpu.memory_space<vmem>>, vector<288x128xbf16>
    %c1024_245 = arith.constant 1024 : index
    %c0_246 = arith.constant 0 : index
    %207 = vector.load %arg6[%c1024_245, %c0_246] : memref<1152x128xbf16, #tpu.memory_space<vmem>>, vector<128x128xbf16>
    %cst_247 = arith.constant dense<0.000000e+00> : vector<288x128xf32>
    %208 = tpu.matmul %206, %207, %cst_247 {dimension_numbers = #tpu.dot_dimension_numbers<[1], [0], [0], [1], [0, 0, 1, 1], [], []>} : vector<288x128xbf16>, vector<128x128xbf16>, vector<288x128xf32> -> vector<288x128xf32>
    %c0_248 = arith.constant 0 : index
    %c0_249 = arith.constant 0 : index
    %209 = vector.load %arg10[%c0_248, %c0_249] : memref<288x128xf32, #tpu.memory_space<vmem>>, vector<288x128xf32>
    %210 = arith.addf %209, %208 : vector<288x128xf32>
    %c0_250 = arith.constant 0 : index
    %c0_251 = arith.constant 0 : index
    %211 = vector.load %arg10[%c0_250, %c0_251] : memref<288x128xf32, #tpu.memory_space<vmem>>, vector<288x128xf32>
    tpu.vector_store %arg10[%c0_250, %c0_251], %210 {strides = array<i32>} : memref<288x128xf32, #tpu.memory_space<vmem>>, vector<288x128xf32>,
    %c0_252 = arith.constant 0 : index
    %c0_253 = arith.constant 0 : index
    %212 = vector.load %arg10[%c0_252, %c0_253] : memref<288x128xf32, #tpu.memory_space<vmem>>, vector<288x128xf32>
    %c0_254 = arith.constant 0 : index
    %c0_255 = arith.constant 0 : index
    %213 = vector.load %arg7[%c0_254, %c0_255] : memref<1x128xf32, #tpu.memory_space<vmem>>, vector<1x128xf32>
    %214 = vector.broadcast %213 : vector<1x128xf32> to vector<288x128xf32>
    %215 = arith.addf %212, %214 : vector<288x128xf32>
    %c0_256 = arith.constant 0 : index
    %c0_257 = arith.constant 0 : index
    %c0_258 = arith.constant 0 : index
    %216 = vector.load %arg8[%c0_256, %c0_257, %c0_258] : memref<1x288x128xf32, #tpu.memory_space<vmem>>, vector<1x288x128xf32>
    %217 = vector.shape_cast %216 : vector<1x288x128xf32> to vector<288x128xf32>
    %218 = vector.shape_cast %215 : vector<288x128xf32> to vector<1x288x128xf32>
    tpu.vector_store %arg8[%c0_256, %c0_257, %c0_258], %218 {strides = array<i32>} : memref<1x288x128xf32, #tpu.memory_space<vmem>>, vector<1x288x128xf32>,
    return
  }
  func.func @transform_0(%arg0: i32) -> (i32, i32, i32) {
    %c0_i32 = arith.constant 0 : i32
    %c0_i32_0 = arith.constant 0 : i32
    %c0_i32_1 = arith.constant 0 : i32
    return %arg0, %c0_i32, %c0_i32_0 : i32, i32, i32
  }
  func.func @transform_1(%arg0: i32) -> (i32, i32) {
    %c0_i32 = arith.constant 0 : i32
    %c0_i32_0 = arith.constant 0 : i32
    %c0_i32_1 = arith.constant 0 : i32
    return %c0_i32, %c0_i32_0 : i32, i32
  }
  func.func @transform_2(%arg0: i32) -> (i32, i32) {
    %c0_i32 = arith.constant 0 : i32
    %c0_i32_0 = arith.constant 0 : i32
    %c0_i32_1 = arith.constant 0 : i32
    return %c0_i32, %c0_i32_0 : i32, i32
  }
  func.func @transform_3(%arg0: i32) -> (i32, i32) {
    %c0_i32 = arith.constant 0 : i32
    %c0_i32_0 = arith.constant 0 : i32
    %c0_i32_1 = arith.constant 0 : i32
    return %c0_i32, %c0_i32_0 : i32, i32
  }
  func.func @transform_4(%arg0: i32) -> (i32, i32) {
    %c0_i32 = arith.constant 0 : i32
    %c0_i32_0 = arith.constant 0 : i32
    %c0_i32_1 = arith.constant 0 : i32
    return %c0_i32, %c0_i32_0 : i32, i32
  }
  func.func @transform_5(%arg0: i32) -> (i32, i32) {
    %c0_i32 = arith.constant 0 : i32
    %c0_i32_0 = arith.constant 0 : i32
    %c0_i32_1 = arith.constant 0 : i32
    return %c0_i32, %c0_i32_0 : i32, i32
  }
  func.func @transform_6(%arg0: i32) -> (i32, i32) {
    %c0_i32 = arith.constant 0 : i32
    %c0_i32_0 = arith.constant 0 : i32
    %c0_i32_1 = arith.constant 0 : i32
    return %c0_i32, %c0_i32_0 : i32, i32
  }
  func.func @transform_7(%arg0: i32) -> (i32, i32, i32) {
    %c0_i32 = arith.constant 0 : i32
    %c0_i32_0 = arith.constant 0 : i32
    %c0_i32_1 = arith.constant 0 : i32
    return %arg0, %c0_i32, %c0_i32_0 : i32, i32, i32
  }
}

</mosaic_0001>

<bundles_post_ra>
// kernel: context_encoder_forward.1
= control target key start
LH: loop header
LB: loop body
LE: loop exit
PB: predicated region body
PF: predicated region fallthrough
CT: control target
= control target key end

     0   :  { %s19222_s24 = smov 0   ;;  %s24020_s0 = inlined_call_operand.vmem [shape: bf16[2,336,128], index: 0, kind: input, shape index: {}]   ;;  %s24021_s1 = inlined_call_operand.vmem [shape: bf16[1152,128], index: 1, kind: input, shape index: {}]   ;;  %s24022_s2 = inlined_call_operand.vmem [shape: f32[1,128], index: 2, kind: input, shape index: {}]   ;;  %s24023_s3 = inlined_call_operand.vmem [shape: bf16[1152,128], index: 3, kind: input, shape index: {}]   ;;  %s24024_s4 = inlined_call_operand.vmem [shape: f32[1,128], index: 4, kind: input, shape index: {}]   ;;  %s24025_s5 = inlined_call_operand.vmem [shape: bf16[1152,128], index: 5, kind: input, shape index: {}]   ;;  %s24026_s6 = inlined_call_operand.vmem [shape: f32[1,128], index: 6, kind: input, shape index: {}]   ;;  %s24027_s7 = inlined_call_operand.vmem [shape: f32[2,288,128], index: 7, kind: output, shape index: {}]  }
   0x1 LB: > { %s15307_s25 = sadd.s32 4294967295, %s19179_s24   ;;  %p15311_p0 = scmp.ge.s32.totalorder %s19179_s24, 1  ;;  %s19179_s24 = sphi %s19222_s24, %s17_s24  }
   0x2   : > { %p237_p1 = scmp.lt.s32.totalorder %s19179_s24, 3 }
   0x4   : > { %p238_p2 = pnand %p15311_p0, %p237_p1 }
   0x6   : > { %241 = sbr.rel (%p238_p2) target bundleno = 2243 (0x8c3), region = 48 }
   0xd   : > { %v18774_v0 = vld [vmem:[%s24021_s1] sm:$0xff]   ;;  %v18776_v2 = vld [vmem:[%s24021_s1 + $0x8] sm:$0xff]   ;;  %p269_p3 = scmp.lt.s32.totalorder %s15307_s25, 1  ;;  %v18778_v4 = vld [vmem:[%s24021_s1 + $0x10] sm:$0xff]   ;;  %vm24037_vm0 = vsmask.f32 6400 }
   0xe   : > { %v18775_v1 = vld [vmem:[%s24021_s1 + $0x100] sm:$0xff]   ;;  %16407 = vmatprep.subr.bf16.mxu1 %v18774_v0  ;;  %v18777_v3 = vld [vmem:[%s24021_s1 + $0x108] sm:$0xff]   ;;  %v18779_v5 = vld [vmem:[%s24021_s1 + $0x110] sm:$0xff]   ;;  %vm24035_vm1 = vcmask 1045504   ;;  %vm24039_vm2 = vsmask.f32 7424 }
   0xf   : > { %16615 = vmatprep.subr.bf16.mxu0 %v18775_v1  ;;  %16408 = vmatpush3.bf16.msra.mxu1 %v18774_v0  ;;  %s25129_s25 = smov (!%p269_p3, %s15307_s25), 1  ;;  %v18780_v6 = vld [vmem:[%s24021_s1 + $0x18] sm:$0xff]   ;;  %v18782_v8 = vld [vmem:[%s24021_s1 + $0x20] sm:$0xff]   ;;  %v18784_v10 = vld [vmem:[%s24021_s1 + $0x28] sm:$0xff]   ;;  %vm24038_vm3 = vcmask 1046528   ;;  %vm24034_vm5 = vcmask 1044480  }
  0x10   : > { %16616 = vmatpush3.bf16.msra.mxu0 %v18775_v1  ;;  %16409 = vmatprep.subr.bf16.mxu1 %v18776_v2  ;;  %v18781_v7 = vld [vmem:[%s24021_s1 + $0x118] sm:$0xff]   ;;  %s18691_s19 = smul.u32 168, %s25129_s25  ;;  %v18783_v9 = vld [vmem:[%s24021_s1 + $0x120] sm:$0xff]   ;;  %v18785_v11 = vld [vmem:[%s24021_s1 + $0x128] sm:$0xff]   ;;  %vm24036_vm4 = vsmask.f32 5376 }
  0x11   : > { %16617 = vmatprep.subr.bf16.mxu0 %v18777_v3  ;;  %v18786_v15 = vld [vmem:[%s24021_s1 + $0x30] sm:$0xff]   ;;  %v18788_v26 = vld [vmem:[%s24021_s1 + $0x38] sm:$0xff]   ;;  %v18794_v33 = vld [vmem:[%s24021_s1 + $0x40] sm:$0xff]   ;;  %vm281_vm6 = vcmask 1041408   ;;  %vm24040_vm7 = vsmask.f32 1280 }
  0x12   : > { %s19272_s9 = scalar_lea.vmem %s24020_s0, %s18691_s19  ;;  %v18787_v16 = vld [vmem:[%s24021_s1 + $0x130] sm:$0xff]   ;;  %v18789_v29 = vld [vmem:[%s24021_s1 + $0x138] sm:$0xff]   ;;  %v18796_v39 = vld [vmem:[%s24021_s1 + $0x140] sm:$0xff]   ;;  %vm287_vm9 = vcmask 1047553   ;;  %vm288_vm10 = vsmask.f32 7942 }
  0x13   : > { %16410 = vmatpush3.bf16.msra.mxu1 %v18776_v2  ;;  %v18790_v12 = vld [vmem:[%s19272_s9] sm:$0xff]   ;;  %v18791_v13 = vld [vmem:[%s19272_s9 + $0x8] sm:$0xfe]   ;;  %v18792_v14 = vld [vmem:[%s19272_s9 + $0x10] sm:$0xff]   ;;  %s18692_s23 = smul.u32 288, %s25129_s25 }
  0x14   : > { %16618 = vmatpush3.bf16.msra.mxu0 %v18777_v3  ;;  %16411 = vmatprep.subr.bf16.mxu1 %v18778_v4  ;;  %v3227_v17 = vshrl.u32 %v18791_v13, 16  ;;  %v3230_v18 = vshll.u32 %v18791_v13, 16  ;;  %v3235_v19 = vshrl.u32 %v18792_v14, 16  ;;  %v3238_v20 = vshll.u32 %v18792_v14, 16  ;;  %v18795_v25 = vld [vmem:[%s19272_s9 + $0x18] sm:$0xff]   ;;  %v18799_v36 = vld [vmem:[%s19272_s9 + $0x20] sm:$0xff]   ;;  %vm20462_vm8 = vmand %vm281_vm6, %vm24040_vm7 }
  0x15   : > { %16619 = vmatprep.subr.bf16.mxu0 %v18779_v5  ;;  %16423 = vmatprep.mubr.bf16.mxu1 %v18790_v12  ;;  %v3244_v30 = vshrl.u32 %v18795_v25, 16  ;;  %v3247_v31 = vshll.u32 %v18795_v25, 16  ;;  %v18793_v37 = vld [vmem:[%s19272_s9 + $0x8] sm:$0xff]   ;;  %v3253_v40 = vshrl.u32 %v18799_v36, 16  ;;  %v3256_v41 = vshll.u32 %v18799_v36, 16  ;;  %v18798_v48 = vld [vmem:[%s19272_s9 + $0x10] sm:$0xff]   ;;  %vm20474_vm11 = vmand %vm287_vm9, %vm288_vm10  ;;  %s23943_s30 = scalar_lea.vmem %s24027_s7, %s18692_s23 }
  0x16   : > { %v3229_v21 = vrot.slane %v3227_v17, 1  ;;  %v3232_v22 = vrot.slane %v3230_v18, 2  ;;  %v3237_v23 = vrot.slane %v3235_v19, 1  ;;  %v3240_v24 = vrot.slane %v3238_v20, 2  ;;  %v18801_v42 = vld [vmem:[%s19272_s9 + $0x28] sm:$0xff]   ;;  %v18806_v54 = vld [vmem:[%s19272_s9 + $0x30] sm:$0xff]  }
  0x17   : > { %16412 = vmatpush3.bf16.msra.mxu1 %v18778_v4  ;;  %v3246_v34 = vrot.slane %v3244_v30, 1  ;;  %v3249_v35 = vrot.slane %v3247_v31, 2  ;;  %v18797_v43 = vld [vmem:[%s24021_s1 + $0x148] sm:$0xff]   ;;  %v3255_v44 = vrot.slane %v3253_v40, 1  ;;  %v3258_v45 = vrot.slane %v3256_v41, 2  ;;  %v18800_v56 = vld [vmem:[%s19272_s9 + $0x18] sm:$0xff]  }
  0x18   : > { %16620 = vmatpush3.bf16.msra.mxu0 %v18779_v5  ;;  %16413 = vmatprep.subr.bf16.mxu1 %v18780_v6  ;;  %v3233_v27 = vor.u32 %v3232_v22, %v3229_v21  ;;  %v3241_v28 = vor.u32 %v3240_v24, %v3237_v23  ;;  %v3262_v46 = vshrl.u32 %v18801_v42, 16  ;;  %v3265_v49 = vshll.u32 %v18801_v42, 16  ;;  %v18803_v52 = vld [vmem:[%s24021_s1 + $0x48] sm:$0xff]   ;;  %v18802_v58 = vld [vmem:[%s24021_s1 + $0x150] sm:$0xff]   ;;  %v18808_v61 = vld [vmem:[%s19272_s9 + $0x38] sm:$0xff]  }
  0x19   : > { %16621 = vmatprep.subr.bf16.mxu0 %v18781_v7  ;;  %v3250_v38 = vor.u32 %v3249_v35, %v3246_v34  ;;  %v3259_v50 = vor.u32 %v3258_v45, %v3255_v44  ;;  %v3271_v59 = vshrl.u32 %v18806_v54, 16  ;;  %v3274_v60 = vshll.u32 %v18806_v54, 16  ;;  %v18810_v1 = vld [vmem:[%s24021_s1 + $0x50] sm:$0xff]   ;;  %v18805_v2 = vld [vmem:[%s19272_s9 + $0x20] sm:$0xff]   ;;  %v18804_v5 = vld [vmem:[%s24021_s1 + $0x158] sm:$0xff]  }
  0x1a   : > { %v3242_v32 = vsel %vm24037_vm0, %v3233_v27, %v3241_v28  ;;  %v3264_v51 = vrot.slane %v3262_v46, 1  ;;  %v3267_v53 = vrot.slane %v3265_v49, 2  ;;  %v3280_v0 = vshrl.u32 %v18808_v61, 16  ;;  %v18807_v13 = vld [vmem:[%s19272_s9 + $0x28] sm:$0xff]   ;;  %v18817_v19 = vld [vmem:[%s24021_s1 + $0x58] sm:$0xff]   ;;  %v18812_v22 = vld [vmem:[%s19272_s9 + $0x30] sm:$0xff]  }
  0x1b   : > { %16414 = vmatpush3.bf16.msra.mxu1 %v18780_v6  ;;  %16631 = vmatprep.mubr.bf16.mxu0 %v3242_v32  ;;  %v3251_v47 = vsel %vm24037_vm0, %v3241_v28, %v3250_v38  ;;  %v3260_v55 = vsel %vm24037_vm0, %v3250_v38, %v3259_v50  ;;  %v3273_v62 = vrot.slane %v3271_v59, 1  ;;  %v3276_v63 = vrot.slane %v3274_v60, 2  ;;  %v18811_v25 = vld [vmem:[%s24021_s1 + $0x168] sm:$0xff]   ;;  %v18821_v28 = vld [vmem:[%s19272_s9 + $0x10] sm:$0xff]   ;;  %v18824_v35 = vld [vmem:[%s24021_s1 + $0x60] sm:$0xff]  }
  0x1c   : > { %16622 = vmatpush3.bf16.msra.mxu0 %v18781_v7  ;;  %16415 = vmatprep.subr.bf16.mxu1 %v18782_v8  ;;  %v3268_v57 = vor.u32 %v3267_v53, %v3264_v51  ;;  %v3283_v3 = vshll.u32 %v18808_v61, 16  ;;  %v3282_v7 = vrot.slane %v3280_v0, 1  ;;  %v18820_v30 = vld [vmem:[%s19272_s9 + $0x8] sm:$0xfc]   ;;  %v18816_v32 = vld [vmem:[%s24021_s1 + $0x170] sm:$0xff]   ;;  %v18814_v36 = vld [vmem:[%s19272_s9 + $0x38] sm:$0xff]  }
  0x1d   : > { %16623 = vmatprep.subr.bf16.mxu0 %v18783_v9  ;;  %v3277_v6 = vor.u32 %v3276_v63, %v3273_v62  ;;  %v3894_v34 = vrot.slane %v18820_v30, 2  ;;  %v18819_v38 = vld [vmem:[%s19272_s9 + $0x40] sm:$0xff]   ;;  %v18823_v40 = vld [vmem:[%s19272_s9 + $0x18] sm:$0xff]   ;;  %v18822_v44 = vld [vmem:[%s19272_s9 + $0x48] sm:$0xff]  }
  0x1e   : > { %v3269_v4 = vsel %vm24037_vm0, %v3259_v50, %v3268_v57  ;;  %v18826_v42 = vld [vmem:[%s19272_s9 + $0x20] sm:$0xff]   ;;  %v3897_v45 = vrot.slane %v18823_v40, 2  ;;  %v18825_v46 = vld [vmem:[%s19272_s9 + $0x50] sm:$0xff]   ;;  %v18828_v49 = vld [vmem:[%s19272_s9 + $0x28] sm:$0xff]  }
  0x1f   : > { %16416 = vmatpush3.bf16.msra.mxu1 %v18782_v8  ;;  %v3285_v8 = vrot.slane %v3283_v3, 2  ;;  %v18832_v50 = vld [vmem:[%s19272_s9 + $0x30] sm:$0xff]   ;;  %v18834_v60 = vld [vmem:[%s19272_s9 + $0x38] sm:$0xff]   ;;  %v18838_v0 = vld [vmem:[%s19272_s9 + $0x40] sm:$0xff]  }
  0x20   : > { %16624 = vmatpush3.bf16.msra.mxu0 %v18783_v9  ;;  %16417 = vmatprep.subr.bf16.mxu1 %v18784_v10  ;;  %v18813_v9 = vld [vmem:[%s19272_s9 + $0x40] sm:$0xff]   ;;  %v18836_v54 = vld [vmem:[%s24021_s1 + $0x70] sm:$0xff]   ;;  %v18843_v62 = vld [vmem:[%s24021_s1 + $0x78] sm:$0xff]   ;;  %v3907_v3 = vrot.slane %v18838_v0, 2 }
  0x21   : > { %16625 = vmatprep.subr.bf16.mxu0 %v18785_v11  ;;  %v3292_v12 = vshll.u32 %v18813_v9, 16  ;;  %v3286_v14 = vor.u32 %v3285_v8, %v3282_v7  ;;  %v18841_v59 = vld [vmem:[%s24021_s1 + $0x190] sm:$0xff]   ;;  %v18859_v0 = vld [vmem:[%s24021_s1 + $0x88] sm:$0xff]  }
  0x22   : > { %v18844_v8 = vld [vmem:[%s19272_s9 + $0x50] sm:$0xff]  }
  0x23   : > { %16418 = vmatpush3.bf16.msra.mxu1 %v18784_v10  ;;  %v3278_v10 = vsel %vm24037_vm0, %v3268_v57, %v3277_v6  ;;  %v3294_v18 = vrot.slane %v3292_v12, 2  ;;  %v3287_v24 = vsel %vm24037_vm0, %v3277_v6, %v3286_v14  ;;  %v18831_v57 = vld [vmem:[%s19272_s9 + $0x60] sm:$0xff]   ;;  %v18840_v6 = vld [vmem:[%s19272_s9 + $0x48] sm:$0xff]  }
  0x24   : > { %16626 = vmatpush3.bf16.msra.mxu0 %v18785_v11  ;;  %16419 = vmatprep.subr.bf16.mxu1 %v18786_v15  ;;  %v3289_v11 = vshrl.u32 %v18813_v9, 16  ;;  %v18848_v9 = vld [vmem:[%s19272_s9] sm:$0xff]   ;;  %v3909_v12 = vrot.slane %v18840_v6, 2 }
  0x25   : > { %16627 = vmatprep.subr.bf16.mxu0 %v18787_v16 }
  0x26   : > { %v3291_v17 = vrot.slane %v3289_v11, 1  ;;  %v19402_v11 = vld [vmem:[%s24021_s1 + $0x80] sm:$0xff]  }
  0x27   : > { %16420 = vmatpush3.bf16.msra.mxu1 %v18786_v15  ;;  %v18815_v15 = vld [vmem:[%s19272_s9 + $0x48] sm:$0xff]  }
  0x28   : > { %16628 = vmatpush3.bf16.msra.mxu0 %v18787_v16  ;;  %16421 = vmatprep.subr.bf16.mxu1 %v18788_v26  ;;  %v18809_v16 = vld [vmem:[%s24021_s1 + $0x160] sm:$0xff]   ;;  %v3298_v20 = vshrl.u32 %v18815_v15, 16  ;;  %v3301_v21 = vshll.u32 %v18815_v15, 16  ;;  %v3295_v23 = vor.u32 %v3294_v18, %v3291_v17  ;;  %v18839_v17 = vld [vmem:[%s19272_s9 + $0x78] sm:$0xff]  }
  0x29   : > { %16629 = vmatprep.subr.bf16.mxu0 %v18789_v29  ;;  %v18854_v15 = vld [vmem:[%s24021_s1 + $0x1a0] sm:$0xff]  }
  0x2a   : > { %v3303_v27 = vrot.slane %v3301_v21, 2  ;;  %v18842_v18 = vld [vmem:[%s19272_s9 + $0x80] sm:$0xff]   ;;  %v3910_v21 = vsel %vm24035_vm1, %v3907_v3, %v3909_v12 }
  0x2b   : > { %16422 = vmatpush3.bf16.msra.mxu1 %v18788_v26  ;;  %v3300_v26 = vrot.slane %v3298_v20, 1  ;;  %v1512_v20 = vshrl.u32 %v18848_v9, 16 }
  0x2c   : > { %16630 = vmatpush3.bf16.msra.mxu0 %v18789_v29  ;;  %16459 = vmatprep.subr.bf16.mxu1 %v18794_v33  ;;  %v3296_v29 = vsel %vm24037_vm0, %v3286_v14, %v3295_v23  ;;  %v1514_v14 = vshll.u32 %v18848_v9, 16  ;;  %v18867_v9 = vld [vmem:[%s19272_s9 + $0x38] sm:$0xff]  }
  0x2d   : > { %16667 = vmatprep.subr.bf16.mxu0 %v18796_v39  ;;  %v19341_v31 = vor.u32 %v3303_v27, %v3300_v26  ;;  %v18860_v26 = vld [vmem:[%s24021_s1 + $0x1a8] sm:$0xff]   ;;  %v18851_v27 = vld [vmem:[%s19272_s9 + $0x10] sm:$0xff]  }
  0x2e   : > { %16424 = vmatmul.mubr.bf16.vlgmr.msra.gmra.mrb[0].mxu1 %v18793_v37  ;;  %v18818_v37 = vld [vmem:[%s24021_s1 + $0x178] sm:$0xff]  }
  0x2f   : > { %16632 = vmatmul.mubr.bf16.vlgmr.msra.gmra.mrb[0].mxu0 %v3251_v47  ;;  %16460 = vmatpush3.bf16.msra.mxu1 %v18794_v33  ;;  %v3895_v33 = vrot.slane %v18821_v28, 2  ;;  %v3899_v47 = vrot.slane %v18826_v42, 2  ;;  %v1531_v42 = vshrl.u32 %v18851_v27, 16 }
  0x30   : > { %16668 = vmatpush3.bf16.msra.mxu0 %v18796_v39  ;;  %16427 = vmatprep.mubr.bf16.mxu1 %v18798_v48  ;;  %v3305_v39 = vsel %vm24037_vm0, %v3295_v23, %v19341_v31  ;;  %v18829_v48 = vld [vmem:[%s24021_s1 + $0x180] sm:$0xff]  }
  0x31   : > { %16669 = vmatprep.subr.bf16.mxu0 %v18797_v43  ;;  %16635 = vmatprep.mubr.bf16.mxu0 %v3260_v55  ;;  %v3896_v41 = vsel %vm24035_vm1, %v3894_v34, %v3895_v33  ;;  %v3898_v51 = vsel %vm24035_vm1, %v3895_v33, %v3897_v45  ;;  %v3900_v53 = vsel %vm24035_vm1, %v3897_v45, %v3899_v47  ;;  %v18827_v55 = vld [vmem:[%s19272_s9 + $0x58] sm:$0xff]   ;;  %v18845_v34 = vld [vmem:[%s19272_s9 + $0x88] sm:$0xff]   ;;  %v18866_v45 = vld [vmem:[%s24021_s1 + $0x1b0] sm:$0xff]  }
  0x32   : > { %16461 = vmatprep.subr.bf16.mxu1 %v18803_v52  ;;  %v18855_v33 = vld [vmem:[%s19272_s9 + $0x18] sm:$0xff]  }
  0x33   : > { %16462 = vmatpush3.bf16.msra.mxu1 %v18803_v52  ;;  %v18835_v52 = vld [vmem:[%s24021_s1 + $0x188] sm:$0xff]  }
  0x34   : > { %16670 = vmatpush3.bf16.msra.mxu0 %v18797_v43  ;;  %16463 = vmatprep.subr.bf16.mxu1 %v18810_v1  ;;  %v18830_v43 = vld [vmem:[%s24021_s1 + $0x68] sm:$0xff]  }
  0x35   : > { %16671 = vmatprep.subr.bf16.mxu0 %v18802_v58 }
  0x36   : > { %16428 = vmatmul.mubr.bf16.gmra.mrb[4].mxu1 %v18800_v56  ;;  %v3901_v56 = vrot.slane %v18828_v49, 2  ;;  %v18861_v49 = vld [vmem:[%s19272_s9 + $0x28] sm:$0xff]  }
  0x37   : > { %16636 = vmatmul.mubr.bf16.gmra.mrb[4].mxu0 %v3269_v4  ;;  %16431 = vmatprep.mubr.bf16.mxu1 %v18805_v2  ;;  %v18847_v2 = vld [vmem:[%s24021_s1 + $0x198] sm:$0xff]   ;;  %v18833_v4 = vld [vmem:[%s19272_s9 + $0x68] sm:$0xff]  }
  0x38   : > { %16672 = vmatpush3.bf16.msra.mxu0 %v18802_v58  ;;  %16639 = vmatprep.mubr.bf16.mxu0 %v3278_v10  ;;  %v3903_v58 = vrot.slane %v18832_v50, 2  ;;  %v3902_v61 = vsel %vm24035_vm1, %v3899_v47, %v3901_v56 }
  0x39   : > { %16673 = vmatprep.subr.bf16.mxu0 %v18804_v5  ;;  %16464 = vmatpush3.bf16.msra.mxu1 %v18810_v1  ;;  %v3905_v1 = vrot.slane %v18834_v60, 2  ;;  %v1551_v60 = vshll.u32 %v18861_v49, 16 }
  0x3a   : > { %16465 = vmatprep.subr.bf16.mxu1 %v18817_v19  ;;  %v3904_v63 = vsel %vm24035_vm1, %v3901_v56, %v3903_v58  ;;  %v18858_v56 = vld [vmem:[%s19272_s9 + $0x78] sm:$0xff]  }
  0x3b   : > { %v3906_v7 = vsel %vm24035_vm1, %v3903_v58, %v3905_v1  ;;  %v3908_v10 = vsel %vm24035_vm1, %v3905_v1, %v3907_v3  ;;  %v18872_v58 = vld [vmem:[%s24021_s1 + $0x1b8] sm:$0xff]   ;;  %v1553_v6 = vrot.slane %v1551_v60, 1 }
  0x3c   : > { %16674 = vmatpush3.bf16.msra.mxu0 %v18804_v5  ;;  %v18837_v5 = vld [vmem:[%s19272_s9 + $0x70] sm:$0xff]  }
  0x3d   : > { %16675 = vmatprep.subr.bf16.mxu0 %v18809_v16  ;;  %16466 = vmatpush3.bf16.msra.mxu1 %v18817_v19  ;;  %v18846_v19 = vld [vmem:[%s19272_s9 + $0x58] sm:$0xff]  }
  0x3e   : > { %16432 = vmatmul.mubr.bf16.gmra.mrb[8].mxu1 %v18807_v13  ;;  %16467 = vmatprep.subr.bf16.mxu1 %v18824_v35  ;;  %v18849_v13 = vld [vmem:[%s19272_s9 + $0x8] sm:$0xff]   ;;  %v3913_v28 = vrot.slane %v18846_v19, 2  ;;  %v18869_v19 = vld [vmem:[%s19272_s9 + $0x40] sm:$0xff]  }
  0x3f   : > { %16640 = vmatmul.mubr.bf16.gmra.mrb[8].mxu0 %v3287_v24  ;;  %16435 = vmatprep.mubr.bf16.mxu1 %v18812_v22  ;;  %v1516_v22 = vrot.slane %v1514_v14, 1  ;;  %v1519_v23 = vshll.u32 %v18849_v13, 16 }
  0x40   : > { %16676 = vmatpush3.bf16.msra.mxu0 %v18809_v16  ;;  %16643 = vmatprep.mubr.bf16.mxu0 %v3296_v29  ;;  %v3911_v16 = vrot.slane %v18844_v8, 2  ;;  %v18865_v8 = vld [vmem:[%s24021_s1 + $0x90] sm:$0xff]  }
  0x41   : > { %16677 = vmatprep.subr.bf16.mxu0 %v18811_v25  ;;  %16468 = vmatpush3.bf16.msra.mxu1 %v18824_v35  ;;  %v1517_v29 = vor.u32 %v1516_v22, %v1512_v20  ;;  %v1521_v30 = vrot.slane %v1519_v23, 1  ;;  %v1523_v35 = vshrl.u32 %v18849_v13, 16  ;;  %v18864_v13 = vld [vmem:[%s19272_s9 + $0x88] sm:$0xff]  }
  0x42   : > { %16469 = vmatprep.subr.bf16.mxu1 %v18830_v43  ;;  %v3912_v24 = vsel %vm24035_vm1, %v3909_v12, %v3911_v16  ;;  %v19460_v23 = vld [vmem:[%s19272_s9 + $0x48] sm:$0xff]  }
  0x43   : > { %v1522_v40 = vsel %vm24039_vm2, %v1517_v29, %v1521_v30 }
  0x44   : > { %16678 = vmatpush3.bf16.msra.mxu0 %v18811_v25  ;;  %v18850_v25 = vld [vmem:[%s19272_s9 + $0x60] sm:$0xff]  }
  0x45   : > { %16679 = vmatprep.subr.bf16.mxu0 %v18816_v32  ;;  %16470 = vmatpush3.bf16.msra.mxu1 %v18830_v43  ;;  %v1535_v43 = vshll.u32 %v18855_v33, 16 }
  0x46   : > { %16436 = vmatmul.mubr.bf16.gmra.mrb[12].mxu1 %v18814_v36  ;;  %16471 = vmatprep.subr.bf16.mxu1 %v18836_v54  ;;  %v1527_v36 = vshll.u32 %v18851_v27, 16 }
  0x47   : > { %16644 = vmatmul.mubr.bf16.gmra.mrb[12].mxu0 %v3305_v39  ;;  %16439 = vmatprep.mubr.bf16.mxu1 %v18819_v38  ;;  %v18856_v38 = vld [vmem:[%s19272_s9 + $0x70] sm:$0xff]   ;;  %v3914_v39 = vsel %vm24035_vm1, %v3911_v16, %v3913_v28 }
  0x48   : > { %16680 = vmatpush3.bf16.msra.mxu0 %v18816_v32  ;;  %16683 = vmatprep.mubr.bf16.mxu0 %v3896_v41  ;;  %v3915_v32 = vrot.slane %v18850_v25, 2  ;;  %v1529_v47 = vrot.slane %v1527_v36, 1 }
  0x49   : > { %16681 = vmatprep.subr.bf16.mxu0 %v18818_v37  ;;  %16472 = vmatpush3.bf16.msra.mxu1 %v18836_v54 }
  0x4a   : > { %16473 = vmatprep.subr.bf16.mxu1 %v18843_v62  ;;  %v3916_v41 = vsel %vm24035_vm1, %v3913_v28, %v3915_v32  ;;  %v1533_v50 = vor.u32 %v1531_v42, %v1529_v47 }
  0x4c   : > { %16682 = vmatpush3.bf16.msra.mxu0 %v18818_v37  ;;  %v18853_v37 = vld [vmem:[%s19272_s9 + $0x68] sm:$0xff]  }
  0x4d   : > { %16719 = vmatprep.subr.bf16.mxu0 %v18829_v48  ;;  %16474 = vmatpush3.bf16.msra.mxu1 %v18843_v62 }
  0x4e   : > { %16440 = vmatmul.mubr.bf16.gmra.mrb[16].mxu1 %v18822_v44  ;;  %16511 = vmatprep.subr.bf16.mxu1 %v19402_v11  ;;  %v18857_v44 = vld [vmem:[%s19272_s9 + $0x20] sm:$0xff]  }
  0x4f   : > { %16684 = vmatmul.mubr.bf16.vlgmr.msra.gmra.mrb[0].mxu0 %v3898_v51  ;;  %16443 = vmatprep.mubr.bf16.mxu1 %v18825_v46  ;;  %v1525_v46 = vor.u32 %v1523_v35, %v1521_v30  ;;  %v1537_v51 = vrot.slane %v1535_v43, 1  ;;  %v1571_v30 = vshrl.u32 %v18867_v9, 16  ;;  %v1579_v35 = vshrl.u32 %v18869_v19, 16  ;;  %v18884_v43 = vld [vmem:[%s24021_s1 + $0xa8] sm:$0xff]  }
  0x50   : > { %16687 = vmatprep.mubr.bf16.mxu0 %v3900_v53  ;;  %16720 = vmatpush3.bf16.msra.mxu0 %v18829_v48  ;;  %v3917_v48 = vrot.slane %v18853_v37, 2  ;;  %v1543_v53 = vshll.u32 %v18857_v44, 16  ;;  %v1583_v37 = vshll.u32 %v19460_v23, 16 }
  0x51   : > { %16721 = vmatprep.subr.bf16.mxu0 %v18835_v52  ;;  %v1530_v54 = vsel %vm24039_vm2, %v1525_v46, %v1529_v47  ;;  %v1538_v62 = vsel %vm24039_vm2, %v1533_v50, %v1537_v51 }
  0x52   : > { %v1545_v1 = vrot.slane %v1543_v53, 1  ;;  %v18890_v53 = vld [vmem:[%s24021_s1 + $0xb0] sm:$0xff]  }
  0x54   : > { %16722 = vmatpush3.bf16.msra.mxu0 %v18835_v52  ;;  %v3919_v52 = vrot.slane %v18856_v38, 2  ;;  %v18875_v38 = vld [vmem:[%s19272_s9 + $0x18] sm:$0xff]  }
  0x55   : > { %16723 = vmatprep.subr.bf16.mxu0 %v18841_v59  ;;  %v4429_v50 = vrot.slane %v18875_v38, 2 }
  0x56   : > { %16444 = vmatmul.mubr.bf16.gmra.mrb[20].mxu1 %v18827_v55  ;;  %v1539_v55 = vshrl.u32 %v18855_v33, 16  ;;  %v18878_v33 = vld [vmem:[%s24021_s1 + $0xa0] sm:$0xff]  }
  0x57   : > { %16688 = vmatmul.mubr.bf16.gmra.mrb[4].mxu0 %v3902_v61  ;;  %16447 = vmatprep.mubr.bf16.mxu1 %v18831_v57  ;;  %v1547_v57 = vshrl.u32 %v18857_v44, 16  ;;  %v18862_v61 = vld [vmem:[%s19272_s9 + $0x80] sm:$0xff]  }
  0x58   : > { %16691 = vmatprep.mubr.bf16.mxu0 %v3904_v63  ;;  %16724 = vmatpush3.bf16.msra.mxu0 %v18841_v59  ;;  %v3918_v59 = vsel %vm24035_vm1, %v3915_v32, %v3917_v48  ;;  %v3920_v63 = vsel %vm24035_vm1, %v3917_v48, %v3919_v52  ;;  %v1541_v3 = vor.u32 %v1539_v55, %v1537_v51  ;;  %v18870_v32 = vld [vmem:[%s19272_s9 + $0x98] ss:$0 sps:$4 sm:$0x33]   ;;  %v1585_v48 = vrot.slane %v1583_v37, 1 }
  0x59   : > { %16725 = vmatprep.subr.bf16.mxu0 %v18847_v2  ;;  %v3929_v47 = vrot.slane %v18870_v32, 2  ;;  %v18879_v51 = vld [vmem:[%s19272_s9 + $0x58] sm:$0xff]  }
  0x5c   : > { %16726 = vmatpush3.bf16.msra.mxu0 %v18847_v2  ;;  %v18863_v2 = vld [vmem:[%s19272_s9 + $0x30] sm:$0xff]  }
  0x5d   : > { %16727 = vmatprep.subr.bf16.mxu0 %v18854_v15  ;;  %v1559_v12 = vshll.u32 %v18863_v2, 16  ;;  %v1563_v14 = vshrl.u32 %v18863_v2, 16 }
  0x5e   : > { %16448 = vmatmul.mubr.bf16.gmra.mrb[24].mxu1 %v18833_v4  ;;  %v3921_v4 = vrot.slane %v18858_v56, 2  ;;  %v1587_v56 = vshrl.u32 %v19460_v23, 16  ;;  %v18889_v23 = vld [vmem:[%s24021_s1 + $0x1c8] sm:$0xff]  }
  0x5f   : > { %16692 = vmatmul.mubr.bf16.gmra.mrb[8].mxu0 %v3906_v7  ;;  %16451 = vmatprep.mubr.bf16.mxu1 %v18837_v5  ;;  %v1549_v5 = vor.u32 %v1547_v57, %v1545_v1  ;;  %v3923_v7 = vrot.slane %v18862_v61, 2  ;;  %v1561_v22 = vrot.slane %v1559_v12, 1  ;;  %v18877_v57 = vld [vmem:[%s19272_s9 + $0x20] sm:$0xff]   ;;  %v1599_v61 = vshll.u32 %v18879_v51, 16  ;;  %v19503_v12 = vld [vmem:[%s19272_s9 + $0x38] sm:$0xff]  }
  0x60   : > { %16695 = vmatprep.mubr.bf16.mxu0 %v3908_v10  ;;  %16728 = vmatpush3.bf16.msra.mxu0 %v18854_v15  ;;  %v1555_v10 = vshrl.u32 %v18861_v49, 16  ;;  %v18868_v15 = vld [vmem:[%s19272_s9 + $0x90] sm:$0xff]   ;;  %v3922_v16 = vsel %vm24035_vm1, %v3919_v52, %v3921_v4 }
  0x61   : > { %16729 = vmatprep.subr.bf16.mxu0 %v18860_v26  ;;  %v3924_v20 = vsel %vm24035_vm1, %v3921_v4, %v3923_v7  ;;  %v1565_v27 = vor.u32 %v1563_v14, %v1561_v22  ;;  %v3927_v29 = vrot.slane %v18868_v15, 2  ;;  %v1589_v4 = vor.u32 %v1587_v56, %v1585_v48  ;;  %v18887_v15 = vld [vmem:[%s19272_s9 + $0x70] sm:$0xff]   ;;  %v18908_v56 = vld [vmem:[%s24021_s1 + $0x1e0] sm:$0xff]  }
  0x62   : > { %v1557_v25 = vor.u32 %v1555_v10, %v1553_v6  ;;  %v1603_v14 = vshrl.u32 %v18879_v51, 16  ;;  %v18899_v51 = vld [vmem:[%s19272_s9 + $0x90] ss:$0 sps:$4 sm:$0x11]  }
  0x64   : > { %16730 = vmatpush3.bf16.msra.mxu0 %v18860_v26  ;;  %v3925_v26 = vrot.slane %v18864_v13, 2  ;;  %v1562_v36 = vsel %vm24039_vm2, %v1557_v25, %v1561_v22  ;;  %v4437_v22 = vrot.slane %v19503_v12, 2 }
  0x65   : > { %16731 = vmatprep.subr.bf16.mxu0 %v18866_v45 }
  0x66   : > { %16452 = vmatmul.mubr.bf16.gmra.mrb[28].mxu1 %v18839_v17  ;;  %v1554_v17 = vsel %vm24039_vm2, %v1549_v5, %v1553_v6  ;;  %v3928_v42 = vsel %vm24035_vm1, %v3925_v26, %v3927_v29  ;;  %v4431_v5 = vrot.slane %v18877_v57, 2 }
  0x67   : > { %16696 = vmatmul.mubr.bf16.gmra.mrb[12].mxu0 %v3910_v21  ;;  %16455 = vmatprep.mubr.bf16.mxu1 %v18842_v18  ;;  %v1567_v18 = vshll.u32 %v18867_v9, 16  ;;  %v18871_v21 = vld [vmem:[%s24021_s1 + $0x98] sm:$0xff]   ;;  %v18882_v9 = vld [vmem:[%s19272_s9 + $0x30] sm:$0xff]  }
  0x68   : > { %16699 = vmatprep.mubr.bf16.mxu0 %v3912_v24  ;;  %16732 = vmatpush3.bf16.msra.mxu0 %v18866_v45  ;;  %v19465_v24 = vld [vmem:[%s24021_s1 + $0x1c0] sm:$0xff]   ;;  %v18876_v45 = vld [vmem:[%s19272_s9 + $0x50] sm:$0xff]  }
  0x69   : > { %16733 = vmatprep.subr.bf16.mxu0 %v18872_v58  ;;  %v1569_v28 = vrot.slane %v1567_v18, 1  ;;  %v1595_v60 = vshrl.u32 %v18876_v45, 16 }
  0x6b   : > { %v1573_v46 = vor.u32 %v1571_v30, %v1569_v28  ;;  %v18891_v30 = vld [vmem:[%s19272_s9 + $0x78] sm:$0xff]  }
  0x6c   : > { %16734 = vmatpush3.bf16.msra.mxu0 %v18872_v58  ;;  %v3930_v58 = vsel %vm24035_vm1, %v3927_v29, %v3929_v47  ;;  %v18888_v29 = vld [vmem:[%s19272_s9 + $0x40] sm:$0xff]  }
  0x6d   : > { %16771 = vmatprep.subr.bf16.mxu0 %v19465_v24 }
  0x6e   : > { %16456 = vmatmul.mubr.bf16.gmra.mrb[32].mxu1 %v18845_v34  ;;  %v1575_v34 = vshll.u32 %v18869_v19, 16 }
  0x6f   : > { %16700 = vmatmul.mubr.bf16.gmra.mrb[16].mxu0 %v3914_v39  ;;  %16475 = vmatprep.mubr.bf16.mxu1 %v1522_v40  ;;  %v3926_v39 = vsel %vm24035_vm1, %v3923_v7, %v3925_v26  ;;  %v1570_v40 = vsel %vm24039_vm2, %v1565_v27, %v1569_v28  ;;  %v1601_v7 = vrot.slane %v1599_v61, 1  ;;  %v19518_v26 = vld [vmem:[%s24021_s1 + $0xc0] sm:$0xff]   ;;  %v1623_v28 = vshll.u32 %v18887_v15, 16 }
  0x70   : > { %16703 = vmatprep.mubr.bf16.mxu0 %v3916_v41  ;;  %v18874_v41 = vld [vmem:[%s19272_s9 + $0x10] sm:$0xfc]   ;;  %v1577_v44 = vrot.slane %v1575_v34, 1  ;;  %v19557_v61 = vld [vmem:[%s19272_s9 + $0x60] sm:$0xff]  }
  0x71   : > { %v4428_v52 = vrot.slane %v18874_v41, 2  ;;  %v1605_v27 = vor.u32 %v1603_v14, %v1601_v7  ;;  %v18895_v34 = vld [vmem:[%s24021_s1 + $0x1d0] sm:$0xff]   ;;  %v1625_v38 = vrot.slane %v1623_v28, 1  ;;  %v1631_v41 = vshll.u32 %v18891_v30, 16  ;;  %v19582_v14 = vld [vmem:[%s19272_s9 + $0x18] sm:$0xff]  }
  0x72   : > { %v1581_v49 = vor.u32 %v1579_v35, %v1577_v44  ;;  %v1578_v55 = vsel %vm24039_vm2, %v1573_v46, %v1577_v44  ;;  %v1627_v35 = vshrl.u32 %v18887_v15, 16  ;;  %v4439_v44 = vrot.slane %v18888_v29, 2  ;;  %v19585_v15 = vld [vmem:[%s19272_s9 + $0x78] sm:$0xff]   ;;  %v19605_v29 = vld [vmem:[%s19272_s9 + $0x88] sm:$0xff]  }
  0x73   : > { %v1635_v46 = vshrl.u32 %v18891_v30, 16 }
  0x76   : > { %16476 = vmatmul.mubr.bf16.vlgmr.msra.gmra.mrb[0].mxu1 %v1530_v54  ;;  %v1591_v54 = vshll.u32 %v18876_v45, 16  ;;  %v18901_v45 = vld [vmem:[%s24021_s1 + $0x1d8] sm:$0xff]  }
  0x77   : > { %16704 = vmatmul.mubr.bf16.gmra.mrb[20].mxu0 %v3918_v59  ;;  %16512 = vmatpush3.bf16.msra.mxu1 %v19402_v11  ;;  %v1546_v11 = vsel %vm24039_vm2, %v1541_v3, %v1545_v1  ;;  %v1586_v59 = vsel %vm24039_vm2, %v1581_v49, %v1585_v48  ;;  %v18897_v1 = vld [vmem:[%s24021_s1 + $0xb8] sm:$0xff]   ;;  %v19499_v3 = vld [vmem:[%s19272_s9 + $0x68] sm:$0xff]  }
  0x78   : > { %16479 = vmatprep.mubr.bf16.mxu1 %v1538_v62  ;;  %16707 = vmatprep.mubr.bf16.mxu0 %v3920_v63  ;;  %v18880_v62 = vld [vmem:[%s19272_s9 + $0x28] sm:$0xff]   ;;  %v18881_v63 = vld [vmem:[%s19272_s9 + $0x60] sm:$0xff]   ;;  %v1593_v2 = vrot.slane %v1591_v54, 1  ;;  %v1615_v13 = vshll.u32 %v19499_v3, 16 }
  0x79   : > { %16513 = vmatprep.subr.bf16.mxu1 %v18859_v0  ;;  %v1607_v10 = vshll.u32 %v18881_v63, 16  ;;  %v1611_v18 = vshrl.u32 %v18881_v63, 16 }
  0x7a   : > { %v1597_v6 = vor.u32 %v1595_v60, %v1593_v2  ;;  %v1617_v25 = vrot.slane %v1615_v13, 1  ;;  %v19578_v13 = vld [vmem:[%s19272_s9 + $0x70] sm:$0xff]  }
  0x7b   : > { %16514 = vmatpush3.bf16.msra.mxu1 %v18859_v0  ;;  %v4430_v0 = vsel %vm24035_vm1, %v4428_v52, %v4429_v50  ;;  %v1629_v52 = vor.u32 %v1627_v35, %v1625_v38  ;;  %v19614_v35 = vld [vmem:[%s19272_s9 + $0x30] sm:$0xff]  }
  0x7c   : > { %16515 = vmatprep.subr.bf16.mxu1 %v18865_v8 }
  0x7e   : > { %16480 = vmatmul.mubr.bf16.gmra.mrb[4].mxu1 %v1546_v11  ;;  %v1594_v11 = vsel %vm24039_vm2, %v1589_v4, %v1593_v2  ;;  %v19567_v4 = vld [vmem:[%s19272_s9 + $0x68] sm:$0xff]  }
  0x7f   : > { %16708 = vmatmul.mubr.bf16.gmra.mrb[24].mxu0 %v3922_v16  ;;  %16483 = vmatprep.mubr.bf16.mxu1 %v1554_v17  ;;  %v4432_v16 = vsel %vm24035_vm1, %v4429_v50, %v4431_v5  ;;  %v1602_v17 = vsel %vm24039_vm2, %v1597_v6, %v1601_v7  ;;  %v19544_v50 = vld [vmem:[%s19272_s9 + $0x88] sm:$0xff]   ;;  %v18902_v6 = vld [vmem:[%s19272_s9] sm:$0xfe]  }
  0x80   : > { %16711 = vmatprep.mubr.bf16.mxu0 %v3924_v20  ;;  %16516 = vmatpush3.bf16.msra.mxu1 %v18865_v8  ;;  %v4433_v8 = vrot.slane %v18880_v62, 2  ;;  %v1609_v20 = vrot.slane %v1607_v10, 1  ;;  %v1647_v60 = vshll.u32 %v19544_v50, 16  ;;  %v4440_v62 = vsel %vm24035_vm1, %v4437_v22, %v4439_v44 }
  0x81   : > { %16517 = vmatprep.subr.bf16.mxu1 %v18871_v21  ;;  %v2157_v28 = vrot.slane %v18902_v6, 1  ;;  %v19664_v6 = vld [vmem:[%s24021_s1 + $0x200] sm:$0xff]  }
  0x82   : > { %v4434_v19 = vsel %vm24035_vm1, %v4431_v5, %v4433_v8  ;;  %v1613_v32 = vor.u32 %v1611_v18, %v1609_v20  ;;  %v1610_v37 = vsel %vm24039_vm2, %v1605_v27, %v1609_v20  ;;  %v18914_v5 = vld [vmem:[%s24021_s1 + $0x1e8] sm:$0xff]   ;;  %v1649_v12 = vrot.slane %v1647_v60, 1  ;;  %v19595_v20 = vld [vmem:[%s19272_s9 + $0x80] sm:$0xff]  }
  0x83   : > { %v19655_v60 = vld [vmem:[%s19272_s9 + $0x48] sm:$0xff]  }
  0x84   : > { %16518 = vmatpush3.bf16.msra.mxu1 %v18871_v21  ;;  %v4435_v21 = vrot.slane %v18882_v9, 2  ;;  %v19575_v9 = vld [vmem:[%s19272_s9 + $0x10] sm:$0xff]  }
  0x85   : > { %16519 = vmatprep.subr.bf16.mxu1 %v18878_v33 }
  0x86   : > { %16484 = vmatmul.mubr.bf16.gmra.mrb[8].mxu1 %v1562_v36  ;;  %v18893_v36 = vld [vmem:[%s19272_s9 + $0x80] sm:$0xff]  }
  0x87   : > { %16712 = vmatmul.mubr.bf16.gmra.mrb[28].mxu0 %v3926_v39  ;;  %16487 = vmatprep.mubr.bf16.mxu1 %v1570_v40  ;;  %v19531_v39 = vld [vmem:[%s19272_s9 + $0x48] sm:$0xff]   ;;  %v4436_v40 = vsel %vm24035_vm1, %v4433_v8, %v4435_v21  ;;  %v1639_v47 = vshll.u32 %v18893_v36, 16 }
  0x88   : > { %16715 = vmatprep.mubr.bf16.mxu0 %v3928_v42  ;;  %16520 = vmatpush3.bf16.msra.mxu1 %v18878_v33  ;;  %v1619_v33 = vshrl.u32 %v19499_v3, 16  ;;  %v19536_v42 = vld [vmem:[%s19272_s9 + $0x50] sm:$0xff]   ;;  %v4441_v49 = vrot.slane %v19531_v39, 2  ;;  %v1655_v3 = vshll.u32 %v18899_v51, 16 }
  0x89   : > { %16521 = vmatprep.subr.bf16.mxu1 %v18884_v43  ;;  %v4443_v54 = vrot.slane %v19536_v42, 2  ;;  %v1641_v57 = vrot.slane %v1639_v47, 1  ;;  %v19619_v39 = vld [vmem:[%s19272_s9 + $0x90] sm:$0xff]   ;;  %v19636_v47 = vld [vmem:[%s19272_s9 + $0xa0] ss:$0 sps:$4 sm:$0x33]  }
  0x8a   : > { %v1621_v48 = vor.u32 %v1619_v33, %v1617_v25  ;;  %v4442_v2 = vsel %vm24035_vm1, %v4439_v44, %v4441_v49  ;;  %v18926_v33 = vld [vmem:[%s24021_s1 + $0x1f8] sm:$0xff]   ;;  %v4457_v44 = vrot.slane %v19605_v29, 2  ;;  %v18928_v51 = vld [vmem:[%s19272_s9 + $0x10] sm:$0xfc]  }
  0x8c   : > { %16522 = vmatpush3.bf16.msra.mxu1 %v18884_v43  ;;  %v4438_v43 = vsel %vm24035_vm1, %v4435_v21, %v4437_v22  ;;  %v4449_v22 = vrot.slane %v19567_v4, 2 }
  0x8d   : > { %16523 = vmatprep.subr.bf16.mxu1 %v18890_v53 }
  0x8e   : > { %16488 = vmatmul.mubr.bf16.gmra.mrb[12].mxu1 %v1578_v55  ;;  %v1643_v55 = vshrl.u32 %v18893_v36, 16 }
  0x8f   : > { %16716 = vmatmul.mubr.bf16.gmra.mrb[32].mxu0 %v3930_v58  ;;  %16491 = vmatprep.mubr.bf16.mxu1 %v1586_v59  ;;  %v19552_v58 = vld [vmem:[%s19272_s9 + $0x58] sm:$0xff]   ;;  %v1626_v59 = vsel %vm24039_vm2, %v1621_v48, %v1625_v38  ;;  %v4453_v38 = vrot.slane %v19585_v15, 2 }
  0x90   : > { %16735 = vmatprep.mubr.bf16.mxu0 %v4430_v0  ;;  %16524 = vmatpush3.bf16.msra.mxu1 %v18890_v53  ;;  %v1633_v53 = vrot.slane %v1631_v41, 1  ;;  %v1651_v0 = vshrl.u32 %v19544_v50, 16  ;;  %v4445_v8 = vrot.slane %v19552_v58, 2  ;;  %v1645_v10 = vor.u32 %v1643_v55, %v1641_v57  ;;  %v18929_v55 = vld [vmem:[%s19272_s9 + $0x18] sm:$0xff]   ;;  %v18931_v58 = vld [vmem:[%s19272_s9 + $0x20] sm:$0xff]  }
  0x91   : > { %16525 = vmatprep.subr.bf16.mxu1 %v18897_v1  ;;  %v4455_v41 = vrot.slane %v19595_v20, 2  ;;  %v18932_v20 = vld [vmem:[%s24021_s1 + $0xe0] sm:$0xff]  }
  0x92   : > { %v1634_v63 = vsel %vm24039_vm2, %v1629_v52, %v1633_v53  ;;  %v1637_v7 = vor.u32 %v1635_v46, %v1633_v53  ;;  %v1650_v27 = vsel %vm24039_vm2, %v1645_v10, %v1649_v12  ;;  %v4446_v30 = vsel %vm24035_vm1, %v4443_v54, %v4445_v8 }
  0x93   : > { %v1653_v36 = vor.u32 %v1651_v0, %v1649_v12  ;;  %v2168_v46 = vrot.slane %v19614_v35, 1  ;;  %v18934_v0 = vld [vmem:[%s19272_s9 + $0x28] sm:$0xff]  }
  0x94   : > { %16526 = vmatpush3.bf16.msra.mxu1 %v18897_v1  ;;  %v19563_v1 = vld [vmem:[%s19272_s9 + $0x8] sm:$0xff]   ;;  %v1642_v21 = vsel %vm24039_vm2, %v1637_v7, %v1641_v57  ;;  %v4984_v7 = vshll.u32 %v18931_v58, 16 }
  0x95   : > { %16563 = vmatprep.subr.bf16.mxu1 %v19518_v26  ;;  %v2158_v18 = vrot.slane %v19563_v1, 1  ;;  %v18913_v12 = vld [vmem:[%s24021_s1 + $0xc8] sm:$0xff]  }
  0x96   : > { %16492 = vmatmul.mubr.bf16.gmra.mrb[16].mxu1 %v1594_v11  ;;  %v4447_v11 = vrot.slane %v19557_v61, 2  ;;  %v4964_v61 = vshrl.u32 %v18928_v51, 16 }
  0x97   : > { %16736 = vmatmul.mubr.bf16.vlgmr.msra.gmra.mrb[0].mxu0 %v4432_v16  ;;  %16495 = vmatprep.mubr.bf16.mxu1 %v1602_v17  ;;  %v18920_v16 = vld [vmem:[%s24021_s1 + $0x1f0] sm:$0xff]   ;;  %v1657_v17 = vrot.slane %v1655_v3, 1  ;;  %v2159_v53 = vsel %vm24038_vm3, %v2157_v28, %v2158_v18  ;;  %v4975_v3 = vshll.u32 %v18929_v55, 16 }
  0x98   : > { %16739 = vmatprep.mubr.bf16.mxu0 %v4434_v19  ;;  %16772 = vmatpush3.bf16.msra.mxu0 %v19465_v24  ;;  %v1618_v24 = vsel %vm24039_vm2, %v1613_v32, %v1617_v25  ;;  %v19592_v19 = vld [vmem:[%s19272_s9 + $0x20] sm:$0xff]   ;;  %v4444_v25 = vsel %vm24035_vm1, %v4441_v49, %v4443_v54  ;;  %v2160_v32 = vrot.slane %v19575_v9, 1  ;;  %v4459_v49 = vrot.slane %v19619_v39, 2  ;;  %v18919_v28 = vld [vmem:[%s24021_s1 + $0xd0] sm:$0xff]  }
  0x99   : > { %16773 = vmatprep.subr.bf16.mxu0 %v18889_v23  ;;  %v1658_v48 = vsel %vm24039_vm2, %v1653_v36, %v1657_v17  ;;  %v4448_v52 = vsel %vm24035_vm1, %v4445_v8, %v4447_v11  ;;  %v19667_v8 = vld [vmem:[%s19272_s9 + $0x58] sm:$0xff]   ;;  %v19708_v9 = vrot.slane %v4984_v7, 3 }
  0x9a   : > { %v2161_v10 = vsel %vm24038_vm3, %v2158_v18, %v2160_v32  ;;  %v4990_v18 = vshrl.u32 %v18934_v0, 16  ;;  %v18940_v36 = vld [vmem:[%s19272_s9 + $0x38] sm:$0xff]  }
  0x9c   : > { %16774 = vmatpush3.bf16.msra.mxu0 %v18889_v23  ;;  %v19600_v23 = vld [vmem:[%s19272_s9 + $0x28] sm:$0xff]  }
  0x9d   : > { %16775 = vmatprep.subr.bf16.mxu0 %v18895_v34  ;;  %v2166_v42 = vrot.slane %v19600_v23, 1 }
  0x9e   : > { %16496 = vmatmul.mubr.bf16.gmra.mrb[20].mxu1 %v1610_v37  ;;  %v2162_v37 = vrot.slane %v19582_v14, 1 }
  0x9f   : > { %16740 = vmatmul.mubr.bf16.gmra.mrb[4].mxu0 %v4436_v40  ;;  %16499 = vmatprep.mubr.bf16.mxu1 %v1618_v24  ;;  %v19622_v40 = vld [vmem:[%s19272_s9 + $0x38] sm:$0xff]   ;;  %v2164_v24 = vrot.slane %v19592_v19, 1 }
  0xa0   : > { %16743 = vmatprep.mubr.bf16.mxu0 %v4438_v43  ;;  %16776 = vmatpush3.bf16.msra.mxu0 %v18895_v34  ;;  %v4451_v34 = vrot.slane %v19578_v13, 2  ;;  %v19628_v43 = vld [vmem:[%s19272_s9 + $0x98] sm:$0xff]   ;;  %v2170_v50 = vrot.slane %v19622_v40, 1  ;;  %v2174_v13 = vrot.slane %v19655_v60, 1 }
  0xa1   : > { %16777 = vmatprep.subr.bf16.mxu0 %v18901_v45  ;;  %v4461_v54 = vrot.slane %v19628_v43, 2  ;;  %v2167_v14 = vsel %vm24038_vm3, %v2164_v24, %v2166_v42 }
  0xa2   : > { %v4454_v4 = vsel %vm24035_vm1, %v4451_v34, %v4453_v38  ;;  %v2171_v23 = vsel %vm24038_vm3, %v2168_v46, %v2170_v50 }
  0xa4   : > { %16778 = vmatpush3.bf16.msra.mxu0 %v18901_v45  ;;  %v19632_v45 = vld [vmem:[%s19272_s9 + $0x40] sm:$0xff]  }
  0xa5   : > { %16779 = vmatprep.subr.bf16.mxu0 %v18908_v56  ;;  %v2172_v57 = vrot.slane %v19632_v45, 1 }
  0xa6   : > { %16500 = vmatmul.mubr.bf16.gmra.mrb[24].mxu1 %v1626_v59  ;;  %v4463_v59 = vrot.slane %v19636_v47, 2 }
  0xa7   : > { %16744 = vmatmul.mubr.bf16.gmra.mrb[8].mxu0 %v4440_v62  ;;  %16503 = vmatprep.mubr.bf16.mxu1 %v1634_v63  ;;  %v19658_v62 = vld [vmem:[%s19272_s9 + $0x50] sm:$0xff]   ;;  %v4967_v63 = vshll.u32 %v18928_v51, 16  ;;  %v2175_v40 = vsel %vm24038_vm3, %v2172_v57, %v2174_v13 }
  0xa8   : > { %16747 = vmatprep.mubr.bf16.mxu0 %v4442_v2  ;;  %16780 = vmatpush3.bf16.msra.mxu0 %v18908_v56  ;;  %v4450_v56 = vsel %vm24035_vm1, %v4447_v11, %v4449_v22  ;;  %v4972_v2 = vshrl.u32 %v18929_v55, 16  ;;  %v19678_v11 = vrot.slane %v4964_v61, 2  ;;  %v2176_v1 = vrot.slane %v19658_v62, 1  ;;  %v19717_v55 = vld [vmem:[%s19272_s9 + $0x68] sm:$0xff]  }
  0xa9   : > { %16781 = vmatprep.subr.bf16.mxu0 %v18914_v5  ;;  %v19684_v17 = vrot.slane %v4967_v63, 3  ;;  %v5008_v61 = vshrl.u32 %v18940_v36, 16  ;;  %v19729_v63 = vld [vmem:[%s19272_s9 + $0x70] sm:$0xff]   ;;  %v18968_v62 = vld [vmem:[%s19272_s9 + $0x88] sm:$0xff]  }
  0xac   : > { %16782 = vmatpush3.bf16.msra.mxu0 %v18914_v5  ;;  %v4981_v5 = vshrl.u32 %v18931_v58, 16  ;;  %v18925_v58 = vld [vmem:[%s24021_s1 + $0xd8] sm:$0xff]  }
  0xad   : > { %16783 = vmatprep.subr.bf16.mxu0 %v18920_v16 }
  0xae   : > { %16504 = vmatmul.mubr.bf16.gmra.mrb[28].mxu1 %v1642_v21  ;;  %v19688_v21 = vld [vmem:[%s19272_s9 + $0x60] sm:$0xff]  }
  0xaf   : > { %16748 = vmatmul.mubr.bf16.gmra.mrb[12].mxu0 %v4444_v25  ;;  %16507 = vmatprep.mubr.bf16.mxu1 %v1650_v27  ;;  %v2163_v25 = vsel %vm24038_vm3, %v2160_v32, %v2162_v37  ;;  %v19698_v27 = vrot.slane %v4972_v2, 2  ;;  %v2178_v32 = vrot.slane %v19667_v8, 1  ;;  %v2180_v51 = vrot.slane %v19688_v21, 1  ;;  %v18975_v21 = vld [vmem:[%s19272_s9 + $0xa0] ss:$0 sps:$4 sm:$0x77]  }
  0xb0   : > { %16751 = vmatprep.mubr.bf16.mxu0 %v4446_v30  ;;  %16784 = vmatpush3.bf16.msra.mxu0 %v18920_v16  ;;  %v4452_v16 = vsel %vm24035_vm1, %v4449_v22, %v4451_v34  ;;  %v18936_v22 = vld [vmem:[%s19272_s9 + $0x30] sm:$0xff]   ;;  %v19704_v30 = vrot.slane %v4975_v3, 3  ;;  %v4993_v34 = vshll.u32 %v18934_v0, 16  ;;  %v4456_v0 = vsel %vm24035_vm1, %v4453_v38, %v4455_v41  ;;  %v18946_v3 = vld [vmem:[%s19272_s9 + $0x48] sm:$0xff]  }
  0xb1   : > { %16785 = vmatprep.subr.bf16.mxu0 %v18926_v33  ;;  %v5011_v2 = vshll.u32 %v18940_v36, 16  ;;  %v18948_v36 = vld [vmem:[%s19272_s9 + $0x50] sm:$0xff]   ;;  %v2179_v60 = vsel %vm24038_vm3, %v2176_v1, %v2178_v32 }
  0xb2   : > { %v19747_v15 = vrot.slane %v4993_v34, 3  ;;  %v5035_v35 = vshrl.u32 %v18948_v36, 16 }
  0xb4   : > { %16786 = vmatpush3.bf16.msra.mxu0 %v18926_v33  ;;  %v19706_v33 = vrot.slane %v4981_v5, 2 }
  0xb5   : > { %16823 = vmatprep.subr.bf16.mxu0 %v19664_v6 }
  0xb6   : > { %16508 = vmatmul.mubr.bf16.gmra.mrb[32].mxu1 %v1658_v48  ;;  %v19713_v48 = vrot.slane %v4990_v18, 2  ;;  %v19766_v18 = vrot.slane %v5011_v2, 3 }
  0xb7   : > { %16752 = vmatmul.mubr.bf16.gmra.mrb[16].mxu0 %v4448_v52  ;;  %16527 = vmatprep.mubr.bf16.mxu1 %v2159_v53  ;;  %v4999_v52 = vshrl.u32 %v18936_v22, 16  ;;  %v5002_v53 = vshll.u32 %v18936_v22, 16  ;;  %v5029_v22 = vshll.u32 %v18946_v3, 16 }
  0xb8   : > { %16755 = vmatprep.mubr.bf16.mxu0 %v4450_v56  ;;  %v18942_v56 = vld [vmem:[%s19272_s9 + $0x40] sm:$0xff]  }
  0xb9   : > { %v19749_v38 = vrot.slane %v4999_v52, 2  ;;  %v19751_v5 = vrot.slane %v5002_v53, 3  ;;  %v5017_v19 = vshrl.u32 %v18942_v56, 16  ;;  %v5020_v7 = vshll.u32 %v18942_v56, 16 }
  0xba   : > { %v2169_v52 = vsel %vm24038_vm3, %v2166_v42, %v2168_v46  ;;  %v19805_v29 = vrot.slane %v5029_v22, 3  ;;  %v5038_v46 = vshll.u32 %v18948_v36, 16  ;;  %v18958_v36 = vld [vmem:[%s19272_s9 + $0x68] sm:$0xff]  }
  0xbb   : > { %v19770_v34 = vrot.slane %v5020_v7, 3  ;;  %v4970_v7 = vor.u32 %v19684_v17, %v19678_v11  ;;  %v2173_v11 = vsel %vm24038_vm3, %v2170_v50, %v2172_v57  ;;  %v4464_v17 = vsel %vm24035_vm1, %v4461_v54, %v4463_v59 }
  0xbc   : > { %v5062_v50 = vshrl.u32 %v18958_v36, 16  ;;  %v5065_v57 = vshll.u32 %v18958_v36, 16 }
  0xbe   : > { %16528 = vmatmul.mubr.bf16.vlgmr.msra.gmra.mrb[0].mxu1 %v2161_v10  ;;  %v2184_v10 = vrot.slane %v19729_v63, 1  ;;  %v20068_v63 = vld [vmem:[%s19272_s9 + $0x80] sm:$0xff]  }
  0xbf   : > { %16756 = vmatmul.mubr.bf16.gmra.mrb[20].mxu0 %v4452_v16  ;;  %16564 = vmatpush3.bf16.msra.mxu1 %v19518_v26  ;;  %v2165_v26 = vsel %vm24038_vm3, %v2162_v37, %v2164_v24  ;;  %v4458_v37 = vsel %vm24035_vm1, %v4455_v41, %v4457_v44  ;;  %v2182_v24 = vrot.slane %v19717_v55, 1  ;;  %v19757_v41 = vrot.slane %v5008_v61, 2  ;;  %v19764_v16 = vld [vmem:[%s19272_s9 + $0x80] sm:$0xff]   ;;  %v18952_v61 = vld [vmem:[%s19272_s9 + $0x58] sm:$0xff]  }
  0xc0   : > { %16531 = vmatprep.mubr.bf16.mxu1 %v2163_v25  ;;  %16759 = vmatprep.mubr.bf16.mxu0 %v4454_v4  ;;  %v5026_v25 = vshrl.u32 %v18946_v3, 16  ;;  %v19768_v4 = vrot.slane %v5017_v19, 2  ;;  %v2188_v56 = vrot.slane %v19764_v16, 1  ;;  %v5047_v2 = vshll.u32 %v18952_v61, 16  ;;  %v19815_v19 = vld [vmem:[%s19272_s9 + $0x8] sm:$0xfe]  }
  0xc1   : > { %16565 = vmatprep.subr.bf16.mxu1 %v18913_v12  ;;  %v20072_v16 = vld [vmem:[%s19272_s9 + $0x48] sm:$0xff]  }
  0xc2   : > { %v19797_v42 = vrot.slane %v5026_v25, 2  ;;  %v4978_v25 = vor.u32 %v19704_v30, %v19698_v27  ;;  %v18951_v27 = vld [vmem:[%s24021_s1 + $0xf8] sm:$0xff]   ;;  %v19851_v47 = vrot.slane %v5047_v2, 3 }
  0xc3   : > { %16566 = vmatpush3.bf16.msra.mxu1 %v18913_v12  ;;  %v19761_v12 = vld [vmem:[%s19272_s9 + $0x78] sm:$0xff]  }
  0xc4   : > { %16567 = vmatprep.subr.bf16.mxu1 %v18919_v28  ;;  %v2186_v53 = vrot.slane %v19761_v12, 1  ;;  %v4979_v59 = vsel %vm24036_vm4, %v4970_v7, %v4978_v25  ;;  %v19870_v7 = vld [vmem:[%s19272_s9 + $0x20] sm:$0xff]  }
  0xc6   : > { %16532 = vmatmul.mubr.bf16.gmra.mrb[4].mxu1 %v2165_v26  ;;  %v19784_v26 = vld [vmem:[%s19272_s9 + $0x88] sm:$0xff]   ;;  %v2187_v55 = vsel %vm24038_vm3, %v2184_v10, %v2186_v53 }
  0xc7   : > { %16760 = vmatmul.mubr.bf16.gmra.mrb[24].mxu0 %v4456_v0  ;;  %16535 = vmatprep.mubr.bf16.mxu1 %v2167_v14  ;;  %v4460_v0 = vsel %vm24035_vm1, %v4457_v44, %v4459_v49  ;;  %v18954_v14 = vld [vmem:[%s19272_s9 + $0x60] sm:$0xff]   ;;  %v19808_v44 = vld [vmem:[%s19272_s9 + $0x90] ss:$0 sps:$4 sm:$0x11]   ;;  %v2190_v39 = vrot.slane %v19784_v26, 1 }
  0xc8   : > { %16763 = vmatprep.mubr.bf16.mxu0 %v4458_v37  ;;  %16568 = vmatpush3.bf16.msra.mxu1 %v18919_v28  ;;  %v18938_v28 = vld [vmem:[%s24021_s1 + $0xe8] sm:$0xff]   ;;  %v4462_v37 = vsel %vm24035_vm1, %v4459_v49, %v4461_v54  ;;  %v5044_v49 = vshrl.u32 %v18952_v61, 16  ;;  %v5053_v3 = vshrl.u32 %v18954_v14, 16  ;;  %v5056_v22 = vshll.u32 %v18954_v14, 16  ;;  %v19856_v54 = vld [vmem:[%s19272_s9 + $0x18] sm:$0xff]   ;;  %v20111_v26 = vld [vmem:[%s19272_s9 + $0x60] sm:$0xff]  }
  0xc9   : > { %16569 = vmatprep.subr.bf16.mxu1 %v18925_v58  ;;  %v2192_v61 = vrot.slane %v19808_v44, 1  ;;  %v2191_v12 = vsel %vm24038_vm3, %v2188_v56, %v2190_v39 }
  0xca   : > { %v19843_v30 = vrot.slane %v5044_v49, 2  ;;  %v19853_v43 = vrot.slane %v5053_v3, 2  ;;  %v19859_v14 = vrot.slane %v5056_v22, 3  ;;  %v19866_v49 = vrot.slane %v5062_v50, 2 }
  0xcb   : > { %v4996_v22 = vor.u32 %v19747_v15, %v19713_v48  ;;  %v19888_v15 = vld [vmem:[%s19272_s9 + $0x28] sm:$0xff]  }
  0xcc   : > { %16570 = vmatpush3.bf16.msra.mxu1 %v18925_v58  ;;  %v18944_v58 = vld [vmem:[%s24021_s1 + $0xf0] sm:$0xff]  }
  0xcd   : > { %16571 = vmatprep.subr.bf16.mxu1 %v18932_v20 }
  0xce   : > { %16536 = vmatmul.mubr.bf16.gmra.mrb[8].mxu1 %v2169_v52  ;;  %v19822_v52 = vrot.slane %v5035_v35, 2  ;;  %v18963_v35 = vld [vmem:[%s19272_s9 + $0x78] sm:$0xff]  }
  0xcf   : > { %16764 = vmatmul.mubr.bf16.gmra.mrb[28].mxu0 %v4460_v0  ;;  %16539 = vmatprep.mubr.bf16.mxu1 %v2171_v23  ;;  %v19824_v0 = vrot.slane %v5038_v46, 3  ;;  %v19827_v23 = vld [vmem:[%s19272_s9 + $0x10] sm:$0xff]   ;;  %v4987_v46 = vor.u32 %v19708_v9, %v19706_v33  ;;  %v5080_v36 = vshrl.u32 %v18963_v35, 16  ;;  %v2177_v33 = vsel %vm24038_vm3, %v2174_v13, %v2176_v1  ;;  %v18943_v9 = vld [vmem:[%s24021_s1 + $0x208] sm:$0xff]   ;;  %v19913_v1 = vld [vmem:[%s19272_s9 + $0x38] sm:$0xff]  }
  0xd0   : > { %16767 = vmatprep.mubr.bf16.mxu0 %v4462_v37  ;;  %16572 = vmatpush3.bf16.msra.mxu1 %v18932_v20  ;;  %v18960_v20 = vld [vmem:[%s19272_s9 + $0x70] sm:$0xff]   ;;  %v2691_v37 = vrot.slane %v19815_v19, 1  ;;  %v2692_v45 = vrot.slane %v19827_v23, 1 }
  0xd1   : > { %16573 = vmatprep.subr.bf16.mxu1 %v18938_v28  ;;  %v5074_v3 = vshll.u32 %v18960_v20, 16  ;;  %v4988_v50 = vsel %vm24036_vm4, %v4978_v25, %v4987_v46 }
  0xd3   : > { %v19896_v13 = vrot.slane %v5074_v3, 3 }
  0xd4   : > { %16574 = vmatpush3.bf16.msra.mxu1 %v18938_v28  ;;  %v5071_v28 = vshrl.u32 %v18960_v20, 16 }
  0xd5   : > { %16575 = vmatprep.subr.bf16.mxu1 %v18944_v58 }
  0xd6   : > { %16540 = vmatmul.mubr.bf16.gmra.mrb[12].mxu1 %v2173_v11  ;;  %v18965_v11 = vld [vmem:[%s19272_s9 + $0x80] sm:$0xff]   ;;  %v19885_v48 = vrot.slane %v5071_v28, 2 }
  0xd7   : > { %16768 = vmatmul.mubr.bf16.gmra.mrb[32].mxu0 %v4464_v17  ;;  %16543 = vmatprep.mubr.bf16.mxu1 %v2175_v40  ;;  %v19875_v17 = vrot.slane %v5065_v57, 3  ;;  %v5083_v40 = vshll.u32 %v18963_v35, 16  ;;  %v5092_v20 = vshll.u32 %v18965_v11, 16  ;;  %v4997_v57 = vsel %vm24036_vm4, %v4987_v46, %v4996_v22  ;;  %v19905_v28 = vld [vmem:[%s24021_s1 + $0x100] sm:$0xff]   ;;  %v18970_v46 = vld [vmem:[%s19272_s9 + $0x90] sm:$0xff]  }
  0xd8   : > { %16787 = vmatprep.mubr.bf16.mxu0 %v4979_v59  ;;  %16576 = vmatpush3.bf16.msra.mxu1 %v18944_v58  ;;  %v5089_v58 = vshrl.u32 %v18965_v11, 16  ;;  %v19899_v59 = vld [vmem:[%s19272_s9 + $0x30] sm:$0xff]   ;;  %v19909_v35 = vrot.slane %v5080_v36, 2 }
  0xd9   : > { %16577 = vmatprep.subr.bf16.mxu1 %v18951_v27  ;;  %v19917_v3 = vrot.slane %v5083_v40, 3  ;;  %v18949_v11 = vld [vmem:[%s24021_s1 + $0x210] sm:$0xff]   ;;  %v19926_v2 = vrot.slane %v5092_v20, 3  ;;  %v5014_v40 = vor.u32 %v19766_v18, %v19757_v41  ;;  %v19936_v20 = vld [vmem:[%s19272_s9 + $0x40] sm:$0xff]   ;;  %v2183_v18 = vsel %vm24038_vm3, %v2180_v51, %v2182_v24 }
  0xda   : > { %v19924_v25 = vrot.slane %v5089_v58, 2  ;;  %v5110_v58 = vshll.u32 %v18970_v46, 16 }
  0xdc   : > { %16578 = vmatpush3.bf16.msra.mxu1 %v18951_v27  ;;  %v5005_v27 = vor.u32 %v19751_v5, %v19749_v38  ;;  %v5101_v38 = vshll.u32 %v18968_v62, 16  ;;  %v5107_v5 = vshrl.u32 %v18970_v46, 16 }
  0xdd   : > { %17811 = vmatprep.subr.bf16.mxu1 %v19905_v28 }
  0xde   : > { %16544 = vmatmul.mubr.bf16.gmra.mrb[16].mxu1 %v2177_v33  ;;  %v5098_v33 = vshrl.u32 %v18968_v62, 16  ;;  %v5006_v41 = vsel %vm24036_vm4, %v4996_v22, %v5005_v27  ;;  %v18955_v62 = vld [vmem:[%s24021_s1 + $0x218] sm:$0xff]   ;;  %v19953_v46 = vrot.slane %v5101_v38, 3  ;;  %v5015_v22 = vsel %vm24036_vm4, %v5005_v27, %v5014_v40 }
  0xdf   : > { %16788 = vmatmul.mubr.bf16.vlgmr.msra.gmra.mrb[0].mxu0 %v4988_v50  ;;  %16547 = vmatprep.mubr.bf16.mxu1 %v2179_v60  ;;  %v19959_v60 = vld [vmem:[%s19272_s9 + $0x48] sm:$0xff]   ;;  %v5125_v27 = vshrl.u32 %v18975_v21, 16  ;;  %v19986_v50 = vld [vmem:[%s19272_s9 + $0x10] sm:$0xf8]  }
  0xe0   : > { %16791 = vmatprep.mubr.bf16.mxu0 %v4997_v57  ;;  %16824 = vmatpush3.bf16.msra.mxu0 %v19664_v6  ;;  %v19933_v36 = vrot.slane %v5098_v33, 2  ;;  %v18973_v57 = vld [vmem:[%s19272_s9 + $0x98] sm:$0xff]   ;;  %v2181_v6 = vsel %vm24038_vm3, %v2178_v32, %v2180_v51  ;;  %v19955_v33 = vrot.slane %v5107_v5, 2  ;;  %v19962_v51 = vrot.slane %v5110_v58, 3 }
  0xe1   : > { %16825 = vmatprep.subr.bf16.mxu0 %v18943_v9  ;;  %v5116_v8 = vshrl.u32 %v18973_v57, 16  ;;  %v5119_v32 = vshll.u32 %v18973_v57, 16  ;;  %v5128_v5 = vshll.u32 %v18975_v21, 16  ;;  %v19971_v57 = vld [vmem:[%s19272_s9 + $0x50] sm:$0xff]   ;;  %v5023_v58 = vor.u32 %v19770_v34, %v19768_v4  ;;  %v19983_v21 = vld [vmem:[%s19272_s9 + $0x18] sm:$0xff]   ;;  %v18966_v34 = vld [vmem:[%s24021_s1 + $0x228] sm:$0xff]  }
  0xe2   : > { %v2185_v4 = vsel %vm24038_vm3, %v2182_v24, %v2184_v10  ;;  %v18971_v10 = vld [vmem:[%s24021_s1 + $0x230] sm:$0xff]   ;;  %v20041_v24 = vld [vmem:[%s19272_s9 + $0x38] sm:$0xff]  }
  0xe3   : > { %v19968_v38 = vrot.slane %v5116_v8, 2  ;;  %v19980_v8 = vrot.slane %v5125_v27, 2  ;;  %v20031_v27 = vld [vmem:[%s19272_s9 + $0x30] sm:$0xff]  }
  0xe4   : > { %16826 = vmatpush3.bf16.msra.mxu0 %v18943_v9  ;;  %v18961_v9 = vld [vmem:[%s24021_s1 + $0x220] sm:$0xff]  }
  0xe5   : > { %16827 = vmatprep.subr.bf16.mxu0 %v18949_v11 }
  0xe6   : > { %16548 = vmatmul.mubr.bf16.gmra.mrb[20].mxu1 %v2181_v6  ;;  %v5032_v6 = vor.u32 %v19805_v29, %v19797_v42  ;;  %v19996_v42 = vrot.slane %v5128_v5, 3  ;;  %v19999_v29 = vld [vmem:[%s19272_s9 + $0x58] sm:$0xff]   ;;  %v20014_v5 = vld [vmem:[%s19272_s9 + $0x60] sm:$0xff]  }
  0xe7   : > { %16792 = vmatmul.mubr.bf16.gmra.mrb[4].mxu0 %v5006_v41  ;;  %16551 = vmatprep.mubr.bf16.mxu1 %v2183_v18  ;;  %v19977_v41 = vrot.slane %v5119_v32, 3  ;;  %v20009_v32 = vld [vmem:[%s19272_s9 + $0x20] sm:$0xff]  }
  0xe8   : > { %16795 = vmatprep.mubr.bf16.mxu0 %v5015_v22  ;;  %16828 = vmatpush3.bf16.msra.mxu0 %v18949_v11  ;;  %v5024_v11 = vsel %vm24036_vm4, %v5014_v40, %v5023_v58  ;;  %v5033_v22 = vsel %vm24036_vm4, %v5023_v58, %v5032_v6  ;;  %v20018_v40 = vld [vmem:[%s19272_s9 + $0x28] sm:$0xff]  }
  0xe9   : > { %16829 = vmatprep.subr.bf16.mxu0 %v18955_v62  ;;  %v20025_v58 = vld [vmem:[%s19272_s9 + $0x68] sm:$0xff]  }
  0xec   : > { %16830 = vmatpush3.bf16.msra.mxu0 %v18955_v62  ;;  %v20037_v62 = vld [vmem:[%s19272_s9 + $0x70] sm:$0xff]  }
  0xed   : > { %16831 = vmatprep.subr.bf16.mxu0 %v18961_v9 }
  0xee   : > { %16552 = vmatmul.mubr.bf16.gmra.mrb[24].mxu1 %v2185_v4  ;;  %v5041_v4 = vor.u32 %v19824_v0, %v19822_v52  ;;  %v2189_v52 = vsel %vm24038_vm3, %v2186_v53, %v2188_v56  ;;  %v18976_v0 = vld [vmem:[%s24021_s1 + $0x238] sm:$0xff]  }
  0xef   : > { %16796 = vmatmul.mubr.bf16.gmra.mrb[8].mxu0 %v5024_v11  ;;  %16555 = vmatprep.mubr.bf16.mxu1 %v2187_v55  ;;  %v5050_v11 = vor.u32 %v19851_v47, %v19843_v30  ;;  %v20053_v47 = vld [vmem:[%s19272_s9 + $0x78] sm:$0xff]   ;;  %v20082_v30 = vld [vmem:[%s19272_s9 + $0x50] sm:$0xff]  }
  0xf0   : > { %16799 = vmatprep.mubr.bf16.mxu0 %v5033_v22  ;;  %16832 = vmatpush3.bf16.msra.mxu0 %v18961_v9  ;;  %v5042_v9 = vsel %vm24036_vm4, %v5032_v6, %v5041_v4  ;;  %v20063_v22 = vld [vmem:[%s19272_s9 + $0x40] sm:$0xff]   ;;  %v5068_v6 = vor.u32 %v19875_v17, %v19866_v49  ;;  %v20092_v56 = vld [vmem:[%s19272_s9 + $0x58] sm:$0xff]  }
  0xf1   : > { %16833 = vmatprep.subr.bf16.mxu0 %v18966_v34  ;;  %v5051_v55 = vsel %vm24036_vm4, %v5041_v4, %v5050_v11  ;;  %v5059_v4 = vor.u32 %v19859_v14, %v19853_v43  ;;  %v2193_v43 = vsel %vm24038_vm3, %v2190_v39, %v2192_v61  ;;  %v20101_v49 = vld [vmem:[%s19272_s9 + $0x98] ss:$0 sps:$4 sm:$0x11]   ;;  %v18998_v14 = vld [vmem:[%s19272_s9 + $0x50] sm:$0xff]   ;;  %v5086_v61 = vor.u32 %v19917_v3, %v19909_v35 }
  0xf2   : > { %v3307_v19 = vshrl.u32 %v18998_v14, 16  ;;  %v24225_v35 = vrot.slane %v19856_v54, 1  ;;  %v5095_v54 = vor.u32 %v19926_v2, %v19924_v25  ;;  %v20181_v2 = vld [vmem:[%s19272_s9 + $0x90] sm:$0xff]   ;;  %v24232_v25 = vrot.slane %v19888_v15, 1  ;;  %v20211_v15 = vld [vmem:[%s19272_s9 + $0x98] sm:$0xff]  }
  0xf3   : > { %v5060_v17 = vsel %vm24036_vm4, %v5050_v11, %v5059_v4  ;;  %v5069_v39 = vsel %vm24036_vm4, %v5059_v4, %v5068_v6  ;;  %v5077_v4 = vor.u32 %v19896_v13, %v19885_v48  ;;  %v19002_v11 = vld [vmem:[%s19272_s9 + $0x60] sm:$0xff]   ;;  %v19004_v48 = vld [vmem:[%s19272_s9 + $0x68] sm:$0xff]   ;;  %24231 = vst [vmem:[#allocation7_spill] sm:$0xff] %v20181_v2  ;;  %v24240_v2 = vrot.slane %v19936_v20, 1 }
  0xf4   : > { %16834 = vmatpush3.bf16.msra.mxu0 %v18966_v34  ;;  %v20076_v34 = vld [vmem:[%s19272_s9 + $0x88] sm:$0xff]   ;;  %v3325_v13 = vshrl.u32 %v19002_v11, 16  ;;  %v2695_v3 = vsel %vm24038_vm3, %v2692_v45, %v24225_v35  ;;  %v24228_v18 = vmov %v24225_v35  ;;  %v3337_v35 = vshll.u32 %v19004_v48, 16 }
  0xf5   : > { %16835 = vmatprep.subr.bf16.mxu0 %v18971_v10 }
  0xf6   : > { %16556 = vmatmul.mubr.bf16.gmra.mrb[28].mxu1 %v2189_v52  ;;  %v20132_v52 = vrot.slane %v3307_v19, 1 }
  0xf7   : > { %16800 = vmatmul.mubr.bf16.gmra.mrb[12].mxu0 %v5042_v9  ;;  %16559 = vmatprep.mubr.bf16.mxu1 %v2191_v12  ;;  %v20088_v12 = vld [vmem:[%s19272_s9 + $0x90] sm:$0xff]  }
  0xf8   : > { %16803 = vmatprep.mubr.bf16.mxu0 %v5051_v55  ;;  %16836 = vmatpush3.bf16.msra.mxu0 %v18971_v10  ;;  %v2693_v10 = vsel %vm24038_vm3, %v2691_v37, %v2692_v45  ;;  %v20118_v55 = vld [vmem:[%s19272_s9 + $0x68] sm:$0xff]   ;;  %v3310_v37 = vshll.u32 %v18998_v14, 16  ;;  %v20122_v9 = vld [vmem:[%s19272_s9 + $0x70] sm:$0xff]   ;;  %v5087_v45 = vsel %vm24036_vm4, %v5077_v4, %v5086_v61 }
  0xf9   : > { %16837 = vmatprep.subr.bf16.mxu0 %v18976_v0 }
  0xfa   : > { %v20134_v53 = vrot.slane %v3310_v37, 2 }
  0xfc   : > { %16838 = vmatpush3.bf16.msra.mxu0 %v18976_v0  ;;  %v19000_v0 = vld [vmem:[%s19272_s9 + $0x58] sm:$0xff]  }
  0xfd   : > { %v3316_v14 = vshrl.u32 %v19000_v0, 16  ;;  %v3319_v44 = vshll.u32 %v19000_v0, 16  ;;  %v5078_v0 = vsel %vm24036_vm4, %v5068_v6, %v5077_v4  ;;  %v20160_v6 = vld [vmem:[%s19272_s9 + $0x80] sm:$0xff]  }
  0xfe   : > { %16560 = vmatmul.mubr.bf16.gmra.mrb[32].mxu1 %v2193_v43  ;;  %v24227_v43 = vrot.slane %v19870_v7, 1 }
  0xff   : > { %16804 = vmatmul.mubr.bf16.gmra.mrb[16].mxu0 %v5060_v17  ;;  %16579 = vmatprep.mubr.bf16.mxu1 %v2693_v10  ;;  %v20143_v17 = vld [vmem:[%s19272_s9 + $0x78] sm:$0xff]   ;;  %v20146_v19 = vrot.slane %v3316_v14, 1  ;;  %v20148_v37 = vrot.slane %v3319_v44, 2  ;;  %v20150_v10 = vrot.slane %v3325_v13, 1  ;;  %v19006_v44 = vld [vmem:[%s19272_s9 + $0x70] sm:$0xff]   ;;  %v20172_v14 = vld [vmem:[%s19272_s9 + $0x88] sm:$0xff]  }
 0x100   : > { %16807 = vmatprep.mubr.bf16.mxu0 %v5069_v39  ;;  %v3328_v39 = vshll.u32 %v19002_v11, 16  ;;  %24226 = vst [vmem:[#allocation4_spill] sm:$0xff] %v20143_v17  ;;  %v2697_v23 = vsel %vm24038_vm3, %v24228_v18, %v24227_v43  ;;  %v3334_v11 = vshrl.u32 %v19004_v48, 16  ;;  %24230 = vst [vmem:[#allocation6_spill] sm:$0xff] %v20172_v14  ;;  %v19161_v48 = vld [vmem:[%s24021_s1 + $0x108] sm:$0xff]   ;;  %v3343_v13 = vshrl.u32 %v19006_v44, 16 }
 0x101   : > { %v24234_v17 = vrot.slane %v19899_v59, 1 }
 0x102   : > { %v20166_v18 = vrot.slane %v3328_v39, 2  ;;  %v20169_v43 = vrot.slane %v3334_v11, 1  ;;  %v24233_v39 = vrot.slane %v19870_v7, 1  ;;  %v19010_v11 = vld [vmem:[%s19272_s9 + $0x80] sm:$0xff]   ;;  %v24235_v7 = vmov %v24232_v25 }
 0x104   : > { %24229 = vst [vmem:[#allocation5_spill] sm:$0xff] %v20169_v43  ;;  %v5096_v43 = vsel %vm24036_vm4, %v5086_v61, %v5095_v54 }
 0x106   : > { %16580 = vmatmul.mubr.bf16.vlgmr.msra.gmra.mrb[0].mxu1 %v2695_v3  ;;  %v3346_v3 = vshll.u32 %v19006_v44, 16 }
 0x107   : > { %16808 = vmatmul.mubr.bf16.gmra.mrb[20].mxu0 %v5078_v0  ;;  %17819 = vmatpush3.bf16.msra.mxu1 %v19905_v28  ;;  %v5104_v28 = vor.u32 %v19953_v46, %v19933_v36  ;;  %v19008_v0 = vld [vmem:[%s19272_s9 + $0x78] sm:$0xff]  }
 0x108   : > { %16583 = vmatprep.mubr.bf16.mxu1 %v2697_v23  ;;  %16811 = vmatprep.mubr.bf16.mxu0 %v5087_v45  ;;  %v2699_v23 = vsel %vm24038_vm3, %v24233_v39, %v24232_v25  ;;  %v20188_v45 = vrot.slane %v3337_v35, 2  ;;  %v3352_v46 = vshrl.u32 %v19008_v0, 16  ;;  %v3355_v44 = vshll.u32 %v19008_v0, 16  ;;  %v19162_v35 = vld [vmem:[%s24021_s1 + $0x110] sm:$0xff]  }
 0x109   : > { %17812 = vmatprep.subr.bf16.mxu1 %v19161_v48  ;;  %v2701_v25 = vsel %vm24038_vm3, %v24235_v7, %v24234_v17  ;;  %v3361_v39 = vshrl.u32 %v19010_v11, 16  ;;  %v5105_v36 = vsel %vm24036_vm4, %v5095_v54, %v5104_v28  ;;  %v20205_v4 = vrot.slane %v3346_v3, 2  ;;  %v19012_v7 = vld [vmem:[%s19272_s9 + $0x88] sm:$0xff]  }
 0x10a   : > { %v20207_v0 = vrot.slane %v3352_v46, 1  ;;  %v3364_v17 = vshll.u32 %v19010_v11, 16  ;;  %v20216_v14 = vrot.slane %v3355_v44, 2  ;;  %v5122_v3 = vor.u32 %v19977_v41, %v19968_v38  ;;  %v19014_v11 = vld [vmem:[%s19272_s9 + $0x90] sm:$0xff]  }
 0x10b   : > { %17820 = vmatpush3.bf16.msra.mxu1 %v19161_v48  ;;  %v20202_v48 = vrot.slane %v3343_v13, 1  ;;  %v5113_v13 = vor.u32 %v19962_v51, %v19955_v33  ;;  %v20218_v54 = vrot.slane %v3361_v39, 1  ;;  %v3370_v46 = vshrl.u32 %v19012_v7, 16 }
 0x10c   : > { %17813 = vmatprep.subr.bf16.mxu1 %v19162_v35  ;;  %v3373_v61 = vshll.u32 %v19012_v7, 16  ;;  %v20229_v33 = vrot.slane %v3364_v17, 2  ;;  %v3379_v44 = vshrl.u32 %v19014_v11, 16  ;;  %v24238_v38 = vrot.slane %v19913_v1, 1 }
 0x10d   : > { %v24239_v41 = vrot.slane %v19899_v59, 1  ;;  %v3382_v39 = vshll.u32 %v19014_v11, 16  ;;  %v19015_v7 = vld [vmem:[%s19272_s9 + $0x98] ss:$0 sps:$4 sm:$0x33]   ;;  %v19164_v59 = vld [vmem:[%s24021_s1 + $0x120] sm:$0xff]  }
 0x10e   : > { %16584 = vmatmul.mubr.bf16.gmra.mrb[4].mxu1 %v2699_v23  ;;  %v20223_v23 = vld [vmem:[%s19272_s9 + $0xa0] ss:$0 sps:$4 sm:$0x77]   ;;  %24236 = vst [vmem:[#allocation8_spill] sm:$0xff] %v20229_v33  ;;  %v24241_v17 = vmov %v24238_v38  ;;  %v20247_v51 = vrot.slane %v3373_v61, 2  ;;  %v3391_v1 = vshll.u32 %v19015_v7, 16 }
 0x10f   : > { %16812 = vmatmul.mubr.bf16.gmra.mrb[24].mxu0 %v5096_v43  ;;  %16587 = vmatprep.mubr.bf16.mxu1 %v2701_v25  ;;  %v19163_v43 = vld [vmem:[%s24021_s1 + $0x118] sm:$0xff]   ;;  %v2703_v25 = vsel %vm24038_vm3, %v24239_v41, %v24238_v38  ;;  %v2705_v33 = vsel %vm24038_vm3, %v24241_v17, %v24240_v2  ;;  %v20255_v11 = vrot.slane %v3382_v39, 2  ;;  %v3388_v38 = vshrl.u32 %v19015_v7, 16 }
 0x110   : > { %16815 = vmatprep.mubr.bf16.mxu0 %v5105_v36  ;;  %17821 = vmatpush3.bf16.msra.mxu1 %v19162_v35  ;;  %v20232_v36 = vrot.slane %v3370_v46, 1  ;;  %v5114_v35 = vsel %vm24036_vm4, %v5104_v28, %v5113_v13  ;;  %v5123_v46 = vsel %vm24036_vm4, %v5113_v13, %v5122_v3  ;;  %v20253_v28 = vrot.slane %v3379_v44, 1 }
 0x111   : > { %17814 = vmatprep.subr.bf16.mxu1 %v19163_v43  ;;  %v20257_v2 = vrot.slane %v3388_v38, 1  ;;  %v20259_v61 = vrot.slane %v3391_v1, 2  ;;  %v5131_v13 = vor.u32 %v19996_v42, %v19980_v8  ;;  %v24242_v44 = vrot.slane %v19959_v60, 1  ;;  %v19167_v60 = vld [vmem:[%s24021_s1 + $0x138] sm:$0xff]  }
 0x112   : > { %24237 = vst [vmem:[#allocation9_spill] sm:$0xff] %v20232_v36  ;;  %v5666_v36 = vrot.slane %v20223_v23, 3  ;;  %v24243_v41 = vrot.slane %v19936_v20, 1  ;;  %v24246_v42 = vrot.slane %v19983_v21, 3  ;;  %v24247_v7 = vrot.slane %v19986_v50, 3  ;;  %v19166_v20 = vld [vmem:[%s24021_s1 + $0x130] sm:$0xff]  }
 0x113   : > { %v24245_v39 = vmov %v24242_v44  ;;  %v24256_v21 = vrot.slane %v20025_v58, 1  ;;  %v24266_v58 = vrot.slane %v20063_v22, 3  ;;  %v24276_v22 = vrot.slane %v20088_v12, 1  ;;  %v19018_v23 = vld [vmem:[%s24023_s3 + $0x10] sm:$0xff]  }
 0x114   : > { %17822 = vmatpush3.bf16.msra.mxu1 %v19163_v43  ;;  %v19165_v43 = vld [vmem:[%s24021_s1 + $0x128] sm:$0xff]   ;;  %v5633_v17 = vsel %vm24034_vm5, %v24247_v7, %v24246_v42  ;;  %v24251_v38 = vmov %v24246_v42 }
 0x115   : > { %17815 = vmatprep.subr.bf16.mxu1 %v19164_v59  ;;  %v24261_v42 = vmov %v24256_v21 }
 0x116   : > { %16588 = vmatmul.mubr.bf16.gmra.mrb[8].mxu1 %v2703_v25  ;;  %v5132_v25 = vsel %vm24036_vm4, %v5122_v3, %v5131_v13  ;;  %v24248_v3 = vrot.slane %v19999_v29, 1  ;;  %v24252_v13 = vrot.slane %v20014_v5, 1  ;;  %v24258_v29 = vrot.slane %v20031_v27, 3 }
 0x117   : > { %16816 = vmatmul.mubr.bf16.gmra.mrb[28].mxu0 %v5114_v35  ;;  %16591 = vmatprep.mubr.bf16.mxu1 %v2705_v33  ;;  %v2707_v33 = vsel %vm24038_vm3, %v24243_v41, %v24242_v44  ;;  %v24244_v35 = vrot.slane %v19971_v57, 1  ;;  %v24254_v41 = vrot.slane %v20018_v40, 3  ;;  %v24264_v40 = vrot.slane %v20053_v47, 1 }
 0x118   : > { %16819 = vmatprep.mubr.bf16.mxu0 %v5123_v46  ;;  %17823 = vmatpush3.bf16.msra.mxu1 %v19164_v59  ;;  %v24250_v59 = vrot.slane %v20009_v32, 3  ;;  %v24260_v32 = vrot.slane %v20037_v62, 1  ;;  %v24268_v27 = vrot.slane %v20068_v63, 1  ;;  %v24274_v47 = vrot.slane %v20082_v30, 3 }
 0x119   : > { %17816 = vmatprep.subr.bf16.mxu1 %v19165_v43  ;;  %v2709_v8 = vsel %vm24038_vm3, %v24245_v39, %v24244_v35  ;;  %v24249_v50 = vmov %v24244_v35  ;;  %v24259_v39 = vmov %v24254_v41 }
 0x11a   : > { %v2711_v46 = vsel %vm24038_vm3, %v24249_v50, %v24248_v3  ;;  %v5635_v1 = vsel %vm24034_vm5, %v24251_v38, %v24250_v59  ;;  %v2717_v7 = vsel %vm24038_vm3, %v24261_v42, %v24260_v32 }
 0x11c   : > { %17824 = vmatpush3.bf16.msra.mxu1 %v19165_v43  ;;  %v24253_v43 = vmov %v24248_v3 }
 0x11d   : > { %17817 = vmatprep.subr.bf16.mxu1 %v19166_v20  ;;  %v2713_v44 = vsel %vm24038_vm3, %v24253_v43, %v24252_v13  ;;  %v24273_v43 = vmov %v24268_v27 }
 0x11e   : > { %16592 = vmatmul.mubr.bf16.gmra.mrb[12].mxu1 %v2707_v33  ;;  %v24255_v33 = vmov %v24250_v59  ;;  %v24269_v59 = vmov %v24264_v40 }
 0x11f   : > { %16820 = vmatmul.mubr.bf16.gmra.mrb[32].mxu0 %v5132_v25  ;;  %16595 = vmatprep.mubr.bf16.mxu1 %v2709_v8  ;;  %v5637_v57 = vsel %vm24034_vm5, %v24255_v33, %v24254_v41  ;;  %v24257_v25 = vmov %v24252_v13  ;;  %v5639_v8 = vsel %vm24034_vm5, %v24259_v39, %v24258_v29  ;;  %v2721_v38 = vsel %vm24038_vm3, %v24269_v59, %v24268_v27 }
 0x120   : > { %16839 = vmatprep.mubr.bf16.mxu0 %v5633_v17  ;;  %17825 = vmatpush3.bf16.msra.mxu1 %v19166_v20  ;;  %v2715_v35 = vsel %vm24038_vm3, %v24257_v25, %v24256_v21  ;;  %v24262_v17 = vrot.slane %v20041_v24, 3  ;;  %v24263_v20 = vmov %v24258_v29  ;;  %v24271_v13 = vmov %v24266_v58 }
 0x121   : > { %17818 = vmatprep.subr.bf16.mxu1 %v19167_v60  ;;  %v24272_v24 = vrot.slane %v20076_v34, 1  ;;  %v24278_v25 = vrot.slane %v20092_v56, 3  ;;  %v24280_v29 = vrot.slane %v20101_v49, 1  ;;  %v24281_v39 = vmov %v24276_v22 }
 0x122   : > { %v5641_v5 = vsel %vm24034_vm5, %v24263_v20, %v24262_v17  ;;  %v24267_v50 = vmov %v24262_v17  ;;  %v3331_v56 = vor.u32 %v20166_v18, %v20150_v10  ;;  %v24291_v10 = vld [vmem:[#allocation5_spill] sm:$0xff] }
 0x123   : > { %v2727_v34 = vsel %vm24038_vm3, %v24281_v39, %v24280_v29  ;;  %v24308_v29 = vmov 0 }
 0x124   : > { %17826 = vmatpush3.bf16.msra.mxu1 %v19167_v60  ;;  %v24265_v60 = vmov %v24260_v32  ;;  %v24283_v32 = vmov %v24278_v25  ;;  %v24309_v29 = vsel %vm20474_vm11, 4294967295, %v24308_v29 }
 0x125   : > { %v2719_v3 = vsel %vm24038_vm3, %v24265_v60, %v24264_v40  ;;  %24310 = vst [vmem:[#allocation5_spill] sm:$0xff] %v24309_v29 }
 0x126   : > { %16596 = vmatmul.mubr.bf16.gmra.mrb[16].mxu1 %v2711_v46  ;;  %v5643_v46 = vsel %vm24034_vm5, %v24267_v50, %v24266_v58 }
 0x127   : > { %16840 = vmatmul.mubr.bf16.vlgmr.msra.gmra.mrb[0].mxu0 %v5635_v1  ;;  %16599 = vmatprep.mubr.bf16.mxu1 %v2713_v44  ;;  %v24270_v1 = vrot.slane %v20072_v16, 3  ;;  %v2723_v44 = vsel %vm24038_vm3, %v24273_v43, %v24272_v24  ;;  %v3313_v16 = vor.u32 %v20134_v53, %v20132_v52  ;;  %v3322_v52 = vor.u32 %v20148_v37, %v20146_v19 }
 0x128   : > { %16843 = vmatprep.mubr.bf16.mxu0 %v5637_v57  ;;  %v24277_v57 = vmov %v24272_v24  ;;  %v3340_v37 = vor.u32 %v20188_v45, %v24291_v10 }
 0x129   : > { %v5645_v62 = vsel %vm24034_vm5, %v24271_v13, %v24270_v1  ;;  %v24275_v41 = vmov %v24270_v1  ;;  %v2725_v21 = vsel %vm24038_vm3, %v24277_v57, %v24276_v22  ;;  %v3314_v42 = vsel %vm24037_vm0, %v19341_v31, %v3313_v16  ;;  %v24298_v13 = vld [vmem:[#allocation7_spill] sm:$0xff] }
 0x12a   : > { %v5647_v33 = vsel %vm24034_vm5, %v24275_v41, %v24274_v47  ;;  %v3323_v12 = vsel %vm24037_vm0, %v3313_v16, %v3322_v52  ;;  %v24286_v31 = vrot.slane %v20122_v9, 3  ;;  %v3332_v20 = vsel %vm24037_vm0, %v3322_v52, %v3331_v56  ;;  %v290_v16 = vld [vmem:[#allocation2 + $0x98] sm:$0xfe] }
 0x12b   : > { %v3341_v18 = vsel %vm24037_vm0, %v3331_v56, %v3340_v37  ;;  %v3385_v41 = vor.u32 %v20255_v11, %v20253_v28  ;;  %v19016_v28 = vld [vmem:[%s24023_s3] sm:$0xff]   ;;  %v24305_v11 = vmov 0  ;;  %v291_v39 = vsel %vm20474_vm11, 0, %v290_v16 }
 0x12c   : > { %v24290_v60 = vmov %v24286_v31  ;;  %16875 = vmatprep.subr.bf16.mxu1 %v19016_v28  ;;  %v24306_v11 = vsel %vm20462_vm8, 4294967295, %v24305_v11  ;;  %292 = vst [vmem:[#allocation2 + $0x98] sm:$0xfe] %v291_v39 }
 0x12e   : > { %16600 = vmatmul.mubr.bf16.gmra.mrb[20].mxu1 %v2715_v35  ;;  %v24279_v35 = vmov %v24274_v47 }
 0x12f   : > { %16844 = vmatmul.mubr.bf16.gmra.mrb[4].mxu0 %v5639_v8  ;;  %16603 = vmatprep.mubr.bf16.mxu1 %v2717_v7  ;;  %v5649_v63 = vsel %vm24034_vm5, %v24279_v35, %v24278_v25  ;;  %v24282_v8 = vrot.slane %v20111_v26, 3  ;;  %v24284_v7 = vrot.slane %v20118_v55, 3  ;;  %v3349_v55 = vor.u32 %v20205_v4, %v20202_v48  ;;  %v24297_v48 = vld [vmem:[#allocation8_spill] sm:$0xff]  ;;  %v19020_v35 = vld [vmem:[%s24023_s3 + $0x20] sm:$0xff]  }
 0x130   : > { %16847 = vmatprep.mubr.bf16.mxu0 %v5641_v5  ;;  %v24288_v5 = vld [vmem:[#allocation4_spill] sm:$0xff]  ;;  %v3358_v4 = vor.u32 %v20216_v14, %v20207_v0  ;;  %v24303_v0 = vld [vmem:[#allocation9_spill] sm:$0xff] }
 0x131   : > { %v5651_v30 = vsel %vm24034_vm5, %v24283_v32, %v24282_v8  ;;  %v24285_v17 = vmov %v24282_v8  ;;  %v24287_v49 = vmov %v24284_v7  ;;  %v24289_v40 = vrot.slane %v24288_v5, 3  ;;  %24307 = vst [vmem:[#allocation4_spill] sm:$0xff] %v24306_v11  ;;  %v19023_v8 = vld [vmem:[%s24023_s3 + $0x38] sm:$0xff]  }
 0x132   : > { %v5653_v53 = vsel %vm24034_vm5, %v24285_v17, %v24284_v7  ;;  %v5655_v26 = vsel %vm24034_vm5, %v24287_v49, %v24286_v31  ;;  %v3350_v50 = vsel %vm24037_vm0, %v3340_v37, %v3349_v55  ;;  %v3359_v1 = vsel %vm24037_vm0, %v3349_v55, %v3358_v4  ;;  %v20492_v17 = vld [vmem:[%s24023_s3 + $0x40] sm:$0xff]  }
 0x133   : > { %v5657_v19 = vsel %vm24034_vm5, %v24290_v60, %v24289_v40  ;;  %v24293_v58 = vmov %v24289_v40  ;;  %v19181_v32 = vmov 0  }
 0x134   : > { %280 = vst [vmem:[#allocation2] sm:$0xff] %v19181_v32  ;;  %293 = vst [vmem:[#allocation2 + $0xa0] sm:$0xff] %v19181_v32 }
 0x136   : > { %16604 = vmatmul.mubr.bf16.gmra.mrb[24].mxu1 %v2719_v3  ;;  %v24292_v3 = vrot.slane %v20160_v6, 3 }
 0x137   : > { %16848 = vmatmul.mubr.bf16.gmra.mrb[8].mxu0 %v5643_v46  ;;  %16607 = vmatprep.mubr.bf16.mxu1 %v2721_v38  ;;  %v24294_v46 = vld [vmem:[#allocation6_spill] sm:$0xff]  ;;  %v3367_v38 = vor.u32 %v24297_v48, %v20218_v54  ;;  %v3376_v54 = vor.u32 %v20247_v51, %v24303_v0  ;;  %v3394_v51 = vor.u32 %v20259_v61, %v20257_v2  ;;  %v284_v2 = vld [vmem:[#allocation2 + $0x8] sm:$0x3] }
 0x138   : > { %16851 = vmatprep.mubr.bf16.mxu0 %v5645_v62  ;;  %v5659_v9 = vsel %vm24034_vm5, %v24293_v58, %v24292_v3  ;;  %v24295_v27 = vrot.slane %v24294_v46, 3  ;;  %v24296_v59 = vmov %v24292_v3  ;;  %v24299_v62 = vrot.slane %v24298_v13, 3  ;;  %24311 = vst [vmem:[#allocation6_spill] sm:$0xff] %v20492_v17 }
 0x139   : > { %v3368_v43 = vsel %vm24037_vm0, %v3358_v4, %v3367_v38  ;;  %v3395_v25 = vsel %vm24037_vm0, %v3385_v41, %v3394_v51  ;;  %v285_v61 = vsel %vm20462_vm8, 0, %v284_v2 }
 0x13a   : > { %v5661_v45 = vsel %vm24034_vm5, %v24296_v59, %v24295_v27  ;;  %v24300_v24 = vmov %v24295_v27  ;;  %v24302_v47 = vmov %v24299_v62  ;;  %286 = vst [vmem:[#allocation2 + $0x8] sm:$0x3] %v285_v61 }
 0x13b   : > { %v5663_v6 = vsel %vm24034_vm5, %v24300_v24, %v24299_v62 }
 0x13e   : > { %16608 = vmatmul.mubr.bf16.gmra.mrb[28].mxu1 %v2723_v44  ;;  %v24301_v44 = vrot.slane %v20211_v15, 3  ;;  %v19017_v15 = vld [vmem:[%s24023_s3 + $0x8] sm:$0xff]  }
 0x13f   : > { %16852 = vmatmul.mubr.bf16.gmra.mrb[12].mxu0 %v5647_v33  ;;  %16611 = vmatprep.mubr.bf16.mxu1 %v2725_v21  ;;  %v3377_v33 = vsel %vm24037_vm0, %v3367_v38, %v3376_v54  ;;  %v3386_v21 = vsel %vm24037_vm0, %v3376_v54, %v3385_v41 }
 0x140   : > { %16855 = vmatprep.mubr.bf16.mxu0 %v5649_v63  ;;  %v5665_v14 = vsel %vm24034_vm5, %v24302_v47, %v24301_v44  ;;  %v24304_v22 = vmov %v24301_v44  ;;  %v19021_v63 = vld [vmem:[%s24023_s3 + $0x28] sm:$0xff]  }
 0x141   : > { %v5667_v57 = vsel %vm24034_vm5, %v24304_v22, %v5666_v36  ;;  %v19019_v36 = vld [vmem:[%s24023_s3 + $0x18] sm:$0xff]  }
 0x146   : > { %16612 = vmatmul.mubr.bf16.gmra.mrb[32].mxu1 %v2727_v34  ;;  %v19022_v34 = vld [vmem:[%s24023_s3 + $0x30] sm:$0xff]  }
 0x147   : > { %16856 = vmatmul.mubr.bf16.gmra.mrb[16].mxu0 %v5651_v30  ;;  %16647 = vmatprep.mubr.bf16.mxu1 %v3314_v42  ;;  %v294_v30 = vlaneseq }
 0x148   : > { %16859 = vmatprep.mubr.bf16.mxu0 %v5653_v53 }
 0x149   : > { %v20486_v42 = vshrl.u32 %v294_v30, 7 }
 0x14b   : > { %v297_v7 = vadd.s32 16, %v20486_v42  ;;  %v298_v56 = vadd.s32 24, %v20486_v42  ;;  %v20501_v31 = vmul.u32.u64.low 3817748708, %v20486_v42  ;;  %v20502_v49 = vmul.u32.u64.high 3817748708, %v20486_v42, %v20501_v31 }
 0x14c   : > { %v20516_v55 = vadd.s32 32, %v20486_v42  ;;  %v20520_v3 = vadd.s32 56, %v20486_v42  ;;  %v20529_v59 = vadd.s32 40, %v20486_v42  ;;  %v20533_v48 = vadd.s32 80, %v20486_v42 }
 0x14d   : > { %v20494_v53 = vmul.u32.u64.low 3817748708, %v297_v7  ;;  %v20495_v52 = vmul.u32.u64.high 3817748708, %v297_v7, %v20494_v53  ;;  %v20540_v13 = vadd.s32 64, %v20486_v42  ;;  %v20592_v16 = vadd.s32 112, %v20486_v42 }
 0x14e   : > { %16648 = vmatmul.mubr.bf16.vlgmr.msra.gmra.mrb[16].mxu1 %v3323_v12  ;;  %v296_v12 = vadd.s32 8, %v20486_v42  ;;  %v20525_v46 = vmul.u32.u64.low 3817748708, %v20516_v55  ;;  %v20526_v27 = vmul.u32.u64.high 3817748708, %v20516_v55, %v20525_v46  ;;  %v20901_v29 = vadd.s32 208, %v20486_v42 }
 0x14f   : > { %16860 = vmatmul.mubr.bf16.gmra.mrb[20].mxu0 %v5655_v26  ;;  %16651 = vmatprep.mubr.bf16.mxu1 %v3332_v20  ;;  %v301_v26 = vadd.s32 48, %v20486_v42  ;;  %v20505_v20 = vmul.u32.u64.low 3817748708, %v298_v56  ;;  %v20506_v5 = vmul.u32.u64.high 3817748708, %v298_v56, %v20505_v20  ;;  %v359_v37 = vshrl.u32 %v20495_v52, 4 }
 0x150   : > { %16863 = vmatprep.mubr.bf16.mxu0 %v5657_v19  ;;  %16876 = vmatpush3.bf16.msra.mxu1 %v19016_v28  ;;  %v20508_v40 = vmul.u32.u64.low 3817748708, %v296_v12  ;;  %v20509_v60 = vmul.u32.u64.high 3817748708, %v296_v12, %v20508_v40  ;;  %v20548_v44 = vmul.u32.u64.low 3817748708, %v20529_v59  ;;  %v20549_v47 = vmul.u32.u64.high 3817748708, %v20529_v59, %v20548_v44 }
 0x151   : > { %16877 = vmatprep.subr.bf16.mxu1 %v19017_v15  ;;  %v20511_v19 = vmul.u32.u64.low 3817748708, %v301_v26  ;;  %v20512_v10 = vmul.u32.u64.high 3817748708, %v301_v26, %v20511_v19  ;;  %v360_v58 = vmul.u32 18, %v359_v37  ;;  %v24319_v20 = vmov 0 }
 0x152   : > { %v392_v30 = vshrl.u32 %v20549_v47, 4  ;;  %v20650_v19 = vadd.s32 120, %v20486_v42 }
 0x153   : > { %v403_v4 = vshrl.u32 %v20512_v10, 4  ;;  %v20542_v62 = vsub.s32 %v297_v7, %v360_v58  ;;  %v24315_v7 = vmov 0 }
 0x154   : > { %16878 = vmatpush3.bf16.msra.mxu1 %v19017_v15  ;;  %v381_v15 = vshrl.u32 %v20526_v27, 4  ;;  %v393_v37 = vmul.u32 18, %v392_v30 }
 0x155   : > { %16879 = vmatprep.subr.bf16.mxu1 %v19018_v23  ;;  %v404_v54 = vmul.u32 18, %v403_v4  ;;  %vm729_vm12 = vcmp.ne.s32.totalorder %v20542_v62, 0  ;;  %vm765_vm13 = vcmp.lt.s32.totalorder %v20542_v62, 0  ;;  %v20581_v2 = vadd.s32 18, %v20542_v62 }
 0x156   : > { %16652 = vmatmul.mubr.bf16.gmra.mrb[20].mxu1 %v3341_v18  ;;  %v337_v18 = vshrl.u32 %v20502_v49, 4  ;;  %vm20606_vm10 = vmand %vm765_vm13, %vm729_vm12  ;;  %v20696_v47 = vsub.s32 %v20529_v59, %v393_v37  ;;  %v24347_v37 = vmov 0 }
 0x157   : > { %16864 = vmatmul.mubr.bf16.gmra.mrb[24].mxu0 %v5659_v9  ;;  %16655 = vmatprep.mubr.bf16.mxu1 %v3350_v50  ;;  %v370_v9 = vshrl.u32 %v20506_v5, 4  ;;  %v348_v50 = vshrl.u32 %v20509_v60, 4  ;;  %v20584_v61 = vsub.s32 %v301_v26, %v404_v54 }
 0x158   : > { %16867 = vmatprep.mubr.bf16.mxu0 %v5661_v45  ;;  %16880 = vmatpush3.bf16.msra.mxu1 %v19018_v23  ;;  %v338_v45 = vmul.u32 18, %v337_v18  ;;  %v20637_v49 = vmul.u32.u64.low 3817748708, %v20592_v16  ;;  %v20638_v26 = vmul.u32.u64.high 3817748708, %v20592_v16, %v20637_v49  ;;  %24325 = vst [vmem:[#allocation10_spill] sm:$0xff] %v20696_v47 }
 0x159   : > { %16881 = vmatprep.subr.bf16.mxu1 %v19019_v36  ;;  %v371_v24 = vmul.u32 18, %v370_v9  ;;  %24312 = vst [vmem:[#allocation8_spill] sm:$0xff] %v20584_v61  ;;  %vm733_vm12 = vcmp.ne.s32.totalorder %v20584_v61, 0  ;;  %vm769_vm13 = vcmp.lt.s32.totalorder %v20584_v61, 0  ;;  %v24342_v49 = vmov 0 }
 0x15a   : > { %v20555_v0 = vsub.s32 %v20486_v42, %v338_v45  ;;  %v24322_v45 = vmov 0  ;;  %v491_v59 = vshrl.u32 %v20638_v26, 4  ;;  %v20770_v26 = vadd.s32 128, %v20486_v42 }
 0x15b   : > { %v20889_v9 = vadd.s32 168, %v20486_v42 }
 0x15c   : > { %16882 = vmatpush3.bf16.msra.mxu1 %v19019_v36  ;;  %vm727_vm14 = vcmp.ne.s32.totalorder %v20555_v0, 0  ;;  %vm763_vm15 = vcmp.lt.s32.totalorder %v20555_v0, 0  ;;  %v492_v30 = vmul.u32 18, %v491_v59 }
 0x15d   : > { %16883 = vmatprep.subr.bf16.mxu1 %v19020_v35  ;;  %vm20617_vm4 = vmand %vm763_vm15, %vm727_vm14 }
 0x15e   : > { %16656 = vmatmul.mubr.bf16.gmra.mrb[24].mxu1 %v3359_v1  ;;  %v20536_v38 = vmul.u32.u64.low 3817748708, %v20520_v3  ;;  %v20537_v1 = vmul.u32.u64.high 3817748708, %v20520_v3, %v20536_v38  ;;  %v24316_v7 = vsel %vm20617_vm4, 4294967295, %v24315_v7 }
 0x15f   : > { %16868 = vmatmul.mubr.bf16.gmra.mrb[28].mxu0 %v5663_v6  ;;  %16659 = vmatprep.mubr.bf16.mxu1 %v3368_v43  ;;  %v20545_v6 = vadd.s32 88, %v20486_v42  ;;  %v349_v43 = vmul.u32 18, %v348_v50  ;;  %v20665_v50 = vadd.s32 18, %v20584_v61  ;;  %v20684_v38 = vadd.s32 104, %v20486_v42 }
 0x160   : > { %16871 = vmatprep.mubr.bf16.mxu0 %v5665_v14  ;;  %16884 = vmatpush3.bf16.msra.mxu1 %v19020_v35  ;;  %v20552_v14 = vadd.s32 72, %v20486_v42  ;;  %v20588_v35 = vadd.s32 18, %v20555_v0 }
 0x161   : > { %16885 = vmatprep.subr.bf16.mxu1 %v19021_v63  ;;  %v20572_v28 = vsub.s32 %v296_v12, %v349_v43  ;;  %v20690_v43 = vmul.u32.u64.low 3817748708, %v20650_v19  ;;  %v20691_v44 = vmul.u32.u64.high 3817748708, %v20650_v19, %v20690_v43 }
 0x162   : > { %v20576_v23 = vmul.u32.u64.low 3817748708, %v20552_v14  ;;  %v20577_v36 = vmul.u32.u64.high 3817748708, %v20552_v14, %v20576_v23 }
 0x163   : > { %vm728_vm5 = vcmp.ne.s32.totalorder %v20572_v28, 0  ;;  %vm764_vm1 = vcmp.lt.s32.totalorder %v20572_v28, 0  ;;  %v20622_v53 = vadd.s32 18, %v20572_v28 }
 0x164   : > { %16886 = vmatpush3.bf16.msra.mxu1 %v19021_v63  ;;  %v414_v63 = vshrl.u32 %v20537_v1, 4  ;;  %vm20640_vm14 = vmand %vm764_vm1, %vm728_vm5  ;;  %v436_v18 = vshrl.u32 %v20577_v36, 4  ;;  %v24332_v36 = vmov 0 }
 0x165   : > { %16887 = vmatprep.subr.bf16.mxu1 %v19022_v34  ;;  %v24320_v20 = vsel %vm20640_vm14, 4294967295, %v24319_v20  ;;  %vm20679_vm1 = vmand %vm769_vm13, %vm733_vm12  ;;  %vm732_vm12 = vcmp.ne.s32.totalorder %v20696_v47, 0  ;;  %vm768_vm13 = vcmp.lt.s32.totalorder %v20696_v47, 0 }
 0x166   : > { %16660 = vmatmul.mubr.bf16.gmra.mrb[28].mxu1 %v3377_v33  ;;  %v20558_v41 = vmul.u32.u64.low 3817748708, %v20533_v48  ;;  %v20559_v33 = vmul.u32.u64.high 3817748708, %v20533_v48, %v20558_v41  ;;  %v415_v12 = vmul.u32 18, %v414_v63  ;;  %v24323_v45 = vsel %vm20679_vm1, 4294967295, %v24322_v45  ;;  %vm20756_vm11 = vmand %vm768_vm13, %vm732_vm12 }
 0x167   : > { %16872 = vmatmul.mubr.bf16.gmra.mrb[32].mxu0 %v5667_v57  ;;  %16663 = vmatprep.mubr.bf16.mxu1 %v3386_v21  ;;  %v20562_v22 = vmul.u32.u64.low 3817748708, %v20540_v13  ;;  %v20563_v57 = vmul.u32.u64.high 3817748708, %v20540_v13, %v20562_v22  ;;  %v20566_v21 = vsub.s32 %v298_v56, %v371_v24  ;;  %v437_v54 = vmul.u32 18, %v436_v18 }
 0x168   : > { %16888 = vmatpush3.bf16.msra.mxu1 %v19022_v34  ;;  %17359 = vmatprep.mubr.bf16.mxu0 %v19181_v32  ;;  %v20600_v34 = vadd.s32 96, %v20486_v42  ;;  %v447_v52 = vshrl.u32 %v20559_v33, 4  ;;  %v20687_v1 = vsub.s32 %v20520_v3, %v415_v12  ;;  %v20709_v22 = vadd.s32 144, %v20486_v42 }
 0x169   : > { %16889 = vmatprep.subr.bf16.mxu1 %v19023_v8  ;;  %vm730_vm6 = vcmp.ne.s32.totalorder %v20566_v21, 0  ;;  %vm766_vm9 = vcmp.lt.s32.totalorder %v20566_v21, 0  ;;  %v20597_v39 = vadd.s32 18, %v20566_v21  ;;  %v425_v31 = vshrl.u32 %v20563_v57, 4 }
 0x16a   : > { %vm20631_vm0 = vmand %vm766_vm9, %vm730_vm6  ;;  %v20646_v40 = vmul.u32.u64.low 3817748708, %v20600_v34  ;;  %v20647_v60 = vmul.u32.u64.high 3817748708, %v20600_v34, %v20646_v40  ;;  %v448_v46 = vmul.u32 18, %v447_v52  ;;  %24324 = vst [vmem:[#allocation9_spill] sm:$0xff] %v20687_v1  ;;  %vm734_vm6 = vcmp.ne.s32.totalorder %v20687_v1, 0 }
 0x16b   : > { %v426_v4 = vmul.u32 18, %v425_v31  ;;  %vm770_vm9 = vcmp.lt.s32.totalorder %v20687_v1, 0  ;;  %v20726_v23 = vadd.s32 18, %v20687_v1  ;;  %v24339_v52 = vmov 0 }
 0x16c   : > { %16890 = vmatpush3.bf16.msra.mxu1 %v19023_v8  ;;  %v20706_v33 = vsub.s32 %v20533_v48, %v448_v46  ;;  %v469_v48 = vshrl.u32 %v20647_v60, 4  ;;  %vm20747_vm8 = vmand %vm770_vm9, %vm734_vm6  ;;  %v24340_v52 = vsel %vm20756_vm11, 4294967295, %v24339_v52  ;;  %v502_v31 = vshrl.u32 %v20691_v44, 4 }
 0x16d   : > { %16927 = vmatprep.subr.bf16.mxu1 %v20492_v17  ;;  %v20712_v57 = vsub.s32 %v20540_v13, %v426_v4  ;;  %24330 = vst [vmem:[#allocation15_spill] sm:$0xff] %v20726_v23  ;;  %v20731_v13 = vsub.s32 %v20552_v14, %v437_v54  ;;  %v20752_v14 = vadd.s32 18, %v20696_v47  ;;  %24341 = vst [vmem:[#allocation20_spill] sm:$0xff] %v24340_v52  ;;  %v20860_v4 = vadd.s32 176, %v20486_v42 }
 0x16e   : > { %16664 = vmatmul.mubr.bf16.gmra.mrb[32].mxu1 %v3395_v25  ;;  %v20569_v51 = vmul.u32.u64.low 3817748708, %v20545_v6  ;;  %v20570_v25 = vmul.u32.u64.high 3817748708, %v20545_v6, %v20569_v51  ;;  %24327 = vst [vmem:[#allocation12_spill] sm:$0xff] %v20706_v33  ;;  %vm737_vm2 = vcmp.ne.s32.totalorder %v20706_v33, 0  ;;  %vm773_vm7 = vcmp.lt.s32.totalorder %v20706_v33, 0 }
 0x16f   : > { %16891 = vmatprep.mubr.bf16.mxu1 %v19181_v32  ;;  %v382_v32 = vmul.u32 18, %v381_v15  ;;  %24328 = vst [vmem:[#allocation13_spill] sm:$0xff] %v20712_v57  ;;  %24331 = vst [vmem:[#allocation16_spill] sm:$0xff] %v20731_v13  ;;  %v470_v12 = vmul.u32 18, %v469_v48  ;;  %vm736_vm9 = vcmp.ne.s32.totalorder %v20731_v13, 0  ;;  %v20780_v60 = vadd.s32 18, %v20706_v33 }
 0x170   : > { %v458_v5 = vshrl.u32 %v20570_v25, 4  ;;  %v20716_v51 = vmul.u32.u64.low 3817748708, %v20684_v38  ;;  %v20717_v25 = vmul.u32.u64.high 3817748708, %v20684_v38, %v20716_v51  ;;  %24338 = vst [vmem:[#allocation19_spill] sm:$0xff] %v20752_v14  ;;  %vm20763_vm6 = vmand %vm773_vm7, %vm737_vm2  ;;  %vm24346_vm2 = vcmp.lt.s32.totalorder %v20712_v57, 0 }
 0x171   : > { %v20653_v10 = vsub.s32 %v20516_v55, %v382_v32  ;;  %v24335_v32 = vmov 0  ;;  %v24343_v49 = vsel %vm20763_vm6, 4294967295, %v24342_v49  ;;  %24345 = vst [vmem:[#allocation22_spill] sm:$0xff] %v20780_v60  ;;  %v20791_v18 = vadd.s32 18, %v20712_v57 }
 0x172   : > { %v459_v24 = vmul.u32 18, %v458_v5  ;;  %v24336_v32 = vsel %vm20747_vm8, 4294967295, %v24335_v32  ;;  %24344 = vst [vmem:[#allocation21_spill] sm:$0xff] %v24343_v49  ;;  %v20773_v5 = vadd.s32 152, %v20486_v42  ;;  %v20809_v43 = vadd.s32 18, %v20731_v13 }
 0x173   : > { %24321 = vst [vmem:[#allocation7_spill] sm:$0xff] %v20653_v10  ;;  %vm731_vm5 = vcmp.ne.s32.totalorder %v20653_v10, 0  ;;  %vm767_vm15 = vcmp.lt.s32.totalorder %v20653_v10, 0  ;;  %v20703_v3 = vadd.s32 18, %v20653_v10  ;;  %24337 = vst [vmem:[#allocation18_spill] sm:$0xff] %v24336_v32  ;;  %v20812_v44 = vsub.s32 %v20592_v16, %v492_v30 }
 0x174   : > { %v20722_v15 = vsub.s32 %v20545_v6, %v459_v24  ;;  %vm20737_vm3 = vmand %vm767_vm15, %vm731_vm5  ;;  %v20744_v6 = vmul.u32.u64.low 3817748708, %v20709_v22  ;;  %v20745_v63 = vmul.u32.u64.high 3817748708, %v20709_v22, %v20744_v6  ;;  %vm735_vm5 = vcmp.ne.s32.totalorder %v20712_v57, 0  ;;  %24350 = vst [vmem:[#allocation24_spill] sm:$0xff] %v20791_v18 }
 0x175   : > { %24326 = vst [vmem:[#allocation11_spill] sm:$0xff] %v20703_v3  ;;  %v24333_v36 = vsel %vm20737_vm3, 4294967295, %v24332_v36  ;;  %vm772_vm15 = vcmp.lt.s32.totalorder %v20731_v13, 0  ;;  %vm20786_vm7 = vmand %vm24346_vm2, %vm735_vm5  ;;  %v24352_v24 = vmov 0  ;;  %v480_v54 = vshrl.u32 %v20717_v25, 4 }
 0x176   : > { %24329 = vst [vmem:[#allocation14_spill] sm:$0xff] %v20722_v15  ;;  %24334 = vst [vmem:[#allocation17_spill] sm:$0xff] %v24333_v36  ;;  %vm738_vm1 = vcmp.ne.s32.totalorder %v20722_v15, 0  ;;  %vm774_vm14 = vcmp.lt.s32.totalorder %v20722_v15, 0  ;;  %v24348_v37 = vsel %vm20786_vm7, 4294967295, %v24347_v37  ;;  %v20794_v46 = vadd.s32 18, %v20722_v15 }
 0x177   : > { %24349 = vst [vmem:[#allocation23_spill] sm:$0xff] %v24348_v37  ;;  %vm20804_vm12 = vmand %vm774_vm14, %vm738_vm1  ;;  %v24356_v51 = vmov 0  ;;  %v20828_v48 = vsub.s32 %v20600_v34, %v470_v12  ;;  %v503_v16 = vmul.u32 18, %v502_v31  ;;  %v20831_v6 = vadd.s32 136, %v20486_v42 }
 0x178   : > { %24351 = vst [vmem:[#allocation25_spill] sm:$0xff] %v20794_v46  ;;  %v24353_v24 = vsel %vm20804_vm12, 4294967295, %v24352_v24  ;;  %24355 = vst [vmem:[#allocation27_spill] sm:$0xff] %v20809_v43  ;;  %v20834_v25 = vmul.u32.u64.low 3817748708, %v20770_v26  ;;  %v20835_v30 = vmul.u32.u64.high 3817748708, %v20770_v26, %v20834_v25  ;;  %v535_v31 = vshrl.u32 %v20745_v63, 4 }
 0x179   : > { %24354 = vst [vmem:[#allocation26_spill] sm:$0xff] %v24353_v24  ;;  %vm20823_vm14 = vmand %vm772_vm15, %vm736_vm9  ;;  %v20838_v59 = vmul.u32.u64.low 3817748708, %v20773_v5  ;;  %v20839_v40 = vmul.u32.u64.high 3817748708, %v20773_v5, %v20838_v59  ;;  %vm741_vm1 = vcmp.ne.s32.totalorder %v20812_v44, 0  ;;  %v481_v25 = vmul.u32 18, %v480_v54 }
 0x17a   : > { %v24357_v51 = vsel %vm20823_vm14, 4294967295, %v24356_v51  ;;  %v20863_v34 = vsub.s32 %v20650_v19, %v503_v16  ;;  %v20866_v41 = vmul.u32.u64.low 3817748708, %v20831_v6  ;;  %v20867_v27 = vmul.u32.u64.high 3817748708, %v20831_v6, %v20866_v41 }
 0x17b   : > { %24358 = vst [vmem:[#allocation28_spill] sm:$0xff] %v24357_v51  ;;  %v20870_v63 = vadd.s32 160, %v20486_v42  ;;  %vm777_vm13 = vcmp.lt.s32.totalorder %v20812_v44, 0  ;;  %v20876_v59 = vadd.s32 18, %v20812_v44  ;;  %vm739_vm5 = vcmp.ne.s32.totalorder %v20828_v48, 0 }
 0x17c   : > { %24359 = vst [vmem:[#allocation29_spill] sm:$0xff] %v20863_v34  ;;  %v20880_v54 = vadd.s32 184, %v20486_v42  ;;  %vm775_vm15 = vcmp.lt.s32.totalorder %v20828_v48, 0  ;;  %v20886_v41 = vadd.s32 18, %v20828_v48  ;;  %v536_v16 = vmul.u32 18, %v535_v31  ;;  %vm20949_vm9 = vmand %vm777_vm13, %vm741_vm1 }
 0x17d   : > { %v20894_v58 = vsub.s32 %v20684_v38, %v481_v25  ;;  %v20897_v11 = vmul.u32.u64.low 3817748708, %v20860_v4  ;;  %v20898_v17 = vmul.u32.u64.high 3817748708, %v20860_v4, %v20897_v11  ;;  %v20911_v51 = vadd.s32 192, %v20486_v42  ;;  %vm20963_vm14 = vmand %vm775_vm15, %vm739_vm5 }
 0x17e   : > { %v20907_v31 = vmul.u32.u64.low 3817748708, %v20870_v63  ;;  %v20908_v43 = vmul.u32.u64.high 3817748708, %v20870_v63, %v20907_v31  ;;  %v513_v38 = vshrl.u32 %v20835_v30, 4  ;;  %v546_v25 = vshrl.u32 %v20839_v40, 4 }
 0x17f   : > { %24360 = vst [vmem:[#allocation30_spill] sm:$0xff] %v20894_v58  ;;  %v20916_v11 = vmul.u32.u64.low 3817748708, %v20880_v54  ;;  %v20917_v15 = vmul.u32.u64.high 3817748708, %v20880_v54, %v20916_v11  ;;  %v20920_v46 = vsub.s32 %v20709_v22, %v536_v16  ;;  %v20927_v31 = vadd.s32 216, %v20486_v42 }
 0x180   : > { %v20923_v24 = vmul.u32.u64.low 3817748708, %v20889_v9  ;;  %v20924_v57 = vmul.u32.u64.high 3817748708, %v20889_v9, %v20923_v24  ;;  %v20932_v40 = vmul.u32.u64.low 3817748708, %v20901_v29  ;;  %v20933_v30 = vmul.u32.u64.high 3817748708, %v20901_v29, %v20932_v40 }
 0x181   : > { %24361 = vst [vmem:[#allocation31_spill] sm:$0xff] %v20920_v46  ;;  %v524_v11 = vshrl.u32 %v20867_v27, 4  ;;  %v20937_v22 = vmul.u32.u64.low 3817748708, %v20911_v51  ;;  %v20938_v16 = vmul.u32.u64.high 3817748708, %v20911_v51, %v20937_v22  ;;  %v20941_v18 = vadd.s32 200, %v20486_v42 }
 0x182   : > { %v24363_v37 = vmov 0  ;;  %v514_v27 = vmul.u32 18, %v513_v38  ;;  %v547_v40 = vmul.u32 18, %v546_v25  ;;  %v20955_v33 = vadd.s32 240, %v20486_v42 }
 0x183   : > { %v24364_v37 = vsel %vm20949_vm9, 4294967295, %v24363_v37  ;;  %v24366_v60 = vmov 0  ;;  %vm745_vm1 = vcmp.ne.s32.totalorder %v20920_v46, 0  ;;  %vm781_vm13 = vcmp.lt.s32.totalorder %v20920_v46, 0 }
 0x184   : > { %v24367_v60 = vsel %vm20963_vm14, 4294967295, %v24366_v60  ;;  %v20970_v38 = vmul.u32.u64.low 3817748708, %v20927_v31  ;;  %v20971_v25 = vmul.u32.u64.high 3817748708, %v20927_v31, %v20970_v38  ;;  %vm24369_vm2 = vcmp.ne.s32.totalorder %v20863_v34, 0 }
 0x185   : > { %vm24370_vm12 = vcmp.lt.s32.totalorder %v20863_v34, 0  ;;  %v20987_v47 = vadd.s32 18, %v20894_v58  ;;  %v20990_v14 = vadd.s32 18, %v20920_v46  ;;  %v579_v38 = vshrl.u32 %v20898_v17, 4 }
 0x186   : > { %vm20979_vm7 = vmand %vm24370_vm12, %vm24369_vm2  ;;  %vm24377_vm5 = vcmp.ne.s32.totalorder %v20894_v58, 0  ;;  %vm24378_vm12 = vcmp.lt.s32.totalorder %v20894_v58, 0  ;;  %v24379_v52 = vmov 0  ;;  %v525_v10 = vmul.u32 18, %v524_v11 }
 0x187   : > { %24374 = vst [vmem:[#allocation36_spill] sm:$0xff] %v20987_v47  ;;  %24375 = vst [vmem:[#allocation37_spill] sm:$0xff] %v20990_v14  ;;  %v557_v3 = vshrl.u32 %v20908_v43, 4  ;;  %v21005_v36 = vmul.u32.u64.low 3817748708, %v20941_v18  ;;  %v21006_v1 = vmul.u32.u64.high 3817748708, %v20941_v18, %v21005_v36  ;;  %v24382_v17 = vmov 0 }
 0x188   : > { %vm20999_vm15 = vmand %vm24378_vm12, %vm24377_vm5  ;;  %v590_v23 = vshrl.u32 %v20917_v15, 4  ;;  %v21021_v11 = vmul.u32.u64.low 3817748708, %v20955_v33  ;;  %v21022_v43 = vmul.u32.u64.high 3817748708, %v20955_v33, %v21021_v11  ;;  %v21033_v61 = vsub.s32 %v20773_v5, %v547_v40 }
 0x189   : > { %v24380_v52 = vsel %vm20999_vm15, 4294967295, %v24379_v52  ;;  %vm21012_vm2 = vmand %vm781_vm13, %vm745_vm1  ;;  %v580_v11 = vmul.u32 18, %v579_v38  ;;  %v623_v36 = vshrl.u32 %v20933_v30, 4  ;;  %v558_v40 = vmul.u32 18, %v557_v3 }
 0x18a   : > { %24381 = vst [vmem:[#allocation39_spill] sm:$0xff] %v24380_v52  ;;  %v24383_v17 = vsel %vm21012_vm2, 4294967295, %v24382_v17  ;;  %v601_v32 = vshrl.u32 %v20938_v16, 4  ;;  %v591_v38 = vmul.u32 18, %v590_v23  ;;  %v21058_v30 = vadd.s32 224, %v20486_v42 }
 0x18b   : > { %24384 = vst [vmem:[#allocation40_spill] sm:$0xff] %v24383_v17  ;;  %v634_v3 = vshrl.u32 %v20971_v25, 4  ;;  %v21071_v16 = vadd.s32 18, %v21033_v61  ;;  %v21074_v23 = vsub.s32 %v20860_v4, %v580_v11  ;;  %v624_v46 = vmul.u32 18, %v623_v36 }
 0x18c   : > { %v21080_v17 = vsub.s32 %v20870_v63, %v558_v40  ;;  %v612_v25 = vshrl.u32 %v21006_v1, 4  ;;  %v21084_v58 = vsub.s32 %v20880_v54, %v591_v38  ;;  %v667_v47 = vshrl.u32 %v21022_v43, 4 }
 0x18d   : > { %v21088_v52 = vmul.u32.u64.low 3817748708, %v21058_v30  ;;  %v21089_v4 = vmul.u32.u64.high 3817748708, %v21058_v30, %v21088_v52  ;;  %v24391_v1 = vmov 0  ;;  %v21112_v54 = vadd.s32 248, %v20486_v42 }
 0x18e   : > { %24387 = vst [vmem:[#allocation43_spill] sm:$0xff] %v21080_v17  ;;  %24388 = vst [vmem:[#allocation44_spill] sm:$0xff] %v21084_v58  ;;  %v21109_v52 = vsub.s32 %v20901_v29, %v624_v46  ;;  %vm24395_vm12 = vcmp.ne.s32.totalorder %v21033_v61, 0  ;;  %v613_v29 = vmul.u32 18, %v612_v25  ;;  %v21138_v40 = vadd.s32 18, %v21074_v23 }
 0x18f   : > { %v24415_v25 = vmov 0  ;;  %v24454_v8 = vmov 0 }
 0x190   : > { %24394 = vst [vmem:[#allocation47_spill] sm:$0xff] %v21109_v52  ;;  %vm789_vm11 = vcmp.lt.s32.totalorder %v21109_v52, 0 }
 0x1d9   : > { %v20872_v12 = vpop.f32.mrb[0].mxu1 }
 0x1da   : > { %v20882_v19 = vpop.f32.mrb[1].mxu1 }
 0x1db   : > { %v20891_v55 = vpop.f32.mrb[2].mxu1 }
 0x1dc   : > { %v20903_v13 = vpop.f32.mrb[3].mxu1 }
 0x1e1   : > { %v20943_v24 = vpop.f32.mrb[4].mxu1 }
 0x1e2   : > { %24362 = vst [vmem:[#allocation32_spill] sm:$0xff] %v20943_v24  ;;  %v20957_v22 = vpop.f32.mrb[5].mxu1  ;;  %v20984_v24 = vadd.s32 18, %v20863_v34 }
 0x1e3   : > { %24365 = vst [vmem:[#allocation33_spill] sm:$0xff] %v20957_v22  ;;  %v20973_v49 = vpop.f32.mrb[6].mxu1  ;;  %v24371_v22 = vmov 0 }
 0x1e4   : > { %24368 = vst [vmem:[#allocation34_spill] sm:$0xff] %v20973_v49  ;;  %v24372_v22 = vsel %vm20979_vm7, 4294967295, %v24371_v22  ;;  %24373 = vst [vmem:[#allocation35_spill] sm:$0xff] %v20984_v24  ;;  %v20993_v49 = vpop.f32.mrb[7].mxu1  ;;  %vm24396_vm7 = vcmp.lt.s32.totalorder %v21033_v61, 0  ;;  %v24442_v24 = vsel %vm20631_vm0, %v20597_v39, %v20566_v21  ;;  %v24449_v21 = vmov 0 }
 0x1e5   : > { %24376 = vst [vmem:[#allocation38_spill] sm:$0xff] %v20993_v49  ;;  %v21017_v49 = vsub.s32 %v20770_v26, %v514_v27  ;;  %v568_v26 = vshrl.u32 %v20924_v57, 4  ;;  %v21050_v57 = vsub.s32 %v20831_v6, %v525_v10  ;;  %vm21118_vm14 = vmand %vm24396_vm7, %vm24395_vm12  ;;  %vm24413_vm12 = vcmp.ne.s32.totalorder %v21080_v17, 0 }
 0x1e6   : > { %vm24414_vm7 = vcmp.lt.s32.totalorder %v21080_v17, 0 }
 0x1e7   : > { %24385 = vst [vmem:[#allocation41_spill] sm:$0xff] %v21017_v49  ;;  %vm743_vm1 = vcmp.ne.s32.totalorder %v21017_v49, 0  ;;  %v21063_v5 = vadd.s32 18, %v21017_v49  ;;  %v569_v10 = vmul.u32 18, %v568_v26  ;;  %v602_v26 = vmul.u32 18, %v601_v32 }
 0x1e8   : > { %v21093_v36 = vadd.s32 18, %v21050_v57  ;;  %v635_v32 = vmul.u32 18, %v634_v3  ;;  %vm24390_vm13 = vcmp.lt.s32.totalorder %v21017_v49, 0  ;;  %vm24401_vm15 = vcmp.ne.s32.totalorder %v21050_v57, 0 }
 0x1e9   : > { %v21053_v15 = vpop.f32.mrb[8].mxu1  ;;  %24386 = vst [vmem:[#allocation42_spill] sm:$0xff] %v21063_v5  ;;  %v21096_v63 = vsub.s32 %v20889_v9, %v569_v10  ;;  %vm21102_vm5 = vmand %vm24390_vm13, %vm743_vm1  ;;  %v21125_v43 = vsub.s32 %v20911_v51, %v602_v26  ;;  %vm24402_vm2 = vcmp.lt.s32.totalorder %v21050_v57, 0  ;;  %v668_v51 = vmul.u32 18, %v667_v47 }
 0x1ea   : > { %v21060_v27 = vpop.f32.mrb[9].mxu1  ;;  %v24392_v1 = vsel %vm21102_vm5, 4294967295, %v24391_v1  ;;  %vm21133_vm9 = vmand %vm24402_vm2, %vm24401_vm15  ;;  %vm24406_vm13 = vcmp.ne.s32.totalorder %v21074_v23, 0  ;;  %vm24407_vm1 = vcmp.lt.s32.totalorder %v21074_v23, 0  ;;  %v21153_v3 = vadd.s32 18, %v21080_v17 }
 0x1eb   : > { %v21067_v6 = vpop.f32.mrb[10].mxu1  ;;  %24389 = vst [vmem:[#allocation45_spill] sm:$0xff] %v21096_v63  ;;  %24393 = vst [vmem:[#allocation46_spill] sm:$0xff] %v24392_v1  ;;  %vm784_vm2 = vcmp.lt.s32.totalorder %v21096_v63, 0  ;;  %v21158_v26 = vsub.s32 %v20927_v31, %v635_v32  ;;  %vm751_vm3 = vcmp.ne.s32.totalorder %v21125_v43, 0  ;;  %vm787_vm8 = vcmp.lt.s32.totalorder %v21125_v43, 0 }
 0x1ec   : > { %v21076_v14 = vpop.f32.mrb[11].mxu1  ;;  %24399 = vst [vmem:[#allocation48_spill] sm:$0xff] %v21125_v43  ;;  %vm21148_vm6 = vmand %vm24407_vm1, %vm24406_vm13  ;;  %vm753_vm13 = vcmp.ne.s32.totalorder %v21109_v52, 0  ;;  %vm24424_vm5 = vcmp.ne.s32.totalorder %v21096_v63, 0  ;;  %v24425_v32 = vmov 0  ;;  %v21205_v49 = vadd.s32 18, %v21096_v63 }
 0x1ed   : > { %24410 = vst [vmem:[#allocation51_spill] sm:$0xff] %v21153_v3  ;;  %24411 = vst [vmem:[#allocation52_spill] sm:$0xff] %v21158_v26  ;;  %v21208_v5 = vsub.s32 %v20955_v33, %v668_v51  ;;  %v645_v1 = vshrl.u32 %v21089_v4, 4  ;;  %v21219_v34 = vadd.s32 18, %v21125_v43  ;;  %v24435_v33 = vmov 0 }
 0x1ee   : > { %vm21166_vm1 = vmand %vm24414_vm7, %vm24413_vm12  ;;  %vm24419_vm7 = vcmp.ne.s32.totalorder %v21084_v58, 0  ;;  %vm24420_vm12 = vcmp.lt.s32.totalorder %v21084_v58, 0  ;;  %24428 = vst [vmem:[#allocation58_spill] sm:$0xff] %v21205_v49  ;;  %v24438_v4 = vsel %vm20606_vm10, %v20581_v2, %v20542_v62  ;;  %v24439_v51 = vmov 0 }
 0x1ef   : > { %v24416_v25 = vsel %vm21166_vm1, 4294967295, %v24415_v25  ;;  %vm21186_vm15 = vmand %vm24420_vm12, %vm24419_vm7  ;;  %24429 = vst [vmem:[#allocation59_spill] sm:$0xff] %v21208_v5  ;;  %vm21261_vm12 = vcmp.lt.s32.totalorder %v24442_v24, 16  ;;  %v24443_v17 = vmov 0  ;;  %v21266_v3 = vadd.s32 18, %v21158_v26 }
 0x1f0   : > { %24417 = vst [vmem:[#allocation54_spill] sm:$0xff] %v24416_v25  ;;  %vm21200_vm4 = vmand %vm784_vm2, %vm24424_vm5  ;;  %vm754_vm5 = vcmp.ne.s32.totalorder %v21158_v26, 0  ;;  %v24444_v17 = vsel %vm21261_vm12, 4294967295, %v24443_v17  ;;  %v21271_v62 = vadd.s32 232, %v20486_v42  ;;  %vm24447_vm10 = vnez %v24316_v7 }
 0x1f1   : > { %v21127_v46 = vpop.f32.mrb[12].mxu1  ;;  %v24426_v32 = vsel %vm21200_vm4, 4294967295, %v24425_v32  ;;  %vm21211_vm7 = vmand %vm789_vm11, %vm753_vm13  ;;  %24434 = vst [vmem:[#allocation62_spill] sm:$0xff] %v21219_v34  ;;  %vm21252_vm13 = vcmp.lt.s32.totalorder %v24438_v4, 16  ;;  %v24448_v2 = vsel %vm24447_vm10, %v20588_v35, %v20555_v0  ;;  %vm24452_vm2 = vnez %v24320_v20 }
 0x1f2   : > { %24400 = vst [vmem:[#allocation49_spill] sm:$0xff] %v21127_v46  ;;  %v21142_v38 = vpop.f32.mrb[13].mxu1  ;;  %24427 = vst [vmem:[#allocation57_spill] sm:$0xff] %v24426_v32  ;;  %v24440_v51 = vsel %vm21252_vm13, 4294967295, %v24439_v51  ;;  %vm21278_vm0 = vcmp.lt.s32.totalorder %v24448_v2, 16  ;;  %v24453_v39 = vsel %vm24452_vm2, %v20622_v53, %v20572_v28  ;;  %vm24457_vm10 = vcmp.lt.s32.totalorder %v21158_v26, 0 }
 0x1f3   : > { %24405 = vst [vmem:[#allocation50_spill] sm:$0xff] %v21142_v38  ;;  %v21160_v47 = vpop.f32.mrb[14].mxu1  ;;  %v21173_v38 = vmul.u32.u64.low 3817748708, %v21112_v54  ;;  %v21174_v46 = vmul.u32.u64.high 3817748708, %v21112_v54, %v21173_v38  ;;  %vm21243_vm11 = vmand %vm787_vm8, %vm751_vm3  ;;  %v24450_v21 = vsel %vm21278_vm0, 4294967295, %v24449_v21  ;;  %vm21287_vm3 = vcmp.lt.s32.totalorder %v24453_v39, 16 }
 0x1f4   : > { %24412 = vst [vmem:[#allocation53_spill] sm:$0xff] %v21160_v47  ;;  %v21176_v31 = vpop.f32.mrb[15].mxu1  ;;  %v21193_v38 = vsub.s32 %v20941_v18, %v613_v29  ;;  %v24430_v18 = vmov 0  ;;  %v21216_v29 = vadd.s32 18, %v21109_v52  ;;  %v24436_v33 = vsel %vm21243_vm11, 4294967295, %v24435_v33  ;;  %24441 = vst [vmem:[#allocation64_spill] sm:$0xff] %v24440_v51 }
 0x1f5   : > { %24418 = vst [vmem:[#allocation55_spill] sm:$0xff] %v21176_v31  ;;  %v21196_v31 = vadd.s32 18, %v21084_v58  ;;  %v24431_v18 = vsel %vm21211_vm7, 4294967295, %v24430_v18  ;;  %24437 = vst [vmem:[#allocation63_spill] sm:$0xff] %v24436_v33  ;;  %v24455_v8 = vsel %vm21287_vm3, 4294967295, %v24454_v8  ;;  %v24458_v0 = vmov 0 }
 0x1f6   : > { %24423 = vst [vmem:[#allocation56_spill] sm:$0xff] %v21193_v38  ;;  %24432 = vst [vmem:[#allocation60_spill] sm:$0xff] %v24431_v18  ;;  %vm757_vm1 = vcmp.ne.s32.totalorder %v21208_v5, 0  ;;  %v646_v28 = vmul.u32 18, %v645_v1  ;;  %v21308_v53 = vld [vmem:[%s24022_s2] ss:$0 sm:$0xff] }
 0x1f7   : > { %24433 = vst [vmem:[#allocation61_spill] sm:$0xff] %v21216_v29  ;;  %24445 = vst [vmem:[#allocation65_spill] sm:$0xff] %v24444_v17  ;;  %v21323_v1 = vadd.s32 18, %v21193_v38  ;;  %v24464_v39 = vmov 0  ;;  %v21335_v20 = vadd.s32 18, %v21208_v5  ;;  %v678_v56 = vshrl.u32 %v21174_v46, 4 }
 0x1f8   : > { %24446 = vst [vmem:[#allocation66_spill] sm:$0xff] %v21266_v3  ;;  %24451 = vst [vmem:[#allocation67_spill] sm:$0xff] %v24450_v21  ;;  %v21339_v24 = vadd.s32 272, %v20486_v42  ;;  %v24469_v43 = vmov 0  ;;  %v21355_v46 = vmul.u32.u64.low 3817748708, %v21271_v62  ;;  %v21356_v34 = vmul.u32.u64.high 3817748708, %v21271_v62, %v21355_v46 }
 0x1f9   : > { %24456 = vst [vmem:[#allocation68_spill] sm:$0xff] %v24455_v8  ;;  %vm21299_vm8 = vmand %vm24457_vm10, %vm754_vm5  ;;  %vm24462_vm5 = vcmp.ne.s32.totalorder %v21193_v38, 0  ;;  %vm24463_vm10 = vcmp.lt.s32.totalorder %v21193_v38, 0  ;;  %v24475_v38 = vmov 0 }
 0x1fa   : > { %v24459_v0 = vsel %vm21299_vm8, 4294967295, %v24458_v0  ;;  %v16841_v35 = vpop.f32.mrb[0].mxu0  ;;  %24461 = vst [vmem:[#allocation70_spill] sm:$0xff] %v21323_v1  ;;  %vm21330_vm2 = vmand %vm24463_vm10, %vm24462_vm5  ;;  %vm24468_vm5 = vcmp.lt.s32.totalorder %v21208_v5, 0  ;;  %v24480_v1 = vld [vmem:[#allocation9_spill] sm:$0xff] }
 0x1fb   : > { %24460 = vst [vmem:[#allocation69_spill] sm:$0xff] %v24459_v0  ;;  %v17827_v4 = vadd.f32 %v16841_v35, %v20872_v12  ;;  %v5768_v2 = vpop.f32.mrb[1].mxu0  ;;  %v24465_v39 = vsel %vm21330_vm2, 4294967295, %v24464_v39  ;;  %24467 = vst [vmem:[#allocation72_spill] sm:$0xff] %v21335_v20  ;;  %v21361_v0 = vsub.s32 %v21058_v30, %v646_v28  ;;  %v21364_v35 = vadd.s32 256, %v20486_v42 }
 0x1fc   : > { %24466 = vst [vmem:[#allocation71_spill] sm:$0xff] %v24465_v39  ;;  %v17828_v7 = vadd.f32 %v5768_v2, %v20882_v19  ;;  %v16842_v12 = vpop.f32.mrb[2].mxu0  ;;  %vm21350_vm10 = vmand %vm24468_vm5, %vm757_vm1  ;;  %v679_v28 = vmul.u32 18, %v678_v56  ;;  %vm24472_vm1 = vnez %v24323_v45  ;;  %v24482_v30 = vmov 0  ;;  %v24486_v56 = vld [vmem:[#allocation11_spill] sm:$0xff] }
 0x1fd   : > { %v24470_v43 = vsel %vm21350_vm10, 4294967295, %v24469_v43  ;;  %v6064_v19 = vadd.f32 %v17827_v4, %v21308_v53  ;;  %v17829_v2 = vadd.f32 %v16842_v12, %v20891_v55  ;;  %v5771_v33 = vpop.f32.mrb[3].mxu0  ;;  %v21373_v4 = vadd.s32 280, %v20486_v42 }
 0x1fe   : > { %24471 = vst [vmem:[#allocation73_spill] sm:$0xff] %v24470_v43  ;;  %v6062_v26 = vadd.f32 %v17828_v7, %v21308_v53  ;;  %v17830_v3 = vadd.f32 %v5771_v33, %v20903_v13  ;;  %v24473_v33 = vld [vmem:[#allocation8_spill] sm:$0xff]  ;;  %v24497_v20 = vmov 0  ;;  %vm755_vm7 = vcmp.ne.s32.totalorder %v21361_v0, 0 }
 0x1ff   : > { %v6100_v55 = vmax.f32 %v6064_v19, 0.0  ;;  %v6065_v12 = vadd.f32 %v17829_v2, %v21308_v53  ;;  %v24474_v46 = vsel %vm24472_vm1, %v20665_v50, %v24473_v33  ;;  %v24477_v19 = vld [vmem:[#allocation18_spill] sm:$0xff]  ;;  %v24479_v2 = vld [vmem:[#allocation15_spill] sm:$0xff]  ;;  %v24484_v50 = vld [vmem:[#allocation17_spill] sm:$0xff] }
 0x200   : > { %v6098_v7 = vmax.f32 %v6062_v26, 0.0  ;;  %v6063_v13 = vadd.f32 %v17830_v3, %v21308_v53  ;;  %vm21386_vm5 = vcmp.lt.s32.totalorder %v24474_v46, 16  ;;  %vm24478_vm2 = vnez %v24477_v19  ;;  %v24487_v46 = vld [vmem:[#allocation7_spill] sm:$0xff] }
 0x201   : > { %v24476_v38 = vsel %vm21386_vm5, 4294967295, %v24475_v38  ;;  %v24481_v39 = vsel %vm24478_vm2, %v24479_v2, %v24480_v1  ;;  %v21400_v3 = vmul.u32.u64.low 3817748708, %v21339_v24  ;;  %v21401_v26 = vmul.u32.u64.high 3817748708, %v21339_v24, %v21400_v3  ;;  %v24492_v1 = vld [vmem:[#allocation20_spill] sm:$0xff]  ;;  %v24495_v2 = vld [vmem:[#allocation10_spill] sm:$0xff] }
 0x202   : > { %vm21395_vm8 = vcmp.lt.s32.totalorder %v24481_v39, 16  ;;  %v6101_v45 = vmax.f32 %v6065_v12, 0.0  ;;  %vm24485_vm1 = vnez %v24484_v50  ;;  %v24489_v19 = vmov 0  ;;  %v24494_v39 = vld [vmem:[#allocation19_spill] sm:$0xff] }
 0x203   : > { %v24483_v30 = vsel %vm21395_vm8, 4294967295, %v24482_v30  ;;  %v24488_v33 = vsel %vm24485_vm1, %v24486_v56, %v24487_v46  ;;  %vm24493_vm2 = vnez %v24492_v1  ;;  %v6099_v50 = vmax.f32 %v6063_v13, 0.0  ;;  %v16845_v56 = vpop.f32.mrb[4].mxu0 }
 0x204   : > { %vm21409_vm10 = vcmp.lt.s32.totalorder %v24488_v33, 16  ;;  %v24496_v5 = vsel %vm24493_vm2, %v24494_v39, %v24495_v2  ;;  %v21424_v12 = vmul.u32.u64.low 3817748708, %v21364_v35  ;;  %v21425_v3 = vmul.u32.u64.high 3817748708, %v21364_v35, %v21424_v12  ;;  %v24500_v39 = vld [vmem:[#allocation32_spill] sm:$0xff]  ;;  %v5784_v43 = vpop.f32.mrb[5].mxu0 }
 0x205   : > { %v24490_v19 = vsel %vm21409_vm10, 4294967295, %v24489_v19  ;;  %vm21418_vm11 = vcmp.lt.s32.totalorder %v24496_v5, 16  ;;  %vm791_vm1 = vcmp.lt.s32.totalorder %v21361_v0, 0  ;;  %v6208_v5 = vsel %vm21252_vm13, %v6100_v55, 0.0  ;;  %v16846_v51 = vpop.f32.mrb[6].mxu0 }
 0x206   : > { %24491 = vst [vmem:[#allocation8_spill] sm:$0xff] %v24490_v19  ;;  %v24498_v20 = vsel %vm21418_vm11, 4294967295, %v24497_v20  ;;  %v21430_v46 = vmul.u32.u64.low 3817748708, %v21373_v4  ;;  %v21431_v33 = vmul.u32.u64.high 3817748708, %v21373_v4, %v21430_v46  ;;  %v6209_v1 = vsel %vm21261_vm12, %v6101_v45, 0.0  ;;  %v24502_v45 = vld [vmem:[#allocation34_spill] sm:$0xff]  ;;  %vm21459_vm2 = vmand %vm791_vm1, %vm755_vm7 }
 0x207   : > { %24499 = vst [vmem:[#allocation18_spill] sm:$0xff] %v24498_v20  ;;  %v17831_v2 = vadd.f32 %v16845_v56, %v24500_v39  ;;  %v21440_v12 = vadd.s32 18, %v21361_v0  ;;  %v6206_v13 = vsel %vm21278_vm0, %v6098_v7, 0.0  ;;  %v6243_v52 = vpack.c.bf16 %v6209_v1, %v6208_v5  ;;  %v24501_v46 = vld [vmem:[#allocation33_spill] sm:$0xff]  ;;  %v5787_v56 = vpop.f32.mrb[7].mxu0  ;;  %v24503_v5 = vld [vmem:[#allocation38_spill] sm:$0xff] }
 0x208   : > { %v6207_v29 = vsel %vm21287_vm3, %v6099_v50, 0.0  ;;  %v17832_v18 = vadd.f32 %v5784_v43, %v24501_v46  ;;  %v17833_v63 = vadd.f32 %v16846_v51, %v24502_v45  ;;  %v21450_v39 = vsub.s32 %v21112_v54, %v679_v28  ;;  %v24506_v46 = vld [vmem:[#allocation21_spill] sm:$0xff] }
 0x209   : > { %v6242_v55 = vpack.c.bf16 %v6207_v29, %v6206_v13  ;;  %v6068_v17 = vadd.f32 %v17831_v2, %v21308_v53  ;;  %v6269_v49 = vshrl.u32 %v6243_v52, 16  ;;  %v6272_v32 = vshll.u32 %v6243_v52, 16 }
 0x20a   : > { %v6066_v7 = vadd.f32 %v17832_v18, %v21308_v53  ;;  %v17834_v1 = vadd.f32 %v5787_v56, %v24503_v5  ;;  %v6069_v43 = vadd.f32 %v17833_v63, %v21308_v53  ;;  %v24504_v29 = vmov 0  ;;  %v24509_v63 = vld [vmem:[#allocation12_spill] sm:$0xff]  ;;  %v24513_v56 = vld [vmem:[#allocation23_spill] sm:$0xff]  ;;  %v16849_v25 = vpop.f32.mrb[8].mxu0 }
 0x20b   : > { %v6261_v8 = vshrl.u32 %v6242_v55, 16  ;;  %v6264_v50 = vshll.u32 %v6242_v55, 16  ;;  %v6104_v21 = vmax.f32 %v6068_v17, 0.0  ;;  %v24505_v29 = vsel %vm21459_vm2, 4294967295, %v24504_v29  ;;  %v24508_v17 = vld [vmem:[#allocation22_spill] sm:$0xff]  ;;  %v24515_v5 = vld [vmem:[#allocation24_spill] sm:$0xff] }
 0x20c   : > { %v6271_v54 = vrot.slane %v6269_v49, 6  ;;  %v6274_v51 = vrot.slane %v6272_v32, 7  ;;  %v6102_v52 = vmax.f32 %v6066_v7, 0.0  ;;  %v6067_v18 = vadd.f32 %v17834_v1, %v21308_v53  ;;  %v24516_v49 = vld [vmem:[#allocation13_spill] sm:$0xff] }
 0x20d   : > { %v6263_v28 = vrot.slane %v6261_v8, 6  ;;  %v6266_v2 = vrot.slane %v6264_v50, 7  ;;  %v6105_v13 = vmax.f32 %v6069_v43, 0.0  ;;  %vm24507_vm3 = vnez %v24506_v46  ;;  %v24520_v8 = vld [vmem:[#allocation26_spill] sm:$0xff]  ;;  %v24522_v1 = vld [vmem:[#allocation25_spill] sm:$0xff] }
 0x20e   : > { %v24510_v55 = vsel %vm24507_vm3, %v24508_v17, %v24509_v63  ;;  %vm24514_vm7 = vnez %v24513_v56  ;;  %v24518_v7 = vmov 0  ;;  %vm24521_vm12 = vnez %v24520_v8  ;;  %v24523_v50 = vld [vmem:[#allocation14_spill] sm:$0xff] }
 0x20f   : > { %vm21469_vm0 = vcmp.lt.s32.totalorder %v24510_v55, 16  ;;  %v24517_v32 = vsel %vm24514_vm7, %v24515_v5, %v24516_v49  ;;  %v24524_v43 = vsel %vm24521_vm12, %v24522_v1, %v24523_v50  ;;  %v24525_v46 = vmov 0  ;;  %v6440_v55 = vld [vmem:[#allocation2 + $0x8] sm:$0xfe]  ;;  %v24529_v49 = vld [vmem:[#allocation27_spill] sm:$0xff]  ;;  %v5800_v50 = vpop.f32.mrb[9].mxu0 }
 0x210   : > { %vm21478_vm1 = vcmp.lt.s32.totalorder %v24517_v32, 16  ;;  %vm21487_vm13 = vcmp.lt.s32.totalorder %v24524_v43, 16  ;;  %v656_v17 = vshrl.u32 %v21356_v34, 4  ;;  %v6275_v63 = vor.u32 %v6274_v51, %v6271_v54  ;;  %v24527_v5 = vld [vmem:[#allocation28_spill] sm:$0xff] }
 0x211   : > { %v24519_v7 = vsel %vm21478_vm1, 4294967295, %v24518_v7  ;;  %v24526_v46 = vsel %vm21487_vm13, 4294967295, %v24525_v46  ;;  %v6103_v56 = vmax.f32 %v6067_v18, 0.0  ;;  %vm24528_vm3 = vnez %v24527_v5  ;;  %v24530_v32 = vld [vmem:[#allocation16_spill] sm:$0xff] }
 0x212   : > { %v24531_v58 = vsel %vm24528_vm3, %v24529_v49, %v24530_v32  ;;  %v24532_v8 = vmov 0  ;;  %v21506_v34 = vadd.s32 264, %v20486_v42  ;;  %v6267_v54 = vor.u32 %v6266_v2, %v6263_v28  ;;  %v16850_v32 = vpop.f32.mrb[10].mxu0  ;;  %v24535_v2 = vld [vmem:[#allocation5_spill] sm:$0xff] }
 0x213   : > { %vm21497_vm7 = vcmp.lt.s32.totalorder %v24531_v58, 16  ;;  %v6212_v51 = vsel %vm21386_vm5, %v6104_v21, 0.0  ;;  %v6213_v18 = vsel %vm21395_vm8, %v6105_v13, 0.0  ;;  %v17835_v58 = vadd.f32 %v16849_v25, %v21053_v15  ;;  %v5803_v15 = vpop.f32.mrb[11].mxu0 }
 0x214   : > { %v24533_v8 = vsel %vm21497_vm7, 4294967295, %v24532_v8  ;;  %v6210_v43 = vsel %vm21409_vm10, %v6102_v52, 0.0  ;;  %v6245_v5 = vpack.c.bf16 %v6213_v18, %v6212_v51  ;;  %v6211_v49 = vsel %vm21418_vm11, %v6103_v56, 0.0 }
 0x215   : > { %v17836_v42 = vadd.f32 %v5800_v50, %v21060_v27  ;;  %vm24534_vm12 = vsmask.f32 1280  ;;  %vm24536_vm3 = vnez %v24535_v2  ;;  %v6244_v1 = vpack.c.bf16 %v6211_v49, %v6210_v43 }
 0x216   : > { %v6276_v28 = vsel %vm24534_vm12, %v6267_v54, %v6275_v63  ;;  %v6441_v21 = vsel %vm24536_vm3, %v6267_v54, %v6440_v55  ;;  %v6072_v13 = vadd.f32 %v17835_v58, %v21308_v53  ;;  %v6287_v25 = vshrl.u32 %v6245_v5, 16 }
 0x217   : > { %6442 = vst [vmem:[#allocation2 + $0x8] sm:$0xfe] %v6441_v21  ;;  %6443 = vst [vmem:[#allocation2 + $0x10] sm:$0xff] %v6276_v28  ;;  %v6290_v52 = vshll.u32 %v6245_v5, 16  ;;  %v6070_v51 = vadd.f32 %v17836_v42, %v21308_v53  ;;  %v17837_v56 = vadd.f32 %v16850_v32, %v21067_v6  ;;  %v6278_v18 = vshrl.u32 %v6244_v1, 16 }
 0x218   : > { %v6281_v27 = vshll.u32 %v6244_v1, 16  ;;  %v6108_v50 = vmax.f32 %v6072_v13, 0.0  ;;  %v17838_v20 = vadd.f32 %v5803_v15, %v21076_v14  ;;  %v6289_v19 = vrot.slane %v6287_v25, 6  ;;  %v16853_v1 = vpop.f32.mrb[12].mxu0 }
 0x219   : > { %v6292_v2 = vrot.slane %v6290_v52, 7  ;;  %v6106_v55 = vmax.f32 %v6070_v51, 0.0  ;;  %v6073_v54 = vadd.f32 %v17837_v56, %v21308_v53  ;;  %v6280_v58 = vrot.slane %v6278_v18, 6  ;;  %v24559_v52 = vld [vmem:[#allocation49_spill] sm:$0xff]  ;;  %v5816_v56 = vpop.f32.mrb[13].mxu0 }
 0x21a   : > { %v6283_v43 = vrot.slane %v6281_v27, 7  ;;  %v6071_v49 = vadd.f32 %v17838_v20, %v21308_v53  ;;  %v657_v21 = vmul.u32 18, %v656_v17  ;;  %vm24537_vm12 = vnez %v24364_v37  ;;  %v24546_v37 = vld [vmem:[#allocation35_spill] sm:$0xff] }
 0x21b   : > { %v21527_v5 = vor.u32 %v6292_v2, %v6289_v19  ;;  %v6109_v42 = vmax.f32 %v6073_v54, 0.0  ;;  %v24538_v6 = vsel %vm24537_vm12, %v20876_v59, %v20812_v44  ;;  %v24539_v14 = vmov 0  ;;  %v24547_v19 = vld [vmem:[#allocation29_spill] sm:$0xff]  ;;  %v24551_v59 = vld [vmem:[#allocation39_spill] sm:$0xff]  ;;  %v24553_v2 = vld [vmem:[#allocation36_spill] sm:$0xff] }
 0x21c   : > { %vm21534_vm3 = vcmp.lt.s32.totalorder %v24538_v6, 16  ;;  %vm24541_vm11 = vnez %v24367_v60  ;;  %v24543_v20 = vmov 0  ;;  %vm24545_vm8 = vnez %v24372_v22  ;;  %v24554_v60 = vld [vmem:[#allocation30_spill] sm:$0xff] }
 0x21d   : > { %v24540_v14 = vsel %vm21534_vm3, 4294967295, %v24539_v14  ;;  %v24542_v32 = vsel %vm24541_vm11, %v20886_v41, %v20828_v48  ;;  %v24548_v17 = vsel %vm24545_vm8, %v24546_v37, %v24547_v19  ;;  %v24549_v44 = vmov 0  ;;  %v16854_v19 = vpop.f32.mrb[14].mxu0 }
 0x21e   : > { %vm21543_vm10 = vcmp.lt.s32.totalorder %v24542_v32, 16  ;;  %vm21552_vm12 = vcmp.lt.s32.totalorder %v24548_v17, 16  ;;  %vm24552_vm5 = vnez %v24551_v59  ;;  %v24556_v48 = vmov 0  ;;  %v24560_v32 = vld [vmem:[#allocation50_spill] sm:$0xff] }
 0x21f   : > { %v24544_v20 = vsel %vm21543_vm10, 4294967295, %v24543_v20  ;;  %v24550_v44 = vsel %vm21552_vm12, 4294967295, %v24549_v44  ;;  %v24555_v13 = vsel %vm24552_vm5, %v24553_v2, %v24554_v60  ;;  %v6284_v22 = vor.u32 %v6283_v43, %v6280_v58  ;;  %v19025_v58 = vld [vmem:[%s24023_s3 + $0x48] sm:$0xff]   ;;  %v24563_v2 = vld [vmem:[#allocation53_spill] sm:$0xff] }
 0x220   : > { %vm21561_vm2 = vcmp.lt.s32.totalorder %v24555_v13, 16  ;;  %v21566_v41 = vmul.u32.u64.low 3817748708, %v21506_v34  ;;  %v21567_v15 = vmul.u32.u64.high 3817748708, %v21506_v34, %v21566_v41  ;;  %v6107_v25 = vmax.f32 %v6071_v49, 0.0 }
 0x221   : > { %v24557_v48 = vsel %vm21561_vm2, 4294967295, %v24556_v48  ;;  %v17839_v51 = vadd.f32 %v16853_v1, %v24559_v52  ;;  %v711_v18 = vshrl.u32 %v21401_v26, 4  ;;  %v6216_v27 = vsel %vm21469_vm0, %v6108_v50, 0.0  ;;  %v6464_v1 = vld [vmem:[#allocation2 + $0x8] sm:$0xff]  ;;  %v24564_v41 = vld [vmem:[#allocation55_spill] sm:$0xff]  ;;  %v24565_v52 = vld [vmem:[#allocation6_spill] sm:$0xff] }
 0x222   : > { %24558 = vst [vmem:[#allocation15_spill] sm:$0xff] %v24557_v48  ;;  %v6214_v54 = vsel %vm21478_vm1, %v6106_v55, 0.0  ;;  %v6217_v6 = vsel %vm21487_vm13, %v6109_v42, 0.0  ;;  %v17840_v37 = vadd.f32 %v5816_v56, %v24560_v32  ;;  %vm24561_vm11 = vsmask.f32 1280  ;;  %v5819_v55 = vpop.f32.mrb[15].mxu0  ;;  %16892 = vmatmul.mubr.bf16.vlgmr.msra.gmra.mrb[36].mxu1 %v6464_v1 }
 0x223   : > { %v6285_v43 = vsel %vm24561_vm11, %v6275_v63, %v6284_v22  ;;  %vm24562_vm8 = vmmov %vm24561_vm11  ;;  %v6247_v49 = vpack.c.bf16 %v6217_v6, %v6216_v27  ;;  %v6215_v50 = vsel %vm21497_vm7, %v6107_v25, 0.0  ;;  %v6076_v17 = vadd.f32 %v17839_v51, %v21308_v53  ;;  %16895 = vmatprep.mubr.bf16.mxu1 %v6276_v28  ;;  %16928 = vmatpush3.bf16.msra.mxu1 %v24565_v52  ;;  %v19026_v51 = vld [vmem:[%s24023_s3 + $0x50] sm:$0xff]  }
 0x224   : > { %v6294_v26 = vsel %vm24562_vm8, %v6284_v22, %v21527_v5  ;;  %6444 = vst [vmem:[#allocation2 + $0x18] sm:$0xff] %v6285_v43  ;;  %v6246_v42 = vpack.c.bf16 %v6215_v50, %v6214_v54  ;;  %v6074_v59 = vadd.f32 %v17840_v37, %v21308_v53  ;;  %v17841_v60 = vadd.f32 %v16854_v19, %v24563_v2  ;;  %vm24566_vm11 = vmmov %vm24562_vm8 }
 0x225   : > { %6445 = vst [vmem:[#allocation2 + $0x20] sm:$0xff] %v6294_v26  ;;  %v6305_v63 = vshrl.u32 %v6247_v49, 16  ;;  %v6308_v13 = vshll.u32 %v6247_v49, 16  ;;  %v17842_v22 = vadd.f32 %v5819_v55, %v24564_v41  ;;  %v689_v25 = vshrl.u32 %v21425_v3, 4  ;;  %16929 = vmatprep.subr.bf16.mxu1 %v19025_v58  ;;  %v16857_v3 = vpop.f32.mrb[16].mxu0 }
 0x226   : > { %v6296_v56 = vshrl.u32 %v6246_v42, 16  ;;  %v6299_v27 = vshll.u32 %v6246_v42, 16  ;;  %v6112_v6 = vmax.f32 %v6076_v17, 0.0  ;;  %v6110_v54 = vmax.f32 %v6074_v59, 0.0  ;;  %v5832_v59 = vpop.f32.mrb[17].mxu0 }
 0x227   : > { %v6307_v32 = vrot.slane %v6305_v63, 6  ;;  %v6310_v37 = vrot.slane %v6308_v13, 7  ;;  %v6077_v19 = vadd.f32 %v17841_v60, %v21308_v53  ;;  %v6075_v28 = vadd.f32 %v17842_v22, %v21308_v53  ;;  %16930 = vmatpush3.bf16.msra.mxu1 %v19025_v58  ;;  %v16858_v13 = vpop.f32.mrb[18].mxu0  ;;  %v19027_v60 = vld [vmem:[%s24023_s3 + $0x58] sm:$0xff]  }
 0x228   : > { %v6298_v49 = vrot.slane %v6296_v56, 6  ;;  %v6301_v50 = vrot.slane %v6299_v27, 7  ;;  %v21601_v55 = vsub.s32 %v21271_v62, %v657_v21  ;;  %v712_v2 = vmul.u32 18, %v711_v18  ;;  %16931 = vmatprep.subr.bf16.mxu1 %v19026_v51  ;;  %v5835_v56 = vpop.f32.mrb[19].mxu0 }
 0x229   : > { %v21603_v1 = vor.u32 %v6310_v37, %v6307_v32  ;;  %v6113_v42 = vmax.f32 %v6077_v19, 0.0  ;;  %v6111_v17 = vmax.f32 %v6075_v28, 0.0  ;;  %v21609_v41 = vadd.s32 18, %v21450_v39  ;;  %v24570_v37 = vld [vmem:[#allocation31_spill] sm:$0xff] }
 0x22a   : > { %v6302_v63 = vor.u32 %v6301_v50, %v6298_v49  ;;  %v690_v22 = vmul.u32 18, %v689_v25  ;;  %v722_v62 = vshrl.u32 %v21431_v33, 4  ;;  %v6220_v21 = vsel %vm21534_vm3, %v6112_v6, 0.0  ;;  %16896 = vmatmul.mubr.bf16.gmra.mrb[40].mxu1 %v6285_v43  ;;  %v24567_v6 = vld [vmem:[#allocation40_spill] sm:$0xff]  ;;  %v21650_v49 = vld [vmem:[#allocation2] sm:$0xff] }
 0x22b   : > { %v6218_v58 = vsel %vm21543_vm10, %v6110_v54, 0.0  ;;  %v6221_v18 = vsel %vm21552_vm12, %v6113_v42, 0.0  ;;  %v6219_v52 = vsel %vm21561_vm2, %v6111_v17, 0.0  ;;  %16899 = vmatprep.mubr.bf16.mxu1 %v6294_v26  ;;  %vm24568_vm5 = vnez %v24567_v6  ;;  %v24569_v54 = vld [vmem:[#allocation37_spill] sm:$0xff]  ;;  %16932 = vmatpush3.bf16.msra.mxu1 %v19026_v51 }
 0x22c   : > { %v6303_v27 = vsel %vm24562_vm8, %v21527_v5, %v6302_v63  ;;  %v21624_v25 = vsel %vm24566_vm11, %v6302_v63, %v21603_v1  ;;  %v6249_v33 = vpack.c.bf16 %v6221_v18, %v6220_v21  ;;  %v6248_v32 = vpack.c.bf16 %v6219_v52, %v6218_v58  ;;  %v24581_v63 = vld [vmem:[#allocation42_spill] sm:$0xff]  ;;  %v24582_v21 = vld [vmem:[#allocation41_spill] sm:$0xff]  ;;  %16933 = vmatprep.subr.bf16.mxu1 %v19027_v60  ;;  %v19028_v18 = vld [vmem:[%s24023_s3 + $0x60] sm:$0xff]   ;;  %v16649_v52 = vpop.f32.mrb[16].mxu1 }
 0x22d   : > { %6446 = vst [vmem:[#allocation2 + $0x28] sm:$0xff] %v6303_v27  ;;  %6447 = vst [vmem:[#allocation2 + $0x30] sm:$0xff] %v21624_v25  ;;  %v24571_v19 = vsel %vm24568_vm5, %v24569_v54, %v24570_v37  ;;  %v24572_v28 = vmov 0  ;;  %v24575_v5 = vsel %vm21118_vm14, %v21071_v16, %v21033_v61  ;;  %v24576_v43 = vmov 0  ;;  %v24579_v16 = vld [vmem:[#allocation46_spill] sm:$0xff] }
 0x22e   : > { %vm21632_vm2 = vcmp.lt.s32.totalorder %v24571_v19, 16  ;;  %vm21641_vm11 = vcmp.lt.s32.totalorder %v24575_v5, 16  ;;  %v21648_v26 = vsub.s32 %v21339_v24, %v712_v2  ;;  %v6796_v50 = vshll.u32 %v21650_v49, 16  ;;  %v16861_v19 = vpop.f32.mrb[20].mxu0  ;;  %v3560_v5 = vpop.f32.mrb[17].mxu1 }
 0x22f   : > { %v24573_v28 = vsel %vm21632_vm2, 4294967295, %v24572_v28  ;;  %v24577_v43 = vsel %vm21641_vm11, 4294967295, %v24576_v43  ;;  %v6323_v9 = vshrl.u32 %v6249_v33, 16  ;;  %v6326_v42 = vshll.u32 %v6249_v33, 16  ;;  %16934 = vmatpush3.bf16.msra.mxu1 %v19027_v60 }
 0x230   : > { %24574 = vst [vmem:[#allocation9_spill] sm:$0xff] %v24573_v28  ;;  %24578 = vst [vmem:[#allocation17_spill] sm:$0xff] %v24577_v43  ;;  %v6314_v17 = vshrl.u32 %v6248_v32, 16  ;;  %v6317_v61 = vshll.u32 %v6248_v32, 16  ;;  %vm24580_vm14 = vnez %v24579_v16  ;;  %v24584_v58 = vmov 0  ;;  %16935 = vmatprep.subr.bf16.mxu1 %v19028_v18 }
 0x231   : > { %v24583_v51 = vsel %vm24580_vm14, %v24581_v63, %v24582_v21  ;;  %v24587_v24 = vsel %vm21133_vm9, %v21093_v36, %v21050_v57  ;;  %v24588_v2 = vmov 0  ;;  %v21675_v33 = vadd.s32 18, %v21601_v55  ;;  %v5848_v21 = vpop.f32.mrb[21].mxu0 }
 0x232   : > { %vm21658_vm5 = vcmp.lt.s32.totalorder %v24583_v51, 16  ;;  %vm21667_vm12 = vcmp.lt.s32.totalorder %v24587_v24, 16  ;;  %v21678_v32 = vsub.s32 %v21364_v35, %v690_v22  ;;  %v723_v11 = vmul.u32 18, %v722_v62  ;;  %v16650_v51 = vpop.f32.mrb[18].mxu1  ;;  %16900 = vmatmul.mubr.bf16.gmra.mrb[44].mxu1 %v6303_v27 }
 0x233   : > { %v24585_v58 = vsel %vm21658_vm5, 4294967295, %v24584_v58  ;;  %v24589_v2 = vsel %vm21667_vm12, 4294967295, %v24588_v2  ;;  %v700_v6 = vshrl.u32 %v21567_v15, 4  ;;  %v6325_v57 = vrot.slane %v6323_v9, 6  ;;  %v3563_v62 = vpop.f32.mrb[19].mxu1  ;;  %v19029_v9 = vld [vmem:[%s24023_s3 + $0x68] sm:$0xff]   ;;  %16903 = vmatprep.mubr.bf16.mxu1 %v21624_v25  ;;  %16936 = vmatpush3.bf16.msra.mxu1 %v19028_v18 }
 0x234   : > { %24586 = vst [vmem:[#allocation11_spill] sm:$0xff] %v24585_v58  ;;  %24590 = vst [vmem:[#allocation7_spill] sm:$0xff] %v24589_v2  ;;  %v6328_v36 = vrot.slane %v6326_v42, 7  ;;  %v6316_v54 = vrot.slane %v6314_v17, 6  ;;  %v6319_v37 = vrot.slane %v6317_v61, 7  ;;  %v17843_v16 = vadd.f32 %v16857_v3, %v16649_v52  ;;  %16937 = vmatprep.subr.bf16.mxu1 %v19029_v9 }
 0x235   : > { %v17844_v63 = vadd.f32 %v5832_v59, %v3560_v5  ;;  %vm24591_vm9 = vcmp.ne.s32.totalorder %v21450_v39, 0  ;;  %vm24592_vm14 = vcmp.lt.s32.totalorder %v21450_v39, 0  ;;  %v17845_v3 = vadd.f32 %v16858_v13, %v16650_v51  ;;  %v16862_v59 = vpop.f32.mrb[22].mxu0 }
 0x236   : > { %vm21685_vm8 = vmand %vm24592_vm14, %vm24591_vm9  ;;  %v21691_v15 = vor.u32 %v6328_v36, %v6325_v57  ;;  %v6320_v22 = vor.u32 %v6319_v37, %v6316_v54  ;;  %v21694_v60 = vadd.s32 18, %v21648_v26  ;;  %v6080_v42 = vadd.f32 %v17843_v16, %v21308_v53  ;;  %v5851_v24 = vpop.f32.mrb[23].mxu0  ;;  %v24608_v16 = vld [vmem:[#allocation44_spill] sm:$0xff] }
 0x237   : > { %v6078_v17 = vadd.f32 %v17844_v63, %v21308_v53  ;;  %v17846_v61 = vadd.f32 %v5835_v56, %v3563_v62  ;;  %vm24595_vm9 = vcmp.ne.s32.totalorder %v21601_v55, 0  ;;  %vm24596_vm14 = vcmp.lt.s32.totalorder %v21601_v55, 0  ;;  %16938 = vmatpush3.bf16.msra.mxu1 %v19029_v9 }
 0x238   : > { %vm21705_vm3 = vmand %vm24596_vm14, %vm24595_vm9  ;;  %v21710_v52 = vsub.s32 %v21373_v4, %v723_v11  ;;  %vm24599_vm10 = vsmask.f32 1280  ;;  %v6081_v56 = vadd.f32 %v17845_v3, %v21308_v53  ;;  %vm24601_vm9 = vcmp.ne.s32.totalorder %v21648_v26, 0 }
 0x239   : > { %v6321_v57 = vsel %vm24599_vm10, %v21603_v1, %v6320_v22  ;;  %vm24600_vm7 = vmmov %vm24599_vm10  ;;  %vm24602_vm14 = vcmp.lt.s32.totalorder %v21648_v26, 0  ;;  %v6116_v1 = vmax.f32 %v6080_v42, 0.0  ;;  %v6114_v11 = vmax.f32 %v6078_v17, 0.0  ;;  %v24622_v42 = vld [vmem:[#allocation45_spill] sm:$0xff] }
 0x23a   : > { %v21716_v36 = vsel %vm24600_vm7, %v6320_v22, %v21691_v15  ;;  %vm21727_vm1 = vmand %vm24602_vm14, %vm24601_vm9  ;;  %6448 = vst [vmem:[#allocation2 + $0x38] sm:$0xff] %v6321_v57  ;;  %v6079_v27 = vadd.f32 %v17846_v61, %v21308_v53  ;;  %v24605_v37 = vsel %vm21148_vm6, %v21138_v40, %v21074_v23  ;;  %v24609_v63 = vsel %vm21186_vm15, %v21196_v31, %v24608_v16  ;;  %v24613_v22 = vld [vmem:[#allocation54_spill] sm:$0xff]  ;;  %v24615_v23 = vld [vmem:[#allocation51_spill] sm:$0xff] }
 0x23b   : > { %6449 = vst [vmem:[#allocation2 + $0x40] sm:$0xff] %v21716_v36  ;;  %vm21739_vm10 = vcmp.lt.s32.totalorder %v24605_v37, 16  ;;  %vm21748_vm7 = vcmp.lt.s32.totalorder %v24609_v63, 16  ;;  %v24610_v51 = vmov 0  ;;  %v6794_v25 = vshrl.u32 %v21650_v49, 16  ;;  %v24616_v40 = vld [vmem:[#allocation43_spill] sm:$0xff]  ;;  %16904 = vmatmul.mubr.bf16.gmra.mrb[48].mxu1 %v6321_v57 }
 0x23c   : > { %v24611_v51 = vsel %vm21748_vm7, 4294967295, %v24610_v51  ;;  %v6117_v10 = vmax.f32 %v6081_v56, 0.0  ;;  %vm24614_vm9 = vnez %v24613_v22  ;;  %v24618_v62 = vmov 0  ;;  %v24621_v31 = vld [vmem:[#allocation58_spill] sm:$0xff]  ;;  %v19030_v37 = vld [vmem:[%s24023_s3 + $0x70] sm:$0xff]   ;;  %v16653_v22 = vpop.f32.mrb[20].mxu1  ;;  %16907 = vmatprep.mubr.bf16.mxu1 %v21716_v36 }
 0x23d   : > { %24612 = vst [vmem:[#allocation20_spill] sm:$0xff] %v24611_v51  ;;  %v24617_v3 = vsel %vm24614_vm9, %v24615_v23, %v24616_v40  ;;  %v24623_v17 = vsel %vm21200_vm4, %v24621_v31, %v24622_v42  ;;  %v24624_v61 = vmov 0  ;;  %v21776_v56 = vadd.s32 18, %v21678_v32  ;;  %v16865_v42 = vpop.f32.mrb[24].mxu0  ;;  %v3576_v49 = vpop.f32.mrb[21].mxu1  ;;  %16939 = vmatprep.subr.bf16.mxu1 %v19030_v37  ;;  %v24629_v57 = vld [vmem:[#allocation60_spill] sm:$0xff] }
 0x23e   : > { %vm21758_vm6 = vcmp.lt.s32.totalorder %v24617_v3, 16  ;;  %vm21767_vm15 = vcmp.lt.s32.totalorder %v24623_v17, 16  ;;  %v6798_v16 = vrot.slane %v6796_v50, 1  ;;  %v6115_v63 = vmax.f32 %v6079_v27, 0.0  ;;  %v16654_v18 = vpop.f32.mrb[22].mxu1  ;;  %16940 = vmatpush3.bf16.msra.mxu1 %v19030_v37  ;;  %v24645_v37 = vld [vmem:[#allocation69_spill] sm:$0xff] }
 0x23f   : > { %v24619_v62 = vsel %vm21758_vm6, 4294967295, %v24618_v62  ;;  %v24625_v61 = vsel %vm21767_vm15, 4294967295, %v24624_v61  ;;  %vm762_vm4 = vcmp.ne.s32.totalorder %v21710_v52, 0  ;;  %v701_v40 = vmul.u32 18, %v700_v6  ;;  %v5864_v6 = vpop.f32.mrb[25].mxu0  ;;  %v21897_v51 = vld [vmem:[#allocation2 + $0x8] sm:$0xff] }
 0x240   : > { %24626 = vst [vmem:[#allocation19_spill] sm:$0xff] %v24625_v61  ;;  %v6224_v3 = vsel %vm21632_vm2, %v6116_v1, 0.0  ;;  %v6225_v47 = vsel %vm21641_vm11, %v6117_v10, 0.0  ;;  %v17847_v31 = vadd.f32 %v16861_v19, %v16653_v22  ;;  %vm798_vm14 = vcmp.lt.s32.totalorder %v21710_v52, 0  ;;  %v21798_v19 = vpop.f32.mrb[26].mxu0  ;;  %v3579_v22 = vpop.f32.mrb[23].mxu1 }
 0x241   : > { %v6222_v50 = vsel %vm21658_vm5, %v6114_v11, 0.0  ;;  %v6251_v27 = vpack.c.bf16 %v6225_v47, %v6224_v3  ;;  %v6223_v17 = vsel %vm21667_vm12, %v6115_v63, 0.0  ;;  %v17848_v23 = vadd.f32 %v5848_v21, %v3576_v49  ;;  %v19031_v11 = vld [vmem:[%s24023_s3 + $0x78] sm:$0xff]   ;;  %v5867_v47 = vpop.f32.mrb[27].mxu0  ;;  %vm21812_vm9 = vmand %vm798_vm14, %vm762_vm4 }
 0x242   : > { %v6250_v1 = vpack.c.bf16 %v6223_v17, %v6222_v50  ;;  %v6084_v54 = vadd.f32 %v17847_v31, %v21308_v53  ;;  %v17849_v10 = vadd.f32 %v16862_v59, %v16654_v18  ;;  %v21801_v43 = vadd.s32 18, %v21710_v52  ;;  %16941 = vmatprep.subr.bf16.mxu1 %v19031_v11 }
 0x243   : > { %v6341_v63 = vshrl.u32 %v6251_v27, 16  ;;  %v6344_v21 = vshll.u32 %v6251_v27, 16  ;;  %v6082_v3 = vadd.f32 %v17848_v23, %v21308_v53  ;;  %v17850_v9 = vadd.f32 %v5851_v24, %v3579_v22  ;;  %v24632_v22 = vld [vmem:[#allocation47_spill] sm:$0xff]  ;;  %16942 = vmatpush3.bf16.msra.mxu1 %v19031_v11 }
 0x244   : > { %v6332_v49 = vshrl.u32 %v6250_v1, 16  ;;  %v6335_v31 = vshll.u32 %v6250_v1, 16  ;;  %v6120_v59 = vmax.f32 %v6084_v54, 0.0  ;;  %v6085_v18 = vadd.f32 %v17849_v10, %v21308_v53  ;;  %v24631_v10 = vld [vmem:[#allocation61_spill] sm:$0xff] }
 0x245   : > { %v6343_v17 = vrot.slane %v6341_v63, 6  ;;  %v6346_v27 = vrot.slane %v6344_v21, 7  ;;  %v6118_v2 = vmax.f32 %v6082_v3, 0.0  ;;  %v6083_v24 = vadd.f32 %v17850_v9, %v21308_v53  ;;  %v24637_v63 = vld [vmem:[#allocation63_spill] sm:$0xff]  ;;  %v24639_v21 = vld [vmem:[#allocation62_spill] sm:$0xff]  ;;  %v24640_v3 = vld [vmem:[#allocation48_spill] sm:$0xff] }
 0x246   : > { %v6334_v54 = vrot.slane %v6332_v49, 6  ;;  %v6337_v23 = vrot.slane %v6335_v31, 7  ;;  %v6121_v1 = vmax.f32 %v6085_v18, 0.0  ;;  %vm24630_vm12 = vnez %v24629_v57  ;;  %v24647_v49 = vld [vmem:[#allocation66_spill] sm:$0xff]  ;;  %v24648_v31 = vld [vmem:[#allocation52_spill] sm:$0xff] }
 0x247   : > { %v24633_v58 = vsel %vm24630_vm12, %v24631_v10, %v24632_v22  ;;  %v24634_v28 = vmov 0  ;;  %vm24638_vm14 = vnez %v24637_v63  ;;  %v24642_v36 = vmov 0  ;;  %v21852_v10 = vld [vmem:[%s24023_s3 + $0x80] sm:$0xff]  }
 0x248   : > { %vm21823_vm4 = vcmp.lt.s32.totalorder %v24633_v58, 16  ;;  %v24641_v9 = vsel %vm24638_vm14, %v24639_v21, %v24640_v3  ;;  %vm24646_vm5 = vnez %v24645_v37  ;;  %v24650_v57 = vmov 0  ;;  %v16657_v21 = vpop.f32.mrb[24].mxu1  ;;  %v24653_v3 = vld [vmem:[#allocation71_spill] sm:$0xff]  ;;  %v24656_v37 = vld [vmem:[#allocation56_spill] sm:$0xff]  ;;  %16979 = vmatprep.subr.bf16.mxu1 %v21852_v10 }
 0x249   : > { %v24635_v28 = vsel %vm21823_vm4, 4294967295, %v24634_v28  ;;  %vm21832_vm11 = vcmp.lt.s32.totalorder %v24641_v9, 16  ;;  %v24649_v18 = vsel %vm24646_vm5, %v24647_v49, %v24648_v31  ;;  %v21847_v58 = vor.u32 %v6798_v16, %v6794_v25  ;;  %v24655_v9 = vld [vmem:[#allocation70_spill] sm:$0xff] }
 0x24a   : > { %24636 = vst [vmem:[#allocation10_spill] sm:$0xff] %v24635_v28  ;;  %v24643_v36 = vsel %vm21832_vm11, 4294967295, %v24642_v36  ;;  %vm21841_vm2 = vcmp.lt.s32.totalorder %v24649_v18, 16  ;;  %v21854_v22 = vor.u32 %v6346_v27, %v6343_v17  ;;  %v6119_v63 = vmax.f32 %v6083_v24, 0.0 }
 0x24b   : > { %24644 = vst [vmem:[#allocation32_spill] sm:$0xff] %v24643_v36  ;;  %v24651_v57 = vsel %vm21841_vm2, 4294967295, %v24650_v57  ;;  %vm24654_vm5 = vnez %v24653_v3  ;;  %v24658_v31 = vmov 0  ;;  %v21870_v16 = vsub.s32 %v21506_v34, %v701_v40  ;;  %v16869_v3 = vpop.f32.mrb[28].mxu0 }
 0x24c   : > { %24652 = vst [vmem:[#allocation33_spill] sm:$0xff] %v24651_v57  ;;  %v24657_v49 = vsel %vm24654_vm5, %v24655_v9, %v24656_v37  ;;  %v6338_v17 = vor.u32 %v6337_v23, %v6334_v54  ;;  %v6228_v27 = vsel %vm21739_vm10, %v6120_v59, 0.0  ;;  %v6229_v24 = vsel %vm21748_vm7, %v6121_v1, 0.0  ;;  %v3592_v9 = vpop.f32.mrb[25].mxu1  ;;  %v5880_v34 = vpop.f32.mrb[29].mxu0  ;;  %v19037_v57 = vld [vmem:[%s24023_s3 + $0xa8] sm:$0xff]  }
 0x24d   : > { %vm21861_vm14 = vcmp.lt.s32.totalorder %v24657_v49, 16  ;;  %v17851_v18 = vadd.f32 %v16865_v42, %v16657_v21  ;;  %v6226_v37 = vsel %vm21758_vm6, %v6118_v2, 0.0  ;;  %v6253_v49 = vpack.c.bf16 %v6229_v24, %v6228_v27  ;;  %v16658_v40 = vpop.f32.mrb[26].mxu1  ;;  %v16870_v2 = vpop.f32.mrb[30].mxu0 }
 0x24e   : > { %v24659_v31 = vsel %vm21861_vm14, 4294967295, %v24658_v31  ;;  %v6227_v25 = vsel %vm21767_vm15, %v6119_v63, 0.0  ;;  %v17852_v48 = vadd.f32 %v5864_v6, %v3592_v9  ;;  %vm24661_vm5 = vsmask.f32 1280  ;;  %v3595_v1 = vpop.f32.mrb[27].mxu1  ;;  %v5883_v21 = vpop.f32.mrb[31].mxu0 }
 0x24f   : > { %24660 = vst [vmem:[#allocation34_spill] sm:$0xff] %v24659_v31  ;;  %v21882_v59 = vsel %vm24661_vm5, %v21691_v15, %v6338_v17  ;;  %vm24662_vm13 = vmmov %vm24661_vm5  ;;  %v6252_v54 = vpack.c.bf16 %v6227_v25, %v6226_v37  ;;  %v6088_v23 = vadd.f32 %v17851_v18, %v21308_v53  ;;  %v6359_v6 = vshrl.u32 %v6253_v49, 16 }
 0x250   : > { %v21886_v42 = vsel %vm24662_vm13, %v6338_v17, %v21854_v22  ;;  %6450 = vst [vmem:[#allocation2 + $0x48] sm:$0xff] %v21882_v59  ;;  %v6362_v11 = vshll.u32 %v6253_v49, 16  ;;  %v6086_v15 = vadd.f32 %v17852_v48, %v21308_v53  ;;  %v17853_v63 = vadd.f32 %v21798_v19, %v16658_v40  ;;  %16908 = vmatmul.mubr.bf16.gmra.mrb[52].mxu1 %v21882_v59  ;;  %v24663_v40 = vld [vmem:[#allocation73_spill] sm:$0xff] }
 0x251   : > { %6451 = vst [vmem:[#allocation2 + $0x50] sm:$0xff] %v21886_v42  ;;  %v6350_v17 = vshrl.u32 %v6252_v54, 16  ;;  %v6353_v27 = vshll.u32 %v6252_v54, 16  ;;  %v6124_v25 = vmax.f32 %v6088_v23, 0.0  ;;  %v17854_v24 = vadd.f32 %v5867_v47, %v3595_v1  ;;  %16911 = vmatprep.mubr.bf16.mxu1 %v21886_v42  ;;  %v24665_v54 = vld [vmem:[#allocation72_spill] sm:$0xff]  ;;  %v24666_v23 = vld [vmem:[#allocation59_spill] sm:$0xff] }
 0x252   : > { %v6361_v18 = vrot.slane %v6359_v6, 6  ;;  %v6364_v9 = vrot.slane %v6362_v11, 7  ;;  %v6122_v37 = vmax.f32 %v6086_v15, 0.0  ;;  %v6089_v61 = vadd.f32 %v17853_v63, %v21308_v53 }
 0x253   : > { %v6352_v49 = vrot.slane %v6350_v17, 6  ;;  %v6355_v48 = vrot.slane %v6353_v27, 7  ;;  %v6087_v19 = vadd.f32 %v17854_v24, %v21308_v53  ;;  %vm24664_vm13 = vnez %v24663_v40  ;;  %v16661_v17 = vpop.f32.mrb[28].mxu1  ;;  %v16873_v24 = vpop.f32.mrb[32].mxu0 }
 0x254   : > { %v24667_v47 = vsel %vm24664_vm13, %v24665_v54, %v24666_v23  ;;  %v24668_v1 = vmov 0  ;;  %vm24671_vm12 = vnez %v24505_v29  ;;  %v24673_v11 = vmov 0  ;;  %v5896_v54 = vpop.f32.mrb[33].mxu0 }
 0x255   : > { %vm21905_vm5 = vcmp.lt.s32.totalorder %v24667_v47, 16  ;;  %v24672_v6 = vsel %vm24671_vm12, %v21440_v12, %v21361_v0  ;;  %v21919_v15 = vor.u32 %v6364_v9, %v6361_v18  ;;  %v6125_v63 = vmax.f32 %v6089_v61, 0.0  ;;  %v3608_v18 = vpop.f32.mrb[29].mxu1 }
 0x256   : > { %v24669_v1 = vsel %vm21905_vm5, 4294967295, %v24668_v1  ;;  %vm21914_vm15 = vcmp.lt.s32.totalorder %v24672_v6, 16  ;;  %v24676_v27 = vsel %vm21685_vm8, %v21609_v41, %v21450_v39  ;;  %v24677_v29 = vmov 0  ;;  %v16662_v23 = vpop.f32.mrb[30].mxu1 }
 0x257   : > { %24670 = vst [vmem:[#allocation38_spill] sm:$0xff] %v24669_v1  ;;  %v24674_v11 = vsel %vm21914_vm15, 4294967295, %v24673_v11  ;;  %vm21926_vm13 = vcmp.lt.s32.totalorder %v24676_v27, 16  ;;  %v24680_v0 = vsel %vm21705_vm3, %v21675_v33, %v21601_v55  ;;  %v24681_v12 = vmov 0 }
 0x258   : > { %24675 = vst [vmem:[#allocation21_spill] sm:$0xff] %v24674_v11  ;;  %v24678_v29 = vsel %vm21926_vm13, 4294967295, %v24677_v29  ;;  %vm21935_vm12 = vcmp.lt.s32.totalorder %v24680_v0, 16  ;;  %v21941_v35 = vadd.s32 18, %v21870_v16  ;;  %v6356_v61 = vor.u32 %v6355_v48, %v6352_v49  ;;  %v16874_v48 = vpop.f32.mrb[34].mxu0 }
 0x259   : > { %24679 = vst [vmem:[#allocation22_spill] sm:$0xff] %v24678_v29  ;;  %v24682_v12 = vsel %vm21935_vm12, 4294967295, %v24681_v12  ;;  %v6123_v39 = vmax.f32 %v6087_v19, 0.0  ;;  %v17855_v41 = vadd.f32 %v16869_v3, %v16661_v17  ;;  %v6801_v9 = vshll.u32 %v21897_v51, 16  ;;  %v3611_v19 = vpop.f32.mrb[31].mxu1  ;;  %v5899_v17 = vpop.f32.mrb[35].mxu0 }
 0x25a   : > { %24683 = vst [vmem:[#allocation12_spill] sm:$0xff] %v24682_v12  ;;  %v6232_v13 = vsel %vm21823_vm4, %v6124_v25, 0.0  ;;  %v6230_v55 = vsel %vm21832_vm11, %v6122_v37, 0.0  ;;  %v6233_v33 = vsel %vm21841_vm2, %v6125_v63, 0.0  ;;  %v17856_v40 = vadd.f32 %v5880_v34, %v3608_v18 }
 0x25b   : > { %vm24684_vm3 = vcmp.ne.s32.totalorder %v21678_v32, 0  ;;  %vm24685_vm8 = vcmp.lt.s32.totalorder %v21678_v32, 0  ;;  %vm24688_vm6 = vsmask.f32 1280  ;;  %v6255_v49 = vpack.c.bf16 %v6233_v33, %v6232_v13 }
 0x25c   : > { %vm21954_vm7 = vmand %vm24685_vm8, %vm24684_vm3  ;;  %v21960_v25 = vsel %vm24688_vm6, %v21854_v22, %v6356_v61  ;;  %v6231_v34 = vsel %vm21861_vm14, %v6123_v39, 0.0  ;;  %v6092_v6 = vadd.f32 %v17855_v41, %v21308_v53  ;;  %v6090_v22 = vadd.f32 %v17856_v40, %v21308_v53 }
 0x25d   : > { %vm24689_vm11 = vmmov %vm24688_vm6  ;;  %6452 = vst [vmem:[#allocation2 + $0x58] sm:$0xff] %v21960_v25  ;;  %v6254_v47 = vpack.c.bf16 %v6231_v34, %v6230_v55  ;;  %v17857_v63 = vadd.f32 %v16870_v2, %v16662_v23  ;;  %v6377_v27 = vshrl.u32 %v6255_v49, 16  ;;  %v6380_v0 = vshll.u32 %v6255_v49, 16  ;;  %16912 = vmatmul.mubr.bf16.gmra.mrb[56].mxu1 %v21960_v25  ;;  %v16665_v49 = vpop.f32.mrb[32].mxu1 }
 0x25e   : > { %v21964_v37 = vsel %vm24689_vm11, %v6356_v61, %v21919_v15  ;;  %v17858_v61 = vadd.f32 %v5883_v21, %v3611_v19  ;;  %v903_v39 = vsel %vm21954_vm7, %v21776_v56, %v21678_v32  ;;  %vm24690_vm11 = vcmp.ne.s32.totalorder %v21870_v16, 0 }
 0x25f   : > { %6453 = vst [vmem:[#allocation2 + $0x60] sm:$0xff] %v21964_v37  ;;  %vm24691_vm6 = vcmp.lt.s32.totalorder %v21870_v16, 0  ;;  %v6368_v2 = vshrl.u32 %v6254_v47, 16  ;;  %v6371_v41 = vshll.u32 %v6254_v47, 16  ;;  %v6128_v13 = vmax.f32 %v6092_v6, 0.0  ;;  %16915 = vmatprep.mubr.bf16.mxu1 %v21964_v37 }
 0x260   : > { %vm21980_vm3 = vmand %vm24691_vm6, %vm24690_vm11  ;;  %v6126_v55 = vmax.f32 %v6090_v22, 0.0  ;;  %v24694_v21 = vsel %vm21727_vm1, %v21694_v60, %v21648_v26  ;;  %v24695_v32 = vmov 0  ;;  %v24698_v56 = vsel %vm21812_vm9, %v21801_v43, %v21710_v52  ;;  %v3624_v22 = vpop.f32.mrb[33].mxu1 }
 0x261   : > { %vm21990_vm7 = vcmp.lt.s32.totalorder %v24694_v21, 16  ;;  %vm21999_vm8 = vcmp.lt.s32.totalorder %v24698_v56, 16  ;;  %v24699_v33 = vmov 0  ;;  %v6379_v40 = vrot.slane %v6377_v27, 6 }
 0x262   : > { %v24696_v32 = vsel %vm21990_vm7, 4294967295, %v24695_v32  ;;  %v24700_v33 = vsel %vm21999_vm8, 4294967295, %v24699_v33  ;;  %v6382_v4 = vrot.slane %v6380_v0, 7  ;;  %v6093_v23 = vadd.f32 %v17857_v63, %v21308_v53 }
 0x263   : > { %24697 = vst [vmem:[#allocation23_spill] sm:$0xff] %v24696_v32  ;;  %24701 = vst [vmem:[#allocation24_spill] sm:$0xff] %v24700_v33  ;;  %v6091_v26 = vadd.f32 %v17858_v61, %v21308_v53  ;;  %v6370_v60 = vrot.slane %v6368_v2, 6  ;;  %v6373_v3 = vrot.slane %v6371_v41, 7  ;;  %vm22006_vm1 = vcmp.lt.s32.totalorder %v903_v39, 16  ;;  %v16666_v39 = vpop.f32.mrb[34].mxu1 }
 0x264   : > { %v24702_v50 = vmov 0  ;;  %v904_v43 = vsel %vm21980_vm3, %v21941_v35, %v21870_v16  ;;  %v22014_v52 = vrot.slane %v6801_v9, 1  ;;  %v6383_v34 = vor.u32 %v6382_v4, %v6379_v40 }
 0x265   : > { %v24703_v50 = vsel %vm22006_vm1, 4294967295, %v24702_v50  ;;  %v6129_v19 = vmax.f32 %v6093_v23, 0.0  ;;  %v6127_v47 = vmax.f32 %v6091_v26, 0.0  ;;  %v17859_v6 = vadd.f32 %v16873_v24, %v16665_v49  ;;  %v3627_v24 = vpop.f32.mrb[35].mxu1  ;;  %v22038_v26 = vld [vmem:[#allocation2 + $0x10] sm:$0xff] }
 0x266   : > { %24704 = vst [vmem:[#allocation13_spill] sm:$0xff] %v24703_v50  ;;  %v6374_v63 = vor.u32 %v6373_v3, %v6370_v60  ;;  %v6236_v27 = vsel %vm21905_vm5, %v6128_v13, 0.0  ;;  %v6234_v0 = vsel %vm21914_vm15, %v6126_v55, 0.0  ;;  %v17860_v61 = vadd.f32 %v5896_v54, %v3624_v22 }
 0x267   : > { %v6237_v18 = vsel %vm21926_vm13, %v6129_v19, 0.0  ;;  %v6235_v16 = vsel %vm21935_vm12, %v6127_v47, 0.0  ;;  %v6096_v35 = vadd.f32 %v17859_v6, %v21308_v53  ;;  %v17861_v9 = vadd.f32 %v16874_v48, %v16666_v39 }
 0x268   : > { %vm24705_vm9 = vsmask.f32 1280  ;;  %v6257_v13 = vpack.c.bf16 %v6237_v18, %v6236_v27  ;;  %v6256_v54 = vpack.c.bf16 %v6235_v16, %v6234_v0  ;;  %v6094_v21 = vadd.f32 %v17860_v61, %v21308_v53 }
 0x269   : > { %v22027_v2 = vsel %vm24705_vm9, %v21919_v15, %v6374_v63  ;;  %vm24706_vm11 = vmmov %vm24705_vm9  ;;  %v6132_v55 = vmax.f32 %v6096_v35, 0.0  ;;  %v6097_v56 = vadd.f32 %v17861_v9, %v21308_v53  ;;  %v17862_v48 = vadd.f32 %v5899_v17, %v3627_v24 }
 0x26a   : > { %v22030_v41 = vsel %vm24706_vm11, %v6374_v63, %v6383_v34  ;;  %6454 = vst [vmem:[#allocation2 + $0x68] sm:$0xff] %v22027_v2  ;;  %16916 = vmatmul.mubr.bf16.gmra.mrb[60].mxu1 %v22027_v2  ;;  %v6395_v40 = vshrl.u32 %v6257_v13, 16  ;;  %v6398_v15 = vshll.u32 %v6257_v13, 16  ;;  %v6386_v4 = vshrl.u32 %v6256_v54, 16  ;;  %vm24711_vm11 = vmmov %vm24705_vm9 }
 0x26b   : > { %6455 = vst [vmem:[#allocation2 + $0x70] sm:$0xff] %v22030_v41  ;;  %v6389_v23 = vshll.u32 %v6256_v54, 16  ;;  %16919 = vmatprep.mubr.bf16.mxu1 %v22030_v41  ;;  %v6130_v60 = vmax.f32 %v6094_v21, 0.0  ;;  %v6133_v3 = vmax.f32 %v6097_v56, 0.0  ;;  %vm22040_vm6 = vcmp.lt.s32.totalorder %v904_v43, 16  ;;  %v22065_v56 = vld [vmem:[#allocation2 + $0x18] sm:$0xff] }
 0x26c   : > { %v24707_v49 = vmov 0  ;;  %v6095_v19 = vadd.f32 %v17862_v48, %v21308_v53  ;;  %v6397_v47 = vrot.slane %v6395_v40, 6  ;;  %v6400_v17 = vrot.slane %v6398_v15, 7 }
 0x26d   : > { %v24708_v49 = vsel %vm22040_vm6, 4294967295, %v24707_v49  ;;  %v6388_v6 = vrot.slane %v6386_v4, 6  ;;  %v6391_v22 = vrot.slane %v6389_v23, 7  ;;  %v6240_v63 = vsel %vm21990_vm7, %v6132_v55, 0.0 }
 0x26e   : > { %24709 = vst [vmem:[#allocation26_spill] sm:$0xff] %v24708_v49  ;;  %v6241_v27 = vsel %vm21999_vm8, %v6133_v3, 0.0  ;;  %v6131_v0 = vmax.f32 %v6095_v19, 0.0  ;;  %v24168_v61 = vshll.u32 %v22038_v26, 16  ;;  %v6401_v39 = vor.u32 %v6400_v17, %v6397_v47  ;;  %v6460_v3 = vld [vmem:[#allocation2 + $0x98] sm:$0x3] }
 0x26f   : > { %v6392_v43 = vor.u32 %v6391_v22, %v6388_v6  ;;  %v6259_v18 = vpack.c.bf16 %v6241_v27, %v6240_v63  ;;  %vm24710_vm3 = vsmask.f32 7424  ;;  %v6238_v16 = vsel %vm22006_vm1, %v6130_v60, 0.0 }
 0x270   : > { %v6804_v53 = vsel %vm24710_vm3, %v21847_v58, %v22014_v52  ;;  %v6239_v35 = vsel %vm22040_vm6, %v6131_v0, 0.0  ;;  %v6865_v9 = vshll.u32 %v21882_v59, 16  ;;  %v6873_v24 = vshll.u32 %v21886_v42, 16 }
 0x271   : > { %v22060_v13 = vsel %vm24705_vm9, %v6383_v34, %v6392_v43  ;;  %v22063_v54 = vsel %vm24711_vm11, %v6392_v43, %v6401_v39  ;;  %v6413_v55 = vshrl.u32 %v6259_v18, 16  ;;  %v6416_v21 = vshll.u32 %v6259_v18, 16  ;;  %vm24714_vm11 = vmmov %vm24710_vm3 }
 0x272   : > { %6456 = vst [vmem:[#allocation2 + $0x78] sm:$0xff] %v22060_v13  ;;  %6457 = vst [vmem:[#allocation2 + $0x80] sm:$0xff] %v22063_v54  ;;  %v6258_v58 = vpack.c.bf16 %v6239_v35, %v6238_v16  ;;  %16920 = vmatmul.mubr.bf16.gmra.mrb[64].mxu1 %v22060_v13  ;;  %v22070_v48 = vrot.slane %v6865_v9, 1  ;;  %v6869_v40 = vshrl.u32 %v21882_v59, 16  ;;  %v6875_v34 = vrot.slane %v6873_v24, 1  ;;  %v24712_v16 = vld [vmem:[#allocation4_spill] sm:$0xff] }
 0x273   : > { %v6415_v15 = vrot.slane %v6413_v55, 6  ;;  %v6418_v4 = vrot.slane %v6416_v21, 7  ;;  %16923 = vmatprep.mubr.bf16.mxu1 %v22063_v54  ;;  %v6877_v23 = vshrl.u32 %v21886_v42, 16  ;;  %v6881_v60 = vshll.u32 %v21960_v25, 16 }
 0x274   : > { %v6404_v19 = vshrl.u32 %v6258_v58, 16  ;;  %v6407_v47 = vshll.u32 %v6258_v58, 16  ;;  %v24166_v17 = vshll.u32 %v22065_v56, 16  ;;  %v6871_v6 = vor.u32 %v6869_v40, %v22070_v48 }
 0x275   : > { %v6419_v22 = vor.u32 %v6418_v4, %v6415_v15  ;;  %v6879_v63 = vor.u32 %v6877_v23, %v6875_v34  ;;  %v6883_v27 = vrot.slane %v6881_v60, 1  ;;  %v6885_v59 = vshrl.u32 %v21960_v25, 16 }
 0x276   : > { %v6406_v0 = vrot.slane %v6404_v19, 6  ;;  %v6409_v43 = vrot.slane %v6407_v47, 7  ;;  %v22080_v18 = vsel %vm24710_vm3, %v6871_v6, %v6875_v34  ;;  %v6889_v42 = vshll.u32 %v21964_v37, 16 }
 0x277   : > { %vm24713_vm9 = vnez %v24712_v16  ;;  %v22086_v9 = vsel %vm24714_vm11, %v6879_v63, %v6883_v27  ;;  %v6887_v24 = vor.u32 %v6885_v59, %v6883_v27  ;;  %v6893_v55 = vshrl.u32 %v21964_v37, 16 }
 0x278   : > { %v6461_v35 = vsel %vm24713_vm9, %v6419_v22, %v6460_v3  ;;  %v6410_v21 = vor.u32 %v6409_v43, %v6406_v0  ;;  %v6891_v58 = vrot.slane %v6889_v42, 1  ;;  %v6897_v25 = vshll.u32 %v22027_v2, 16 }
 0x279   : > { %6462 = vst [vmem:[#allocation2 + $0x98] sm:$0x3] %v6461_v35  ;;  %v6901_v40 = vshrl.u32 %v22027_v2, 16  ;;  %v6905_v34 = vshll.u32 %v22030_v41, 16  ;;  %v6909_v15 = vshrl.u32 %v22030_v41, 16  ;;  %v6913_v4 = vshll.u32 %v22060_v13, 16 }
 0x27a   : > { %v6917_v23 = vshrl.u32 %v22060_v13, 16  ;;  %vm24715_vm3 = vsmask.f32 1280  ;;  %vm24717_vm9 = vsmask.f32 7424  ;;  %v6895_v19 = vor.u32 %v6893_v55, %v6891_v58  ;;  %v22116_v55 = vld [vmem:[#allocation2 + $0x20] sm:$0xff] }
 0x27b   : > { %v22096_v60 = vsel %vm24715_vm3, %v6401_v39, %v6410_v21  ;;  %vm24716_vm11 = vmmov %vm24715_vm3  ;;  %v22102_v3 = vsel %vm24717_vm9, %v6887_v24, %v6891_v58  ;;  %v6899_v47 = vrot.slane %v6897_v25, 1  ;;  %v6907_v6 = vrot.slane %v6905_v34, 1 }
 0x27c   : > { %v22099_v37 = vsel %vm24716_vm11, %v6410_v21, %v6419_v22  ;;  %6458 = vst [vmem:[#allocation2 + $0x88] sm:$0xff] %v22096_v60  ;;  %16924 = vmatmul.mubr.bf16.gmra.mrb[68].mxu1 %v22096_v60  ;;  %v6915_v63 = vrot.slane %v6913_v4, 1  ;;  %v6921_v27 = vshll.u32 %v22063_v54, 16  ;;  %v6805_v39 = vshrl.u32 %v21897_v51, 16  ;;  %vm24718_vm3 = vmmov %vm24717_vm9 }
 0x27d   : > { %6459 = vst [vmem:[#allocation2 + $0x90] sm:$0xff] %v22099_v37  ;;  %16943 = vmatprep.mubr.bf16.mxu1 %v6804_v53  ;;  %v6811_v22 = vrot.slane %v24168_v61, 1  ;;  %v6929_v59 = vshll.u32 %v22096_v60, 16  ;;  %v22113_v0 = vsel %vm24717_vm9, %v6895_v19, %v6899_v47  ;;  %v6903_v43 = vor.u32 %v6901_v40, %v6899_v47  ;;  %vm24719_vm11 = vmmov %vm24718_vm3 }
 0x27e   : > { %v6911_v42 = vor.u32 %v6909_v15, %v6907_v6  ;;  %v6919_v35 = vor.u32 %v6917_v23, %v6915_v63  ;;  %v6807_v24 = vor.u32 %v6805_v39, %v22014_v52  ;;  %v6923_v21 = vrot.slane %v6921_v27, 1  ;;  %v22130_v15 = vld [vmem:[#allocation2 + $0x28] sm:$0xff]  ;;  %vm24720_vm9 = vmmov %vm24718_vm3 }
 0x27f   : > { %v6925_v58 = vshrl.u32 %v22063_v54, 16  ;;  %v22119_v25 = vrot.slane %v6929_v59, 1  ;;  %v24169_v53 = vshrl.u32 %v22038_v26, 16  ;;  %v6819_v34 = vrot.slane %v24166_v17, 1  ;;  %v19033_v27 = vld [vmem:[%s24023_s3 + $0x88] sm:$0xff]   ;;  %vm24722_vm6 = vmmov %vm24718_vm3 }
 0x280   : > { %v22125_v4 = vsel %vm24718_vm3, %v6903_v43, %v6907_v6  ;;  %v22128_v40 = vsel %vm24719_vm11, %v6911_v42, %v6915_v63  ;;  %v22133_v52 = vsel %vm24720_vm9, %v6919_v35, %v6923_v21  ;;  %v24165_v47 = vshll.u32 %v22116_v55, 16  ;;  %vm24721_vm11 = vmmov %vm24718_vm3 }
 0x281   : > { %v6927_v23 = vor.u32 %v6925_v58, %v6923_v21  ;;  %v6815_v19 = vor.u32 %v24169_v53, %v6811_v22  ;;  %v6812_v6 = vsel %vm24718_vm3, %v6807_v24, %v6811_v22  ;;  %v6833_v59 = vshll.u32 %v22130_v15, 16  ;;  %v19034_v22 = vld [vmem:[%s24023_s3 + $0x90] sm:$0xff]  }
 0x282   : > { %v24167_v43 = vshrl.u32 %v22065_v56, 16  ;;  %v6827_v42 = vrot.slane %v24165_v47, 1  ;;  %v24170_v35 = vrot.slane %v22027_v2, 1  ;;  %v7373_v24 = vrot.slane %v22030_v41, 1  ;;  %v22159_v58 = vld [vmem:[#allocation2 + $0x30] sm:$0xff] }
 0x283   : > { %v22144_v63 = vsel %vm24721_vm11, %v6927_v23, %v22119_v25  ;;  %v6820_v39 = vsel %vm24722_vm6, %v6815_v19, %v6819_v34  ;;  %v7377_v23 = vrot.slane %v22063_v54, 1  ;;  %v22166_v19 = vrot.slane %v22096_v60, 1 }
 0x284   : > { %16944 = vmatmul.mubr.bf16.vlgmr.msra.gmra.mrb[36].mxu1 %v6812_v6  ;;  %v6823_v21 = vor.u32 %v24167_v43, %v6819_v34  ;;  %v24171_v6 = vshrl.u32 %v22116_v55, 16  ;;  %vm24723_vm6 = vcmask 1046528   ;;  %v22174_v34 = vld [vmem:[#allocation2 + $0x38] sm:$0xff]  ;;  %v6841_v43 = vshll.u32 %v22159_v58, 16 }
 0x285   : > { %16947 = vmatprep.mubr.bf16.mxu1 %v6820_v39  ;;  %16980 = vmatpush3.bf16.msra.mxu1 %v21852_v10  ;;  %v22162_v10 = vrot.slane %v22060_v13, 1  ;;  %v6835_v39 = vrot.slane %v6833_v59, 1  ;;  %v22172_v41 = vsel %vm24723_vm6, %v24170_v35, %v7373_v24  ;;  %vm24724_vm9 = vmmov %vm24723_vm6  ;;  %v6837_v53 = vshrl.u32 %v22130_v15, 16  ;;  %v22197_v35 = vld [vmem:[#allocation2 + $0x40] sm:$0xff] }
 0x286   : > { %16981 = vmatprep.subr.bf16.mxu1 %v19033_v27  ;;  %vm24725_vm3 = vmmov %vm24723_vm6  ;;  %v6831_v17 = vor.u32 %v24171_v6, %v6827_v42  ;;  %vm24727_vm6 = vsmask.f32 7424  ;;  %v6845_v6 = vshrl.u32 %v22159_v58, 16  ;;  %v6849_v16 = vshll.u32 %v22174_v34, 16 }
 0x287   : > { %v22178_v13 = vsel %vm24724_vm9, %v7373_v24, %v22162_v10  ;;  %v22182_v54 = vsel %vm24725_vm3, %v22162_v10, %v7377_v23  ;;  %vm24726_vm11 = vmmov %vm24725_vm3  ;;  %v24178_v24 = vrot.slane %v22099_v37, 1  ;;  %v6828_v61 = vsel %vm24727_vm6, %v6823_v21, %v6827_v42 }
 0x288   : > { %v22186_v47 = vsel %vm24726_vm11, %v7377_v23, %v22166_v19  ;;  %vm24728_vm9 = vmmov %vm24727_vm6  ;;  %v6853_v42 = vshrl.u32 %v22174_v34, 16  ;;  %v6843_v21 = vrot.slane %v6841_v43, 1  ;;  %v6861_v33 = vshrl.u32 %v22197_v35, 16 }
 0x289   : > { %16982 = vmatpush3.bf16.msra.mxu1 %v19033_v27  ;;  %v19035_v27 = vld [vmem:[%s24023_s3 + $0x98] sm:$0xff]   ;;  %v6836_v23 = vsel %vm24728_vm9, %v6831_v17, %v6835_v39  ;;  %v22206_v49 = vsel %vm24725_vm3, %v22166_v19, %v24178_v24  ;;  %v6839_v17 = vor.u32 %v6837_v53, %v6835_v39  ;;  %v6857_v50 = vshll.u32 %v22197_v35, 16  ;;  %vm24729_vm11 = vmmov %vm24727_vm6 }
 0x28a   : > { %16983 = vmatprep.subr.bf16.mxu1 %v19034_v22  ;;  %v8249_v32 = vrot.slane %v6837_v53, 1  ;;  %v8252_v12 = vrot.slane %v6833_v59, 2  ;;  %v6851_v29 = vrot.slane %v6849_v16, 1  ;;  %v8258_v24 = vrot.slane %v6845_v6, 1 }
 0x28b   : > { %v8261_v11 = vrot.slane %v6841_v43, 2  ;;  %v8270_v1 = vrot.slane %v6849_v16, 2  ;;  %v6847_v31 = vor.u32 %v6845_v6, %v6843_v21  ;;  %v8276_v39 = vrot.slane %v6861_v33, 1 }
 0x28c   : > { %16948 = vmatmul.mubr.bf16.gmra.mrb[40].mxu1 %v6828_v61  ;;  %v19036_v61 = vld [vmem:[%s24023_s3 + $0xa0] sm:$0xff]   ;;  %v6844_v28 = vsel %vm24729_vm11, %v6839_v17, %v6843_v21  ;;  %v8279_v59 = vrot.slane %v6857_v50, 2  ;;  %vm24730_vm9 = vsmask.f32 6400 }
 0x28d   : > { %16951 = vmatprep.mubr.bf16.mxu1 %v6836_v23  ;;  %16984 = vmatpush3.bf16.msra.mxu1 %v19034_v22  ;;  %v22214_v22 = vor.u32 %v8252_v12, %v8249_v32  ;;  %v8267_v23 = vrot.slane %v6853_v42, 1  ;;  %v8262_v36 = vor.u32 %v8261_v11, %v8258_v24  ;;  %v6852_v43 = vsel %vm24727_vm6, %v6847_v31, %v6851_v29  ;;  %vm24731_vm3 = vmmov %vm24730_vm9  ;;  %v22254_v24 = vld [vmem:[#allocation2 + $0x78] sm:$0xff] }
 0x28e   : > { %16985 = vmatprep.subr.bf16.mxu1 %v19035_v27  ;;  %v22228_v16 = vor.u32 %v8279_v59, %v8276_v39  ;;  %v6859_v11 = vrot.slane %v6857_v50, 1  ;;  %vm24732_vm11 = vmmov %vm24731_vm3  ;;  %v8337_v21 = vshrl.u32 %v22254_v24, 16 }
 0x28f   : > { %v8271_v53 = vor.u32 %v8270_v1, %v8267_v23  ;;  %v22223_v12 = vsel %vm24730_vm9, %v22214_v22, %v8262_v36  ;;  %v19038_v1 = vld [vmem:[%s24023_s3 + $0xb0] sm:$0xff]   ;;  %vm24733_vm9 = vmmov %vm24727_vm6 }
 0x290   : > { %v6863_v6 = vor.u32 %v6861_v33, %v6859_v11 }
 0x291   : > { %16986 = vmatpush3.bf16.msra.mxu1 %v19035_v27  ;;  %v22226_v32 = vsel %vm24731_vm3, %v8262_v36, %v8271_v53  ;;  %v22235_v31 = vsel %vm24732_vm11, %v8271_v53, %v22228_v16  ;;  %v19039_v36 = vld [vmem:[%s24023_s3 + $0xb8] sm:$0xff]   ;;  %vm24734_vm3 = vmmov %vm24727_vm6  ;;  %vm24735_vm11 = vcmask 1046528  }
 0x292   : > { %16987 = vmatprep.subr.bf16.mxu1 %v19036_v61  ;;  %v6868_v50 = vsel %vm24733_vm9, %v6863_v6, %v22070_v48  ;;  %v7292_v48 = vld [vmem:[#allocation2] sm:$0xfe] }
 0x294   : > { %16952 = vmatmul.mubr.bf16.gmra.mrb[44].mxu1 %v6844_v28  ;;  %v6855_v28 = vor.u32 %v6853_v42, %v6851_v29  ;;  %v19040_v29 = vld [vmem:[%s24023_s3 + $0xc0] sm:$0xff]   ;;  %v7346_v42 = vrot.slane %v7292_v48, 1  ;;  %v7351_v48 = vrot.slane %v22065_v56, 1 }
 0x295   : > { %16955 = vmatprep.mubr.bf16.mxu1 %v6852_v43  ;;  %16988 = vmatpush3.bf16.msra.mxu1 %v19036_v61  ;;  %v9770_v43 = vrot.slane %v8337_v21, 2 }
 0x296   : > { %16989 = vmatprep.subr.bf16.mxu1 %v19037_v57  ;;  %v6860_v27 = vsel %vm24727_vm6, %v6855_v28, %v6859_v11  ;;  %vm24736_vm6 = vsmask.f32 5376 }
 0x297   : > { %vm24737_vm9 = vmmov %vm24736_vm6 }
 0x299   : > { %16990 = vmatpush3.bf16.msra.mxu1 %v19037_v57  ;;  %v6776_v57 = vld [vmem:[#allocation2 + $0x90] sm:$0x1] }
 0x29a   : > { %16991 = vmatprep.subr.bf16.mxu1 %v19038_v1  ;;  %v6937_v33 = vshll.u32 %v6776_v57, 16 }
 0x29c   : > { %16956 = vmatmul.mubr.bf16.gmra.mrb[48].mxu1 %v6860_v27 }
 0x29d   : > { %16959 = vmatprep.mubr.bf16.mxu1 %v6868_v50  ;;  %16992 = vmatpush3.bf16.msra.mxu1 %v19038_v1  ;;  %v22292_v50 = vrot.slane %v22038_v26, 1 }
 0x29e   : > { %16993 = vmatprep.subr.bf16.mxu1 %v19039_v36 }
 0x2a1   : > { %16994 = vmatpush3.bf16.msra.mxu1 %v19039_v36 }
 0x2a2   : > { %17031 = vmatprep.subr.bf16.mxu1 %v19040_v29 }
 0x2a4   : > { %16960 = vmatmul.mubr.bf16.gmra.mrb[52].mxu1 %v22080_v18  ;;  %v22256_v18 = vld [vmem:[#allocation2 + $0x80] sm:$0xff] }
 0x2a5   : > { %16963 = vmatprep.mubr.bf16.mxu1 %v22086_v9  ;;  %v22258_v9 = vld [vmem:[#allocation2 + $0x88] sm:$0xff]  ;;  %v24189_v17 = vshll.u32 %v22256_v18, 16 }
 0x2a6   : > { %v24188_v23 = vshrl.u32 %v22258_v9, 16 }
 0x2a7   : > { %v9782_v1 = vrot.slane %v24189_v17, 3 }
 0x2a8   : > { %v9788_v28 = vrot.slane %v24188_v23, 2 }
 0x2ac   : > { %16964 = vmatmul.mubr.bf16.gmra.mrb[56].mxu1 %v22102_v3  ;;  %v6933_v3 = vshrl.u32 %v22096_v60, 16  ;;  %v24187_v60 = vshll.u32 %v22258_v9, 16 }
 0x2ad   : > { %16967 = vmatprep.mubr.bf16.mxu1 %v22113_v0  ;;  %v6939_v0 = vrot.slane %v6937_v33, 1 }
 0x2ae   : > { %v6935_v61 = vor.u32 %v6933_v3, %v22119_v25  ;;  %v9791_v36 = vrot.slane %v24187_v60, 3  ;;  %v24748_v60 = vrot.slane %v22027_v2, 1 }
 0x2b0   : > { %v6940_v53 = vsel %vm24734_vm3, %v6935_v61, %v6939_v0  ;;  %v9792_v3 = vor.u32 %v9791_v36, %v9788_v28  ;;  %v19041_v61 = vld [vmem:[%s24023_s3 + $0xc8] sm:$0xff]   ;;  %vm24738_vm3 = vmmov %vm24735_vm11  ;;  %v19043_v28 = vld [vmem:[%s24023_s3 + $0xd8] sm:$0xff]  }
 0x2b4   : > { %16968 = vmatmul.mubr.bf16.gmra.mrb[60].mxu1 %v22125_v4  ;;  %v22261_v4 = vld [vmem:[#allocation2 + $0x90] sm:$0xff] }
 0x2b5   : > { %16971 = vmatprep.mubr.bf16.mxu1 %v22128_v40  ;;  %v7347_v40 = vrot.slane %v21897_v51, 1  ;;  %v24186_v39 = vshrl.u32 %v22261_v4, 16  ;;  %v24185_v51 = vshll.u32 %v22261_v4, 16 }
 0x2b7   : > { %v7348_v59 = vsel %vm24735_vm11, %v7346_v42, %v7347_v40  ;;  %v9797_v27 = vrot.slane %v24186_v39, 2  ;;  %v9800_v33 = vrot.slane %v24185_v51, 3  ;;  %vm24739_vm11 = vmmov %vm24736_vm6  ;;  %v22366_v51 = vld [vmem:[#allocation2 + $0x60] sm:$0xff] }
 0x2b9   : > { %v22301_v42 = vor.u32 %v9800_v33, %v9797_v27  ;;  %v7357_v27 = vrot.slane %v22159_v58, 1  ;;  %v19045_v33 = vld [vmem:[%s24023_s3 + $0xe8] sm:$0xff]   ;;  %v19046_v58 = vld [vmem:[%s24023_s3 + $0xf0] sm:$0xff]  }
 0x2bc   : > { %16972 = vmatmul.mubr.bf16.gmra.mrb[64].mxu1 %v22133_v52  ;;  %v8340_v52 = vshll.u32 %v22254_v24, 16 }
 0x2bd   : > { %16975 = vmatprep.mubr.bf16.mxu1 %v22144_v63  ;;  %v8346_v63 = vshrl.u32 %v22256_v18, 16 }
 0x2be   : > { %v9773_v25 = vrot.slane %v8340_v52, 3 }
 0x2bf   : > { %v9779_v11 = vrot.slane %v8346_v63, 2 }
 0x2c0   : > { %v22285_v6 = vor.u32 %v9773_v25, %v9770_v43  ;;  %v22313_v43 = vsel %vm24739_vm11, %v9792_v3, %v22301_v42  ;;  %vm24742_vm11 = vmmov %vm24738_vm3 }
 0x2c1   : > { %v9783_v57 = vor.u32 %v9782_v1, %v9779_v11  ;;  %v19042_v11 = vld [vmem:[%s24023_s3 + $0xd0] sm:$0xff]   ;;  %v7353_v1 = vrot.slane %v22116_v55, 1 }
 0x2c3   : > { %v22299_v0 = vsel %vm24736_vm6, %v22285_v6, %v9783_v57  ;;  %vm24740_vm6 = vmmov %vm24738_vm3 }
 0x2c4   : > { %16976 = vmatmul.mubr.bf16.gmra.mrb[68].mxu1 %v6940_v53  ;;  %v22307_v53 = vsel %vm24737_vm9, %v9783_v57, %v9792_v3  ;;  %v22317_v25 = vsel %vm24740_vm6, %v22292_v50, %v7351_v48  ;;  %vm24741_vm9 = vmmov %vm24738_vm3  ;;  %v7359_v57 = vrot.slane %v22174_v34, 1  ;;  %v7361_v34 = vrot.slane %v22197_v35, 1  ;;  %v19048_v35 = vld [vmem:[%s24023_s3 + $0x100] sm:$0xff]  }
 0x2c5   : > { %16995 = vmatprep.mubr.bf16.mxu1 %v7348_v59  ;;  %v7350_v59 = vsel %vm24738_vm3, %v7347_v40, %v22292_v50  ;;  %v7355_v40 = vrot.slane %v22130_v15, 1  ;;  %v7354_v36 = vsel %vm24741_vm9, %v7351_v48, %v7353_v1  ;;  %v19044_v15 = vld [vmem:[%s24023_s3 + $0xe0] sm:$0xff]   ;;  %vm24743_vm6 = vmmov %vm24738_vm3 }
 0x2c6   : > { %v7360_v3 = vsel %vm24743_vm6, %v7357_v27, %v7359_v57  ;;  %vm24744_vm9 = vmmov %vm24738_vm3 }
 0x2c7   : > { %v7358_v48 = vsel %vm24742_vm11, %v7355_v40, %v7357_v27  ;;  %vm24745_vm11 = vmmov %vm24738_vm3 }
 0x2c8   : > { %vm24746_vm6 = vmmov %vm24738_vm3 }
 0x2cc   : > { %16996 = vmatmul.mubr.bf16.vlgmr.msra.gmra.mrb[36].mxu1 %v7350_v59 }
 0x2cd   : > { %16999 = vmatprep.mubr.bf16.mxu1 %v22317_v25  ;;  %17032 = vmatpush3.bf16.msra.mxu1 %v19040_v29  ;;  %v22330_v29 = vsel %vm24738_vm3, %v7353_v1, %v7355_v40  ;;  %v7362_v1 = vsel %vm24744_vm9, %v7359_v57, %v7361_v34  ;;  %vm24747_vm9 = vmmov %vm24738_vm3 }
 0x2ce   : > { %17033 = vmatprep.subr.bf16.mxu1 %v19041_v61 }
 0x2d1   : > { %17034 = vmatpush3.bf16.msra.mxu1 %v19041_v61  ;;  %v22343_v61 = vld [vmem:[#allocation2 + $0x48] sm:$0xff] }
 0x2d2   : > { %17035 = vmatprep.subr.bf16.mxu1 %v19042_v11  ;;  %v7363_v59 = vrot.slane %v22343_v61, 1 }
 0x2d4   : > { %17000 = vmatmul.mubr.bf16.gmra.mrb[40].mxu1 %v7354_v36  ;;  %v7364_v40 = vsel %vm24738_vm3, %v7361_v34, %v7363_v59 }
 0x2d5   : > { %17003 = vmatprep.mubr.bf16.mxu1 %v22330_v29  ;;  %17036 = vmatpush3.bf16.msra.mxu1 %v19042_v11  ;;  %v19047_v11 = vld [vmem:[%s24023_s3 + $0xf8] sm:$0xff]  }
 0x2d6   : > { %17037 = vmatprep.subr.bf16.mxu1 %v19043_v28 }
 0x2d9   : > { %17038 = vmatpush3.bf16.msra.mxu1 %v19043_v28  ;;  %v22355_v28 = vld [vmem:[#allocation2 + $0x50] sm:$0xff] }
 0x2da   : > { %17039 = vmatprep.subr.bf16.mxu1 %v19044_v15  ;;  %v7365_v27 = vrot.slane %v22355_v28, 1 }
 0x2dc   : > { %17004 = vmatmul.mubr.bf16.gmra.mrb[44].mxu1 %v7358_v48  ;;  %v7366_v57 = vsel %vm24745_vm11, %v7363_v59, %v7365_v27  ;;  %v7310_v59 = vld [vmem:[#allocation2 + $0x90] sm:$0x1]  ;;  %vm24749_vm11 = vmmov %vm24738_vm3 }
 0x2dd   : > { %17007 = vmatprep.mubr.bf16.mxu1 %v7360_v3  ;;  %17040 = vmatpush3.bf16.msra.mxu1 %v19044_v15  ;;  %v22357_v15 = vld [vmem:[#allocation2 + $0x58] sm:$0xff] }
 0x2de   : > { %17041 = vmatprep.subr.bf16.mxu1 %v19045_v33 }
 0x2e1   : > { %17042 = vmatpush3.bf16.msra.mxu1 %v19045_v33  ;;  %v7367_v33 = vrot.slane %v22357_v15, 1 }
 0x2e2   : > { %17043 = vmatprep.subr.bf16.mxu1 %v19046_v58 }
 0x2e3   : > { %v7368_v34 = vsel %vm24746_vm6, %v7365_v27, %v7367_v33  ;;  %v7381_v27 = vrot.slane %v7310_v59, 1  ;;  %vm24750_vm6 = vmmov %vm24738_vm3  ;;  %v7752_v59 = vld [vmem:[#allocation2 + $0x98] sm:$0x1] }
 0x2e4   : > { %17008 = vmatmul.mubr.bf16.gmra.mrb[48].mxu1 %v7362_v1 }
 0x2e5   : > { %17011 = vmatprep.mubr.bf16.mxu1 %v7364_v40  ;;  %17044 = vmatpush3.bf16.msra.mxu1 %v19046_v58  ;;  %v7369_v58 = vrot.slane %v22366_v51, 1 }
 0x2e6   : > { %17045 = vmatprep.subr.bf16.mxu1 %v19047_v11 }
 0x2e7   : > { %v7370_v39 = vsel %vm24747_vm9, %v7367_v33, %v7369_v58  ;;  %v7372_v23 = vsel %vm24738_vm3, %v7369_v58, %v24748_v60  ;;  %v7382_v33 = vsel %vm24749_vm11, %v22166_v19, %v7381_v27  ;;  %v19051_v19 = vld [vmem:[%s24023_s3 + $0x118] sm:$0xff]   ;;  %v19054_v60 = vld [vmem:[%s24023_s3 + $0x130] sm:$0xff]   ;;  %vm24751_vm9 = vmmov %vm24738_vm3 }
 0x2e8   : > { %vm24752_vm11 = vmmov %vm24738_vm3 }
 0x2e9   : > { %17046 = vmatpush3.bf16.msra.mxu1 %v19047_v11  ;;  %v7734_v11 = vld [vmem:[#allocation2 + $0x8] sm:$0xfe] }
 0x2ea   : > { %17083 = vmatprep.subr.bf16.mxu1 %v19048_v35  ;;  %v7788_v17 = vrot.slane %v7734_v11, 1 }
 0x2ec   : > { %17012 = vmatmul.mubr.bf16.gmra.mrb[52].mxu1 %v7366_v57  ;;  %v7790_v2 = vsel %vm24750_vm6, %v7788_v17, %v22292_v50  ;;  %v19052_v17 = vld [vmem:[%s24023_s3 + $0x120] sm:$0xff]   ;;  %v19055_v50 = vld [vmem:[%s24023_s3 + $0x138] sm:$0xff]   ;;  %vm24756_vm6 = vmmov %vm24738_vm3 }
 0x2ed   : > { %17015 = vmatprep.mubr.bf16.mxu1 %v7368_v34 }
 0x2f4   : > { %17016 = vmatmul.mubr.bf16.gmra.mrb[56].mxu1 %v7370_v39 }
 0x2f5   : > { %17019 = vmatprep.mubr.bf16.mxu1 %v7372_v23  ;;  %v19053_v23 = vld [vmem:[%s24023_s3 + $0x128] sm:$0xff]  }
 0x2fc   : > { %17020 = vmatmul.mubr.bf16.gmra.mrb[60].mxu1 %v22172_v41  ;;  %v19049_v41 = vld [vmem:[%s24023_s3 + $0x108] sm:$0xff]  }
 0x2fd   : > { %17023 = vmatprep.mubr.bf16.mxu1 %v22178_v13  ;;  %v19050_v13 = vld [vmem:[%s24023_s3 + $0x110] sm:$0xff]  }
 0x304   : > { %17024 = vmatmul.mubr.bf16.gmra.mrb[64].mxu1 %v22182_v54 }
 0x305   : > { %17027 = vmatprep.mubr.bf16.mxu1 %v22186_v47 }
 0x30c   : > { %17028 = vmatmul.mubr.bf16.gmra.mrb[68].mxu1 %v7382_v33 }
 0x30d   : > { %17047 = vmatprep.mubr.bf16.mxu1 %v7790_v2  ;;  %v24754_v2 = vshll.u32 %v22038_v26, 16 }
 0x314   : > { %17048 = vmatmul.mubr.bf16.vlgmr.msra.gmra.mrb[36].mxu1 %v22317_v25  ;;  %v19056_v25 = vld [vmem:[%s24023_s3 + $0x140] sm:$0xff]  }
 0x315   : > { %17051 = vmatprep.mubr.bf16.mxu1 %v7354_v36  ;;  %17084 = vmatpush3.bf16.msra.mxu1 %v19048_v35  ;;  %v22407_v36 = vld [vmem:[#allocation2 + $0x68] sm:$0xff] }
 0x316   : > { %17085 = vmatprep.subr.bf16.mxu1 %v19049_v41 }
 0x319   : > { %17086 = vmatpush3.bf16.msra.mxu1 %v19049_v41  ;;  %v8225_v41 = vrot.slane %v24754_v2, 2 }
 0x31a   : > { %17087 = vmatprep.subr.bf16.mxu1 %v19050_v13 }
 0x31c   : > { %17052 = vmatmul.mubr.bf16.gmra.mrb[40].mxu1 %v22330_v29  ;;  %v22409_v29 = vld [vmem:[#allocation2 + $0x70] sm:$0xff] }
 0x31d   : > { %17055 = vmatprep.mubr.bf16.mxu1 %v7358_v48  ;;  %17088 = vmatpush3.bf16.msra.mxu1 %v19050_v13  ;;  %v7811_v48 = vrot.slane %v22407_v36, 1 }
 0x31e   : > { %17089 = vmatprep.subr.bf16.mxu1 %v19051_v19 }
 0x321   : > { %17090 = vmatpush3.bf16.msra.mxu1 %v19051_v19 }
 0x322   : > { %17091 = vmatprep.subr.bf16.mxu1 %v19052_v17 }
 0x324   : > { %17056 = vmatmul.mubr.bf16.gmra.mrb[44].mxu1 %v7360_v3  ;;  %v7813_v3 = vrot.slane %v22409_v29, 1 }
 0x325   : > { %17059 = vmatprep.mubr.bf16.mxu1 %v7362_v1  ;;  %17092 = vmatpush3.bf16.msra.mxu1 %v19052_v17  ;;  %v7812_v1 = vsel %vm24751_vm9, %v7369_v58, %v7811_v48  ;;  %v24753_v58 = vshrl.u32 %v22038_v26, 16  ;;  %vm24759_vm9 = vsmask.f32 6400  ;;  %v24760_v26 = vshrl.u32 %v22116_v55, 16 }
 0x326   : > { %17093 = vmatprep.subr.bf16.mxu1 %v19053_v23  ;;  %v7816_v35 = vsel %vm24752_vm11, %v7813_v3, %v22162_v10  ;;  %v7823_v10 = vrot.slane %v7752_v59, 1  ;;  %v8283_v59 = vshrl.u32 %v22343_v61, 16 }
 0x327   : > { %v8222_v33 = vrot.slane %v24753_v58, 1  ;;  %v8295_v58 = vshll.u32 %v22355_v28, 16 }
 0x329   : > { %17094 = vmatpush3.bf16.msra.mxu1 %v19053_v23  ;;  %v8226_v19 = vor.u32 %v8225_v41, %v8222_v33  ;;  %v8297_v41 = vrot.slane %v8295_v58, 2 }
 0x32a   : > { %17095 = vmatprep.subr.bf16.mxu1 %v19054_v60 }
 0x32c   : > { %17060 = vmatmul.mubr.bf16.gmra.mrb[48].mxu1 %v7364_v40  ;;  %v7814_v40 = vsel %vm24738_vm3, %v7811_v48, %v7813_v3  ;;  %v8240_v3 = vrot.slane %v24760_v26, 1  ;;  %vm24762_vm3 = vmmov %vm24759_vm9 }
 0x32d   : > { %17063 = vmatprep.mubr.bf16.mxu1 %v7366_v57  ;;  %17096 = vmatpush3.bf16.msra.mxu1 %v19054_v60  ;;  %v8176_v57 = vld [vmem:[#allocation2 + $0x8] sm:$0xfe]  ;;  %v24758_v60 = vshll.u32 %v22065_v56, 16  ;;  %vm24763_vm11 = vmmov %vm24762_vm3 }
 0x32e   : > { %17097 = vmatprep.subr.bf16.mxu1 %v19055_v50 }
 0x331   : > { %17098 = vmatpush3.bf16.msra.mxu1 %v19055_v50  ;;  %v8234_v50 = vrot.slane %v24758_v60, 2 }
 0x332   : > { %17135 = vmatprep.subr.bf16.mxu1 %v19056_v25 }
 0x334   : > { %17064 = vmatmul.mubr.bf16.gmra.mrb[52].mxu1 %v7368_v34  ;;  %v8215_v34 = vshll.u32 %v8176_v57, 16 }
 0x335   : > { %17067 = vmatprep.mubr.bf16.mxu1 %v7370_v39  ;;  %v8212_v39 = vshrl.u32 %v8176_v57, 16 }
 0x336   : > { %v8217_v27 = vrot.slane %v8215_v34, 2 }
 0x337   : > { %v8214_v11 = vrot.slane %v8212_v39, 1  ;;  %v19059_v39 = vld [vmem:[%s24023_s3 + $0x158] sm:$0xff]  }
 0x339   : > { %v8218_v13 = vor.u32 %v8217_v27, %v8214_v11  ;;  %v8286_v11 = vshll.u32 %v22343_v61, 16  ;;  %v8292_v27 = vshrl.u32 %v22355_v28, 16 }
 0x33b   : > { %v8227_v48 = vsel %vm24759_vm9, %v8218_v13, %v8226_v19  ;;  %v8288_v33 = vrot.slane %v8286_v11, 2  ;;  %v8294_v2 = vrot.slane %v8292_v27, 1  ;;  %vm24765_vm9 = vmmov %vm24762_vm3 }
 0x33c   : > { %17068 = vmatmul.mubr.bf16.gmra.mrb[56].mxu1 %v7812_v1 }
 0x33d   : > { %17071 = vmatprep.mubr.bf16.mxu1 %v7814_v40 }
 0x344   : > { %17072 = vmatmul.mubr.bf16.gmra.mrb[60].mxu1 %v7816_v35  ;;  %v19057_v35 = vld [vmem:[%s24023_s3 + $0x148] sm:$0xff]  }
 0x345   : > { %17075 = vmatprep.mubr.bf16.mxu1 %v22182_v54  ;;  %v24755_v54 = vrot.slane %v22099_v37, 1 }
 0x347   : > { %v7824_v17 = vsel %vm24756_vm6, %v24755_v54, %v7823_v10  ;;  %vm24764_vm6 = vmmov %vm24762_vm3  ;;  %v19062_v10 = vld [vmem:[%s24023_s3 + $0x170] sm:$0xff]   ;;  %v8304_v54 = vshll.u32 %v22357_v15, 16 }
 0x34c   : > { %17076 = vmatmul.mubr.bf16.gmra.mrb[64].mxu1 %v22186_v47  ;;  %v24757_v47 = vshrl.u32 %v22065_v56, 16 }
 0x34d   : > { %17079 = vmatprep.mubr.bf16.mxu1 %v22206_v49  ;;  %v24761_v49 = vshll.u32 %v22116_v55, 16  ;;  %v19058_v55 = vld [vmem:[%s24023_s3 + $0x150] sm:$0xff]  }
 0x34e   : > { %v8231_v23 = vrot.slane %v24757_v47, 1  ;;  %v8310_v47 = vshrl.u32 %v22366_v51, 16 }
 0x34f   : > { %v8243_v1 = vrot.slane %v24761_v49, 2  ;;  %v22478_v49 = vld [vmem:[%s24023_s3 + $0x180] sm:$0xff]  }
 0x350   : > { %v8235_v40 = vor.u32 %v8234_v50, %v8231_v23  ;;  %v8306_v50 = vrot.slane %v8304_v54, 2  ;;  %v8312_v26 = vrot.slane %v8310_v47, 1  ;;  %v24772_v47 = vshll.u32 %v22258_v9, 16 }
 0x351   : > { %v8244_v37 = vor.u32 %v8243_v1, %v8240_v3 }
 0x352   : > { %v8236_v57 = vsel %vm24762_vm3, %v8226_v19, %v8235_v40  ;;  %v8301_v19 = vshrl.u32 %v22357_v15, 16 }
 0x353   : > { %v8245_v56 = vsel %vm24763_vm11, %v8235_v40, %v8244_v37  ;;  %v8254_v34 = vsel %vm24764_vm6, %v8244_v37, %v22214_v22  ;;  %v19061_v22 = vld [vmem:[%s24023_s3 + $0x168] sm:$0xff]   ;;  %v8319_v40 = vshrl.u32 %v22407_v36, 16  ;;  %vm24766_vm11 = vmmov %vm24762_vm3 }
 0x354   : > { %17080 = vmatmul.mubr.bf16.gmra.mrb[68].mxu1 %v7824_v17  ;;  %v8298_v17 = vor.u32 %v8297_v41, %v8294_v2  ;;  %v8303_v60 = vrot.slane %v8301_v19, 1  ;;  %vm24767_vm6 = vmmov %vm24762_vm3  ;;  %v8348_v2 = vrot.slane %v8346_v63, 1  ;;  %v24769_v41 = vshll.u32 %v22256_v18, 16 }
 0x355   : > { %17099 = vmatprep.mubr.bf16.mxu1 %v8227_v48 }
 0x356   : > { %v8307_v1 = vor.u32 %v8306_v50, %v8303_v60  ;;  %v8194_v50 = vld [vmem:[#allocation2 + $0x98] sm:$0x3] }
 0x35c   : > { %17100 = vmatmul.mubr.bf16.vlgmr.msra.gmra.mrb[36].mxu1 %v8236_v57  ;;  %v8331_v57 = vshll.u32 %v22409_v29, 16 }
 0x35d   : > { %17103 = vmatprep.mubr.bf16.mxu1 %v8245_v56  ;;  %17136 = vmatpush3.bf16.msra.mxu1 %v19056_v25  ;;  %v19060_v25 = vld [vmem:[%s24023_s3 + $0x160] sm:$0xff]   ;;  %v8308_v56 = vsel %vm24766_vm11, %v8298_v17, %v8307_v1  ;;  %vm24770_vm11 = vmmov %vm24762_vm3 }
 0x35e   : > { %17137 = vmatprep.subr.bf16.mxu1 %v19057_v35 }
 0x361   : > { %17138 = vmatpush3.bf16.msra.mxu1 %v19057_v35  ;;  %v8328_v35 = vshrl.u32 %v22409_v29, 16 }
 0x362   : > { %17139 = vmatprep.subr.bf16.mxu1 %v19058_v55 }
 0x364   : > { %17104 = vmatmul.mubr.bf16.gmra.mrb[40].mxu1 %v8254_v34 }
 0x365   : > { %17107 = vmatprep.mubr.bf16.mxu1 %v22223_v12  ;;  %17140 = vmatpush3.bf16.msra.mxu1 %v19058_v55  ;;  %v8285_v12 = vrot.slane %v8283_v59, 1  ;;  %v8321_v55 = vrot.slane %v8319_v40, 1  ;;  %v8333_v59 = vrot.slane %v8331_v57, 2  ;;  %v8732_v57 = vld [vmem:[#allocation2 + $0x8] sm:$0xfc] }
 0x366   : > { %17141 = vmatprep.subr.bf16.mxu1 %v19059_v39 }
 0x367   : > { %v8289_v13 = vor.u32 %v8288_v33, %v8285_v12  ;;  %v8342_v12 = vrot.slane %v8340_v52, 2  ;;  %v8360_v52 = vrot.slane %v24772_v47, 2  ;;  %v22549_v47 = vld [vmem:[#allocation2 + $0x38] sm:$0xff] }
 0x369   : > { %17142 = vmatpush3.bf16.msra.mxu1 %v19059_v39  ;;  %v8290_v23 = vsel %vm24765_vm9, %v22228_v16, %v8289_v13  ;;  %v8299_v48 = vsel %vm24762_vm3, %v8289_v13, %v8298_v17  ;;  %v8322_v16 = vshll.u32 %v22407_v36, 16  ;;  %vm24768_vm9 = vmmov %vm24762_vm3  ;;  %v24771_v17 = vshrl.u32 %v22258_v9, 16 }
 0x36a   : > { %17143 = vmatprep.subr.bf16.mxu1 %v19060_v25 }
 0x36b   : > { %v8324_v39 = vrot.slane %v8322_v16, 2 }
 0x36c   : > { %17108 = vmatmul.mubr.bf16.gmra.mrb[44].mxu1 %v22226_v32  ;;  %v8313_v32 = vshll.u32 %v22366_v51, 16 }
 0x36d   : > { %17111 = vmatprep.mubr.bf16.mxu1 %v22235_v31  ;;  %17144 = vmatpush3.bf16.msra.mxu1 %v19060_v25  ;;  %v19063_v31 = vld [vmem:[%s24023_s3 + $0x178] sm:$0xff]   ;;  %v8330_v25 = vrot.slane %v8328_v35, 1  ;;  %v8325_v11 = vor.u32 %v8324_v39, %v8321_v55  ;;  %v8786_v39 = vrot.slane %v8732_v57, 2 }
 0x36e   : > { %17145 = vmatprep.subr.bf16.mxu1 %v19061_v22  ;;  %v8315_v3 = vrot.slane %v8313_v32, 2 }
 0x36f   : > { %v8334_v27 = vor.u32 %v8333_v59, %v8330_v25 }
 0x370   : > { %v8316_v37 = vor.u32 %v8315_v3, %v8312_v26  ;;  %v8373_v26 = vshrl.u32 %v8194_v50, 16  ;;  %v8376_v3 = vshll.u32 %v8194_v50, 16 }
 0x371   : > { %17146 = vmatpush3.bf16.msra.mxu1 %v19061_v22  ;;  %v8339_v22 = vrot.slane %v8337_v21, 1  ;;  %v8335_v33 = vsel %vm24762_vm3, %v8325_v11, %v8334_v27  ;;  %v8357_v21 = vrot.slane %v24771_v17, 1  ;;  %v19067_v17 = vld [vmem:[%s24023_s3 + $0x198] sm:$0xff]  }
 0x372   : > { %17147 = vmatprep.subr.bf16.mxu1 %v19062_v10  ;;  %v8317_v34 = vsel %vm24767_vm6, %v8307_v1, %v8316_v37  ;;  %v8326_v58 = vsel %vm24768_vm9, %v8316_v37, %v8325_v11  ;;  %vm24773_vm6 = vmmov %vm24762_vm3  ;;  %v8375_v16 = vrot.slane %v8373_v26, 1  ;;  %v8378_v37 = vrot.slane %v8376_v3, 2  ;;  %v22511_v11 = vld [vmem:[#allocation2 + $0x18] sm:$0xff] }
 0x373   : > { %v8343_v13 = vor.u32 %v8342_v12, %v8339_v22  ;;  %vm24776_vm9 = vmmov %vm24762_vm3  ;;  %v19065_v12 = vld [vmem:[%s24023_s3 + $0x188] sm:$0xff]   ;;  %v8801_v26 = vrot.slane %v22343_v61, 2  ;;  %v8803_v3 = vrot.slane %v22355_v28, 2  ;;  %v19072_v61 = vld [vmem:[%s24023_s3 + $0x1c0] sm:$0xff]   ;;  %v8805_v28 = vrot.slane %v22357_v15, 2 }
 0x374   : > { %17112 = vmatmul.mubr.bf16.gmra.mrb[48].mxu1 %v8290_v23  ;;  %v24775_v23 = vshll.u32 %v22261_v4, 16  ;;  %v8379_v55 = vor.u32 %v8378_v37, %v8375_v16  ;;  %v8807_v37 = vrot.slane %v22366_v51, 2  ;;  %v8813_v15 = vrot.slane %v22254_v24, 2 }
 0x375   : > { %17115 = vmatprep.mubr.bf16.mxu1 %v8299_v48  ;;  %17148 = vmatpush3.bf16.msra.mxu1 %v19062_v10  ;;  %v8351_v10 = vrot.slane %v24769_v41, 2  ;;  %v8344_v54 = vsel %vm24770_vm11, %v8334_v27, %v8343_v13  ;;  %v8361_v48 = vor.u32 %v8360_v52, %v8357_v21  ;;  %vm24777_vm11 = vmmov %vm24762_vm3  ;;  %v22513_v27 = vld [vmem:[#allocation2 + $0x20] sm:$0xff]  ;;  %v22528_v41 = vld [vmem:[#allocation2 + $0x28] sm:$0xff] }
 0x376   : > { %17149 = vmatprep.subr.bf16.mxu1 %v19063_v31  ;;  %v8369_v60 = vrot.slane %v24775_v23, 2  ;;  %v8791_v22 = vrot.slane %v22513_v27, 2  ;;  %v22552_v52 = vld [vmem:[#allocation2 + $0x40] sm:$0xff]  ;;  %v19069_v23 = vld [vmem:[%s24023_s3 + $0x1a8] sm:$0xff]  }
 0x377   : > { %v8352_v19 = vor.u32 %v8351_v10, %v8348_v2  ;;  %v22532_v10 = vld [vmem:[#allocation2 + $0x30] sm:$0xff] }
 0x379   : > { %17150 = vmatpush3.bf16.msra.mxu1 %v19063_v31  ;;  %v8353_v32 = vsel %vm24773_vm6, %v8343_v13, %v8352_v19  ;;  %v24774_v31 = vshrl.u32 %v22261_v4, 16  ;;  %v8362_v40 = vsel %vm24776_vm9, %v8352_v19, %v8361_v48  ;;  %vm24778_vm6 = vcmask 1045504   ;;  %v19066_v13 = vld [vmem:[%s24023_s3 + $0x190] sm:$0xff]  }
 0x37a   : > { %17187 = vmatprep.subr.bf16.mxu1 %v22478_v49  ;;  %vm24779_vm9 = vmmov %vm24778_vm6  ;;  %v8793_v19 = vrot.slane %v22528_v41, 2 }
 0x37b   : > { %v8366_v63 = vrot.slane %v24774_v31, 1  ;;  %v8797_v31 = vrot.slane %v22549_v47, 2 }
 0x37c   : > { %17116 = vmatmul.mubr.bf16.gmra.mrb[52].mxu1 %v8308_v56  ;;  %v8733_v56 = vld [vmem:[#allocation2 + $0x10] sm:$0xff] }
 0x37d   : > { %17119 = vmatprep.mubr.bf16.mxu1 %v8317_v34  ;;  %v8370_v1 = vor.u32 %v8369_v60, %v8366_v63  ;;  %v8787_v34 = vrot.slane %v8733_v56, 2  ;;  %v22559_v63 = vrot.slane %v22552_v52, 2  ;;  %v22589_v56 = vrot.slane %v22407_v36, 2 }
 0x37f   : > { %v8371_v35 = vsel %vm24762_vm3, %v8361_v48, %v8370_v1  ;;  %v8380_v25 = vsel %vm24777_vm11, %v8370_v1, %v8379_v55  ;;  %v8788_v59 = vsel %vm24778_vm6, %v8786_v39, %v8787_v34  ;;  %vm24780_vm3 = vmmov %vm24778_vm6  ;;  %v19070_v48 = vld [vmem:[%s24023_s3 + $0x1b0] sm:$0xff]   ;;  %v19071_v1 = vld [vmem:[%s24023_s3 + $0x1b8] sm:$0xff]   ;;  %v8811_v55 = vrot.slane %v22409_v29, 2 }
 0x380   : > { %vm24781_vm11 = vmmov %vm24780_vm3  ;;  %v22567_v50 = vsel %vm24780_vm3, %v8797_v31, %v22559_v63  ;;  %v8808_v57 = vsel %vm24780_vm3, %v8805_v28, %v8807_v37  ;;  %v8817_v29 = vrot.slane %v22258_v9, 2 }
 0x381   : > { %v22543_v21 = vsel %vm24781_vm11, %v8791_v22, %v8793_v19  ;;  %vm24782_vm6 = vmmov %vm24780_vm3 }
 0x382   : > { %vm24784_vm11 = vmmov %vm24780_vm3 }
 0x384   : > { %17120 = vmatmul.mubr.bf16.gmra.mrb[56].mxu1 %v8326_v58  ;;  %v22516_v58 = vrot.slane %v22511_v11, 2 }
 0x385   : > { %17123 = vmatprep.mubr.bf16.mxu1 %v8335_v33 }
 0x386   : > { %v8790_v33 = vsel %vm24779_vm9, %v8787_v34, %v22516_v58  ;;  %v22526_v2 = vsel %vm24780_vm3, %v22516_v58, %v8791_v22  ;;  %vm24783_vm9 = vmmov %vm24780_vm3  ;;  %v8815_v34 = vrot.slane %v22256_v18, 2  ;;  %v8750_v18 = vld [vmem:[#allocation2 + $0x98] sm:$0x3] }
 0x388   : > { %v22606_v36 = vsel %vm24780_vm3, %v8813_v15, %v8815_v34 }
 0x38c   : > { %17124 = vmatmul.mubr.bf16.gmra.mrb[60].mxu1 %v8344_v54  ;;  %v8795_v54 = vrot.slane %v22532_v10, 2 }
 0x38d   : > { %17127 = vmatprep.mubr.bf16.mxu1 %v8353_v32  ;;  %v19068_v32 = vld [vmem:[%s24023_s3 + $0x1a0] sm:$0xff]  }
 0x38e   : > { %v8798_v60 = vsel %vm24783_vm9, %v8795_v54, %v8797_v31  ;;  %vm24786_vm9 = vmmov %vm24780_vm3  ;;  %v22647_v31 = vld [vmem:[#allocation2 + $0x50] sm:$0xff] }
 0x394   : > { %17128 = vmatmul.mubr.bf16.gmra.mrb[64].mxu1 %v8362_v40  ;;  %v8802_v40 = vsel %vm24784_vm11, %v22559_v63, %v8801_v26  ;;  %vm24787_vm11 = vmmov %vm24780_vm3 }
 0x395   : > { %17131 = vmatprep.mubr.bf16.mxu1 %v8371_v35  ;;  %v8806_v35 = vsel %vm24786_vm9, %v8803_v3, %v8805_v28  ;;  %v8810_v39 = vsel %vm24787_vm11, %v8807_v37, %v22589_v56  ;;  %vm24789_vm9 = vmmov %vm24780_vm3  ;;  %v22673_v37 = vld [vmem:[#allocation2 + $0x98] sm:$0xff] }
 0x396   : > { %vm24790_vm11 = vmmov %vm24780_vm3 }
 0x397   : > { %v8818_v22 = vsel %vm24790_vm11, %v8815_v34, %v8817_v29  ;;  %vm24793_vm11 = vmmov %vm24780_vm3 }
 0x39c   : > { %17132 = vmatmul.mubr.bf16.gmra.mrb[68].mxu1 %v8380_v25  ;;  %v22602_v25 = vsel %vm24789_vm9, %v8811_v55, %v8813_v15  ;;  %vm24792_vm9 = vmmov %vm24780_vm3 }
 0x39d   : > { %17151 = vmatprep.mubr.bf16.mxu1 %v8788_v59  ;;  %v22611_v59 = vrot.slane %v22261_v4, 2  ;;  %v19073_v4 = vld [vmem:[%s24023_s3 + $0x1c8] sm:$0xff]  }
 0x3a4   : > { %17152 = vmatmul.mubr.bf16.vlgmr.msra.gmra.mrb[36].mxu1 %v8790_v33  ;;  %v9174_v33 = vld [vmem:[#allocation2 + $0x10] sm:$0xfc] }
 0x3a5   : > { %17155 = vmatprep.mubr.bf16.mxu1 %v22526_v2  ;;  %17188 = vmatpush3.bf16.msra.mxu1 %v22478_v49  ;;  %v22547_v49 = vsel %vm24782_vm6, %v8793_v19, %v8795_v54  ;;  %vm24785_vm6 = vmmov %vm24780_vm3  ;;  %v19074_v54 = vld [vmem:[%s24023_s3 + $0x1d0] sm:$0xff]  }
 0x3a6   : > { %17189 = vmatprep.subr.bf16.mxu1 %v19065_v12  ;;  %v8804_v16 = vsel %vm24785_vm6, %v8801_v26, %v8803_v3  ;;  %vm24788_vm6 = vmmov %vm24780_vm3 }
 0x3a7   : > { %v22596_v51 = vsel %vm24788_vm6, %v22589_v56, %v8811_v55  ;;  %vm24791_vm6 = vmmov %vm24780_vm3  ;;  %v9660_v55 = vshrl.u32 %v22511_v11, 16 }
 0x3a8   : > { %v22616_v24 = vsel %vm24791_vm6, %v8817_v29, %v22611_v59  ;;  %vm24794_vm6 = vmmov %vm24780_vm3 }
 0x3a9   : > { %17190 = vmatpush3.bf16.msra.mxu1 %v19065_v12  ;;  %v8821_v12 = vrot.slane %v8750_v18, 2 }
 0x3aa   : > { %17191 = vmatprep.subr.bf16.mxu1 %v19066_v13 }
 0x3ab   : > { %v8822_v19 = vsel %vm24792_vm9, %v22611_v59, %v8821_v12  ;;  %vm24795_vm9 = vmmov %vm24780_vm3  ;;  %v9669_v12 = vshrl.u32 %v22513_v27, 16 }
 0x3ac   : > { %17156 = vmatmul.mubr.bf16.gmra.mrb[40].mxu1 %v22543_v21 }
 0x3ad   : > { %17159 = vmatprep.mubr.bf16.mxu1 %v22547_v49  ;;  %17192 = vmatpush3.bf16.msra.mxu1 %v19066_v13  ;;  %v9228_v13 = vrot.slane %v9174_v33, 2  ;;  %v9672_v33 = vshll.u32 %v22513_v27, 16 }
 0x3ae   : > { %17193 = vmatprep.subr.bf16.mxu1 %v19067_v17 }
 0x3af   : > { %v9230_v9 = vsel %vm24780_vm3, %v9228_v13, %v22516_v58  ;;  %v19075_v58 = vld [vmem:[%s24023_s3 + $0x1d8] sm:$0xff]  }
 0x3b1   : > { %17194 = vmatpush3.bf16.msra.mxu1 %v19067_v17  ;;  %v22635_v17 = vld [vmem:[#allocation2 + $0x48] sm:$0xff] }
 0x3b2   : > { %17195 = vmatprep.subr.bf16.mxu1 %v19068_v32 }
 0x3b4   : > { %17160 = vmatmul.mubr.bf16.gmra.mrb[44].mxu1 %v8798_v60 }
 0x3b5   : > { %17163 = vmatprep.mubr.bf16.mxu1 %v22567_v50  ;;  %17196 = vmatpush3.bf16.msra.mxu1 %v19068_v32  ;;  %v19077_v32 = vld [vmem:[%s24023_s3 + $0x1e8] sm:$0xff]  }
 0x3b6   : > { %17197 = vmatprep.subr.bf16.mxu1 %v19069_v23 }
 0x3b9   : > { %17198 = vmatpush3.bf16.msra.mxu1 %v19069_v23  ;;  %v22649_v23 = vld [vmem:[#allocation2 + $0x58] sm:$0xff] }
 0x3ba   : > { %17199 = vmatprep.subr.bf16.mxu1 %v19070_v48  ;;  %v9245_v26 = vrot.slane %v22649_v23, 2 }
 0x3bc   : > { %17164 = vmatmul.mubr.bf16.gmra.mrb[48].mxu1 %v8802_v40  ;;  %v19080_v40 = vld [vmem:[%s24023_s3 + $0x200] sm:$0xff]  }
 0x3bd   : > { %17167 = vmatprep.mubr.bf16.mxu1 %v8804_v16  ;;  %17200 = vmatpush3.bf16.msra.mxu1 %v19070_v48  ;;  %v9243_v48 = vrot.slane %v22647_v31, 2 }
 0x3be   : > { %17201 = vmatprep.subr.bf16.mxu1 %v19071_v1 }
 0x3bf   : > { %v9246_v3 = vsel %vm24795_vm9, %v9243_v48, %v9245_v26  ;;  %vm24798_vm9 = vmmov %vm24780_vm3 }
 0x3c1   : > { %17202 = vmatpush3.bf16.msra.mxu1 %v19071_v1  ;;  %v22661_v1 = vld [vmem:[#allocation2 + $0x60] sm:$0xff] }
 0x3c2   : > { %17239 = vmatprep.subr.bf16.mxu1 %v19072_v61  ;;  %v9247_v16 = vrot.slane %v22661_v1, 2 }
 0x3c4   : > { %17168 = vmatmul.mubr.bf16.gmra.mrb[52].mxu1 %v8806_v35  ;;  %v9616_v35 = vld [vmem:[#allocation2 + $0x10] sm:$0xfc] }
 0x3c5   : > { %17171 = vmatprep.mubr.bf16.mxu1 %v8808_v57  ;;  %v9261_v57 = vrot.slane %v22673_v37, 2  ;;  %v9652_v15 = vshrl.u32 %v9616_v35, 16  ;;  %v9655_v34 = vshll.u32 %v9616_v35, 16 }
 0x3c7   : > { %v9654_v29 = vrot.slane %v9652_v15, 2  ;;  %v9705_v15 = vshrl.u32 %v22552_v52, 16 }
 0x3cc   : > { %17172 = vmatmul.mubr.bf16.gmra.mrb[56].mxu1 %v8810_v39  ;;  %v9663_v39 = vshll.u32 %v22511_v11, 16 }
 0x3cd   : > { %17175 = vmatprep.mubr.bf16.mxu1 %v22596_v51 }
 0x3d4   : > { %17176 = vmatmul.mubr.bf16.gmra.mrb[60].mxu1 %v22602_v25 }
 0x3d5   : > { %17179 = vmatprep.mubr.bf16.mxu1 %v22606_v36 }
 0x3dc   : > { %17180 = vmatmul.mubr.bf16.gmra.mrb[64].mxu1 %v8818_v22 }
 0x3dd   : > { %17183 = vmatprep.mubr.bf16.mxu1 %v22616_v24 }
 0x3e4   : > { %17184 = vmatmul.mubr.bf16.gmra.mrb[68].mxu1 %v8822_v19  ;;  %v9678_v19 = vshrl.u32 %v22528_v41, 16 }
 0x3e5   : > { %17203 = vmatprep.mubr.bf16.mxu1 %v9230_v9  ;;  %v9681_v9 = vshll.u32 %v22528_v41, 16 }
 0x3ec   : > { %17204 = vmatmul.mubr.bf16.vlgmr.msra.gmra.mrb[36].mxu1 %v22526_v2  ;;  %v19076_v2 = vld [vmem:[%s24023_s3 + $0x1e0] sm:$0xff]  }
 0x3ed   : > { %17207 = vmatprep.mubr.bf16.mxu1 %v22543_v21  ;;  %17240 = vmatpush3.bf16.msra.mxu1 %v19072_v61  ;;  %v9241_v21 = vrot.slane %v22635_v17, 2  ;;  %v9248_v61 = vsel %vm24780_vm3, %v9245_v26, %v9247_v16  ;;  %v9696_v26 = vshrl.u32 %v22549_v47, 16 }
 0x3ee   : > { %17241 = vmatprep.subr.bf16.mxu1 %v19073_v4 }
 0x3ef   : > { %v9698_v35 = vrot.slane %v9696_v26, 2 }
 0x3f1   : > { %17242 = vmatpush3.bf16.msra.mxu1 %v19073_v4 }
 0x3f2   : > { %17243 = vmatprep.subr.bf16.mxu1 %v19074_v54 }
 0x3f4   : > { %17208 = vmatmul.mubr.bf16.gmra.mrb[40].mxu1 %v22547_v49  ;;  %v9242_v49 = vsel %vm24793_vm11, %v22559_v63, %v9241_v21  ;;  %v19079_v63 = vld [vmem:[%s24023_s3 + $0x1f8] sm:$0xff]   ;;  %vm24796_vm11 = vmmov %vm24780_vm3 }
 0x3f5   : > { %17211 = vmatprep.mubr.bf16.mxu1 %v8798_v60  ;;  %17244 = vmatpush3.bf16.msra.mxu1 %v19074_v54  ;;  %v19078_v60 = vld [vmem:[%s24023_s3 + $0x1f0] sm:$0xff]   ;;  %v9250_v28 = vsel %vm24796_vm11, %v9247_v16, %v22589_v56  ;;  %v9674_v54 = vrot.slane %v9672_v33, 3 }
 0x3f6   : > { %17245 = vmatprep.subr.bf16.mxu1 %v19075_v58 }
 0x3f9   : > { %17246 = vmatpush3.bf16.msra.mxu1 %v19075_v58 }
 0x3fa   : > { %17247 = vmatprep.subr.bf16.mxu1 %v19076_v2 }
 0x3fc   : > { %17212 = vmatmul.mubr.bf16.gmra.mrb[44].mxu1 %v22567_v50  ;;  %v9244_v50 = vsel %vm24794_vm6, %v9241_v21, %v9243_v48  ;;  %vm24797_vm6 = vmmov %vm24780_vm3  ;;  %vm24799_vm3 = vsmask.f32 5376  ;;  %v9683_v21 = vrot.slane %v9681_v9, 3  ;;  %v19084_v9 = vld [vmem:[%s24023_s3 + $0x220] sm:$0xff]  }
 0x3fd   : > { %17215 = vmatprep.mubr.bf16.mxu1 %v9242_v49  ;;  %17248 = vmatpush3.bf16.msra.mxu1 %v19076_v2  ;;  %v9262_v56 = vsel %vm24797_vm6, %v22611_v59, %v9261_v57  ;;  %v9671_v59 = vrot.slane %v9669_v12, 2  ;;  %v9680_v2 = vrot.slane %v9678_v19, 2  ;;  %v9687_v49 = vshrl.u32 %v22532_v10, 16  ;;  %vm24800_vm11 = vmmov %vm24799_vm3  ;;  %v19089_v19 = vld [vmem:[%s24025_s5 + $0x8] sm:$0xff]  }
 0x3fe   : > { %17249 = vmatprep.subr.bf16.mxu1 %v19077_v32  ;;  %vm24801_vm6 = vmmov %vm24799_vm3 }
 0x3ff   : > { %v9684_v48 = vor.u32 %v9683_v21, %v9680_v2  ;;  %v9689_v16 = vrot.slane %v9687_v49, 2  ;;  %v9735_v2 = vshll.u32 %v22649_v23, 16  ;;  %v19090_v21 = vld [vmem:[%s24025_s5 + $0x10] sm:$0xff]  }
 0x401   : > { %17250 = vmatpush3.bf16.msra.mxu1 %v19077_v32  ;;  %v9675_v32 = vor.u32 %v9674_v54, %v9671_v59  ;;  %v9726_v59 = vshll.u32 %v22647_v31, 16 }
 0x402   : > { %17251 = vmatprep.subr.bf16.mxu1 %v19078_v60 }
 0x404   : > { %17216 = vmatmul.mubr.bf16.gmra.mrb[48].mxu1 %v9244_v50  ;;  %v19081_v50 = vld [vmem:[%s24023_s3 + $0x208] sm:$0xff]  }
 0x405   : > { %17219 = vmatprep.mubr.bf16.mxu1 %v9246_v3  ;;  %17252 = vmatpush3.bf16.msra.mxu1 %v19078_v60  ;;  %v9690_v60 = vshll.u32 %v22532_v10, 16 }
 0x406   : > { %17253 = vmatprep.subr.bf16.mxu1 %v19079_v63 }
 0x409   : > { %17254 = vmatpush3.bf16.msra.mxu1 %v19079_v63  ;;  %v9699_v63 = vshll.u32 %v22549_v47, 16 }
 0x40a   : > { %17291 = vmatprep.subr.bf16.mxu1 %v19080_v40 }
 0x40c   : > { %17220 = vmatmul.mubr.bf16.gmra.mrb[52].mxu1 %v9248_v61  ;;  %v9692_v61 = vrot.slane %v9690_v60, 3 }
 0x40d   : > { %17223 = vmatprep.mubr.bf16.mxu1 %v9250_v28  ;;  %v9685_v28 = vsel %vm24801_vm6, %v9675_v32, %v9684_v48  ;;  %vm24804_vm6 = vmmov %vm24799_vm3 }
 0x414   : > { %17224 = vmatmul.mubr.bf16.gmra.mrb[56].mxu1 %v22596_v51  ;;  %v9192_v51 = vld [vmem:[#allocation2 + $0xa0] sm:$0x3] }
 0x415   : > { %17227 = vmatprep.mubr.bf16.mxu1 %v22602_v25  ;;  %v9662_v25 = vrot.slane %v9660_v55, 2  ;;  %v9263_v18 = vrot.slane %v9192_v51, 2  ;;  %v19082_v55 = vld [vmem:[%s24023_s3 + $0x210] sm:$0xff]   ;;  %v9714_v51 = vshrl.u32 %v22635_v17, 16 }
 0x417   : > { %v9264_v4 = vsel %vm24798_vm9, %v9261_v57, %v9263_v18  ;;  %v9701_v57 = vrot.slane %v9699_v63, 3  ;;  %vm24802_vm9 = vmmov %vm24799_vm3  ;;  %v9716_v12 = vrot.slane %v9714_v51, 2 }
 0x41c   : > { %17228 = vmatmul.mubr.bf16.gmra.mrb[60].mxu1 %v22606_v36  ;;  %v9665_v36 = vrot.slane %v9663_v39, 3  ;;  %v9693_v39 = vor.u32 %v9692_v61, %v9689_v16  ;;  %v22732_v16 = vld [vmem:[#allocation2 + $0x68] sm:$0xff]  ;;  %v19086_v61 = vld [vmem:[%s24023_s3 + $0x230] sm:$0xff]  }
 0x41d   : > { %17231 = vmatprep.mubr.bf16.mxu1 %v8818_v22  ;;  %v9657_v22 = vrot.slane %v9655_v34, 3  ;;  %v9708_v34 = vshll.u32 %v22552_v52, 16 }
 0x41e   : > { %v9666_v13 = vor.u32 %v9665_v36, %v9662_v25  ;;  %v9717_v25 = vshll.u32 %v22635_v17, 16  ;;  %v9694_v36 = vsel %vm24802_vm9, %v9684_v48, %v9693_v39  ;;  %v9728_v48 = vrot.slane %v9726_v59, 3  ;;  %vm24805_vm9 = vmmov %vm24799_vm3 }
 0x420   : > { %v9676_v3 = vsel %vm24800_vm11, %v9666_v13, %v9675_v32  ;;  %v9719_v33 = vrot.slane %v9717_v25, 3  ;;  %v19085_v32 = vld [vmem:[%s24023_s3 + $0x228] sm:$0xff]   ;;  %vm24803_vm11 = vmmov %vm24799_vm3 }
 0x422   : > { %v9720_v54 = vor.u32 %v9719_v33, %v9716_v12  ;;  %v19093_v12 = vld [vmem:[%s24025_s5 + $0x28] sm:$0xff]  }
 0x424   : > { %17232 = vmatmul.mubr.bf16.gmra.mrb[64].mxu1 %v22616_v24  ;;  %v9658_v24 = vor.u32 %v9657_v22, %v9654_v29  ;;  %v9707_v29 = vrot.slane %v9705_v15, 2  ;;  %v9710_v22 = vrot.slane %v9708_v34, 3  ;;  %v9753_v15 = vshll.u32 %v22732_v16, 16  ;;  %v19092_v34 = vld [vmem:[%s24025_s5 + $0x20] sm:$0xff]  }
 0x425   : > { %17235 = vmatprep.mubr.bf16.mxu1 %v9262_v56  ;;  %v9702_v56 = vor.u32 %v9701_v57, %v9698_v35  ;;  %v9741_v35 = vshrl.u32 %v22661_v1, 16  ;;  %v9744_v57 = vshll.u32 %v22661_v1, 16 }
 0x426   : > { %v9667_v58 = vsel %vm24799_vm3, %v9658_v24, %v9666_v13  ;;  %v19088_v13 = vld [vmem:[%s24025_s5] sm:$0xff]   ;;  %v9711_v24 = vor.u32 %v9710_v22, %v9707_v29  ;;  %v9755_v22 = vrot.slane %v9753_v15, 3  ;;  %v10229_v15 = vrot.slane %v22513_v27, 3 }
 0x427   : > { %v9703_v18 = vsel %vm24799_vm3, %v9693_v39, %v9702_v56  ;;  %17343 = vmatprep.subr.bf16.mxu0 %v19088_v13  ;;  %v9750_v39 = vshrl.u32 %v22732_v16, 16  ;;  %v9743_v25 = vrot.slane %v9741_v35, 2  ;;  %v10237_v27 = vrot.slane %v22552_v52, 3 }
 0x428   : > { %17344 = vmatpush3.bf16.msra.mxu0 %v19088_v13  ;;  %v9712_v49 = vsel %vm24803_vm11, %v9702_v56, %v9711_v24  ;;  %v9721_v26 = vsel %vm24804_vm6, %v9711_v24, %v9720_v54  ;;  %v19087_v56 = vld [vmem:[%s24023_s3 + $0x238] sm:$0xff]   ;;  %vm24806_vm11 = vmmov %vm24799_vm3  ;;  %v10245_v52 = vrot.slane %v22661_v1, 3 }
 0x429   : > { %17345 = vmatprep.subr.bf16.mxu0 %v19089_v19  ;;  %v9752_v29 = vrot.slane %v9750_v39, 2  ;;  %vm24807_vm6 = vmmov %vm24799_vm3 }
 0x42c   : > { %17236 = vmatmul.mubr.bf16.gmra.mrb[68].mxu1 %v9264_v4  ;;  %v9723_v4 = vshrl.u32 %v22647_v31, 16  ;;  %17346 = vmatpush3.bf16.msra.mxu0 %v19089_v19 }
 0x42d   : > { %17255 = vmatprep.mubr.bf16.mxu1 %v9667_v58  ;;  %v9732_v58 = vshrl.u32 %v22649_v23, 16  ;;  %17347 = vmatprep.subr.bf16.mxu0 %v19090_v21 }
 0x42e   : > { %v9725_v60 = vrot.slane %v9723_v4, 2 }
 0x42f   : > { %v9734_v63 = vrot.slane %v9732_v58, 2 }
 0x430   : > { %17348 = vmatpush3.bf16.msra.mxu0 %v19090_v21 }
 0x434   : > { %17256 = vmatmul.mubr.bf16.vlgmr.msra.gmra.mrb[36].mxu1 %v9676_v3  ;;  %v19091_v3 = vld [vmem:[%s24025_s5 + $0x18] sm:$0xff]  }
 0x435   : > { %17259 = vmatprep.mubr.bf16.mxu1 %v9685_v28  ;;  %17292 = vmatpush3.bf16.msra.mxu1 %v19080_v40  ;;  %v19083_v40 = vld [vmem:[%s24023_s3 + $0x218] sm:$0xff]   ;;  %v9729_v28 = vor.u32 %v9728_v48, %v9725_v60 }
 0x436   : > { %17293 = vmatprep.subr.bf16.mxu1 %v19081_v50  ;;  %17349 = vmatprep.subr.bf16.mxu0 %v19091_v3 }
 0x437   : > { %v9730_v51 = vsel %vm24805_vm9, %v9720_v54, %v9729_v28  ;;  %17350 = vmatpush3.bf16.msra.mxu0 %v19091_v3  ;;  %vm24808_vm9 = vmmov %vm24799_vm3 }
 0x438   : > { %17351 = vmatprep.subr.bf16.mxu0 %v19092_v34 }
 0x439   : > { %17294 = vmatpush3.bf16.msra.mxu1 %v19081_v50  ;;  %v9737_v50 = vrot.slane %v9735_v2, 3 }
 0x43a   : > { %17295 = vmatprep.subr.bf16.mxu1 %v19082_v55 }
 0x43b   : > { %17352 = vmatpush3.bf16.msra.mxu0 %v19092_v34  ;;  %v10231_v34 = vrot.slane %v22528_v41, 3  ;;  %v10239_v41 = vrot.slane %v22635_v17, 3  ;;  %v10247_v17 = vrot.slane %v22732_v16, 3 }
 0x43c   : > { %17260 = vmatmul.mubr.bf16.gmra.mrb[40].mxu1 %v9694_v36  ;;  %17353 = vmatprep.subr.bf16.mxu0 %v19093_v12 }
 0x43d   : > { %17263 = vmatprep.mubr.bf16.mxu1 %v9703_v18  ;;  %17296 = vmatpush3.bf16.msra.mxu1 %v19082_v55  ;;  %v9738_v55 = vor.u32 %v9737_v50, %v9734_v63  ;;  %v22749_v18 = vld [vmem:[#allocation2 + $0x70] sm:$0xff] }
 0x43e   : > { %17297 = vmatprep.subr.bf16.mxu1 %v19083_v40  ;;  %v9759_v13 = vshrl.u32 %v22749_v18, 16  ;;  %v9762_v19 = vshll.u32 %v22749_v18, 16 }
 0x43f   : > { %v9739_v36 = vsel %vm24799_vm3, %v9729_v28, %v9738_v55  ;;  %17354 = vmatpush3.bf16.msra.mxu0 %v19093_v12 }
 0x440   : > { %v9761_v4 = vrot.slane %v9759_v13, 2  ;;  %v9764_v59 = vrot.slane %v9762_v19, 3  ;;  %v10185_v13 = vld [vmem:[#allocation2 + $0x78] sm:$0xff] }
 0x441   : > { %17298 = vmatpush3.bf16.msra.mxu1 %v19083_v40  ;;  %v9746_v40 = vrot.slane %v9744_v57, 3  ;;  %v10172_v57 = vld [vmem:[#allocation2 + $0x10] sm:$0xf8] }
 0x442   : > { %17299 = vmatprep.subr.bf16.mxu1 %v19084_v9  ;;  %v9765_v58 = vor.u32 %v9764_v59, %v9761_v4  ;;  %v19169_v4 = vld [vmem:[#allocation2 + $0x88] sm:$0xff] }
 0x443   : > { %v9747_v33 = vor.u32 %v9746_v40, %v9743_v25  ;;  %v10255_v16 = vrot.slane %v19169_v4, 3 }
 0x444   : > { %17264 = vmatmul.mubr.bf16.gmra.mrb[44].mxu1 %v9712_v49  ;;  %v9775_v21 = vsel %vm24799_vm3, %v9765_v58, %v22285_v6  ;;  %v9807_v49 = vshll.u32 %v22673_v37, 16 }
 0x445   : > { %17267 = vmatprep.mubr.bf16.mxu1 %v9721_v26  ;;  %17300 = vmatpush3.bf16.msra.mxu1 %v19084_v9  ;;  %v9756_v9 = vor.u32 %v9755_v22, %v9752_v29  ;;  %v9748_v24 = vsel %vm24806_vm11, %v9738_v55, %v9747_v33  ;;  %v9634_v26 = vld [vmem:[#allocation2 + $0xa0] sm:$0x7]  ;;  %vm24809_vm11 = vmmov %vm24799_vm3  ;;  %v10226_v55 = vrot.slane %v10172_v57, 3 }
 0x446   : > { %17301 = vmatprep.subr.bf16.mxu1 %v19085_v32  ;;  %v9809_v48 = vrot.slane %v9807_v49, 3  ;;  %v9813_v63 = vshrl.u32 %v9634_v26, 16  ;;  %v9816_v50 = vshll.u32 %v9634_v26, 16  ;;  %v10190_v49 = vld [vmem:[#allocation2 + $0xa0] sm:$0x7]  ;;  %v19094_v26 = vld [vmem:[%s24025_s5 + $0x30] sm:$0xff]  }
 0x447   : > { %v9757_v54 = vsel %vm24807_vm6, %v9747_v33, %v9756_v9  ;;  %v9766_v2 = vsel %vm24808_vm9, %v9756_v9, %v9765_v58  ;;  %vm24810_vm6 = vmmov %vm24799_vm3  ;;  %vm24811_vm9 = vcmask 1044480   ;;  %v19170_v58 = vld [vmem:[#allocation2 + $0x90] sm:$0xff]  ;;  %17355 = vmatprep.subr.bf16.mxu0 %v19094_v26 }
 0x448   : > { %v9818_v28 = vrot.slane %v9816_v50, 3  ;;  %vm24812_vm3 = vmmov %vm24811_vm9  ;;  %17356 = vmatpush3.bf16.msra.mxu0 %v19094_v26  ;;  %v22815_v50 = vld [vmem:[%s24024_s4] ss:$0 sm:$0xff] }
 0x449   : > { %17302 = vmatpush3.bf16.msra.mxu1 %v19085_v32  ;;  %v9804_v32 = vshrl.u32 %v22673_v37, 16  ;;  %vm24814_vm8 = vmmov %vm24812_vm3 }
 0x44a   : > { %17303 = vmatprep.subr.bf16.mxu1 %v19086_v61 }
 0x44b   : > { %v9806_v60 = vrot.slane %v9804_v32, 2 }
 0x44c   : > { %17268 = vmatmul.mubr.bf16.gmra.mrb[48].mxu1 %v9730_v51 }
 0x44d   : > { %17271 = vmatprep.mubr.bf16.mxu1 %v9739_v36  ;;  %17304 = vmatpush3.bf16.msra.mxu1 %v19086_v61  ;;  %v9810_v3 = vor.u32 %v9809_v48, %v9806_v60  ;;  %v9815_v61 = vrot.slane %v9813_v63, 2  ;;  %v10240_v36 = vsel %vm24812_vm3, %v10237_v27, %v10239_v41  ;;  %v10261_v60 = vrot.slane %v10190_v49, 3  ;;  %v22809_v63 = vld [vmem:[%s24025_s5 + $0x40] sm:$0xff]   ;;  %v10963_v49 = vld [vmem:[#allocation2 + $0x8] sm:$0xfe] }
 0x44e   : > { %17305 = vmatprep.subr.bf16.mxu1 %v19087_v56 }
 0x44f   : > { %v9811_v6 = vsel %vm24809_vm11, %v22301_v42, %v9810_v3  ;;  %v9819_v35 = vor.u32 %v9818_v28, %v9815_v61  ;;  %vm24813_vm11 = vmmov %vm24812_vm3 }
 0x450   : > { %v10232_v42 = vsel %vm24813_vm11, %v10229_v15, %v10231_v34  ;;  %vm24817_vm11 = vmmov %vm24812_vm3 }
 0x451   : > { %17306 = vmatpush3.bf16.msra.mxu1 %v19087_v56  ;;  %v9820_v39 = vsel %vm24810_vm6, %v9810_v3, %v9819_v35  ;;  %v10233_v56 = vrot.slane %v22532_v10, 3  ;;  %vm24815_vm6 = vmmov %vm24812_vm3  ;;  %v10241_v10 = vrot.slane %v22647_v31, 3  ;;  %v10249_v31 = vrot.slane %v22749_v18, 3 }
 0x452   : > { %v10259_v18 = vrot.slane %v22673_v37, 3  ;;  %v19095_v37 = vld [vmem:[%s24025_s5 + $0x38] sm:$0xff]  }
 0x453   : > { %v10234_v51 = vsel %vm24814_vm8, %v10231_v34, %v10233_v56  ;;  %v10242_v29 = vsel %vm24817_vm11, %v10239_v41, %v10241_v10  ;;  %vm24818_vm8 = vmmov %vm24812_vm3  ;;  %v10250_v19 = vsel %vm24812_vm3, %v10247_v17, %v10249_v31  ;;  %17357 = vmatprep.subr.bf16.mxu0 %v19095_v37  ;;  %v24832_v41 = vld [vmem:[#allocation68_spill] sm:$0xff] }
 0x454   : > { %17272 = vmatmul.mubr.bf16.gmra.mrb[52].mxu1 %v9748_v24  ;;  %vm24821_vm11 = vmmov %vm24812_vm3  ;;  %v10186_v24 = vld [vmem:[#allocation2 + $0x80] sm:$0xff]  ;;  %17358 = vmatpush3.bf16.msra.mxu0 %v19095_v37  ;;  %v24838_v37 = vld [vmem:[#allocation18_spill] sm:$0xff] }
 0x455   : > { %17275 = vmatprep.mubr.bf16.mxu1 %v9757_v54  ;;  %v10253_v1 = vrot.slane %v10186_v24, 3  ;;  %17395 = vmatprep.subr.bf16.mxu0 %v22809_v63 }
 0x45c   : > { %17276 = vmatmul.mubr.bf16.gmra.mrb[56].mxu1 %v9766_v2  ;;  %v10257_v2 = vrot.slane %v19170_v58, 3 }
 0x45d   : > { %17279 = vmatprep.mubr.bf16.mxu1 %v9775_v21 }
 0x45e   : > { %v10260_v32 = vsel %vm24812_vm3, %v10257_v2, %v10259_v18 }
 0x464   : > { %17280 = vmatmul.mubr.bf16.gmra.mrb[60].mxu1 %v22299_v0  ;;  %v10227_v0 = vrot.slane %v22511_v11, 3  ;;  %v10235_v11 = vrot.slane %v22549_v47, 3  ;;  %v10243_v47 = vrot.slane %v22649_v23, 3  ;;  %v10251_v23 = vrot.slane %v10185_v13, 3 }
 0x465   : > { %17283 = vmatprep.mubr.bf16.mxu1 %v22307_v53 }
 0x466   : > { %v10228_v53 = vsel %vm24811_vm9, %v10226_v55, %v10227_v0  ;;  %v10236_v25 = vsel %vm24815_vm6, %v10233_v56, %v10235_v11  ;;  %vm24816_vm9 = vmmov %vm24812_vm3  ;;  %v10244_v22 = vsel %vm24818_vm8, %v10241_v10, %v10243_v47  ;;  %v10252_v9 = vsel %vm24821_vm11, %v10249_v31, %v10251_v23  ;;  %v24828_v56 = vld [vmem:[#allocation65_spill] sm:$0xff] }
 0x467   : > { %v10238_v40 = vsel %vm24816_vm9, %v10235_v11, %v10237_v27  ;;  %vm24819_vm6 = vmmov %vm24812_vm3 }
 0x468   : > { %v10246_v12 = vsel %vm24819_vm6, %v10243_v47, %v10245_v52  ;;  %vm24820_vm9 = vmmov %vm24812_vm3 }
 0x469   : > { %v10248_v33 = vsel %vm24820_vm9, %v10245_v52, %v10247_v17  ;;  %vm24822_vm8 = vmmov %vm24812_vm3 }
 0x46a   : > { %v10254_v59 = vsel %vm24822_vm8, %v10251_v23, %v10253_v1  ;;  %vm24823_vm6 = vmmov %vm24812_vm3 }
 0x46b   : > { %v10256_v54 = vsel %vm24823_vm6, %v10253_v1, %v10255_v16  ;;  %vm24824_vm9 = vmmov %vm24812_vm3  ;;  %vm24829_vm6 = vnez %v24828_v56 }
 0x46c   : > { %17284 = vmatmul.mubr.bf16.gmra.mrb[64].mxu1 %v22313_v43  ;;  %v10230_v43 = vsel %vm24812_vm3, %v10227_v0, %v10229_v15  ;;  %v10258_v21 = vsel %vm24824_vm9, %v10255_v16, %v10257_v2  ;;  %vm24825_vm11 = vmmov %vm24812_vm3  ;;  %vm24833_vm3 = vnez %v24832_v41 }
 0x46d   : > { %17287 = vmatprep.mubr.bf16.mxu1 %v9811_v6  ;;  %v10262_v48 = vsel %vm24825_vm11, %v10259_v18, %v10261_v60  ;;  %vm24834_vm11 = vnez %v24476_v38  ;;  %v24836_v60 = vld [vmem:[#allocation8_spill] sm:$0xff] }
 0x474   : > { %17288 = vmatmul.mubr.bf16.gmra.mrb[68].mxu1 %v9820_v39 }
 0x475   : > { %17307 = vmatprep.mubr.bf16.mxu1 %v10228_v53 }
 0x47c   : > { %17308 = vmatmul.mubr.bf16.vlgmr.msra.gmra.mrb[36].mxu1 %v10230_v43  ;;  %v24826_v43 = vld [vmem:[#allocation64_spill] sm:$0xff] }
 0x47d   : > { %17311 = vmatprep.mubr.bf16.mxu1 %v10232_v42  ;;  %vm24827_vm8 = vnez %v24826_v43 }
 0x484   : > { %17312 = vmatmul.mubr.bf16.gmra.mrb[40].mxu1 %v10234_v51  ;;  %v24830_v51 = vld [vmem:[#allocation67_spill] sm:$0xff] }
 0x485   : > { %17315 = vmatprep.mubr.bf16.mxu1 %v10236_v25  ;;  %vm24831_vm9 = vnez %v24830_v51 }
 0x48c   : > { %17316 = vmatmul.mubr.bf16.gmra.mrb[44].mxu1 %v10238_v40 }
 0x48d   : > { %17319 = vmatprep.mubr.bf16.mxu1 %v10240_v36 }
 0x494   : > { %17320 = vmatmul.mubr.bf16.gmra.mrb[48].mxu1 %v10242_v29 }
 0x495   : > { %17323 = vmatprep.mubr.bf16.mxu1 %v10244_v22 }
 0x49c   : > { %17324 = vmatmul.mubr.bf16.gmra.mrb[52].mxu1 %v10246_v12 }
 0x49d   : > { %17327 = vmatprep.mubr.bf16.mxu1 %v10248_v33 }
 0x4a4   : > { %17328 = vmatmul.mubr.bf16.gmra.mrb[56].mxu1 %v10250_v19 }
 0x4a5   : > { %17331 = vmatprep.mubr.bf16.mxu1 %v10252_v9 }
 0x4ac   : > { %17332 = vmatmul.mubr.bf16.gmra.mrb[60].mxu1 %v10254_v59 }
 0x4ad   : > { %17335 = vmatprep.mubr.bf16.mxu1 %v10256_v54 }
 0x4b4   : > { %17336 = vmatmul.mubr.bf16.gmra.mrb[64].mxu1 %v10258_v21 }
 0x4b5   : > { %17339 = vmatprep.mubr.bf16.mxu1 %v10260_v32 }
 0x4bc   : > { %17340 = vmatmul.mubr.bf16.gmra.mrb[68].mxu1 %v10262_v48 }
 0x54f   : > { %v17309_v3 = vpop.f32.mrb[36].mxu1 }
 0x550   : > { %v10659_v61 = vadd.f32 %v17309_v3, %v22815_v50  ;;  %v10363_v28 = vpop.f32.mrb[37].mxu1 }
 0x551   : > { %v10657_v6 = vadd.f32 %v22815_v50, %v10363_v28  ;;  %v17310_v35 = vpop.f32.mrb[38].mxu1 }
 0x552   : > { %v10695_v57 = vmax.f32 %v10659_v61, 0.0  ;;  %v10660_v0 = vadd.f32 %v17310_v35, %v22815_v50  ;;  %v10366_v55 = vpop.f32.mrb[39].mxu1 }
 0x553   : > { %v10693_v39 = vmax.f32 %v10657_v6, 0.0  ;;  %v10658_v53 = vadd.f32 %v22815_v50, %v10366_v55  ;;  %v24841_v6 = vld [vmem:[#allocation5_spill] sm:$0xff] }
 0x554   : > { %v10696_v15 = vmax.f32 %v10660_v0, 0.0  ;;  %v10731_v42 = vsel %vm24827_vm8, %v10695_v57, 0.0  ;;  %vm24835_vm8 = vnez %v24483_v30  ;;  %vm24842_vm1 = vnez %v24841_v6  ;;  %v19098_v6 = vld [vmem:[%s24025_s5 + $0x50] sm:$0xff]  }
 0x555   : > { %v10694_v34 = vmax.f32 %v10658_v53, 0.0  ;;  %v10729_v25 = vsel %vm24831_vm9, %v10693_v39, 0.0  ;;  %vm24839_vm9 = vnez %v24838_v37 }
 0x556   : > { %v10732_v11 = vsel %vm24829_vm6, %v10696_v15, 0.0  ;;  %vm24837_vm6 = vnez %v24836_v60 }
 0x557   : > { %v10766_v27 = vpack.c.bf16 %v10732_v11, %v10731_v42  ;;  %v10730_v40 = vsel %vm24833_vm3, %v10694_v34, 0.0  ;;  %v17313_v36 = vpop.f32.mrb[40].mxu1  ;;  %vm24840_vm3 = vsmask.f32 1280 }
 0x558   : > { %v10765_v10 = vpack.c.bf16 %v10730_v40, %v10729_v25  ;;  %v10663_v47 = vadd.f32 %v17313_v36, %v22815_v50  ;;  %v10379_v29 = vpop.f32.mrb[41].mxu1 }
 0x559   : > { %v10792_v22 = vshrl.u32 %v10766_v27, 16  ;;  %v10795_v52 = vshll.u32 %v10766_v27, 16  ;;  %v10661_v17 = vadd.f32 %v22815_v50, %v10379_v29  ;;  %v17314_v12 = vpop.f32.mrb[42].mxu1 }
 0x55a   : > { %v10784_v33 = vshrl.u32 %v10765_v10, 16  ;;  %v10787_v13 = vshll.u32 %v10765_v10, 16  ;;  %v10699_v31 = vmax.f32 %v10663_v47, 0.0  ;;  %v10664_v23 = vadd.f32 %v17314_v12, %v22815_v50  ;;  %v10382_v19 = vpop.f32.mrb[43].mxu1 }
 0x55b   : > { %v10794_v9 = vrot.slane %v10792_v22, 6  ;;  %v10797_v24 = vrot.slane %v10795_v52, 7  ;;  %v10697_v1 = vmax.f32 %v10661_v17, 0.0  ;;  %v10662_v4 = vadd.f32 %v22815_v50, %v10382_v19  ;;  %v22852_v22 = vld [vmem:[#allocation2] sm:$0xff] }
 0x55c   : > { %v10786_v16 = vrot.slane %v10784_v33, 6  ;;  %v10789_v59 = vrot.slane %v10787_v13, 7  ;;  %v10700_v54 = vmax.f32 %v10664_v23, 0.0  ;;  %v10735_v21 = vsel %vm24834_vm11, %v10699_v31, 0.0 }
 0x55d   : > { %v10798_v58 = vor.u32 %v10797_v24, %v10794_v9  ;;  %v10698_v2 = vmax.f32 %v10662_v4, 0.0  ;;  %v10733_v48 = vsel %vm24837_vm6, %v10697_v1, 0.0  ;;  %v11317_v52 = vshrl.u32 %v22852_v22, 16  ;;  %v19097_v24 = vld [vmem:[%s24025_s5 + $0x48] sm:$0xff]  }
 0x55e   : > { %v10790_v18 = vor.u32 %v10789_v59, %v10786_v16  ;;  %v10736_v32 = vsel %vm24835_vm8, %v10700_v54, 0.0  ;;  %v11319_v13 = vshll.u32 %v22852_v22, 16  ;;  %vm24844_vm11 = vnez %v24519_v7 }
 0x55f   : > { %v10768_v26 = vpack.c.bf16 %v10736_v32, %v10735_v21  ;;  %v10734_v3 = vsel %vm24839_vm9, %v10698_v2, 0.0  ;;  %v17317_v61 = vpop.f32.mrb[44].mxu1  ;;  %vm24845_vm8 = vnez %v24533_v8  ;;  %vm24848_vm9 = vnez %v24540_v14  ;;  %v19099_v14 = vld [vmem:[%s24025_s5 + $0x58] sm:$0xff]  }
 0x560   : > { %v22842_v28 = vsel %vm24840_vm3, %v10790_v18, %v10798_v58  ;;  %v10964_v35 = vsel %vm24842_vm1, %v10790_v18, %v10963_v49  ;;  %v10767_v38 = vpack.c.bf16 %v10734_v3, %v10733_v48  ;;  %v10667_v57 = vadd.f32 %v17317_v61, %v22815_v50  ;;  %v10395_v30 = vpop.f32.mrb[45].mxu1 }
 0x561   : > { %10965 = vst [vmem:[#allocation2 + $0x8] sm:$0xfe] %v10964_v35  ;;  %10966 = vst [vmem:[#allocation2 + $0x10] sm:$0xff] %v22842_v28  ;;  %v10810_v0 = vshrl.u32 %v10768_v26, 16  ;;  %v10813_v55 = vshll.u32 %v10768_v26, 16  ;;  %v10665_v39 = vadd.f32 %v22815_v50, %v10395_v30  ;;  %v17318_v53 = vpop.f32.mrb[46].mxu1  ;;  %vm24843_vm1 = vnez %v24526_v46 }
 0x562   : > { %v11332_v15 = vshll.u32 %v22842_v28, 16  ;;  %v10801_v34 = vshrl.u32 %v10767_v38, 16  ;;  %v10804_v43 = vshll.u32 %v10767_v38, 16  ;;  %v10703_v42 = vmax.f32 %v10667_v57, 0.0  ;;  %v10398_v11 = vpop.f32.mrb[47].mxu1 }
 0x563   : > { %v10668_v56 = vadd.f32 %v17318_v53, %v22815_v50  ;;  %v10812_v51 = vrot.slane %v10810_v0, 6  ;;  %v10815_v25 = vrot.slane %v10813_v55, 7  ;;  %v10701_v27 = vmax.f32 %v10665_v39, 0.0 }
 0x564   : > { %v10666_v41 = vadd.f32 %v22815_v50, %v10398_v11  ;;  %v10803_v40 = vrot.slane %v10801_v34, 6  ;;  %v10806_v36 = vrot.slane %v10804_v43, 7  ;;  %v10739_v12 = vsel %vm21469_vm0, %v10703_v42, 0.0  ;;  %vm24846_vm0 = vmmov %vm24840_vm3 }
 0x565   : > { %v10704_v10 = vmax.f32 %v10668_v56, 0.0  ;;  %v10816_v47 = vor.u32 %v10815_v25, %v10812_v51  ;;  %v10737_v31 = vsel %vm24844_vm11, %v10701_v27, 0.0  ;;  %v22867_v1 = vrot.slane %v11332_v15, 1  ;;  %vm24847_vm6 = vmmov %vm24846_vm0  ;;  %v24851_v56 = vld [vmem:[#allocation15_spill] sm:$0xff] }
 0x566   : > { %v10702_v29 = vmax.f32 %v10666_v41, 0.0  ;;  %v10807_v17 = vor.u32 %v10806_v36, %v10803_v40  ;;  %v11336_v30 = vshrl.u32 %v22842_v28, 16  ;;  %vm24849_vm3 = vnez %v24544_v20 }
 0x567   : > { %v10740_v33 = vsel %vm24843_vm1, %v10704_v10, 0.0  ;;  %v17321_v9 = vpop.f32.mrb[48].mxu1  ;;  %vm24850_vm1 = vnez %v24550_v44  ;;  %vm24852_vm11 = vnez %v24851_v56 }
 0x568   : > { %v10770_v23 = vpack.c.bf16 %v10740_v33, %v10739_v12  ;;  %v10738_v19 = vsel %vm24845_vm8, %v10702_v29, 0.0  ;;  %v22870_v45 = vsel %vm24846_vm0, %v10798_v58, %v10807_v17  ;;  %v22873_v46 = vsel %vm24847_vm6, %v10807_v17, %v10816_v47  ;;  %v10411_v16 = vpop.f32.mrb[49].mxu1  ;;  %v10987_v59 = vld [vmem:[#allocation2 + $0x8] sm:$0xff]  ;;  %vm24853_vm8 = vmmov %vm24846_vm0 }
 0x569   : > { %v10769_v4 = vpack.c.bf16 %v10738_v19, %v10737_v31  ;;  %v10671_v7 = vadd.f32 %v17321_v9, %v22815_v50  ;;  %10967 = vst [vmem:[#allocation2 + $0x18] sm:$0xff] %v22870_v45  ;;  %10968 = vst [vmem:[#allocation2 + $0x20] sm:$0xff] %v22873_v46  ;;  %v10669_v2 = vadd.f32 %v22815_v50, %v10411_v16  ;;  %v17322_v18 = vpop.f32.mrb[50].mxu1  ;;  %17360 = vmatmul.mubr.bf16.vlgmr.msra.gmra.mrb[36].mxu0 %v10987_v59  ;;  %v19100_v16 = vld [vmem:[%s24025_s5 + $0x60] sm:$0xff]  }
 0x56a   : > { %v10828_v8 = vshrl.u32 %v10770_v23, 16  ;;  %v10831_v54 = vshll.u32 %v10770_v23, 16  ;;  %v11324_v58 = vshll.u32 %v10987_v59, 16  ;;  %v10672_v60 = vadd.f32 %v17322_v18, %v22815_v50  ;;  %v10414_v48 = vpop.f32.mrb[51].mxu1  ;;  %17363 = vmatprep.mubr.bf16.mxu0 %v22842_v28  ;;  %17396 = vmatpush3.bf16.msra.mxu0 %v22809_v63 }
 0x56b   : > { %v10819_v21 = vshrl.u32 %v10769_v4, 16  ;;  %v10822_v32 = vshll.u32 %v10769_v4, 16  ;;  %v10707_v49 = vmax.f32 %v10671_v7, 0.0  ;;  %v10705_v3 = vmax.f32 %v10669_v2, 0.0  ;;  %17397 = vmatprep.subr.bf16.mxu0 %v19097_v24 }
 0x56c   : > { %v10830_v26 = vrot.slane %v10828_v8, 6  ;;  %v10833_v37 = vrot.slane %v10831_v54, 7  ;;  %v10670_v61 = vadd.f32 %v22815_v50, %v10414_v48  ;;  %v10708_v57 = vmax.f32 %v10672_v60, 0.0  ;;  %v24854_v54 = vld [vmem:[#allocation9_spill] sm:$0xff] }
 0x56d   : > { %v10821_v35 = vrot.slane %v10819_v21, 6  ;;  %v10824_v38 = vrot.slane %v10822_v32, 7  ;;  %v10743_v63 = vsel %vm24848_vm9, %v10707_v49, 0.0  ;;  %v22891_v39 = vrot.slane %v11324_v58, 1  ;;  %v24856_v21 = vld [vmem:[#allocation11_spill] sm:$0xff] }
 0x56e   : > { %v22887_v0 = vor.u32 %v10833_v37, %v10830_v26  ;;  %v10706_v55 = vmax.f32 %v10670_v61, 0.0  ;;  %v10741_v15 = vsel %vm24849_vm3, %v10705_v3, 0.0  ;;  %v10744_v34 = vsel %vm24850_vm1, %v10708_v57, 0.0  ;;  %17398 = vmatpush3.bf16.msra.mxu0 %v19097_v24  ;;  %v24859_v26 = vld [vmem:[#allocation17_spill] sm:$0xff] }
 0x56f   : > { %v10825_v53 = vor.u32 %v10824_v38, %v10821_v35  ;;  %v11328_v43 = vshrl.u32 %v10987_v59, 16  ;;  %v10772_v42 = vpack.c.bf16 %v10744_v34, %v10743_v63  ;;  %v17325_v11 = vpop.f32.mrb[52].mxu1  ;;  %17399 = vmatprep.subr.bf16.mxu0 %v19098_v6  ;;  %v11338_v51 = vor.u32 %v11336_v30, %v22867_v1  ;;  %v24861_v35 = vld [vmem:[#allocation7_spill] sm:$0xff]  ;;  %v19101_v30 = vld [vmem:[%s24025_s5 + $0x68] sm:$0xff]  }
 0x570   : > { %v10742_v28 = vsel %vm24852_vm11, %v10706_v55, 0.0  ;;  %v11340_v20 = vshll.u32 %v22870_v45, 16  ;;  %v10675_v41 = vadd.f32 %v17325_v11, %v22815_v50  ;;  %v10427_v40 = vpop.f32.mrb[53].mxu1  ;;  %vm24855_vm6 = vnez %v24854_v54 }
 0x571   : > { %v22905_v25 = vsel %vm24853_vm8, %v10816_v47, %v10825_v53  ;;  %v22909_v44 = vsel %vm24846_vm0, %v10825_v53, %v22887_v0  ;;  %v10771_v27 = vpack.c.bf16 %v10742_v28, %v10741_v15  ;;  %v10846_v36 = vshrl.u32 %v10772_v42, 16  ;;  %v17326_v17 = vpop.f32.mrb[54].mxu1  ;;  %17364 = vmatmul.mubr.bf16.gmra.mrb[40].mxu0 %v22870_v45  ;;  %vm24863_vm8 = vmmov %vm24846_vm0 }
 0x572   : > { %10969 = vst [vmem:[#allocation2 + $0x28] sm:$0xff] %v22905_v25  ;;  %10970 = vst [vmem:[#allocation2 + $0x30] sm:$0xff] %v22909_v44  ;;  %v10849_v10 = vshll.u32 %v10772_v42, 16  ;;  %v10673_v29 = vadd.f32 %v22815_v50, %v10427_v40  ;;  %v11330_v47 = vor.u32 %v11328_v43, %v22891_v39  ;;  %v10711_v31 = vmax.f32 %v10675_v41, 0.0  ;;  %v10430_v19 = vpop.f32.mrb[55].mxu1  ;;  %17367 = vmatprep.mubr.bf16.mxu0 %v22873_v46 }
 0x573   : > { %v10837_v12 = vshrl.u32 %v10771_v27, 16  ;;  %v10840_v33 = vshll.u32 %v10771_v27, 16  ;;  %v10676_v23 = vadd.f32 %v17326_v17, %v22815_v50  ;;  %17400 = vmatpush3.bf16.msra.mxu0 %v19098_v6  ;;  %v10848_v9 = vrot.slane %v10846_v36, 6 }
 0x574   : > { %v10851_v24 = vrot.slane %v10849_v10, 7  ;;  %v10709_v4 = vmax.f32 %v10673_v29, 0.0  ;;  %v10674_v7 = vadd.f32 %v22815_v50, %v10430_v19  ;;  %17401 = vmatprep.subr.bf16.mxu0 %v19099_v14  ;;  %v10747_v2 = vsel %vm24855_vm6, %v10711_v31, 0.0 }
 0x575   : > { %v10839_v59 = vrot.slane %v10837_v12, 6  ;;  %v10842_v8 = vrot.slane %v10840_v33, 7  ;;  %v10712_v18 = vmax.f32 %v10676_v23, 0.0  ;;  %vm24857_vm9 = vnez %v24856_v21 }
 0x576   : > { %v22925_v58 = vor.u32 %v10851_v24, %v10848_v9  ;;  %v10745_v32 = vsel %vm24857_vm9, %v10709_v4, 0.0  ;;  %v10710_v49 = vmax.f32 %v10674_v7, 0.0  ;;  %vm24858_vm3 = vsmask.f32 7424  ;;  %v24866_v7 = vld [vmem:[#allocation20_spill] sm:$0xff] }
 0x577   : > { %v22931_v60 = vsel %vm24858_vm3, %v11330_v47, %v22867_v1  ;;  %v10843_v48 = vor.u32 %v10842_v8, %v10839_v59  ;;  %vm24860_vm1 = vnez %v24859_v26  ;;  %17402 = vmatpush3.bf16.msra.mxu0 %v19099_v14  ;;  %v11342_v3 = vrot.slane %v11340_v20, 1  ;;  %v17329_v57 = vpop.f32.mrb[56].mxu1  ;;  %vm24864_vm6 = vmmov %vm24858_vm3 }
 0x578   : > { %v10748_v37 = vsel %vm24860_vm1, %v10712_v18, 0.0  ;;  %v11344_v61 = vshrl.u32 %v22870_v45, 16  ;;  %vm24862_vm11 = vnez %v24861_v35  ;;  %17403 = vmatprep.subr.bf16.mxu0 %v19100_v16  ;;  %v11348_v1 = vshll.u32 %v22873_v46, 16  ;;  %v10443_v43 = vpop.f32.mrb[57].mxu1 }
 0x579   : > { %v10774_v6 = vpack.c.bf16 %v10748_v37, %v10747_v2  ;;  %v10746_v38 = vsel %vm24862_vm11, %v10710_v49, 0.0  ;;  %v11352_v63 = vshrl.u32 %v22873_v46, 16  ;;  %v22945_v55 = vsel %vm24863_vm8, %v22887_v0, %v10843_v48  ;;  %v17330_v11 = vpop.f32.mrb[58].mxu1  ;;  %17368 = vmatmul.mubr.bf16.gmra.mrb[44].mxu0 %v22905_v25  ;;  %v24868_v2 = vld [vmem:[#allocation19_spill] sm:$0xff]  ;;  %vm24871_vm11 = vmmov %vm24846_vm0 }
 0x57a   : > { %v22949_v53 = vsel %vm24846_vm0, %v10843_v48, %v22925_v58  ;;  %v10773_v15 = vpack.c.bf16 %v10746_v38, %v10745_v32  ;;  %v10679_v34 = vadd.f32 %v17329_v57, %v22815_v50  ;;  %10971 = vst [vmem:[#allocation2 + $0x38] sm:$0xff] %v22945_v55  ;;  %v10677_v28 = vadd.f32 %v22815_v50, %v10443_v43  ;;  %v10446_v40 = vpop.f32.mrb[59].mxu1  ;;  %vm24872_vm8 = vmmov %vm24864_vm6 }
 0x57b   : > { %10972 = vst [vmem:[#allocation2 + $0x40] sm:$0xff] %v22949_v53  ;;  %v10864_v42 = vshrl.u32 %v10774_v6, 16  ;;  %v10867_v56 = vshll.u32 %v10774_v6, 16  ;;  %v22957_v0 = vsel %vm24864_vm6, %v11338_v51, %v11342_v3  ;;  %v10680_v41 = vadd.f32 %v17330_v11, %v22815_v50  ;;  %17371 = vmatprep.mubr.bf16.mxu0 %v22909_v44  ;;  %17404 = vmatpush3.bf16.msra.mxu0 %v19100_v16  ;;  %v19102_v51 = vld [vmem:[%s24025_s5 + $0x70] sm:$0xff]   ;;  %v23000_v11 = vld [vmem:[%s24025_s5 + $0x80] sm:$0xff]  }
 0x57c   : > { %v10855_v14 = vshrl.u32 %v10773_v15, 16  ;;  %v10858_v20 = vshll.u32 %v10773_v15, 16  ;;  %v10715_v27 = vmax.f32 %v10679_v34, 0.0  ;;  %v10713_v29 = vmax.f32 %v10677_v28, 0.0  ;;  %17405 = vmatprep.subr.bf16.mxu0 %v19101_v30 }
 0x57d   : > { %v10866_v36 = vrot.slane %v10864_v42, 6  ;;  %v10869_v10 = vrot.slane %v10867_v56, 7  ;;  %v10678_v17 = vadd.f32 %v22815_v50, %v10446_v40  ;;  %v10716_v31 = vmax.f32 %v10680_v41, 0.0 }
 0x57e   : > { %v10857_v47 = vrot.slane %v10855_v14, 6  ;;  %v10860_v12 = vrot.slane %v10858_v20, 7  ;;  %v10751_v33 = vsel %vm21739_vm10, %v10715_v27, 0.0  ;;  %vm24865_vm9 = vnez %v24619_v62  ;;  %v19103_v62 = vld [vmem:[%s24025_s5 + $0x78] sm:$0xff]   ;;  %vm24870_vm10 = vmmov %vm24846_vm0 }
 0x57f   : > { %v10870_v23 = vor.u32 %v10869_v10, %v10866_v36  ;;  %v10749_v19 = vsel %vm24865_vm9, %v10713_v29, 0.0  ;;  %v10714_v9 = vmax.f32 %v10678_v17, 0.0  ;;  %v11346_v24 = vor.u32 %v11344_v61, %v11342_v3  ;;  %17406 = vmatpush3.bf16.msra.mxu0 %v19101_v30  ;;  %v17333_v18 = vpop.f32.mrb[60].mxu1  ;;  %v24874_v10 = vld [vmem:[#allocation32_spill] sm:$0xff] }
 0x580   : > { %v10861_v4 = vor.u32 %v10860_v12, %v10857_v47  ;;  %vm24867_vm3 = vnez %v24866_v7  ;;  %v11350_v59 = vrot.slane %v11348_v1, 1  ;;  %v11356_v8 = vshll.u32 %v22905_v25, 16  ;;  %17407 = vmatprep.subr.bf16.mxu0 %v19102_v51  ;;  %v10459_v3 = vpop.f32.mrb[61].mxu1 }
 0x581   : > { %v10752_v16 = vsel %vm24867_vm3, %v10716_v31, 0.0  ;;  %vm24869_vm1 = vnez %v24868_v2  ;;  %v11360_v21 = vshrl.u32 %v22905_v25, 16  ;;  %v11364_v32 = vshll.u32 %v22909_v44, 16  ;;  %v17334_v38 = vpop.f32.mrb[62].mxu1  ;;  %17372 = vmatmul.mubr.bf16.gmra.mrb[48].mxu0 %v22945_v55 }
 0x582   : > { %v10776_v54 = vpack.c.bf16 %v10752_v16, %v10751_v33  ;;  %v10750_v5 = vsel %vm24869_vm1, %v10714_v9, 0.0  ;;  %v22981_v49 = vsel %vm24870_vm10, %v22925_v58, %v10861_v4  ;;  %v22984_v48 = vsel %vm24871_vm11, %v10861_v4, %v10870_v23  ;;  %v10462_v34 = vpop.f32.mrb[63].mxu1  ;;  %17375 = vmatprep.mubr.bf16.mxu0 %v22949_v53 }
 0x583   : > { %v10775_v26 = vpack.c.bf16 %v10750_v5, %v10749_v19  ;;  %v10683_v37 = vadd.f32 %v17333_v18, %v22815_v50  ;;  %10973 = vst [vmem:[#allocation2 + $0x48] sm:$0xff] %v22981_v49  ;;  %10974 = vst [vmem:[#allocation2 + $0x50] sm:$0xff] %v22984_v48  ;;  %v10681_v35 = vadd.f32 %v22815_v50, %v10459_v3  ;;  %17408 = vmatpush3.bf16.msra.mxu0 %v19102_v51 }
 0x584   : > { %v10882_v61 = vshrl.u32 %v10776_v54, 16  ;;  %v10885_v6 = vshll.u32 %v10776_v54, 16  ;;  %v22992_v58 = vsel %vm24872_vm8, %v11346_v24, %v11350_v59  ;;  %v10684_v15 = vadd.f32 %v17334_v38, %v22815_v50  ;;  %17409 = vmatprep.subr.bf16.mxu0 %v19103_v62 }
 0x585   : > { %v10873_v57 = vshrl.u32 %v10775_v26, 16  ;;  %v10876_v30 = vshll.u32 %v10775_v26, 16  ;;  %v10719_v1 = vmax.f32 %v10683_v37, 0.0  ;;  %v10717_v56 = vmax.f32 %v10681_v35, 0.0 }
 0x586   : > { %v10884_v43 = vrot.slane %v10882_v61, 6  ;;  %v10887_v42 = vrot.slane %v10885_v6, 7  ;;  %v10682_v28 = vadd.f32 %v22815_v50, %v10462_v34  ;;  %v10720_v40 = vmax.f32 %v10684_v15, 0.0 }
 0x587   : > { %v10875_v14 = vrot.slane %v10873_v57, 6  ;;  %v10878_v20 = vrot.slane %v10876_v30, 7  ;;  %v10755_v41 = vsel %vm21823_vm4, %v10719_v1, 0.0  ;;  %vm24875_vm0 = vnez %v24874_v10  ;;  %17410 = vmatpush3.bf16.msra.mxu0 %v19103_v62  ;;  %v17337_v7 = vpop.f32.mrb[64].mxu1  ;;  %vm24878_vm4 = vmmov %vm24870_vm10 }
 0x588   : > { %v10888_v36 = vor.u32 %v10887_v42, %v10884_v43  ;;  %v10753_v29 = vsel %vm24875_vm0, %v10717_v56, 0.0  ;;  %v10718_v17 = vmax.f32 %v10682_v28, 0.0  ;;  %v11354_v51 = vor.u32 %v11352_v63, %v11350_v59  ;;  %17447 = vmatprep.subr.bf16.mxu0 %v23000_v11  ;;  %vm24879_vm6 = vmmov %vm24878_vm4  ;;  %v10475_v5 = vpop.f32.mrb[65].mxu1  ;;  %v24890_v43 = vld [vmem:[#allocation13_spill] sm:$0xff] }
 0x589   : > { %v10879_v47 = vor.u32 %v10878_v20, %v10875_v14  ;;  %v10756_v33 = vsel %vm21841_vm2, %v10720_v40, 0.0  ;;  %v11358_v31 = vrot.slane %v11356_v8, 1  ;;  %v11366_v19 = vrot.slane %v11364_v32, 1  ;;  %v17338_v26 = vpop.f32.mrb[66].mxu1  ;;  %17376 = vmatmul.mubr.bf16.gmra.mrb[52].mxu0 %v22981_v49  ;;  %vm24880_vm2 = vmmov %vm24872_vm8 }
 0x58a   : > { %v10778_v9 = vpack.c.bf16 %v10756_v33, %v10755_v41  ;;  %v10754_v4 = vsel %vm21861_vm14, %v10718_v17, 0.0  ;;  %v11368_v16 = vshrl.u32 %v22909_v44, 16  ;;  %v11372_v54 = vshll.u32 %v22945_v55, 16  ;;  %v10478_v35 = vpop.f32.mrb[67].mxu1  ;;  %17379 = vmatprep.mubr.bf16.mxu0 %v22984_v48  ;;  %vm24885_vm14 = vmmov %vm24880_vm2 }
 0x58b   : > { %v23016_v63 = vsel %vm24878_vm4, %v10870_v23, %v10879_v47  ;;  %v23019_v59 = vsel %vm24879_vm6, %v10879_v47, %v10888_v36  ;;  %v10777_v2 = vpack.c.bf16 %v10754_v4, %v10753_v29  ;;  %v10687_v8 = vadd.f32 %v17337_v7, %v22815_v50  ;;  %vm24897_vm1 = vmmov %vm24878_vm4 }
 0x58c   : > { %10975 = vst [vmem:[#allocation2 + $0x58] sm:$0xff] %v23016_v63  ;;  %10976 = vst [vmem:[#allocation2 + $0x60] sm:$0xff] %v23019_v59  ;;  %v10900_v18 = vshrl.u32 %v10778_v9, 16  ;;  %v10903_v62 = vshll.u32 %v10778_v9, 16  ;;  %v10685_v32 = vadd.f32 %v22815_v50, %v10475_v5  ;;  %v23027_v23 = vsel %vm24880_vm2, %v11354_v51, %v11358_v31 }
 0x58d   : > { %v10891_v37 = vshrl.u32 %v10777_v2, 16  ;;  %v10894_v3 = vshll.u32 %v10777_v2, 16  ;;  %v10723_v61 = vmax.f32 %v10687_v8, 0.0  ;;  %v10688_v6 = vadd.f32 %v17338_v26, %v22815_v50  ;;  %vm24898_vm10 = vmmov %vm24880_vm2 }
 0x58e   : > { %v10902_v38 = vrot.slane %v10900_v18, 6  ;;  %v10905_v57 = vrot.slane %v10903_v62, 7  ;;  %v10721_v30 = vmax.f32 %v10685_v32, 0.0  ;;  %v10686_v1 = vadd.f32 %v22815_v50, %v10478_v35  ;;  %vm24899_vm11 = vmmov %vm24880_vm2 }
 0x58f   : > { %v10893_v15 = vrot.slane %v10891_v37, 6  ;;  %v10896_v34 = vrot.slane %v10894_v3, 7  ;;  %v10759_v42 = vsel %vm21905_vm5, %v10723_v61, 0.0  ;;  %v10724_v56 = vmax.f32 %v10688_v6, 0.0  ;;  %v17341_v9 = vpop.f32.mrb[68].mxu1  ;;  %vm24887_vm5 = vmmov %vm24878_vm4 }
 0x590   : > { %v10906_v28 = vor.u32 %v10905_v57, %v10902_v38  ;;  %v10757_v20 = vsel %vm21914_vm15, %v10721_v30, 0.0  ;;  %v10722_v27 = vmax.f32 %v10686_v1, 0.0  ;;  %v11362_v41 = vor.u32 %v11360_v21, %v11358_v31  ;;  %vm24886_vm15 = vmmov %vm24878_vm4 }
 0x591   : > { %v10897_v40 = vor.u32 %v10896_v34, %v10893_v15  ;;  %v10760_v29 = vsel %vm21926_vm13, %v10724_v56, 0.0  ;;  %v11370_v17 = vor.u32 %v11368_v16, %v11366_v19  ;;  %v11374_v51 = vrot.slane %v11372_v54, 1  ;;  %v10491_v54 = vpop.f32.mrb[69].mxu1  ;;  %17380 = vmatmul.mubr.bf16.gmra.mrb[56].mxu0 %v23016_v63  ;;  %vm24888_vm13 = vmmov %vm24880_vm2 }
 0x592   : > { %v10780_v47 = vpack.c.bf16 %v10760_v29, %v10759_v42  ;;  %v10758_v33 = vsel %vm21935_vm12, %v10722_v27, 0.0  ;;  %v23043_v24 = vsel %vm24885_vm14, %v11362_v41, %v11366_v19  ;;  %v11376_v4 = vshrl.u32 %v22945_v55, 16  ;;  %v17342_v5 = vpop.f32.mrb[70].mxu1  ;;  %17383 = vmatprep.mubr.bf16.mxu0 %v23019_v59  ;;  %v24892_v27 = vld [vmem:[#allocation24_spill] sm:$0xff]  ;;  %v24894_v29 = vld [vmem:[#allocation26_spill] sm:$0xff]  ;;  %vm24900_vm8 = vmmov %vm24880_vm2 }
 0x593   : > { %v23047_v7 = vsel %vm24886_vm15, %v10888_v36, %v10897_v40  ;;  %v23050_v21 = vsel %vm24887_vm5, %v10897_v40, %v10906_v28  ;;  %v10779_v31 = vpack.c.bf16 %v10758_v33, %v10757_v20  ;;  %v10691_v16 = vadd.f32 %v17341_v9, %v22815_v50  ;;  %v10494_v37 = vpop.f32.mrb[71].mxu1  ;;  %vm24904_vm6 = vmmov %vm24897_vm1 }
 0x594   : > { %10977 = vst [vmem:[#allocation2 + $0x68] sm:$0xff] %v23047_v7  ;;  %10978 = vst [vmem:[#allocation2 + $0x70] sm:$0xff] %v23050_v21  ;;  %v10918_v2 = vshrl.u32 %v10780_v47, 16  ;;  %v10921_v8 = vshll.u32 %v10780_v47, 16  ;;  %v10689_v19 = vadd.f32 %v22815_v50, %v10491_v54  ;;  %v23058_v36 = vsel %vm24888_vm13, %v11370_v17, %v11374_v51 }
 0x595   : > { %v10909_v18 = vshrl.u32 %v10779_v31, 16  ;;  %v10912_v62 = vshll.u32 %v10779_v31, 16  ;;  %v10727_v32 = vmax.f32 %v10691_v16, 0.0  ;;  %v10692_v26 = vadd.f32 %v17342_v5, %v22815_v50  ;;  %vm24905_vm14 = vmmov %vm24880_vm2 }
 0x596   : > { %v10920_v3 = vrot.slane %v10918_v2, 6  ;;  %v10923_v61 = vrot.slane %v10921_v8, 7  ;;  %v10725_v6 = vmax.f32 %v10689_v19, 0.0  ;;  %v10690_v35 = vadd.f32 %v22815_v50, %v10494_v37  ;;  %vm24906_vm15 = vmmov %vm24880_vm2 }
 0x597   : > { %v10911_v38 = vrot.slane %v10909_v18, 6  ;;  %v10914_v57 = vrot.slane %v10912_v62, 7  ;;  %v10763_v1 = vsel %vm21990_vm7, %v10727_v32, 0.0  ;;  %v10728_v15 = vmax.f32 %v10692_v26, 0.0  ;;  %vm24896_vm7 = vmmov %vm24878_vm4 }
 0x598   : > { %v10924_v34 = vor.u32 %v10923_v61, %v10920_v3  ;;  %vm24891_vm12 = vnez %v24890_v43  ;;  %v10726_v56 = vmax.f32 %v10690_v35, 0.0  ;;  %v11378_v14 = vor.u32 %v11376_v4, %v11374_v51  ;;  %vm24903_vm4 = vmmov %vm24897_vm1 }
 0x599   : > { %v10761_v42 = vsel %vm24891_vm12, %v10725_v6, 0.0  ;;  %v10915_v20 = vor.u32 %v10914_v57, %v10911_v38  ;;  %vm24893_vm9 = vnez %v24892_v27  ;;  %v11380_v40 = vshll.u32 %v22949_v53, 16  ;;  %17384 = vmatmul.mubr.bf16.gmra.mrb[60].mxu0 %v23047_v7  ;;  %vm24907_vm5 = vmmov %vm24880_vm2 }
 0x59a   : > { %v10764_v41 = vsel %vm24893_vm9, %v10728_v15, 0.0  ;;  %v11384_v50 = vshrl.u32 %v22949_v53, 16  ;;  %vm24895_vm3 = vnez %v24894_v29  ;;  %v11388_v47 = vshll.u32 %v22981_v49, 16  ;;  %17387 = vmatprep.mubr.bf16.mxu0 %v23050_v21  ;;  %vm24908_vm13 = vmmov %vm24880_vm2 }
 0x59b   : > { %v10782_v10 = vpack.c.bf16 %v10764_v41, %v10763_v1  ;;  %v10762_v17 = vsel %vm24895_vm3, %v10726_v56, 0.0  ;;  %v11392_v12 = vshrl.u32 %v22981_v49, 16  ;;  %v23076_v33 = vsel %vm24896_vm7, %v10906_v28, %v10915_v20  ;;  %v10983_v1 = vld [vmem:[#allocation2 + $0x98] sm:$0x3]  ;;  %vm24909_vm12 = vmmov %vm24880_vm2 }
 0x59c   : > { %v23079_v51 = vsel %vm24897_vm1, %v10915_v20, %v10924_v34  ;;  %v10781_v9 = vpack.c.bf16 %v10762_v17, %v10761_v42  ;;  %v11382_v4 = vrot.slane %v11380_v40, 1  ;;  %10979 = vst [vmem:[#allocation2 + $0x78] sm:$0xff] %v23076_v33  ;;  %v11390_v54 = vrot.slane %v11388_v47, 1  ;;  %vm24910_vm9 = vmmov %vm24880_vm2 }
 0x59d   : > { %10980 = vst [vmem:[#allocation2 + $0x80] sm:$0xff] %v23079_v51  ;;  %v10936_v31 = vshrl.u32 %v10782_v10, 16  ;;  %v10939_v16 = vshll.u32 %v10782_v10, 16  ;;  %v11396_v2 = vshll.u32 %v22984_v48, 16  ;;  %v11400_v6 = vshrl.u32 %v22984_v48, 16  ;;  %vm24911_vm3 = vmmov %vm24880_vm2 }
 0x59e   : > { %v10927_v8 = vshrl.u32 %v10781_v9, 16  ;;  %v10930_v19 = vshll.u32 %v10781_v9, 16  ;;  %v23087_v28 = vsel %vm24898_vm10, %v11378_v14, %v11382_v4  ;;  %v11386_v5 = vor.u32 %v11384_v50, %v11382_v4  ;;  %v24901_v14 = vld [vmem:[#allocation4_spill] sm:$0xff] }
 0x59f   : > { %v10938_v18 = vrot.slane %v10936_v31, 6  ;;  %v10941_v62 = vrot.slane %v10939_v16, 7  ;;  %v11394_v32 = vor.u32 %v11392_v12, %v11390_v54  ;;  %v11398_v26 = vrot.slane %v11396_v2, 1 }
 0x5a0   : > { %v10929_v37 = vrot.slane %v10927_v8, 6  ;;  %v10932_v3 = vrot.slane %v10930_v19, 7  ;;  %v23090_v61 = vsel %vm24899_vm11, %v11386_v5, %v11390_v54  ;;  %v11321_v38 = vrot.slane %v11319_v13, 1 }
 0x5a1   : > { %v10942_v35 = vor.u32 %v10941_v62, %v10938_v18  ;;  %v23096_v57 = vsel %vm24900_vm8, %v11394_v32, %v11398_v26  ;;  %v11404_v30 = vshll.u32 %v23016_v63, 16  ;;  %v11402_v43 = vor.u32 %v11400_v6, %v11398_v26  ;;  %17388 = vmatmul.mubr.bf16.gmra.mrb[64].mxu0 %v23076_v33 }
 0x5a2   : > { %v10933_v15 = vor.u32 %v10932_v3, %v10929_v37  ;;  %v11408_v42 = vshrl.u32 %v23016_v63, 16  ;;  %v11412_v56 = vshll.u32 %v23019_v59, 16  ;;  %vm24902_vm0 = vnez %v24901_v14  ;;  %17391 = vmatprep.mubr.bf16.mxu0 %v23079_v51 }
 0x5a3   : > { %v10984_v20 = vsel %vm24902_vm0, %v10942_v35, %v10983_v1  ;;  %v11406_v27 = vrot.slane %v11404_v30, 1  ;;  %v11416_v41 = vshrl.u32 %v23019_v59, 16  ;;  %v11420_v13 = vshll.u32 %v23047_v7, 16 }
 0x5a4   : > { %10985 = vst [vmem:[#allocation2 + $0x98] sm:$0x3] %v10984_v20  ;;  %v23106_v40 = vsel %vm24903_vm4, %v10924_v34, %v10933_v15  ;;  %v23109_v50 = vsel %vm24904_vm6, %v10933_v15, %v10942_v35  ;;  %v11414_v10 = vrot.slane %v11412_v56, 1  ;;  %v11428_v29 = vshll.u32 %v23050_v21, 16 }
 0x5a5   : > { %10982 = vst [vmem:[#allocation2 + $0x90] sm:$0xff] %v23109_v50  ;;  %10981 = vst [vmem:[#allocation2 + $0x88] sm:$0xff] %v23106_v40  ;;  %v23116_v17 = vsel %vm24880_vm2, %v11402_v43, %v11406_v27  ;;  %v11410_v47 = vor.u32 %v11408_v42, %v11406_v27  ;;  %v11422_v12 = vrot.slane %v11420_v13, 1  ;;  %v11424_v34 = vshrl.u32 %v23047_v7, 16 }
 0x5a6   : > { %v11418_v9 = vor.u32 %v11416_v41, %v11414_v10  ;;  %v11430_v4 = vrot.slane %v11428_v29, 1  ;;  %v11432_v31 = vshrl.u32 %v23050_v21, 16  ;;  %v11436_v16 = vshll.u32 %v23076_v33, 16 }
 0x5a7   : > { %v23123_v54 = vsel %vm24905_vm14, %v11410_v47, %v11414_v10  ;;  %v11426_v2 = vor.u32 %v11424_v34, %v11422_v12  ;;  %v11440_v8 = vshrl.u32 %v23076_v33, 16  ;;  %v11444_v19 = vshll.u32 %v23079_v51, 16 }
 0x5a8   : > { %v23128_v5 = vsel %vm24906_vm15, %v11418_v9, %v11422_v12  ;;  %v11434_v18 = vor.u32 %v11432_v31, %v11430_v4  ;;  %v11438_v62 = vrot.slane %v11436_v16, 1  ;;  %v11452_v32 = vshll.u32 %v23106_v40, 16  ;;  %v19105_v12 = vld [vmem:[%s24025_s5 + $0x88] sm:$0xff]  }
 0x5a9   : > { %v11322_v26 = vor.u32 %v11321_v38, %v11317_v52  ;;  %v23134_v37 = vsel %vm24907_vm5, %v11426_v2, %v11430_v4  ;;  %v11446_v3 = vrot.slane %v11444_v19, 1  ;;  %v11448_v6 = vshrl.u32 %v23079_v51, 16  ;;  %17392 = vmatmul.mubr.bf16.gmra.mrb[68].mxu0 %v23106_v40  ;;  %v23232_v19 = vld [vmem:[#allocation2 + $0x20] sm:$0xff] }
 0x5aa   : > { %v23138_v35 = vsel %vm24908_vm13, %v11434_v18, %v11438_v62  ;;  %v11442_v30 = vor.u32 %v11440_v8, %v11438_v62  ;;  %v23140_v1 = vrot.slane %v11452_v32, 1  ;;  %v24193_v43 = vrot.slane %v22870_v45, 1  ;;  %v23230_v8 = vld [vmem:[#allocation2 + $0x18] sm:$0xff]  ;;  %v23245_v32 = vld [vmem:[#allocation2 + $0x28] sm:$0xff] }
 0x5ab   : > { %v11450_v15 = vor.u32 %v11448_v6, %v11446_v3  ;;  %v11876_v42 = vrot.slane %v22873_v46, 1  ;;  %v11878_v52 = vrot.slane %v22905_v25, 1  ;;  %v11327_v38 = vsel %vm24910_vm9, %v11322_v26, %v22891_v39 }
 0x5ac   : > { %v23145_v22 = vsel %vm24909_vm12, %v11442_v30, %v11446_v3  ;;  %17411 = vmatprep.mubr.bf16.mxu0 %v11327_v38  ;;  %vm24912_vm7 = vcmask 1046528   ;;  %v11880_v25 = vrot.slane %v22909_v44, 1  ;;  %v11882_v20 = vrot.slane %v22945_v55, 1  ;;  %v23251_v30 = vld [vmem:[#allocation2 + $0x30] sm:$0xff] }
 0x5ad   : > { %v23153_v56 = vsel %vm24911_vm3, %v11450_v15, %v23140_v1  ;;  %v23158_v14 = vsel %vm24912_vm7, %v24193_v43, %v11876_v42  ;;  %vm24913_vm1 = vmmov %vm24912_vm7  ;;  %v11884_v27 = vrot.slane %v22949_v53, 1  ;;  %v11886_v39 = vrot.slane %v22981_v49, 1 }
 0x5ae   : > { %v23161_v46 = vsel %vm24913_vm1, %v11876_v42, %v11878_v52  ;;  %v11888_v41 = vrot.slane %v22984_v48, 1  ;;  %vm24914_vm10 = vmmov %vm24913_vm1  ;;  %v23175_v29 = vrot.slane %v23016_v63, 1  ;;  %v11892_v47 = vrot.slane %v23019_v59, 1 }
 0x5af   : > { %v23169_v13 = vsel %vm24914_vm10, %v11878_v52, %v11880_v25  ;;  %vm24915_vm11 = vmmov %vm24913_vm1  ;;  %v11894_v63 = vrot.slane %v23047_v7, 1  ;;  %v11896_v59 = vrot.slane %v23050_v21, 1  ;;  %v11898_v34 = vrot.slane %v23076_v33, 1  ;;  %v23254_v52 = vld [vmem:[#allocation2 + $0x38] sm:$0xff] }
 0x5b0   : > { %v23172_v10 = vsel %vm24915_vm11, %v11880_v25, %v11882_v20  ;;  %vm24916_vm8 = vmmov %vm24913_vm1  ;;  %v11900_v9 = vrot.slane %v23079_v51, 1  ;;  %v23209_v16 = vrot.slane %v23106_v40, 1  ;;  %v19106_v51 = vld [vmem:[%s24025_s5 + $0x90] sm:$0xff]   ;;  %v24192_v2 = vrot.slane %v23109_v50, 1 }
 0x5b1   : > { %v23179_v44 = vsel %vm24916_vm8, %v11882_v20, %v11884_v27  ;;  %vm24917_vm0 = vmmov %vm24913_vm1  ;;  %17412 = vmatmul.mubr.bf16.vlgmr.msra.gmra.mrb[36].mxu0 %v22931_v60  ;;  %v23227_v60 = vld [vmem:[#allocation2 + $0x10] sm:$0xff]  ;;  %v12752_v26 = vshrl.u32 %v23230_v8, 16  ;;  %v12755_v3 = vshll.u32 %v23230_v8, 16  ;;  %v12761_v6 = vshrl.u32 %v23232_v19, 16 }
 0x5b2   : > { %v23182_v55 = vsel %vm24917_vm0, %v11884_v27, %v11886_v39  ;;  %vm24918_vm4 = vmmov %vm24917_vm0  ;;  %17415 = vmatprep.mubr.bf16.mxu0 %v22957_v0  ;;  %17448 = vmatpush3.bf16.msra.mxu0 %v23000_v11  ;;  %24926 = vst [vmem:[#allocation25_spill] sm:$0xff] %v23227_v60  ;;  %v19107_v11 = vld [vmem:[%s24025_s5 + $0x98] sm:$0xff]   ;;  %v12743_v18 = vshrl.u32 %v23227_v60, 16  ;;  %v12746_v62 = vshll.u32 %v23227_v60, 16  ;;  %v12764_v27 = vshll.u32 %v23232_v19, 16 }
 0x5b3   : > { %v23185_v53 = vsel %vm24918_vm4, %v11886_v39, %v11888_v41  ;;  %vm24919_vm6 = vmmov %vm24917_vm0  ;;  %17449 = vmatprep.subr.bf16.mxu0 %v19105_v12  ;;  %v12754_v38 = vrot.slane %v12752_v26, 1  ;;  %v12757_v25 = vrot.slane %v12755_v3, 2  ;;  %v12763_v20 = vrot.slane %v12761_v6, 1  ;;  %v19108_v39 = vld [vmem:[%s24025_s5 + $0xa0] sm:$0xff]  }
 0x5b4   : > { %v23189_v49 = vsel %vm24919_vm6, %v11888_v41, %v23175_v29  ;;  %vm24920_vm2 = vmmov %vm24917_vm0  ;;  %v12745_v15 = vrot.slane %v12743_v18, 1  ;;  %v12748_v42 = vrot.slane %v12746_v62, 2  ;;  %v12770_v41 = vshrl.u32 %v23245_v32, 16 }
 0x5b5   : > { %v23193_v48 = vsel %vm24920_vm2, %v23175_v29, %v11892_v47  ;;  %vm24921_vm14 = vmmov %vm24917_vm0  ;;  %v12788_v62 = vshrl.u32 %v23254_v52, 16  ;;  %vm24928_vm3 = vsmask.f32 6400  ;;  %vm24942_vm6 = vcmask 1045504  }
 0x5b6   : > { %v23203_v4 = vsel %vm24921_vm14, %v11892_v47, %v11894_v63  ;;  %vm24922_vm15 = vmmov %vm24917_vm0  ;;  %17450 = vmatpush3.bf16.msra.mxu0 %v19105_v12  ;;  %v12773_v47 = vshll.u32 %v23245_v32, 16  ;;  %v12779_v12 = vshrl.u32 %v23251_v30, 16 }
 0x5b7   : > { %v23206_v31 = vsel %vm24922_vm15, %v11894_v63, %v11896_v59  ;;  %vm24923_vm5 = vmmov %vm24917_vm0  ;;  %17451 = vmatprep.subr.bf16.mxu0 %v19106_v51  ;;  %v12758_v63 = vor.u32 %v12757_v25, %v12754_v38  ;;  %v23278_v38 = vld [vmem:[#allocation2 + $0x50] sm:$0xff] }
 0x5b8   : > { %v23213_v7 = vsel %vm24923_vm5, %v11896_v59, %v11898_v34  ;;  %vm24924_vm13 = vmmov %vm24917_vm0  ;;  %v12766_v59 = vrot.slane %v12764_v27, 2  ;;  %v12775_v18 = vrot.slane %v12773_v47, 2  ;;  %v12781_v6 = vrot.slane %v12779_v12, 1 }
 0x5b9   : > { %v23216_v21 = vsel %vm24924_vm13, %v11898_v34, %v11900_v9  ;;  %vm24925_vm12 = vmmov %vm24917_vm0  ;;  %17416 = vmatmul.mubr.bf16.gmra.mrb[40].mxu0 %v22992_v58  ;;  %v23260_v58 = vor.u32 %v12748_v42, %v12745_v15  ;;  %v12782_v34 = vshll.u32 %v23251_v30, 16  ;;  %v19109_v42 = vld [vmem:[%s24025_s5 + $0xa8] sm:$0xff]   ;;  %v12790_v27 = vrot.slane %v12788_v62, 1 }
 0x5ba   : > { %v23222_v33 = vsel %vm24925_vm12, %v11900_v9, %v23209_v16  ;;  %vm24927_vm9 = vmmov %vm24917_vm0  ;;  %17419 = vmatprep.mubr.bf16.mxu0 %v23027_v23  ;;  %17452 = vmatpush3.bf16.msra.mxu0 %v19106_v51  ;;  %v23264_v23 = vld [vmem:[#allocation2 + $0x40] sm:$0xff]  ;;  %v23268_v9 = vld [vmem:[#allocation2 + $0x48] sm:$0xff]  ;;  %v12772_v51 = vrot.slane %v12770_v41, 1  ;;  %v12767_v3 = vor.u32 %v12766_v59, %v12763_v20  ;;  %v12791_v41 = vshll.u32 %v23254_v52, 16 }
 0x5bb   : > { %v23238_v0 = vsel %vm24927_vm9, %v23209_v16, %v24192_v2  ;;  %17453 = vmatprep.subr.bf16.mxu0 %v19107_v11  ;;  %v23273_v26 = vsel %vm24928_vm3, %v23260_v58, %v12758_v63  ;;  %v12784_v15 = vrot.slane %v12782_v34, 2  ;;  %vm24929_vm7 = vmmov %vm24928_vm3  ;;  %v12800_v20 = vshll.u32 %v23264_v23, 16 }
 0x5bc   : > { %v12776_v25 = vor.u32 %v12775_v18, %v12772_v51  ;;  %v23283_v47 = vsel %vm24929_vm7, %v12758_v63, %v12767_v3  ;;  %v12806_v59 = vshrl.u32 %v23268_v9, 16  ;;  %vm24930_vm1 = vmmov %vm24928_vm3  ;;  %v12793_v34 = vrot.slane %v12791_v41, 2 }
 0x5bd   : > { %v12785_v2 = vor.u32 %v12784_v15, %v12781_v6  ;;  %v12809_v18 = vshll.u32 %v23268_v9, 16  ;;  %vm24932_vm10 = vmmov %vm24930_vm1  ;;  %v12802_v62 = vrot.slane %v12800_v20, 2  ;;  %v12815_v15 = vshrl.u32 %v23278_v38, 16 }
 0x5be   : > { %17454 = vmatpush3.bf16.msra.mxu0 %v19107_v11  ;;  %v12797_v11 = vshrl.u32 %v23264_v23, 16  ;;  %v23289_v12 = vsel %vm24930_vm1, %v12767_v3, %v12776_v25  ;;  %v12808_v6 = vrot.slane %v12806_v59, 1  ;;  %v12794_v3 = vor.u32 %v12793_v34, %v12790_v27  ;;  %vm24933_vm11 = vmmov %vm24930_vm1  ;;  %v19111_v59 = vld [vmem:[%s24025_s5 + $0xb8] sm:$0xff]  }
 0x5bf   : > { %17455 = vmatprep.subr.bf16.mxu0 %v19108_v39  ;;  %24931 = vst [vmem:[#allocation14_spill] sm:$0xff] %v23289_v12  ;;  %v23294_v63 = vsel %vm24932_vm10, %v12776_v25, %v12785_v2  ;;  %v12811_v41 = vrot.slane %v12809_v18, 2  ;;  %v12817_v12 = vrot.slane %v12815_v15, 1  ;;  %vm24934_vm8 = vmmov %vm24930_vm1  ;;  %v23337_v18 = vld [vmem:[#allocation2 + $0x60] sm:$0xff] }
 0x5c0   : > { %v12799_v51 = vrot.slane %v12797_v11, 1  ;;  %v12818_v11 = vshll.u32 %v23278_v38, 16  ;;  %vm24935_vm0 = vmmov %vm24930_vm1  ;;  %24941 = vst [vmem:[#allocation29_spill] sm:$0xff] %v23337_v18 }
 0x5c1   : > { %17420 = vmatmul.mubr.bf16.gmra.mrb[44].mxu0 %v23043_v24  ;;  %v19110_v24 = vld [vmem:[%s24025_s5 + $0xb0] sm:$0xff]   ;;  %vm24938_vm4 = vmmov %vm24935_vm0 }
 0x5c2   : > { %17423 = vmatprep.mubr.bf16.mxu0 %v23058_v36  ;;  %17456 = vmatpush3.bf16.msra.mxu0 %v19108_v39  ;;  %v12803_v43 = vor.u32 %v12802_v62, %v12799_v51  ;;  %v23302_v36 = vsel %vm24933_vm11, %v12785_v2, %v12794_v3  ;;  %v12812_v39 = vor.u32 %v12811_v41, %v12808_v6  ;;  %v12820_v25 = vrot.slane %v12818_v11, 2  ;;  %v23335_v51 = vld [vmem:[#allocation2 + $0x58] sm:$0xff]  ;;  %v23346_v62 = vld [vmem:[#allocation2 + $0x68] sm:$0xff]  ;;  %v23348_v6 = vld [vmem:[#allocation2 + $0x70] sm:$0xff] }
 0x5c3   : > { %17457 = vmatprep.subr.bf16.mxu0 %v19109_v42  ;;  %24944 = vst [vmem:[#allocation36_spill] sm:$0xff] %v23346_v62  ;;  %vm24945_vm2 = vmmov %vm24942_vm6  ;;  %v23358_v41 = vld [vmem:[#allocation2 + $0x78] sm:$0xff] }
 0x5c4   : > { %v23305_v20 = vsel %vm24934_vm8, %v12794_v3, %v12803_v43  ;;  %v23311_v27 = vsel %vm24935_vm0, %v12803_v43, %v12812_v39  ;;  %v23313_v34 = vor.u32 %v12820_v25, %v12817_v12  ;;  %v23331_v43 = vrot.slane %v23230_v8, 2  ;;  %vm24947_vm14 = vmmov %vm24945_vm2 }
 0x5c5   : > { %24936 = vst [vmem:[#allocation28_spill] sm:$0xff] %v23311_v27  ;;  %v13316_v12 = vrot.slane %v23245_v32, 2  ;;  %v13320_v3 = vrot.slane %v23254_v52, 2  ;;  %vm24949_vm15 = vmmov %vm24945_vm2  ;;  %v13324_v25 = vrot.slane %v23268_v9, 2 }
 0x5c6   : > { %17458 = vmatpush3.bf16.msra.mxu0 %v19109_v42  ;;  %24937 = vst [vmem:[#allocation27_spill] sm:$0xff] %v23313_v34  ;;  %v23318_v2 = vsel %vm24938_vm4, %v12812_v39, %v23313_v34  ;;  %v23324_v42 = vld [vmem:[%s24025_s5 + $0xc0] sm:$0xff]   ;;  %24940 = vst [vmem:[#allocation35_spill] sm:$0xff] %v23331_v43  ;;  %v13322_v39 = vrot.slane %v23264_v23, 2  ;;  %v13332_v34 = vrot.slane %v23346_v62, 2 }
 0x5c7   : > { %17459 = vmatprep.subr.bf16.mxu0 %v19110_v24  ;;  %24939 = vst [vmem:[#allocation16_spill] sm:$0xff] %v23318_v2  ;;  %vm24952_vm5 = vmmov %vm24945_vm2  ;;  %v13334_v2 = vrot.slane %v23348_v6, 2 }
 0x5c8   : > { %vm24954_vm13 = vmmov %vm24945_vm2 }
 0x5c9   : > { %17424 = vmatmul.mubr.bf16.gmra.mrb[48].mxu0 %v23087_v28  ;;  %v24194_v28 = vrot.slane %v23227_v60, 2  ;;  %vm24956_vm12 = vmmov %vm24945_vm2 }
 0x5ca   : > { %17427 = vmatprep.mubr.bf16.mxu0 %v23090_v61  ;;  %17460 = vmatpush3.bf16.msra.mxu0 %v19110_v24  ;;  %v13314_v61 = vrot.slane %v23232_v19, 2  ;;  %vm24958_vm9 = vmmov %vm24945_vm2 }
 0x5cb   : > { %17461 = vmatprep.subr.bf16.mxu0 %v19111_v59  ;;  %vm24960_vm3 = vmmov %vm24945_vm2 }
 0x5cc   : > { %v23352_v15 = vsel %vm24945_vm2, %v23331_v43, %v13314_v61  ;;  %v23355_v24 = vsel %vm24947_vm14, %v13314_v61, %v13316_v12  ;;  %v13326_v61 = vrot.slane %v23278_v38, 2  ;;  %vm24962_vm7 = vmmov %vm24945_vm2  ;;  %vm24991_vm14 = vsmask.f32 5376 }
 0x5cd   : > { %24946 = vst [vmem:[#allocation30_spill] sm:$0xff] %v23352_v15  ;;  %24948 = vst [vmem:[#allocation49_spill] sm:$0xff] %v23355_v24  ;;  %v13328_v24 = vrot.slane %v23335_v51, 2  ;;  %v13330_v15 = vrot.slane %v23337_v18, 2 }
 0x5ce   : > { %17462 = vmatpush3.bf16.msra.mxu0 %v19111_v59  ;;  %v23365_v59 = vld [vmem:[#allocation2 + $0x80] sm:$0xff]  ;;  %vm24964_vm1 = vmmov %vm24945_vm2  ;;  %vm24989_vm2 = vcmask 1046528  }
 0x5cf   : > { %17499 = vmatprep.subr.bf16.mxu0 %v23324_v42  ;;  %24951 = vst [vmem:[#allocation53_spill] sm:$0xff] %v23365_v59  ;;  %v23393_v27 = vsel %vm24962_vm7, %v13328_v24, %v13330_v15  ;;  %vm24966_vm10 = vmmov %vm24964_vm1 }
 0x5d0   : > { %24963 = vst [vmem:[#allocation46_spill] sm:$0xff] %v23393_v27  ;;  %vm24968_vm11 = vmmov %vm24964_vm1 }
 0x5d1   : > { %17428 = vmatmul.mubr.bf16.gmra.mrb[52].mxu0 %v23096_v57  ;;  %v23343_v57 = vsel %vm24942_vm6, %v24194_v28, %v23331_v43  ;;  %v23367_v28 = vld [vmem:[#allocation2 + $0x88] sm:$0xff]  ;;  %vm24971_vm8 = vmmov %vm24964_vm1  ;;  %vm24987_vm6 = vsmask.f32 7424 }
 0x5d2   : > { %17431 = vmatprep.mubr.bf16.mxu0 %v23116_v17  ;;  %24943 = vst [vmem:[#allocation39_spill] sm:$0xff] %v23343_v57  ;;  %v13318_v17 = vrot.slane %v23251_v30, 2  ;;  %v23375_v57 = vld [vmem:[#allocation2 + $0x90] sm:$0xff]  ;;  %vm24973_vm0 = vmmov %vm24964_vm1 }
 0x5d3   : > { %vm24975_vm4 = vmmov %vm24973_vm0 }
 0x5d4   : > { %v23361_v11 = vsel %vm24949_vm15, %v13316_v12, %v13318_v17  ;;  %v23370_v43 = vsel %vm24952_vm5, %v13318_v17, %v13320_v3  ;;  %v23378_v12 = vsel %vm24954_vm13, %v13320_v3, %v13322_v39  ;;  %v23387_v17 = vsel %vm24958_vm9, %v13324_v25, %v13326_v61  ;;  %vm24995_vm15 = vmmov %vm24991_vm14 }
 0x5d5   : > { %24950 = vst [vmem:[#allocation50_spill] sm:$0xff] %v23361_v11  ;;  %24953 = vst [vmem:[#allocation55_spill] sm:$0xff] %v23370_v43  ;;  %v23381_v11 = vsel %vm24956_vm12, %v13322_v39, %v13324_v25  ;;  %v23390_v43 = vsel %vm24960_vm3, %v13326_v61, %v13328_v24  ;;  %v13336_v3 = vrot.slane %v23358_v41, 2  ;;  %v23398_v39 = vsel %vm24964_vm1, %v13330_v15, %v13332_v34  ;;  %v11299_v15 = vld [vmem:[#allocation2 + $0x90] sm:$0x1] }
 0x5d6   : > { %24955 = vst [vmem:[#allocation6_spill] sm:$0xff] %v23378_v12  ;;  %24957 = vst [vmem:[#allocation40_spill] sm:$0xff] %v23381_v11  ;;  %v23401_v11 = vsel %vm24966_vm10, %v13332_v34, %v13334_v2  ;;  %v13340_v25 = vrot.slane %v23367_v28, 2  ;;  %v23409_v24 = vrot.slane %v23375_v57, 2  ;;  %vm25017_vm10 = vcmask 1044480  }
 0x5d7   : > { %24959 = vst [vmem:[#allocation37_spill] sm:$0xff] %v23387_v17  ;;  %24961 = vst [vmem:[#allocation31_spill] sm:$0xff] %v23390_v43  ;;  %v23406_v61 = vsel %vm24968_vm11, %v13334_v2, %v13336_v3  ;;  %v11815_v2 = vld [vmem:[#allocation2] sm:$0xfe]  ;;  %v24984_v43 = vshrl.u32 %v23348_v6, 16 }
 0x5d8   : > { %24965 = vst [vmem:[#allocation42_spill] sm:$0xff] %v23398_v39  ;;  %24967 = vst [vmem:[#allocation41_spill] sm:$0xff] %v23401_v11  ;;  %v23419_v34 = vsel %vm24975_vm4, %v13340_v25, %v23409_v24  ;;  %v11460_v11 = vshll.u32 %v11299_v15, 16  ;;  %v11456_v39 = vshrl.u32 %v23106_v40, 16  ;;  %v24977_v40 = vshrl.u32 %v23335_v51, 16 }
 0x5d9   : > { %17432 = vmatmul.mubr.bf16.gmra.mrb[56].mxu0 %v23123_v54  ;;  %v13338_v54 = vrot.slane %v23365_v59, 2  ;;  %24969 = vst [vmem:[#allocation44_spill] sm:$0xff] %v23406_v61  ;;  %24970 = vst [vmem:[#allocation54_spill] sm:$0xff] %v23409_v24  ;;  %v24978_v15 = vshll.u32 %v23335_v51, 16 }
 0x5da   : > { %17435 = vmatprep.mubr.bf16.mxu0 %v23128_v5  ;;  %24976 = vst [vmem:[#allocation57_spill] sm:$0xff] %v23419_v34  ;;  %v11458_v24 = vor.u32 %v11456_v39, %v23140_v1  ;;  %v24983_v39 = vshll.u32 %v23346_v62, 16  ;;  %vm24999_vm5 = vmmov %vm24991_vm14 }
 0x5db   : > { %v23412_v27 = vsel %vm24971_vm8, %v13336_v3, %v13338_v54  ;;  %v23415_v5 = vsel %vm24973_vm0, %v13338_v54, %v13340_v25  ;;  %v14257_v3 = vrot.slane %v24977_v40, 2  ;;  %v14260_v61 = vrot.slane %v24978_v15, 3  ;;  %vm25003_vm13 = vmmov %vm24999_vm5 }
 0x5dc   : > { %24972 = vst [vmem:[#allocation51_spill] sm:$0xff] %v23412_v27  ;;  %24974 = vst [vmem:[#allocation43_spill] sm:$0xff] %v23415_v5  ;;  %v11869_v5 = vrot.slane %v11815_v2, 1  ;;  %v23427_v27 = vld [vmem:[#allocation2 + $0x8] sm:$0xff]  ;;  %v11462_v2 = vrot.slane %v11460_v11, 1  ;;  %v24979_v40 = vshrl.u32 %v23337_v18, 16 }
 0x5dd   : > { %v24980_v25 = vshll.u32 %v23337_v18, 16  ;;  %v23455_v34 = vor.u32 %v14260_v61, %v14257_v3  ;;  %v14278_v15 = vrot.slane %v24983_v39, 3  ;;  %v24985_v11 = vshll.u32 %v23348_v6, 16  ;;  %vm25005_vm12 = vmmov %vm24999_vm5 }
 0x5de   : > { %v24988_v61 = vrot.slane %v23427_v27, 1  ;;  %v24990_v39 = vshll.u32 %v23358_v41, 16  ;;  %vm25008_vm9 = vmmov %vm24999_vm5 }
 0x5df   : > { %v14269_v54 = vrot.slane %v24980_v25, 3  ;;  %24982 = vst [vmem:[#allocation58_spill] sm:$0xff] %v23455_v34  ;;  %v14287_v12 = vrot.slane %v24985_v11, 3  ;;  %v24986_v25 = vshrl.u32 %v23358_v41, 16  ;;  %v24993_v11 = vshrl.u32 %v23365_v59, 16  ;;  %vm25010_vm3 = vmmov %vm24999_vm5 }
 0x5e0   : > { %v11871_v3 = vsel %vm24989_vm2, %v11869_v5, %v24988_v61  ;;  %v24998_v61 = vshll.u32 %v23367_v28, 16  ;;  %vm25014_vm7 = vmmov %vm24989_vm2 }
 0x5e1   : > { %17436 = vmatmul.mubr.bf16.gmra.mrb[60].mxu0 %v23134_v37  ;;  %v24981_v37 = vshrl.u32 %v23346_v62, 16  ;;  %v14293_v18 = vrot.slane %v24986_v25, 2  ;;  %v14296_v62 = vrot.slane %v24990_v39, 3  ;;  %v14302_v25 = vrot.slane %v24993_v11, 2  ;;  %vm25015_vm1 = vmmov %vm25010_vm3 }
 0x5e2   : > { %17439 = vmatprep.mubr.bf16.mxu0 %v23138_v35  ;;  %v14266_v35 = vrot.slane %v24979_v40, 2  ;;  %v14284_v40 = vrot.slane %v24984_v43, 2  ;;  %v23472_v43 = vld [vmem:[#allocation2 + $0x98] sm:$0xff]  ;;  %v14314_v39 = vrot.slane %v24998_v61, 3  ;;  %v23510_v61 = vld [vmem:[#allocation2 + $0x30] sm:$0xff]  ;;  %vm25018_vm11 = vmmov %vm25017_vm10 }
 0x5e3   : > { %v14297_v5 = vor.u32 %v14296_v62, %v14293_v18  ;;  %vm25019_vm8 = vmmov %vm25017_vm10 }
 0x5e4   : > { %v14270_v17 = vor.u32 %v14269_v54, %v14266_v35  ;;  %v14288_v35 = vor.u32 %v14287_v12, %v14284_v40  ;;  %v25001_v40 = vshrl.u32 %v23375_v57, 16  ;;  %vm25021_vm0 = vmmov %vm24989_vm2 }
 0x5e5   : > { %vm25022_vm4 = vmmov %vm25019_vm8 }
 0x5e6   : > { %v23476_v54 = vsel %vm24991_vm14, %v23455_v34, %v14270_v17  ;;  %v14320_v11 = vrot.slane %v25001_v40, 2  ;;  %v23499_v18 = vsel %vm25003_vm13, %v14288_v35, %v14297_v5  ;;  %vm25024_vm2 = vmmov %vm25022_vm4 }
 0x5e7   : > { %24992 = vst [vmem:[#allocation45_spill] sm:$0xff] %v23476_v54  ;;  %25004 = vst [vmem:[#allocation47_spill] sm:$0xff] %v23499_v18 }
 0x5e8   : > { %vm25025_vm14 = vmmov %vm25024_vm2 }
 0x5e9   : > { %17440 = vmatmul.mubr.bf16.gmra.mrb[64].mxu0 %v23145_v22  ;;  %vm25028_vm13 = vmmov %vm25021_vm0 }
 0x5ea   : > { %17443 = vmatprep.mubr.bf16.mxu0 %v23153_v56  ;;  %v14275_v56 = vrot.slane %v24981_v37, 2  ;;  %v11463_v37 = vsel %vm24987_vm6, %v11458_v24, %v11462_v2  ;;  %v24994_v24 = vshll.u32 %v23365_v59, 16  ;;  %vm25023_vm6 = vmmov %vm25022_vm4 }
 0x5ec   : > { %v14279_v1 = vor.u32 %v14278_v15, %v14275_v56  ;;  %v14305_v2 = vrot.slane %v24994_v24, 3  ;;  %v24997_v56 = vshrl.u32 %v23367_v28, 16  ;;  %v25002_v24 = vshll.u32 %v23375_v57, 16 }
 0x5ee   : > { %v23483_v22 = vsel %vm24995_vm15, %v14270_v17, %v14279_v1  ;;  %v14311_v15 = vrot.slane %v24997_v56, 2  ;;  %v23490_v54 = vsel %vm24999_vm5, %v14279_v1, %v14288_v35  ;;  %v14306_v12 = vor.u32 %v14305_v2, %v14302_v25  ;;  %v23496_v17 = vld [vmem:[#allocation2 + $0x18] sm:$0xff]  ;;  %v23506_v25 = vld [vmem:[#allocation2 + $0x20] sm:$0xff]  ;;  %v23508_v2 = vld [vmem:[#allocation2 + $0x28] sm:$0xff] }
 0x5ef   : > { %24996 = vst [vmem:[#allocation60_spill] sm:$0xff] %v23483_v22  ;;  %25000 = vst [vmem:[#allocation61_spill] sm:$0xff] %v23490_v54  ;;  %v14323_v34 = vrot.slane %v25002_v24, 3  ;;  %v14327_v56 = vshrl.u32 %v23472_v43, 16  ;;  %v23504_v1 = vrot.slane %v23227_v60, 1  ;;  %v23515_v35 = vld [vmem:[#allocation2 + $0x38] sm:$0xff] }
 0x5f0   : > { %v14315_v62 = vor.u32 %v14314_v39, %v14311_v15  ;;  %v23517_v15 = vld [vmem:[#allocation2 + $0x40] sm:$0xff]  ;;  %v23526_v60 = vld [vmem:[#allocation2 + $0x48] sm:$0xff]  ;;  %vm25026_vm15 = vmmov %vm25024_vm2 }
 0x5f1   : > { %17444 = vmatmul.mubr.bf16.gmra.mrb[68].mxu0 %v11463_v37  ;;  %v14330_v37 = vshll.u32 %v23472_v43, 16  ;;  %v14324_v40 = vor.u32 %v14323_v34, %v14320_v11  ;;  %25007 = vst [vmem:[#allocation62_spill] sm:$0xff] %v23517_v15  ;;  %v14329_v24 = vrot.slane %v14327_v56, 2  ;;  %v14752_v34 = vrot.slane %v23506_v25, 3  ;;  %vm25027_vm5 = vmmov %vm25024_vm2 }
 0x5f2   : > { %17463 = vmatprep.mubr.bf16.mxu0 %v11871_v3  ;;  %v23513_v3 = vsel %vm25005_vm12, %v14297_v5, %v14306_v12  ;;  %v23520_v39 = vsel %vm25008_vm9, %v14306_v12, %v14315_v62  ;;  %v14754_v5 = vrot.slane %v23508_v2, 3  ;;  %v14756_v11 = vrot.slane %v23510_v61, 3  ;;  %vm25029_vm12 = vmmov %vm25021_vm0 }
 0x5f3   : > { %25006 = vst [vmem:[#allocation63_spill] sm:$0xff] %v23513_v3  ;;  %25009 = vst [vmem:[#allocation48_spill] sm:$0xff] %v23520_v39  ;;  %v14332_v18 = vrot.slane %v14330_v37, 3  ;;  %v23523_v54 = vsel %vm25010_vm3, %v14315_v62, %v14324_v40  ;;  %v25013_v12 = vrot.slane %v23427_v27, 1  ;;  %v19113_v62 = vld [vmem:[%s24025_s5 + $0xc8] sm:$0xff]   ;;  %v23540_v37 = vld [vmem:[#allocation2 + $0x50] sm:$0xff] }
 0x5f4   : > { %25011 = vst [vmem:[#allocation69_spill] sm:$0xff] %v23523_v54  ;;  %v25016_v54 = vrot.slane %v23496_v17, 3  ;;  %v23557_v39 = vsel %vm25019_vm8, %v14754_v5, %v14756_v11  ;;  %v25020_v3 = vrot.slane %v22870_v45, 1  ;;  %v19114_v45 = vld [vmem:[%s24025_s5 + $0xd0] sm:$0xff]   ;;  %vm25030_vm9 = vmmov %vm25021_vm0 }
 0x5f5   : > { %v23528_v59 = vor.u32 %v14332_v18, %v14329_v24  ;;  %v11873_v56 = vsel %vm25014_vm7, %v25013_v12, %v23504_v1  ;;  %v14758_v18 = vrot.slane %v23515_v35, 3  ;;  %v14760_v24 = vrot.slane %v23517_v15, 3  ;;  %vm25031_vm3 = vmmov %vm25021_vm0 }
 0x5f6   : > { %v23551_v27 = vsel %vm25017_vm10, %v25016_v54, %v14752_v34  ;;  %v23554_v12 = vsel %vm25018_vm11, %v14752_v34, %v14754_v5  ;;  %v11875_v15 = vsel %vm25021_vm0, %v23504_v1, %v25020_v3  ;;  %v14762_v54 = vrot.slane %v23526_v60, 3  ;;  %vm25032_vm7 = vmmov %vm25021_vm0 }
 0x5f7   : > { %25012 = vst [vmem:[#allocation66_spill] sm:$0xff] %v23528_v59  ;;  %v23546_v22 = vsel %vm25015_vm1, %v14324_v40, %v23528_v59  ;;  %v23564_v40 = vsel %vm25022_vm4, %v14756_v11, %v14758_v18  ;;  %v23567_v59 = vsel %vm25023_vm6, %v14758_v18, %v14760_v24  ;;  %v14764_v34 = vrot.slane %v23540_v37, 3  ;;  %vm25033_vm1 = vmmov %vm25021_vm0 }
 0x5f8   : > { %v23576_v3 = vsel %vm25024_vm2, %v14760_v24, %v14762_v54  ;;  %v14778_v11 = vrot.slane %v23367_v28, 3  ;;  %vm25034_vm10 = vmmov %vm25021_vm0  ;;  %vm25040_vm2 = vsmask.f32 6400 }
 0x5f9   : > { %17464 = vmatmul.mubr.bf16.vlgmr.msra.gmra.mrb[36].mxu0 %v11873_v56  ;;  %v23581_v5 = vsel %vm25025_vm14, %v14762_v54, %v14764_v34  ;;  %v19115_v56 = vld [vmem:[%s24025_s5 + $0xd8] sm:$0xff]   ;;  %v19117_v54 = vld [vmem:[%s24025_s5 + $0xe8] sm:$0xff]   ;;  %vm25035_vm11 = vmmov %vm25021_vm0 }
 0x5fa   : > { %17467 = vmatprep.mubr.bf16.mxu0 %v11875_v15  ;;  %17500 = vmatpush3.bf16.msra.mxu0 %v23324_v42  ;;  %v14780_v42 = vrot.slane %v23375_v57, 3  ;;  %v14782_v15 = vrot.slane %v23472_v43, 3  ;;  %vm25036_vm8 = vmmov %vm25021_vm0 }
 0x5fb   : > { %17501 = vmatprep.subr.bf16.mxu0 %v19113_v62  ;;  %vm25037_vm4 = vmmov %vm25021_vm0 }
 0x5fc   : > { %v23592_v18 = vsel %vm25026_vm15, %v14778_v11, %v14780_v42  ;;  %v23597_v24 = vsel %vm25027_vm5, %v14780_v42, %v14782_v15  ;;  %v12314_v42 = vrot.slane %v23230_v8, 1  ;;  %v12318_v8 = vrot.slane %v23245_v32, 1  ;;  %v19124_v32 = vld [vmem:[%s24025_s5 + $0x120] sm:$0xff]   ;;  %vm25039_vm6 = vmmov %vm25021_vm0 }
 0x5fd   : > { %vm25050_vm14 = vmmov %vm25040_vm2 }
 0x5fe   : > { %17502 = vmatpush3.bf16.msra.mxu0 %v19113_v62  ;;  %v19116_v62 = vld [vmem:[%s24025_s5 + $0xe0] sm:$0xff]   ;;  %vm25054_vm15 = vmmov %vm25040_vm2 }
 0x5ff   : > { %17503 = vmatprep.subr.bf16.mxu0 %v19114_v45  ;;  %vm25057_vm5 = vmmov %vm25040_vm2 }
 0x601   : > { %17468 = vmatmul.mubr.bf16.gmra.mrb[40].mxu0 %v23158_v14  ;;  %v19118_v14 = vld [vmem:[%s24025_s5 + $0xf0] sm:$0xff]  }
 0x602   : > { %17471 = vmatprep.mubr.bf16.mxu0 %v23161_v46  ;;  %17504 = vmatpush3.bf16.msra.mxu0 %v19114_v45  ;;  %v19119_v46 = vld [vmem:[%s24025_s5 + $0xf8] sm:$0xff]  }
 0x603   : > { %17505 = vmatprep.subr.bf16.mxu0 %v19115_v56 }
 0x606   : > { %17506 = vmatpush3.bf16.msra.mxu0 %v19115_v56  ;;  %v12316_v56 = vrot.slane %v23232_v19, 1  ;;  %v12320_v19 = vrot.slane %v23251_v30, 1  ;;  %v12322_v30 = vrot.slane %v23254_v52, 1  ;;  %v19126_v52 = vld [vmem:[%s24025_s5 + $0x130] sm:$0xff]  }
 0x607   : > { %17507 = vmatprep.subr.bf16.mxu0 %v19116_v62 }
 0x609   : > { %17472 = vmatmul.mubr.bf16.gmra.mrb[44].mxu0 %v23169_v13  ;;  %v19120_v13 = vld [vmem:[%s24025_s5 + $0x100] sm:$0xff]  }
 0x60a   : > { %17475 = vmatprep.mubr.bf16.mxu0 %v23172_v10  ;;  %17508 = vmatpush3.bf16.msra.mxu0 %v19116_v62  ;;  %v11833_v10 = vld [vmem:[#allocation2 + $0x90] sm:$0x1]  ;;  %v19121_v62 = vld [vmem:[%s24025_s5 + $0x108] sm:$0xff]  }
 0x60b   : > { %17509 = vmatprep.subr.bf16.mxu0 %v19117_v54 }
 0x60e   : > { %17510 = vmatpush3.bf16.msra.mxu0 %v19117_v54  ;;  %v12315_v54 = vsel %vm25030_vm9, %v23504_v1, %v12314_v42  ;;  %vm25067_vm9 = vmmov %vm25040_vm2 }
 0x60f   : > { %17511 = vmatprep.subr.bf16.mxu0 %v19118_v14 }
 0x611   : > { %17476 = vmatmul.mubr.bf16.gmra.mrb[48].mxu0 %v23179_v44  ;;  %v12257_v44 = vld [vmem:[#allocation2 + $0x8] sm:$0xfe] }
 0x612   : > { %17479 = vmatprep.mubr.bf16.mxu0 %v23182_v55  ;;  %17512 = vmatpush3.bf16.msra.mxu0 %v19118_v14  ;;  %v11904_v55 = vrot.slane %v11833_v10, 1  ;;  %v12311_v45 = vrot.slane %v12257_v44, 1  ;;  %v12317_v14 = vsel %vm25031_vm3, %v12314_v42, %v12316_v56  ;;  %v12324_v10 = vrot.slane %v23264_v23, 1  ;;  %v19125_v44 = vld [vmem:[%s24025_s5 + $0x128] sm:$0xff]   ;;  %vm25070_vm3 = vmmov %vm25040_vm2 }
 0x613   : > { %17513 = vmatprep.subr.bf16.mxu0 %v19119_v46  ;;  %v12326_v23 = vrot.slane %v23268_v9, 1  ;;  %v19128_v9 = vld [vmem:[%s24025_s5 + $0x140] sm:$0xff]  }
 0x615   : > { %v12327_v42 = vsel %vm25036_vm8, %v12324_v10, %v12326_v23 }
 0x616   : > { %17514 = vmatpush3.bf16.msra.mxu0 %v19119_v46  ;;  %v12319_v46 = vsel %vm25032_vm7, %v12316_v56, %v12318_v8  ;;  %vm25071_vm7 = vmmov %vm25040_vm2 }
 0x617   : > { %17551 = vmatprep.subr.bf16.mxu0 %v19120_v13 }
 0x619   : > { %17480 = vmatmul.mubr.bf16.gmra.mrb[52].mxu0 %v23185_v53  ;;  %v11905_v53 = vsel %vm25028_vm13, %v23209_v16, %v11904_v55  ;;  %v19122_v16 = vld [vmem:[%s24025_s5 + $0x110] sm:$0xff]   ;;  %v12323_v55 = vsel %vm25034_vm10, %v12320_v19, %v12322_v30  ;;  %vm25060_vm13 = vmmov %vm25040_vm2  ;;  %vm25075_vm10 = vcmask 1045504  }
 0x61a   : > { %17483 = vmatprep.mubr.bf16.mxu0 %v23189_v49  ;;  %v12313_v49 = vsel %vm25029_vm12, %v12311_v45, %v23504_v1  ;;  %v19123_v1 = vld [vmem:[%s24025_s5 + $0x118] sm:$0xff]   ;;  %v12325_v45 = vsel %vm25035_vm11, %v12322_v30, %v12324_v10  ;;  %vm25064_vm12 = vmmov %vm25040_vm2 }
 0x61b   : > { %vm25093_vm11 = vmmov %vm25075_vm10 }
 0x61c   : > { %vm25095_vm8 = vmmov %vm25075_vm10 }
 0x621   : > { %17484 = vmatmul.mubr.bf16.gmra.mrb[56].mxu0 %v23193_v48 }
 0x622   : > { %17487 = vmatprep.mubr.bf16.mxu0 %v23203_v4 }
 0x629   : > { %17488 = vmatmul.mubr.bf16.gmra.mrb[60].mxu0 %v23206_v31 }
 0x62a   : > { %17491 = vmatprep.mubr.bf16.mxu0 %v23213_v7 }
 0x631   : > { %17492 = vmatmul.mubr.bf16.gmra.mrb[64].mxu0 %v23216_v21 }
 0x632   : > { %17495 = vmatprep.mubr.bf16.mxu0 %v23222_v33 }
 0x639   : > { %17496 = vmatmul.mubr.bf16.gmra.mrb[68].mxu0 %v11905_v53  ;;  %v12328_v53 = vrot.slane %v23278_v38, 1 }
 0x63a   : > { %17515 = vmatprep.mubr.bf16.mxu0 %v12313_v49  ;;  %v19127_v49 = vld [vmem:[%s24025_s5 + $0x138] sm:$0xff]  }
 0x63b   : > { %v12329_v56 = vsel %vm25021_vm0, %v12326_v23, %v12328_v53  ;;  %v12331_v38 = vsel %vm25037_vm4, %v12328_v53, %v23175_v29  ;;  %vm25096_vm0 = vmmov %vm25095_vm8 }
 0x63c   : > { %vm25097_vm4 = vmmov %vm25096_vm0 }
 0x641   : > { %17516 = vmatmul.mubr.bf16.vlgmr.msra.gmra.mrb[36].mxu0 %v12315_v54 }
 0x642   : > { %17519 = vmatprep.mubr.bf16.mxu0 %v12317_v14  ;;  %17552 = vmatpush3.bf16.msra.mxu0 %v19120_v13  ;;  %v12321_v13 = vsel %vm25033_vm1, %v12318_v8, %v12320_v19  ;;  %vm25072_vm1 = vmmov %vm25040_vm2 }
 0x643   : > { %17553 = vmatprep.subr.bf16.mxu0 %v19121_v62 }
 0x646   : > { %17554 = vmatpush3.bf16.msra.mxu0 %v19121_v62  ;;  %v12699_v62 = vld [vmem:[#allocation2 + $0x8] sm:$0xfe] }
 0x647   : > { %17555 = vmatprep.subr.bf16.mxu0 %v19122_v16  ;;  %v12735_v54 = vshrl.u32 %v12699_v62, 16  ;;  %v12738_v14 = vshll.u32 %v12699_v62, 16 }
 0x649   : > { %17520 = vmatmul.mubr.bf16.gmra.mrb[40].mxu0 %v12319_v46  ;;  %v12737_v8 = vrot.slane %v12735_v54, 1  ;;  %v12740_v19 = vrot.slane %v12738_v14, 2  ;;  %v25055_v14 = vshrl.u32 %v23348_v6, 16 }
 0x64a   : > { %17523 = vmatprep.mubr.bf16.mxu0 %v12321_v13  ;;  %17556 = vmatpush3.bf16.msra.mxu0 %v19122_v16  ;;  %v12275_v16 = vld [vmem:[#allocation2 + $0x98] sm:$0x1]  ;;  %v25043_v13 = vshll.u32 %v23335_v51, 16 }
 0x64b   : > { %17557 = vmatprep.subr.bf16.mxu0 %v19123_v1  ;;  %v12346_v29 = vrot.slane %v12275_v16, 1  ;;  %v12853_v16 = vrot.slane %v25055_v14, 1 }
 0x64e   : > { %17558 = vmatpush3.bf16.msra.mxu0 %v19123_v1  ;;  %v25042_v1 = vshrl.u32 %v23335_v51, 16  ;;  %v25049_v51 = vld [vmem:[#allocation27_spill] sm:$0xff] }
 0x64f   : > { %17559 = vmatprep.subr.bf16.mxu0 %v19124_v32 }
 0x650   : > { %v12826_v46 = vrot.slane %v25042_v1, 1 }
 0x651   : > { %17524 = vmatmul.mubr.bf16.gmra.mrb[44].mxu0 %v12323_v55 }
 0x652   : > { %17527 = vmatprep.mubr.bf16.mxu0 %v12325_v45  ;;  %17560 = vmatpush3.bf16.msra.mxu0 %v19124_v32  ;;  %v25044_v32 = vld [vmem:[#allocation28_spill] sm:$0xff] }
 0x653   : > { %17561 = vmatprep.subr.bf16.mxu0 %v19125_v44  ;;  %v25048_v45 = vld [vmem:[#allocation16_spill] sm:$0xff] }
 0x656   : > { %17562 = vmatpush3.bf16.msra.mxu0 %v19125_v44 }
 0x657   : > { %17563 = vmatprep.subr.bf16.mxu0 %v19126_v52 }
 0x659   : > { %17528 = vmatmul.mubr.bf16.gmra.mrb[48].mxu0 %v12327_v42  ;;  %v25051_v42 = vld [vmem:[#allocation36_spill] sm:$0xff] }
 0x65a   : > { %17531 = vmatprep.mubr.bf16.mxu0 %v12329_v56  ;;  %17564 = vmatpush3.bf16.msra.mxu0 %v19126_v52  ;;  %v19136_v52 = vld [vmem:[%s24025_s5 + $0x180] sm:$0xff]   ;;  %v25052_v56 = vshrl.u32 %v25051_v42, 16 }
 0x65b   : > { %17565 = vmatprep.subr.bf16.mxu0 %v19127_v49 }
 0x65e   : > { %17566 = vmatpush3.bf16.msra.mxu0 %v19127_v49 }
 0x65f   : > { %17603 = vmatprep.subr.bf16.mxu0 %v19128_v9 }
 0x661   : > { %17532 = vmatmul.mubr.bf16.gmra.mrb[52].mxu0 %v12331_v38  ;;  %v25053_v38 = vshll.u32 %v25051_v42, 16 }
 0x662   : > { %17535 = vmatprep.mubr.bf16.mxu0 %v23193_v48  ;;  %v12741_v48 = vor.u32 %v12740_v19, %v12737_v8  ;;  %v25056_v8 = vshll.u32 %v23348_v6, 16 }
 0x663   : > { %v12847_v62 = vrot.slane %v25053_v38, 2 }
 0x664   : > { %v12856_v19 = vrot.slane %v25056_v8, 2 }
 0x669   : > { %17536 = vmatmul.mubr.bf16.gmra.mrb[56].mxu0 %v23203_v4  ;;  %v25038_v4 = vrot.slane %v23109_v50, 1  ;;  %v19130_v50 = vld [vmem:[%s24025_s5 + $0x150] sm:$0xff]  }
 0x66a   : > { %17539 = vmatprep.mubr.bf16.mxu0 %v23206_v31 }
 0x66b   : > { %v12347_v31 = vsel %vm25039_vm6, %v25038_v4, %v12346_v29  ;;  %vm25098_vm6 = vsmask.f32 5376 }
 0x671   : > { %17540 = vmatmul.mubr.bf16.gmra.mrb[60].mxu0 %v23213_v7  ;;  %v12750_v7 = vsel %vm25040_vm2, %v12741_v48, %v23260_v58  ;;  %v19132_v58 = vld [vmem:[%s24025_s5 + $0x160] sm:$0xff]   ;;  %v12857_v48 = vor.u32 %v12856_v19, %v12853_v16  ;;  %v25073_v16 = vld [vmem:[#allocation25_spill] sm:$0xff]  ;;  %vm25099_vm2 = vmmov %vm25098_vm6 }
 0x672   : > { %17543 = vmatprep.mubr.bf16.mxu0 %v23216_v21  ;;  %v19129_v21 = vld [vmem:[%s24025_s5 + $0x148] sm:$0xff]   ;;  %v25074_v8 = vrot.slane %v25073_v16, 2  ;;  %v19152_v16 = vld [vmem:[%s24025_s5 + $0x200] sm:$0xff]  }
 0x679   : > { %17544 = vmatmul.mubr.bf16.gmra.mrb[64].mxu0 %v23222_v33  ;;  %v19131_v33 = vld [vmem:[%s24025_s5 + $0x158] sm:$0xff]  }
 0x67a   : > { %17547 = vmatprep.mubr.bf16.mxu0 %v23238_v0  ;;  %v25041_v0 = vld [vmem:[#allocation14_spill] sm:$0xff] }
 0x681   : > { %17548 = vmatmul.mubr.bf16.gmra.mrb[68].mxu0 %v12347_v31  ;;  %v25058_v31 = vshrl.u32 %v23358_v41, 16 }
 0x682   : > { %17567 = vmatprep.mubr.bf16.mxu0 %v12750_v7 }
 0x683   : > { %v12862_v7 = vrot.slane %v25058_v31, 1  ;;  %v19138_v31 = vld [vmem:[%s24025_s5 + $0x190] sm:$0xff]  }
 0x689   : > { %17568 = vmatmul.mubr.bf16.vlgmr.msra.gmra.mrb[36].mxu0 %v23273_v26  ;;  %v19133_v26 = vld [vmem:[%s24025_s5 + $0x168] sm:$0xff]  }
 0x68a   : > { %17571 = vmatprep.mubr.bf16.mxu0 %v23283_v47  ;;  %17604 = vmatpush3.bf16.msra.mxu0 %v19128_v9  ;;  %v19134_v47 = vld [vmem:[%s24025_s5 + $0x170] sm:$0xff]   ;;  %v12844_v9 = vrot.slane %v25052_v56, 1 }
 0x68b   : > { %17605 = vmatprep.subr.bf16.mxu0 %v19129_v21 }
 0x68c   : > { %v12848_v29 = vor.u32 %v12847_v62, %v12844_v9  ;;  %v13255_v62 = vld [vmem:[#allocation2 + $0x8] sm:$0xfc] }
 0x68d   : > { %v13309_v14 = vrot.slane %v13255_v62, 2  ;;  %v19148_v62 = vld [vmem:[%s24025_s5 + $0x1e0] sm:$0xff]  }
 0x68e   : > { %17606 = vmatpush3.bf16.msra.mxu0 %v19129_v21  ;;  %v25059_v21 = vshll.u32 %v23358_v41, 16  ;;  %v25066_v41 = vshll.u32 %v23367_v28, 16 }
 0x68f   : > { %17607 = vmatprep.subr.bf16.mxu0 %v19130_v50  ;;  %v13311_v19 = vsel %vm25075_vm10, %v13309_v14, %v25074_v8  ;;  %v19150_v14 = vld [vmem:[%s24025_s5 + $0x1f0] sm:$0xff]  }
 0x690   : > { %v14139_v8 = vld [vmem:[#allocation2 + $0x10] sm:$0xfc] }
 0x691   : > { %17572 = vmatmul.mubr.bf16.gmra.mrb[40].mxu0 %v25041_v0  ;;  %v25061_v0 = vld [vmem:[#allocation53_spill] sm:$0xff] }
 0x692   : > { %17575 = vmatprep.mubr.bf16.mxu0 %v23294_v63  ;;  %17608 = vmatpush3.bf16.msra.mxu0 %v19130_v50  ;;  %v19135_v63 = vld [vmem:[%s24025_s5 + $0x178] sm:$0xff]   ;;  %v12865_v50 = vrot.slane %v25059_v21, 2  ;;  %v25063_v6 = vshll.u32 %v25061_v0, 16  ;;  %v25078_v21 = vld [vmem:[#allocation49_spill] sm:$0xff] }
 0x693   : > { %17609 = vmatprep.subr.bf16.mxu0 %v19131_v33 }
 0x696   : > { %17610 = vmatpush3.bf16.msra.mxu0 %v19131_v33  ;;  %v12858_v33 = vsel %vm25060_vm13, %v12848_v29, %v12857_v48  ;;  %vm25104_vm13 = vmmov %vm25099_vm2 }
 0x697   : > { %17611 = vmatprep.subr.bf16.mxu0 %v19132_v58 }
 0x699   : > { %17576 = vmatmul.mubr.bf16.gmra.mrb[44].mxu0 %v23302_v36  ;;  %v12829_v36 = vrot.slane %v25043_v13, 2  ;;  %v25065_v13 = vshrl.u32 %v23367_v28, 16 }
 0x69a   : > { %17579 = vmatprep.mubr.bf16.mxu0 %v23305_v20  ;;  %17612 = vmatpush3.bf16.msra.mxu0 %v19132_v58  ;;  %v25045_v20 = vld [vmem:[#allocation29_spill] sm:$0xff]  ;;  %v25062_v58 = vshrl.u32 %v25061_v0, 16  ;;  %v25080_v0 = vld [vmem:[#allocation55_spill] sm:$0xff] }
 0x69b   : > { %17613 = vmatprep.subr.bf16.mxu0 %v19133_v26  ;;  %v25046_v30 = vshrl.u32 %v25045_v20, 16  ;;  %v25047_v44 = vshll.u32 %v25045_v20, 16  ;;  %v12830_v23 = vor.u32 %v12829_v36, %v12826_v46  ;;  %v12880_v36 = vrot.slane %v25065_v13, 1  ;;  %v25085_v13 = vld [vmem:[#allocation46_spill] sm:$0xff] }
 0x69d   : > { %v12835_v10 = vrot.slane %v25046_v30, 1  ;;  %v12838_v55 = vrot.slane %v25047_v44, 2  ;;  %v12831_v49 = vsel %vm25050_vm14, %v25049_v51, %v12830_v23  ;;  %v25068_v30 = vshrl.u32 %v23375_v57, 16  ;;  %vm25100_vm14 = vmmov %vm25099_vm2 }
 0x69e   : > { %17614 = vmatpush3.bf16.msra.mxu0 %v19133_v26  ;;  %v12871_v26 = vrot.slane %v25062_v58, 1  ;;  %v25069_v44 = vshll.u32 %v23375_v57, 16  ;;  %v25081_v58 = vld [vmem:[#allocation6_spill] sm:$0xff] }
 0x69f   : > { %17615 = vmatprep.subr.bf16.mxu0 %v19134_v47  ;;  %v12839_v53 = vor.u32 %v12838_v55, %v12835_v10  ;;  %v12889_v10 = vrot.slane %v25068_v30, 1  ;;  %v25090_v30 = vld [vmem:[#allocation43_spill] sm:$0xff] }
 0x6a0   : > { %v12892_v55 = vrot.slane %v25069_v44, 2  ;;  %v25091_v44 = vld [vmem:[#allocation57_spill] sm:$0xff] }
 0x6a1   : > { %17580 = vmatmul.mubr.bf16.gmra.mrb[48].mxu0 %v25044_v32  ;;  %v12840_v54 = vsel %vm25054_vm15, %v12830_v23, %v12839_v53  ;;  %v12849_v4 = vsel %vm25057_vm5, %v12839_v53, %v12848_v29  ;;  %v12883_v32 = vrot.slane %v25066_v41, 2  ;;  %v19137_v29 = vld [vmem:[%s24025_s5 + $0x188] sm:$0xff]   ;;  %v25087_v41 = vld [vmem:[#allocation41_spill] sm:$0xff]  ;;  %vm25102_vm15 = vmmov %vm25099_vm2 }
 0x6a2   : > { %17583 = vmatprep.mubr.bf16.mxu0 %v25048_v45  ;;  %17616 = vmatpush3.bf16.msra.mxu0 %v19134_v47  ;;  %v12874_v47 = vrot.slane %v25063_v6, 2  ;;  %v12717_v45 = vld [vmem:[#allocation2 + $0x98] sm:$0x3]  ;;  %vm25103_vm5 = vmmov %vm25099_vm2 }
 0x6a3   : > { %17617 = vmatprep.subr.bf16.mxu0 %v19135_v63  ;;  %v12884_v23 = vor.u32 %v12883_v32, %v12880_v36  ;;  %v12896_v53 = vshrl.u32 %v12717_v45, 16  ;;  %v12899_v51 = vshll.u32 %v12717_v45, 16  ;;  %v19143_v6 = vld [vmem:[%s24025_s5 + $0x1b8] sm:$0xff]   ;;  %v25088_v32 = vld [vmem:[#allocation44_spill] sm:$0xff]  ;;  %v13697_v45 = vld [vmem:[#allocation2 + $0x10] sm:$0xfc] }
 0x6a4   : > { %v12875_v1 = vor.u32 %v12874_v47, %v12871_v26  ;;  %v19142_v26 = vld [vmem:[%s24025_s5 + $0x1b0] sm:$0xff]   ;;  %v25082_v47 = vld [vmem:[#allocation40_spill] sm:$0xff]  ;;  %v25086_v36 = vld [vmem:[#allocation42_spill] sm:$0xff] }
 0x6a5   : > { %v12898_v56 = vrot.slane %v12896_v53, 1  ;;  %v12901_v9 = vrot.slane %v12899_v51, 2  ;;  %v25092_v53 = vld [vmem:[#allocation54_spill] sm:$0xff] }
 0x6a6   : > { %17618 = vmatpush3.bf16.msra.mxu0 %v19135_v63  ;;  %v12866_v63 = vor.u32 %v12865_v50, %v12862_v7  ;;  %v12885_v42 = vsel %vm25070_vm3, %v12875_v1, %v12884_v23  ;;  %v19139_v7 = vld [vmem:[%s24025_s5 + $0x198] sm:$0xff]   ;;  %vm25108_vm3 = vmmov %vm25099_vm2 }
 0x6a7   : > { %17655 = vmatprep.subr.bf16.mxu0 %v19136_v52  ;;  %v25079_v50 = vld [vmem:[#allocation50_spill] sm:$0xff] }
 0x6a8   : > { %v12867_v46 = vsel %vm25064_vm12, %v12857_v48, %v12866_v63  ;;  %v12876_v20 = vsel %vm25067_vm9, %v12866_v63, %v12875_v1  ;;  %v25076_v48 = vld [vmem:[#allocation39_spill] sm:$0xff]  ;;  %v25083_v63 = vld [vmem:[#allocation37_spill] sm:$0xff]  ;;  %vm25105_vm12 = vmmov %vm25099_vm2 }
 0x6a9   : > { %17584 = vmatmul.mubr.bf16.gmra.mrb[52].mxu0 %v12831_v49  ;;  %v12893_v49 = vor.u32 %v12892_v55, %v12889_v10  ;;  %v19144_v1 = vld [vmem:[%s24025_s5 + $0x1c0] sm:$0xff]   ;;  %v13273_v10 = vld [vmem:[#allocation2 + $0x98] sm:$0x3]  ;;  %vm25106_vm9 = vmmov %vm25099_vm2 }
 0x6aa   : > { %17587 = vmatprep.mubr.bf16.mxu0 %v12840_v54  ;;  %v12902_v54 = vor.u32 %v12901_v9, %v12898_v56  ;;  %v13344_v55 = vrot.slane %v13273_v10, 2  ;;  %v19145_v56 = vld [vmem:[%s24025_s5 + $0x1c8] sm:$0xff]   ;;  %v19146_v9 = vld [vmem:[%s24025_s5 + $0x1d0] sm:$0xff]  }
 0x6ab   : > { %v12894_v38 = vsel %vm25071_vm7, %v12884_v23, %v12893_v49  ;;  %v13751_v23 = vrot.slane %v13697_v45, 2  ;;  %v14219_v45 = vshrl.u32 %v23515_v35, 16  ;;  %vm25117_vm7 = vmmov %vm25099_vm2 }
 0x6ac   : > { %v12903_v57 = vsel %vm25072_vm1, %v12893_v49, %v12902_v54  ;;  %v13345_v51 = vsel %vm25093_vm11, %v25092_v53, %v13344_v55  ;;  %v25094_v49 = vld [vmem:[#allocation35_spill] sm:$0xff]  ;;  %v19149_v54 = vld [vmem:[%s24025_s5 + $0x1e8] sm:$0xff]   ;;  %vm25119_vm1 = vcmask 1044480  }
 0x6ad   : > { %vm25120_vm10 = vmmov %vm25119_vm1 }
 0x6ae   : > { %vm25121_vm11 = vmmov %vm25119_vm1 }
 0x6b1   : > { %17588 = vmatmul.mubr.bf16.gmra.mrb[56].mxu0 %v12849_v4  ;;  %v25077_v4 = vld [vmem:[#allocation30_spill] sm:$0xff] }
 0x6b2   : > { %17591 = vmatprep.mubr.bf16.mxu0 %v12858_v33  ;;  %v19141_v33 = vld [vmem:[%s24025_s5 + $0x1a8] sm:$0xff]  }
 0x6b9   : > { %17592 = vmatmul.mubr.bf16.gmra.mrb[60].mxu0 %v12867_v46  ;;  %v25084_v46 = vld [vmem:[#allocation31_spill] sm:$0xff] }
 0x6ba   : > { %17595 = vmatprep.mubr.bf16.mxu0 %v12876_v20  ;;  %v25089_v20 = vld [vmem:[#allocation51_spill] sm:$0xff] }
 0x6c1   : > { %17596 = vmatmul.mubr.bf16.gmra.mrb[64].mxu0 %v12885_v42  ;;  %v13753_v42 = vsel %vm25095_vm8, %v13751_v23, %v25094_v49  ;;  %v19153_v23 = vld [vmem:[%s24025_s5 + $0x208] sm:$0xff]   ;;  %vm25122_vm8 = vmmov %vm25119_vm1 }
 0x6c2   : > { %17599 = vmatprep.mubr.bf16.mxu0 %v12894_v38  ;;  %v19147_v38 = vld [vmem:[%s24025_s5 + $0x1d8] sm:$0xff]  }
 0x6c9   : > { %17600 = vmatmul.mubr.bf16.gmra.mrb[68].mxu0 %v12903_v57  ;;  %v19151_v57 = vld [vmem:[%s24025_s5 + $0x1f8] sm:$0xff]  }
 0x6ca   : > { %17619 = vmatprep.mubr.bf16.mxu0 %v13311_v19  ;;  %v13784_v19 = vrot.slane %v23472_v43, 2 }
 0x6d1   : > { %17620 = vmatmul.mubr.bf16.vlgmr.msra.gmra.mrb[36].mxu0 %v25076_v48  ;;  %v14186_v48 = vshll.u32 %v23496_v17, 16 }
 0x6d2   : > { %17623 = vmatprep.mubr.bf16.mxu0 %v25077_v4  ;;  %17656 = vmatpush3.bf16.msra.mxu0 %v19136_v52  ;;  %v19140_v52 = vld [vmem:[%s24025_s5 + $0x1a0] sm:$0xff]  }
 0x6d3   : > { %17657 = vmatprep.subr.bf16.mxu0 %v19137_v29 }
 0x6d6   : > { %17658 = vmatpush3.bf16.msra.mxu0 %v19137_v29  ;;  %v14183_v29 = vshrl.u32 %v23496_v17, 16 }
 0x6d7   : > { %17659 = vmatprep.subr.bf16.mxu0 %v19138_v31 }
 0x6d9   : > { %17624 = vmatmul.mubr.bf16.gmra.mrb[40].mxu0 %v25078_v21 }
 0x6da   : > { %17627 = vmatprep.mubr.bf16.mxu0 %v25079_v50  ;;  %17660 = vmatpush3.bf16.msra.mxu0 %v19138_v31  ;;  %v14178_v31 = vshll.u32 %v14139_v8, 16 }
 0x6db   : > { %17661 = vmatprep.subr.bf16.mxu0 %v19139_v7 }
 0x6de   : > { %17662 = vmatpush3.bf16.msra.mxu0 %v19139_v7  ;;  %v13785_v7 = vsel %vm25096_vm0, %v25092_v53, %v13784_v19  ;;  %vm25123_vm0 = vmmov %vm25119_vm1 }
 0x6df   : > { %17663 = vmatprep.subr.bf16.mxu0 %v19140_v52 }
 0x6e1   : > { %17628 = vmatmul.mubr.bf16.gmra.mrb[44].mxu0 %v25080_v0 }
 0x6e2   : > { %17631 = vmatprep.mubr.bf16.mxu0 %v25081_v58  ;;  %17664 = vmatpush3.bf16.msra.mxu0 %v19140_v52  ;;  %v14188_v52 = vrot.slane %v14186_v48, 3 }
 0x6e3   : > { %17665 = vmatprep.subr.bf16.mxu0 %v19141_v33 }
 0x6e6   : > { %17666 = vmatpush3.bf16.msra.mxu0 %v19141_v33 }
 0x6e7   : > { %17667 = vmatprep.subr.bf16.mxu0 %v19142_v26 }
 0x6e9   : > { %17632 = vmatmul.mubr.bf16.gmra.mrb[48].mxu0 %v25082_v47 }
 0x6ea   : > { %17635 = vmatprep.mubr.bf16.mxu0 %v25083_v63  ;;  %17668 = vmatpush3.bf16.msra.mxu0 %v19142_v26  ;;  %v14192_v26 = vshrl.u32 %v23506_v25, 16 }
 0x6eb   : > { %17669 = vmatprep.subr.bf16.mxu0 %v19143_v6 }
 0x6ee   : > { %17670 = vmatpush3.bf16.msra.mxu0 %v19143_v6  ;;  %v14195_v6 = vshll.u32 %v23506_v25, 16  ;;  %v14213_v25 = vshll.u32 %v23510_v61, 16 }
 0x6ef   : > { %17707 = vmatprep.subr.bf16.mxu0 %v19144_v1 }
 0x6f0   : > { %v14215_v49 = vrot.slane %v14213_v25, 3  ;;  %v14157_v25 = vld [vmem:[#allocation2 + $0xa0] sm:$0x7] }
 0x6f1   : > { %17636 = vmatmul.mubr.bf16.gmra.mrb[52].mxu0 %v25084_v46 }
 0x6f2   : > { %17639 = vmatprep.mubr.bf16.mxu0 %v25085_v13 }
 0x6f9   : > { %17640 = vmatmul.mubr.bf16.gmra.mrb[56].mxu0 %v25086_v36 }
 0x6fa   : > { %17643 = vmatprep.mubr.bf16.mxu0 %v25087_v41 }
 0x701   : > { %17644 = vmatmul.mubr.bf16.gmra.mrb[60].mxu0 %v25088_v32 }
 0x702   : > { %17647 = vmatprep.mubr.bf16.mxu0 %v25089_v20 }
 0x709   : > { %17648 = vmatmul.mubr.bf16.gmra.mrb[64].mxu0 %v25090_v30 }
 0x70a   : > { %17651 = vmatprep.mubr.bf16.mxu0 %v25091_v44 }
 0x711   : > { %17652 = vmatmul.mubr.bf16.gmra.mrb[68].mxu0 %v13345_v51 }
 0x712   : > { %17671 = vmatprep.mubr.bf16.mxu0 %v13753_v42 }
 0x719   : > { %17672 = vmatmul.mubr.bf16.vlgmr.msra.gmra.mrb[36].mxu0 %v25077_v4  ;;  %v14175_v4 = vshrl.u32 %v14139_v8, 16  ;;  %v14240_v8 = vshll.u32 %v23526_v60, 16 }
 0x71a   : > { %17675 = vmatprep.mubr.bf16.mxu0 %v25078_v21  ;;  %17708 = vmatpush3.bf16.msra.mxu0 %v19144_v1  ;;  %v13715_v21 = vld [vmem:[#allocation2 + $0xa0] sm:$0x3]  ;;  %v14204_v1 = vshll.u32 %v23508_v2, 16 }
 0x71b   : > { %17709 = vmatprep.subr.bf16.mxu0 %v19145_v56  ;;  %v14177_v33 = vrot.slane %v14175_v4, 2 }
 0x71e   : > { %17710 = vmatpush3.bf16.msra.mxu0 %v19145_v56  ;;  %v14221_v56 = vrot.slane %v14219_v45, 2  ;;  %v14336_v45 = vshrl.u32 %v14157_v25, 16 }
 0x71f   : > { %17711 = vmatprep.subr.bf16.mxu0 %v19146_v9 }
 0x721   : > { %17676 = vmatmul.mubr.bf16.gmra.mrb[40].mxu0 %v25079_v50  ;;  %v14185_v50 = vrot.slane %v14183_v29, 2 }
 0x722   : > { %17679 = vmatprep.mubr.bf16.mxu0 %v25080_v0  ;;  %17712 = vmatpush3.bf16.msra.mxu0 %v19146_v9  ;;  %v14180_v0 = vrot.slane %v14178_v31, 3 }
 0x723   : > { %17713 = vmatprep.subr.bf16.mxu0 %v19147_v38 }
 0x726   : > { %17714 = vmatpush3.bf16.msra.mxu0 %v19147_v38  ;;  %v25101_v38 = vld [vmem:[#allocation62_spill] sm:$0xff] }
 0x727   : > { %17715 = vmatprep.subr.bf16.mxu0 %v19148_v62 }
 0x729   : > { %17680 = vmatmul.mubr.bf16.gmra.mrb[44].mxu0 %v25081_v58  ;;  %v13786_v58 = vrot.slane %v13715_v21, 2 }
 0x72a   : > { %17683 = vmatprep.mubr.bf16.mxu0 %v25082_v47  ;;  %17716 = vmatpush3.bf16.msra.mxu0 %v19148_v62  ;;  %v14189_v47 = vor.u32 %v14188_v52, %v14185_v50  ;;  %v14228_v62 = vshrl.u32 %v25101_v38, 16  ;;  %v14246_v50 = vshrl.u32 %v23540_v37, 16  ;;  %v14249_v52 = vshll.u32 %v23540_v37, 16 }
 0x72b   : > { %17717 = vmatprep.subr.bf16.mxu0 %v19149_v54 }
 0x72c   : > { %v14230_v29 = vrot.slane %v14228_v62, 2 }
 0x72e   : > { %17718 = vmatpush3.bf16.msra.mxu0 %v19149_v54  ;;  %v14231_v54 = vshll.u32 %v25101_v38, 16 }
 0x72f   : > { %17719 = vmatprep.subr.bf16.mxu0 %v19150_v14 }
 0x730   : > { %v14233_v48 = vrot.slane %v14231_v54, 3  ;;  %v14705_v54 = vld [vmem:[#allocation2 + $0x60] sm:$0xff] }
 0x731   : > { %17684 = vmatmul.mubr.bf16.gmra.mrb[48].mxu0 %v25083_v63  ;;  %v14201_v63 = vshrl.u32 %v23508_v2, 16  ;;  %v14222_v2 = vshll.u32 %v23515_v35, 16 }
 0x732   : > { %17687 = vmatprep.mubr.bf16.mxu0 %v25084_v46  ;;  %17720 = vmatpush3.bf16.msra.mxu0 %v19150_v14  ;;  %v14181_v46 = vor.u32 %v14180_v0, %v14177_v33  ;;  %v14234_v21 = vor.u32 %v14233_v48, %v14230_v29  ;;  %v19157_v0 = vld [vmem:[%s24025_s5 + $0x228] sm:$0xff]   ;;  %v14713_v48 = vld [vmem:[#allocation2 + $0xa0] sm:$0x7] }
 0x733   : > { %17721 = vmatprep.subr.bf16.mxu0 %v19151_v57  ;;  %v14224_v9 = vrot.slane %v14222_v2, 3  ;;  %v14339_v2 = vshll.u32 %v14157_v25, 16 }
 0x735   : > { %v14225_v14 = vor.u32 %v14224_v9, %v14221_v56  ;;  %v25116_v9 = vld [vmem:[#allocation66_spill] sm:$0xff] }
 0x736   : > { %17722 = vmatpush3.bf16.msra.mxu0 %v19151_v57  ;;  %v14237_v57 = vshrl.u32 %v23526_v60, 16  ;;  %v19156_v60 = vld [vmem:[%s24025_s5 + $0x220] sm:$0xff]  }
 0x737   : > { %17759 = vmatprep.subr.bf16.mxu0 %v19152_v16 }
 0x738   : > { %v14239_v31 = vrot.slane %v14237_v57, 2 }
 0x739   : > { %17688 = vmatmul.mubr.bf16.gmra.mrb[52].mxu0 %v25085_v13  ;;  %v13787_v13 = vsel %vm25097_vm4, %v13784_v19, %v13786_v58  ;;  %v14235_v58 = vsel %vm25104_vm13, %v14225_v14, %v14234_v21  ;;  %vm25124_vm4 = vmmov %vm25123_vm0 }
 0x73a   : > { %17691 = vmatprep.mubr.bf16.mxu0 %v25086_v36  ;;  %v14194_v36 = vrot.slane %v14192_v26, 2  ;;  %v14248_v26 = vrot.slane %v14246_v50, 2 }
 0x741   : > { %17692 = vmatmul.mubr.bf16.gmra.mrb[56].mxu0 %v25087_v41  ;;  %v14197_v41 = vrot.slane %v14195_v6, 3  ;;  %v14251_v6 = vrot.slane %v14249_v52, 3 }
 0x742   : > { %17695 = vmatprep.mubr.bf16.mxu0 %v25088_v32  ;;  %v14190_v32 = vsel %vm25098_vm6, %v14181_v46, %v14189_v47  ;;  %v19159_v46 = vld [vmem:[%s24025_s5 + $0x238] sm:$0xff]   ;;  %vm25125_vm6 = vmmov %vm25123_vm0 }
 0x743   : > { %v14198_v10 = vor.u32 %v14197_v41, %v14194_v36  ;;  %v25107_v36 = vld [vmem:[#allocation58_spill] sm:$0xff] }
 0x745   : > { %v14199_v53 = vsel %vm25099_vm2, %v14189_v47, %v14198_v10  ;;  %vm25126_vm2 = vmmov %vm25123_vm0 }
 0x749   : > { %17696 = vmatmul.mubr.bf16.gmra.mrb[60].mxu0 %v25089_v20  ;;  %v14203_v20 = vrot.slane %v14201_v63, 2  ;;  %v19158_v63 = vld [vmem:[%s24025_s5 + $0x230] sm:$0xff]  }
 0x74a   : > { %17699 = vmatprep.mubr.bf16.mxu0 %v25090_v30  ;;  %v14206_v30 = vrot.slane %v14204_v1, 3  ;;  %v14252_v1 = vor.u32 %v14251_v6, %v14248_v26 }
 0x74c   : > { %v14207_v55 = vor.u32 %v14206_v30, %v14203_v20  ;;  %v14262_v41 = vsel %vm25108_vm3, %v14252_v1, %v25107_v36  ;;  %v25110_v20 = vld [vmem:[#allocation60_spill] sm:$0xff]  ;;  %v25111_v30 = vld [vmem:[#allocation61_spill] sm:$0xff] }
 0x74e   : > { %v14208_v42 = vsel %vm25100_vm14, %v14198_v10, %v14207_v55  ;;  %v25112_v10 = vld [vmem:[#allocation47_spill] sm:$0xff]  ;;  %vm25127_vm14 = vmmov %vm25123_vm0 }
 0x751   : > { %17700 = vmatmul.mubr.bf16.gmra.mrb[64].mxu0 %v25091_v44  ;;  %v14210_v44 = vshrl.u32 %v23510_v61, 16  ;;  %v19154_v61 = vld [vmem:[%s24025_s5 + $0x210] sm:$0xff]  }
 0x752   : > { %17703 = vmatprep.mubr.bf16.mxu0 %v13785_v7  ;;  %v14242_v7 = vrot.slane %v14240_v8, 3 }
 0x753   : > { %v14212_v51 = vrot.slane %v14210_v44, 2  ;;  %v25113_v44 = vld [vmem:[#allocation63_spill] sm:$0xff] }
 0x754   : > { %v14243_v33 = vor.u32 %v14242_v7, %v14239_v31  ;;  %v23938_v7 = vld [vmem:[%s24026_s6] ss:$0 sm:$0xff] }
 0x755   : > { %v14216_v35 = vor.u32 %v14215_v49, %v14212_v51  ;;  %v25115_v51 = vld [vmem:[#allocation69_spill] sm:$0xff] }
 0x756   : > { %v14244_v47 = vsel %vm25105_vm12, %v14234_v21, %v14243_v33 }
 0x757   : > { %v14217_v19 = vsel %vm25102_vm15, %v14207_v55, %v14216_v35  ;;  %v14226_v4 = vsel %vm25103_vm5, %v14216_v35, %v14225_v14  ;;  %v25114_v55 = vld [vmem:[#allocation48_spill] sm:$0xff]  ;;  %v25118_v35 = vrot.slane %v23496_v17, 3 }
 0x759   : > { %17704 = vmatmul.mubr.bf16.gmra.mrb[68].mxu0 %v13787_v13  ;;  %v14253_v13 = vsel %vm25106_vm9, %v14243_v33, %v14252_v1 }
 0x75a   : > { %17723 = vmatprep.mubr.bf16.mxu0 %v14190_v32  ;;  %v25109_v32 = vld [vmem:[#allocation45_spill] sm:$0xff] }
 0x761   : > { %17724 = vmatmul.mubr.bf16.vlgmr.msra.gmra.mrb[36].mxu0 %v14199_v53  ;;  %v14341_v53 = vrot.slane %v14339_v2, 3 }
 0x762   : > { %17727 = vmatprep.mubr.bf16.mxu0 %v14208_v42  ;;  %17760 = vmatpush3.bf16.msra.mxu0 %v19152_v16  ;;  %v19155_v16 = vld [vmem:[%s24025_s5 + $0x218] sm:$0xff]   ;;  %v14695_v42 = vld [vmem:[#allocation2 + $0x10] sm:$0xf8] }
 0x763   : > { %17761 = vmatprep.subr.bf16.mxu0 %v19153_v23  ;;  %v14749_v56 = vrot.slane %v14695_v42, 3 }
 0x765   : > { %v14751_v38 = vsel %vm25119_vm1, %v14749_v56, %v25118_v35 }
 0x766   : > { %17762 = vmatpush3.bf16.msra.mxu0 %v19153_v23  ;;  %v14338_v23 = vrot.slane %v14336_v45, 2 }
 0x767   : > { %17763 = vmatprep.subr.bf16.mxu0 %v19154_v61 }
 0x768   : > { %v14342_v49 = vor.u32 %v14341_v53, %v14338_v23 }
 0x769   : > { %17728 = vmatmul.mubr.bf16.gmra.mrb[40].mxu0 %v14217_v19 }
 0x76a   : > { %17731 = vmatprep.mubr.bf16.mxu0 %v14226_v4  ;;  %17764 = vmatpush3.bf16.msra.mxu0 %v19154_v61  ;;  %v14343_v61 = vsel %vm25117_vm7, %v25116_v9, %v14342_v49  ;;  %v14784_v4 = vrot.slane %v14713_v48, 3 }
 0x76b   : > { %17765 = vmatprep.subr.bf16.mxu0 %v19155_v16 }
 0x76c   : > { %v14785_v31 = vsel %vm25127_vm14, %v14782_v15, %v14784_v4 }
 0x76e   : > { %17766 = vmatpush3.bf16.msra.mxu0 %v19155_v16 }
 0x76f   : > { %17767 = vmatprep.subr.bf16.mxu0 %v19156_v60 }
 0x771   : > { %17732 = vmatmul.mubr.bf16.gmra.mrb[44].mxu0 %v14235_v58 }
 0x772   : > { %17735 = vmatprep.mubr.bf16.mxu0 %v14244_v47  ;;  %17768 = vmatpush3.bf16.msra.mxu0 %v19156_v60 }
 0x773   : > { %17769 = vmatprep.subr.bf16.mxu0 %v19157_v0 }
 0x776   : > { %17770 = vmatpush3.bf16.msra.mxu0 %v19157_v0 }
 0x777   : > { %17771 = vmatprep.subr.bf16.mxu0 %v19158_v63 }
 0x779   : > { %17736 = vmatmul.mubr.bf16.gmra.mrb[48].mxu0 %v14253_v13 }
 0x77a   : > { %17739 = vmatprep.mubr.bf16.mxu0 %v14262_v41  ;;  %17772 = vmatpush3.bf16.msra.mxu0 %v19158_v63 }
 0x77b   : > { %17773 = vmatprep.subr.bf16.mxu0 %v19159_v46 }
 0x77e   : > { %17774 = vmatpush3.bf16.msra.mxu0 %v19159_v46 }
 0x781   : > { %17740 = vmatmul.mubr.bf16.gmra.mrb[52].mxu0 %v25109_v32 }
 0x782   : > { %17743 = vmatprep.mubr.bf16.mxu0 %v25110_v20 }
 0x789   : > { %17744 = vmatmul.mubr.bf16.gmra.mrb[56].mxu0 %v25111_v30 }
 0x78a   : > { %17747 = vmatprep.mubr.bf16.mxu0 %v25112_v10 }
 0x791   : > { %17748 = vmatmul.mubr.bf16.gmra.mrb[60].mxu0 %v25113_v44 }
 0x792   : > { %17751 = vmatprep.mubr.bf16.mxu0 %v25114_v55 }
 0x799   : > { %17752 = vmatmul.mubr.bf16.gmra.mrb[64].mxu0 %v25115_v51 }
 0x79a   : > { %17755 = vmatprep.mubr.bf16.mxu0 %v23546_v22  ;;  %v14704_v22 = vld [vmem:[#allocation2 + $0x58] sm:$0xff] }
 0x79b   : > { %v14766_v62 = vrot.slane %v14704_v22, 3 }
 0x79d   : > { %v14767_v17 = vsel %vm25120_vm10, %v14764_v34, %v14766_v62  ;;  %v14709_v34 = vld [vmem:[#allocation2 + $0x80] sm:$0xff] }
 0x79e   : > { %v14776_v16 = vrot.slane %v14709_v34, 3 }
 0x7a0   : > { %v14779_v29 = vsel %vm25126_vm2, %v14776_v16, %v14778_v11 }
 0x7a1   : > { %17756 = vmatmul.mubr.bf16.gmra.mrb[68].mxu0 %v14343_v61 }
 0x7a2   : > { %17775 = vmatprep.mubr.bf16.mxu0 %v14751_v38 }
 0x7a9   : > { %17776 = vmatmul.mubr.bf16.vlgmr.msra.gmra.mrb[36].mxu0 %v23551_v27  ;;  %v14706_v27 = vld [vmem:[#allocation2 + $0x68] sm:$0xff] }
 0x7aa   : > { %17779 = vmatprep.mubr.bf16.mxu0 %v23554_v12  ;;  %v14768_v12 = vrot.slane %v14705_v54, 3  ;;  %v14770_v14 = vrot.slane %v14706_v27, 3 }
 0x7b1   : > { %17780 = vmatmul.mubr.bf16.gmra.mrb[40].mxu0 %v23557_v39  ;;  %v14769_v39 = vsel %vm25121_vm11, %v14766_v62, %v14768_v12 }
 0x7b2   : > { %17783 = vmatprep.mubr.bf16.mxu0 %v23564_v40  ;;  %v14707_v40 = vld [vmem:[#allocation2 + $0x70] sm:$0xff] }
 0x7b3   : > { %v14772_v57 = vrot.slane %v14707_v40, 3 }
 0x7b9   : > { %17784 = vmatmul.mubr.bf16.gmra.mrb[44].mxu0 %v23567_v59  ;;  %v14771_v59 = vsel %vm25122_vm8, %v14768_v12, %v14770_v14 }
 0x7ba   : > { %17787 = vmatprep.mubr.bf16.mxu0 %v23576_v3  ;;  %v14708_v3 = vld [vmem:[#allocation2 + $0x78] sm:$0xff] }
 0x7bb   : > { %v14774_v8 = vrot.slane %v14708_v3, 3 }
 0x7bd   : > { %v14775_v37 = vsel %vm25124_vm4, %v14772_v57, %v14774_v8  ;;  %v14777_v19 = vsel %vm25125_vm6, %v14774_v8, %v14776_v16 }
 0x7c1   : > { %17788 = vmatmul.mubr.bf16.gmra.mrb[48].mxu0 %v23581_v5  ;;  %v14773_v5 = vsel %vm25123_vm0, %v14770_v14, %v14772_v57 }
 0x7c2   : > { %17791 = vmatprep.mubr.bf16.mxu0 %v14767_v17 }
 0x7c9   : > { %17792 = vmatmul.mubr.bf16.gmra.mrb[52].mxu0 %v14769_v39 }
 0x7ca   : > { %17795 = vmatprep.mubr.bf16.mxu0 %v14771_v59 }
 0x7d1   : > { %17796 = vmatmul.mubr.bf16.gmra.mrb[56].mxu0 %v14773_v5 }
 0x7d2   : > { %17799 = vmatprep.mubr.bf16.mxu0 %v14775_v37 }
 0x7d9   : > { %17800 = vmatmul.mubr.bf16.gmra.mrb[60].mxu0 %v14777_v19 }
 0x7da   : > { %17803 = vmatprep.mubr.bf16.mxu0 %v14779_v29 }
 0x7e1   : > { %17804 = vmatmul.mubr.bf16.gmra.mrb[64].mxu0 %v23592_v18 }
 0x7e2   : > { %17807 = vmatprep.mubr.bf16.mxu0 %v23597_v24 }
 0x7e9   : > { %17808 = vmatmul.mubr.bf16.gmra.mrb[68].mxu0 %v14785_v31 }
 0x87c   : > { %v17777_v28 = vpop.f32.mrb[36].mxu0 }
 0x87d   : > { %v15182_v43 = vadd.f32 %v17777_v28, %v23938_v7  ;;  %v14886_v11 = vpop.f32.mrb[37].mxu0 }
 0x87e   : > { %v15180_v15 = vadd.f32 %v23938_v7, %v14886_v11  ;;  %v17778_v18 = vpop.f32.mrb[38].mxu0 }
 0x87f   : > { %15218 = vst [vmem:[%s23943_s30 + $0x10] sm:$0xff] %v15182_v43  ;;  %v15183_v24 = vadd.f32 %v17778_v18, %v23938_v7  ;;  %v14889_v60 = vpop.f32.mrb[39].mxu0 }
 0x880   : > { %15216 = vst [vmem:[%s23943_s30] sm:$0xff] %v15180_v15  ;;  %v15181_v21 = vadd.f32 %v23938_v7, %v14889_v60 }
 0x881   : > { %15219 = vst [vmem:[%s23943_s30 + $0x18] sm:$0xff] %v15183_v24 }
 0x882   : > { %15217 = vst [vmem:[%s23943_s30 + $0x8] sm:$0xff] %v15181_v21 }
 0x884   : > { %v17781_v50 = vpop.f32.mrb[40].mxu0 }
 0x885   : > { %v15186_v52 = vadd.f32 %v17781_v50, %v23938_v7  ;;  %v14902_v33 = vpop.f32.mrb[41].mxu0 }
 0x886   : > { %v15184_v0 = vadd.f32 %v23938_v7, %v14902_v33  ;;  %v17782_v58 = vpop.f32.mrb[42].mxu0 }
 0x887   : > { %15222 = vst [vmem:[%s23943_s30 + $0x30] sm:$0xff] %v15186_v52  ;;  %v15187_v26 = vadd.f32 %v17782_v58, %v23938_v7  ;;  %v14905_v6 = vpop.f32.mrb[43].mxu0 }
 0x888   : > { %15220 = vst [vmem:[%s23943_s30 + $0x20] sm:$0xff] %v15184_v0  ;;  %v15185_v47 = vadd.f32 %v23938_v7, %v14905_v6 }
 0x889   : > { %15223 = vst [vmem:[%s23943_s30 + $0x38] sm:$0xff] %v15187_v26 }
 0x88a   : > { %15221 = vst [vmem:[%s23943_s30 + $0x28] sm:$0xff] %v15185_v47 }
 0x88c   : > { %v17785_v63 = vpop.f32.mrb[44].mxu0 }
 0x88d   : > { %v15190_v1 = vadd.f32 %v17785_v63, %v23938_v7  ;;  %v14918_v46 = vpop.f32.mrb[45].mxu0 }
 0x88e   : > { %v15188_v13 = vadd.f32 %v23938_v7, %v14918_v46  ;;  %v17786_v36 = vpop.f32.mrb[46].mxu0 }
 0x88f   : > { %15226 = vst [vmem:[%s23943_s30 + $0x50] sm:$0xff] %v15190_v1  ;;  %v15191_v41 = vadd.f32 %v17786_v36, %v23938_v7  ;;  %v14921_v32 = vpop.f32.mrb[47].mxu0 }
 0x890   : > { %15224 = vst [vmem:[%s23943_s30 + $0x40] sm:$0xff] %v15188_v13  ;;  %v15189_v20 = vadd.f32 %v23938_v7, %v14921_v32 }
 0x891   : > { %15227 = vst [vmem:[%s23943_s30 + $0x58] sm:$0xff] %v15191_v41 }
 0x892   : > { %15225 = vst [vmem:[%s23943_s30 + $0x48] sm:$0xff] %v15189_v20 }
 0x894   : > { %v17789_v30 = vpop.f32.mrb[48].mxu0 }
 0x895   : > { %v15194_v10 = vadd.f32 %v17789_v30, %v23938_v7  ;;  %v14934_v44 = vpop.f32.mrb[49].mxu0 }
 0x896   : > { %v15192_v25 = vadd.f32 %v23938_v7, %v14934_v44  ;;  %v17790_v55 = vpop.f32.mrb[50].mxu0 }
 0x897   : > { %15230 = vst [vmem:[%s23943_s30 + $0x70] sm:$0xff] %v15194_v10  ;;  %v15195_v45 = vadd.f32 %v17790_v55, %v23938_v7  ;;  %v14937_v2 = vpop.f32.mrb[51].mxu0 }
 0x898   : > { %15228 = vst [vmem:[%s23943_s30 + $0x60] sm:$0xff] %v15192_v25  ;;  %v15193_v23 = vadd.f32 %v23938_v7, %v14937_v2 }
 0x899   : > { %15231 = vst [vmem:[%s23943_s30 + $0x78] sm:$0xff] %v15195_v45 }
 0x89a   : > { %15229 = vst [vmem:[%s23943_s30 + $0x68] sm:$0xff] %v15193_v23 }
 0x89c   : > { %v17793_v53 = vpop.f32.mrb[52].mxu0 }
 0x89d   : > { %v15198_v51 = vadd.f32 %v17793_v53, %v23938_v7  ;;  %v14950_v49 = vpop.f32.mrb[53].mxu0 }
 0x89e   : > { %v15196_v42 = vadd.f32 %v23938_v7, %v14950_v49  ;;  %v17794_v56 = vpop.f32.mrb[54].mxu0 }
 0x89f   : > { %15234 = vst [vmem:[%s23943_s30 + $0x90] sm:$0xff] %v15198_v51  ;;  %v15199_v9 = vadd.f32 %v17794_v56, %v23938_v7  ;;  %v14953_v61 = vpop.f32.mrb[55].mxu0 }
 0x8a0   : > { %15232 = vst [vmem:[%s23943_s30 + $0x80] sm:$0xff] %v15196_v42  ;;  %v15197_v35 = vadd.f32 %v23938_v7, %v14953_v61 }
 0x8a1   : > { %15235 = vst [vmem:[%s23943_s30 + $0x98] sm:$0xff] %v15199_v9 }
 0x8a2   : > { %15233 = vst [vmem:[%s23943_s30 + $0x88] sm:$0xff] %v15197_v35 }
 0x8a4   : > { %v17797_v38 = vpop.f32.mrb[56].mxu0 }
 0x8a5   : > { %v15202_v22 = vadd.f32 %v17797_v38, %v23938_v7  ;;  %v14966_v62 = vpop.f32.mrb[57].mxu0 }
 0x8a6   : > { %v15200_v17 = vadd.f32 %v23938_v7, %v14966_v62  ;;  %v17798_v54 = vpop.f32.mrb[58].mxu0 }
 0x8a7   : > { %15238 = vst [vmem:[%s23943_s30 + $0xb0] sm:$0xff] %v15202_v22  ;;  %v15203_v27 = vadd.f32 %v17798_v54, %v23938_v7  ;;  %v14969_v12 = vpop.f32.mrb[59].mxu0 }
 0x8a8   : > { %15236 = vst [vmem:[%s23943_s30 + $0xa0] sm:$0xff] %v15200_v17  ;;  %v15201_v14 = vadd.f32 %v23938_v7, %v14969_v12 }
 0x8a9   : > { %15239 = vst [vmem:[%s23943_s30 + $0xb8] sm:$0xff] %v15203_v27 }
 0x8aa   : > { %15237 = vst [vmem:[%s23943_s30 + $0xa8] sm:$0xff] %v15201_v14 }
 0x8ac   : > { %v17801_v39 = vpop.f32.mrb[60].mxu0 }
 0x8ad   : > { %v15206_v59 = vadd.f32 %v17801_v39, %v23938_v7  ;;  %v14982_v40 = vpop.f32.mrb[61].mxu0 }
 0x8ae   : > { %v15204_v3 = vadd.f32 %v23938_v7, %v14982_v40  ;;  %v17802_v57 = vpop.f32.mrb[62].mxu0 }
 0x8af   : > { %15242 = vst [vmem:[%s23943_s30 + $0xd0] sm:$0xff] %v15206_v59  ;;  %v15207_v8 = vadd.f32 %v17802_v57, %v23938_v7  ;;  %v14985_v5 = vpop.f32.mrb[63].mxu0 }
 0x8b0   : > { %15240 = vst [vmem:[%s23943_s30 + $0xc0] sm:$0xff] %v15204_v3  ;;  %v15205_v37 = vadd.f32 %v23938_v7, %v14985_v5 }
 0x8b1   : > { %15243 = vst [vmem:[%s23943_s30 + $0xd8] sm:$0xff] %v15207_v8 }
 0x8b2   : > { %15241 = vst [vmem:[%s23943_s30 + $0xc8] sm:$0xff] %v15205_v37 }
 0x8b4   : > { %v17805_v34 = vpop.f32.mrb[64].mxu0 }
 0x8b5   : > { %v15210_v16 = vadd.f32 %v17805_v34, %v23938_v7  ;;  %v14998_v19 = vpop.f32.mrb[65].mxu0 }
 0x8b6   : > { %v15208_v29 = vadd.f32 %v23938_v7, %v14998_v19  ;;  %v17806_v48 = vpop.f32.mrb[66].mxu0 }
 0x8b7   : > { %15246 = vst [vmem:[%s23943_s30 + $0xf0] sm:$0xff] %v15210_v16  ;;  %v15211_v4 = vadd.f32 %v17806_v48, %v23938_v7  ;;  %v15001_v31 = vpop.f32.mrb[67].mxu0 }
 0x8b8   : > { %15244 = vst [vmem:[%s23943_s30 + $0xe0] sm:$0xff] %v15208_v29  ;;  %v15209_v28 = vadd.f32 %v23938_v7, %v15001_v31 }
 0x8b9   : > { %15247 = vst [vmem:[%s23943_s30 + $0xf8] sm:$0xff] %v15211_v4 }
 0x8ba   : > { %15245 = vst [vmem:[%s23943_s30 + $0xe8] sm:$0xff] %v15209_v28 }
 0x8bc   : > { %v17809_v43 = vpop.f32.mrb[68].mxu0 }
 0x8bd   : > { %v15214_v11 = vadd.f32 %v17809_v43, %v23938_v7  ;;  %v15014_v15 = vpop.f32.mrb[69].mxu0 }
 0x8be   : > { %v15212_v18 = vadd.f32 %v23938_v7, %v15014_v15  ;;  %v17810_v24 = vpop.f32.mrb[70].mxu0 }
 0x8bf   : > { %15250 = vst [vmem:[%s23943_s30 + $0x110] sm:$0xff] %v15214_v11  ;;  %v15215_v60 = vadd.f32 %v17810_v24, %v23938_v7  ;;  %v15017_v21 = vpop.f32.mrb[71].mxu0 }
 0x8c0   : > { %15248 = vst [vmem:[%s23943_s30 + $0x100] sm:$0xff] %v15212_v18  ;;  %v15213_v50 = vadd.f32 %v23938_v7, %v15017_v21 }
 0x8c1   : > { %15251 = vst [vmem:[%s23943_s30 + $0x118] sm:$0xff] %v15215_v60 }
 0x8c2   : > { %15249 = vst [vmem:[%s23943_s30 + $0x108] sm:$0xff] %v15213_v50 }
 0x8c3 PF: > { %s17_s24 = sadd.s32 1, %s19179_s24  }
 0x8c4   : > { %p14_p4 = scmp.ge.s32.totalorder %s17_s24, 4  }
 0x8c6   :  { %16 = sbr.rel (!%p14_p4) target bundleno = 1 (0x1), region = 78 }

</bundles_post_ra>
